<compile_context>
chip_gen: v7x
topology: tpu7x:2x2x1
jax: 0.10.0
libtpu: 0.0.40
codegen_flags: <defaults>
</compile_context>

<pallas_src>
import jax
import jax.numpy as jnp
import numpy as np
from jax.experimental import pallas as pl
from jax.experimental.pallas import tpu as pltpu

NUM_FEATURES_DRUG = 78
OUTPUT_DIM = 128
HIDDEN_FC = 1024

LANE = 128
TILE_NODE = 512        # node row / reduction tile for the tiled GCN path
POOL_TILE = 256        # node tile for the tiled pooling stage
POOL_COL = 128         # feature-column tile for pooling (parallel axis)
FUSED_MAX_NODES = 2048  # n_pad threshold for the fully VMEM-resident fast path


def _round_up(x, m):
    return ((x + m - 1) // m) * m


def _pad2(x, rows, cols):
    return jnp.pad(x, ((0, rows - x.shape[0]), (0, cols - x.shape[1])))


# --------------------------------------------------------------------------
# Kernels
# --------------------------------------------------------------------------
def fused_forward_kernel(a_ref, x_ref, w1_ref, b1_ref, w2_ref, b2_ref,
                         w3_ref, b3_ref, mask_t_ref, wf1_ref, bf1_ref,
                         wf2_ref, bf2_ref, o_ref, pooled_ref):
    """Whole forward pass with everything VMEM-resident (small-N fast path)."""
    bf16, f32 = jnp.bfloat16, jnp.float32
    a = a_ref[...]                                   # [n_pad, n_pad] bf16
    h = x_ref[...]                                   # [n_pad, f0]   bf16

    # Three GCN layers: h = relu(A_hat @ (h @ W) + b)
    for w_ref, b_ref in ((w1_ref, b1_ref), (w2_ref, b2_ref), (w3_ref, b3_ref)):
        m = jnp.dot(h, w_ref[...], preferred_element_type=f32).astype(bf16)
        h = jnp.maximum(
            jnp.dot(a, m, preferred_element_type=f32) + b_ref[...], 0.0
        ).astype(bf16)

    # global_max_pool, per-graph (G is tiny).  Exact because h >= 0 post-ReLU:
    # masked max == max of mask-multiplied values, padded nodes contribute 0.
    h32 = h.astype(f32)                              # [n_pad, f3]
    g_pad = pooled_ref.shape[0]
    for g in range(g_pad):                           # static unrolled loop
        mcol = mask_t_ref[:, g:g + 1]                # [n_pad, 1] f32 in {0,1}
        pooled_ref[g:g + 1, :] = jnp.max(h32 * mcol, axis=0, keepdims=True)

    # FC head: fc_g1 -> relu -> (dropout: identity) -> fc_g2
    # TODO(synk): nn.Dropout(p=0.2) modeled as identity (inference mode).
    p = pooled_ref[...].astype(bf16)
    z = jnp.dot(p, wf1_ref[...], preferred_element_type=f32) + bf1_ref[...]
    z = jnp.maximum(z, 0.0).astype(bf16)
    o_ref[...] = jnp.dot(z, wf2_ref[...], preferred_element_type=f32) + bf2_ref[...]


def gcn_layer_kernel(a_ref, x_ref, w_ref, b_ref, o_ref, acc_ref):
    """Tiled H = relu(A_hat @ (X @ W) + b).  The 'linear' stage is fused into
    the aggregate k-loop: the projected features for this node k-tile are
    computed on the fly, so M never makes an HBM round trip."""
    k = pl.program_id(1)

    @pl.when(k == 0)
    def _():
        acc_ref[...] = jnp.zeros_like(acc_ref)

    m = jnp.dot(x_ref[...], w_ref[...],
                preferred_element_type=jnp.float32).astype(jnp.bfloat16)
    acc_ref[...] += jnp.dot(a_ref[...], m, preferred_element_type=jnp.float32)

    @pl.when(k == pl.num_programs(1) - 1)
    def _():
        o_ref[...] = jnp.maximum(acc_ref[...] + b_ref[...], 0.0).astype(o_ref.dtype)


def pool_kernel(mask_t_ref, h_ref, o_ref, acc_ref):
    """global_max_pool over node tiles for one 128-wide feature column tile.
    Per-graph masked max with 2-D intermediates only (no [G,TK,F] broadcast).
    Exact because h >= 0 after ReLU."""
    k = pl.program_id(1)

    @pl.when(k == 0)
    def _():
        acc_ref[...] = jnp.zeros_like(acc_ref)

    h = h_ref[...].astype(jnp.float32)               # [TK, POOL_COL]
    g_pad = acc_ref.shape[0]
    for g in range(g_pad):                           # static unrolled; G tiny
        mcol = mask_t_ref[:, g:g + 1]                # [TK, 1] f32 in {0,1}
        row = jnp.max(h * mcol, axis=0, keepdims=True)      # [1, POOL_COL]
        acc_ref[g:g + 1, :] = jnp.maximum(acc_ref[g:g + 1, :], row)

    @pl.when(k == pl.num_programs(1) - 1)
    def _():
        o_ref[...] = acc_ref[...]


def fc_head_kernel(p_ref, w1_ref, b1_ref, w2_ref, b2_ref, o_ref):
    p = p_ref[...].astype(jnp.bfloat16)
    z = jnp.dot(p, w1_ref[...], preferred_element_type=jnp.float32) + b1_ref[...]
    z = jnp.maximum(z, 0.0).astype(jnp.bfloat16)
    # TODO(synk): nn.Dropout(p=0.2) modeled as identity (inference mode).
    o_ref[...] = jnp.dot(z, w2_ref[...], preferred_element_type=jnp.float32) + b2_ref[...]


# --------------------------------------------------------------------------
# pallas_call wrappers
# --------------------------------------------------------------------------
_VMEM_SPEC = pl.BlockSpec(memory_space=pltpu.MemorySpace.VMEM)


def _fused_forward(a_p, x_p, mask_t, packed, *, g_pad):
    f3 = packed["dims"][2]
    (w1, b1), (w2, b2), (w3, b3) = packed["convs"]
    fo = packed["wf2"].shape[1]
    return pl.pallas_call(
        fused_forward_kernel,
        out_shape=jax.ShapeDtypeStruct((g_pad, fo), jnp.float32),
        in_specs=[_VMEM_SPEC] * 13,
        out_specs=_VMEM_SPEC,
        scratch_shapes=[pltpu.VMEM((g_pad, f3), jnp.float32)],
        compiler_params=pltpu.CompilerParams(vmem_limit_bytes=48 << 20),
    )(a_p, x_p, w1, b1, w2, b2, w3, b3, mask_t,
      packed["wf1"], packed["bf1"], packed["wf2"], packed["bf2"])


def _gcn_layer(a, x, w, b, *, tile):
    n = a.shape[0]
    f_in, f_out = w.shape
    assert x.shape == (n, f_in)
    return pl.pallas_call(
        gcn_layer_kernel,
        out_shape=jax.ShapeDtypeStruct((n, f_out), jnp.bfloat16),
        grid_spec=pltpu.PrefetchScalarGridSpec(
            num_scalar_prefetch=0,
            grid=(n // tile, n // tile),
            in_specs=[
                pl.BlockSpec((tile, tile), lambda i, k: (i, k)),   # A_hat tile
                pl.BlockSpec((tile, f_in), lambda i, k: (k, 0)),   # X k-tile
                pl.BlockSpec((f_in, f_out), lambda i, k: (0, 0)),  # W (resident)
                pl.BlockSpec((1, f_out), lambda i, k: (0, 0)),     # bias
            ],
            out_specs=pl.BlockSpec((tile, f_out), lambda i, k: (i, 0)),
            scratch_shapes=[pltpu.VMEM((tile, f_out), jnp.float32)]),
        compiler_params=pltpu.CompilerParams(
            dimension_semantics=("parallel", "arbitrary")),
    )(a, x, w, b)


def _global_max_pool(mask_t, h, *, tile_k):
    n, g_pad = mask_t.shape
    f = h.shape[1]
    return pl.pallas_call(
        pool_kernel,
        out_shape=jax.ShapeDtypeStruct((g_pad, f), jnp.float32),
        grid_spec=pltpu.PrefetchScalarGridSpec(
            num_scalar_prefetch=0,
            grid=(f // POOL_COL, n // tile_k),
            in_specs=[pl.BlockSpec((tile_k, g_pad), lambda j, k: (k, 0)),
                      pl.BlockSpec((tile_k, POOL_COL), lambda j, k: (k, j))],
            out_specs=pl.BlockSpec((g_pad, POOL_COL), lambda j, k: (0, j)),
            scratch_shapes=[pltpu.VMEM((g_pad, POOL_COL), jnp.float32)]),
        compiler_params=pltpu.CompilerParams(
            dimension_semantics=("parallel", "arbitrary")),
    )(mask_t, h)


def _fc_head(pooled, wf1, bf1, wf2, bf2):
    g = pooled.shape[0]
    out_dim = wf2.shape[1]
    return pl.pallas_call(
        fc_head_kernel,
        out_shape=jax.ShapeDtypeStruct((g, out_dim), jnp.float32),
        in_specs=[_VMEM_SPEC] * 5,
        out_specs=_VMEM_SPEC,
    )(pooled, wf1, bf1, wf2, bf2)


# --------------------------------------------------------------------------
# Param prepacking (one-time) and forward
# --------------------------------------------------------------------------
def prepack_params(params):
    """Pad + cast all weights once; reused across forward calls."""
    (w1, b1, w2, b2, w3, b3, wf1, bf1, wf2, bf2) = params
    bf16, f32 = jnp.bfloat16, jnp.float32
    f0 = _round_up(NUM_FEATURES_DRUG, LANE)          # 128
    f2 = _round_up(NUM_FEATURES_DRUG * 2, LANE)      # 256
    f3 = _round_up(NUM_FEATURES_DRUG * 4, LANE)      # 384
    fo = _round_up(OUTPUT_DIM, LANE)                 # 128
    return {
        "dims": (f0, f2, f3),
        "convs": (
            (_pad2(w1, f0, f0).astype(bf16), _pad2(b1, 1, f0).astype(f32)),
            (_pad2(w2, f0, f2).astype(bf16), _pad2(b2, 1, f2).astype(f32)),
            (_pad2(w3, f2, f3).astype(bf16), _pad2(b3, 1, f3).astype(f32)),
        ),
        "wf1": _pad2(wf1, f3, HIDDEN_FC).astype(bf16),
        "bf1": _pad2(bf1, 1, HIDDEN_FC).astype(f32),
        "wf2": _pad2(wf2, HIDDEN_FC, fo).astype(bf16),
        "bf2": _pad2(bf2, 1, fo).astype(f32),
    }


def drug_gcn_forward(a_hat, x, mask, packed, *, force_path=None):
    """force_path: None (auto), "fused" or "tiled"."""
    n = x.shape[0]
    g = mask.shape[0]
    f0, f2, f3 = packed["dims"]
    g_pad = _round_up(g, 16)          # 16 bf16 rows per sublane tile in FC head
    bf16, f32 = jnp.bfloat16, jnp.float32

    use_fused = (force_path == "fused") or (
        force_path is None and _round_up(n, LANE) <= FUSED_MAX_NODES)

    if use_fused:
        n_pad = _round_up(n, LANE)
        a_p = _pad2(a_hat, n_pad, n_pad).astype(bf16)
        x_p = _pad2(x, n_pad, f0).astype(bf16)
        mask_t = _pad2(mask.T, n_pad, g_pad).astype(f32)
        out = _fused_forward(a_p, x_p, mask_t, packed, g_pad=g_pad)
    else:
        n_pad = _round_up(n, TILE_NODE)
        a_p = _pad2(a_hat, n_pad, n_pad).astype(bf16)
        x_p = _pad2(x, n_pad, f0).astype(bf16)
        mask_t = _pad2(mask.T, n_pad, g_pad).astype(f32)
        h = x_p
        for w, b in packed["convs"]:
            h = _gcn_layer(a_p, h, w, b, tile=TILE_NODE)
        pooled = _global_max_pool(mask_t, h, tile_k=POOL_TILE)   # f32 [g_pad, f3]
        out = _fc_head(pooled, packed["wf1"], packed["bf1"],
                       packed["wf2"], packed["bf2"])
    return out[:g, :OUTPUT_DIM]


# --------------------------------------------------------------------------
# Graph preprocessing / params / reference
# --------------------------------------------------------------------------
def build_normalized_adjacency(edge_index, num_nodes):
    """Dense D^-1/2 (A + I) D^-1/2 with A[i, j] = 1 for edge j -> i."""
    src, dst = edge_index[0], edge_index[1]
    a = jnp.zeros((num_nodes, num_nodes), jnp.float32).at[dst, src].add(1.0)
    a = a + jnp.eye(num_nodes, dtype=jnp.float32)
    deg = jnp.sum(a, axis=1)
    dinv = jnp.where(deg > 0, 1.0 / jnp.sqrt(deg), 0.0)
    return dinv[:, None] * a * dinv[None, :]


def init_params(key):
    """Deterministic glorot-ish init; biases shaped (1, out) for 2-D ops."""
    dims = [
        (NUM_FEATURES_DRUG, NUM_FEATURES_DRUG),          # conv1
        (NUM_FEATURES_DRUG, NUM_FEATURES_DRUG * 2),      # conv2
        (NUM_FEATURES_DRUG * 2, NUM_FEATURES_DRUG * 4),  # conv3
        (NUM_FEATURES_DRUG * 4, HIDDEN_FC),              # fc_g1
        (HIDDEN_FC, OUTPUT_DIM),                         # fc_g2
    ]
    params = []
    keys = jax.random.split(key, len(dims))
    for k, (fan_in, fan_out) in zip(keys, dims):
        kw, kb = jax.random.split(k)
        scale = jnp.sqrt(2.0 / (fan_in + fan_out))
        w = jax.random.normal(kw, (fan_in, fan_out), jnp.float32) * scale
        b = jax.random.normal(kb, (1, fan_out), jnp.float32) * 0.01
        params += [w, b]
    return tuple(params)


def reference_forward(a_hat, x, mask, params):
    """Pure-JAX reference mirroring the kernel's bf16/f32-accum dtype flow."""
    (w1, b1, w2, b2, w3, b3, wf1, bf1, wf2, bf2) = params
    bf16, f32 = jnp.bfloat16, jnp.float32
    a = a_hat.astype(bf16)
    h = x.astype(bf16)
    for w, b in ((w1, b1), (w2, b2), (w3, b3)):
        m = jnp.dot(h, w.astype(bf16), preferred_element_type=f32).astype(bf16)
        h = jnp.maximum(jnp.dot(a, m, preferred_element_type=f32) + b, 0.0).astype(bf16)
    sel = jnp.where(mask[:, :, None] > 0.5, h[None, :, :].astype(f32), -jnp.inf)
    pooled = jnp.max(sel, axis=1)
    pooled = jnp.where(pooled > -jnp.inf, pooled, 0.0)
    z = jnp.maximum(
        jnp.dot(pooled.astype(bf16), wf1.astype(bf16), preferred_element_type=f32)
        + bf1, 0.0).astype(bf16)
    return jnp.dot(z, wf2.astype(bf16), preferred_element_type=f32) + bf2


if __name__ == "__main__":
    key = jax.random.PRNGKey(0)
    k_x, k_p = jax.random.split(key)

    # Small synthetic batched graph: 2 graphs x 8 nodes, ring topology each.
    num_nodes = 16
    num_graphs = 2
    batch = np.array([0] * 8 + [1] * 8, dtype=np.int32)

    edges = []
    for gidx in range(num_graphs):
        base = gidx * 8
        for i in range(8):
            u, v = base + i, base + (i + 1) % 8
            edges.append((u, v))
            edges.append((v, u))
    edge_index = jnp.asarray(np.array(edges, dtype=np.int32).T)  # [2, E]

    x = jax.random.normal(k_x, (num_nodes, NUM_FEATURES_DRUG), jnp.float32)
    a_hat = build_normalized_adjacency(edge_index, num_nodes)
    mask = (jnp.arange(num_graphs)[:, None]
            == jnp.asarray(batch)[None, :]).astype(jnp.float32)

    params = init_params(k_p)
    packed = prepack_params(params)
    ref = reference_forward(a_hat, x, mask, params)

    # Fast path (fully fused, VMEM-resident) — the default for small graphs.
    out_fused = jax.block_until_ready(
        drug_gcn_forward(a_hat, x, mask, packed, force_path="fused"))
    assert out_fused.shape == (num_graphs, OUTPUT_DIM)
    np.testing.assert_allclose(np.asarray(out_fused, dtype=np.float32),
                               np.asarray(ref, dtype=np.float32),
                               rtol=3e-2, atol=3e-2)

    # Tiled path (large-N route), validated on the same data.
    out_tiled = jax.block_until_ready(
        drug_gcn_forward(a_hat, x, mask, packed, force_path="tiled"))
    assert out_tiled.shape == (num_graphs, OUTPUT_DIM)
    np.testing.assert_allclose(np.asarray(out_tiled, dtype=np.float32),
                               np.asarray(ref, dtype=np.float32),
                               rtol=3e-2, atol=3e-2)

    print("KERNEL_OK")
</pallas_src>

<mosaic_0001>
module attributes {stable_mosaic.version = 11 : i64} {
  func.func @fused_forward_kernel(%arg0: memref<128x128xbf16, #tpu.memory_space<vmem>>, %arg1: memref<128x128xbf16, #tpu.memory_space<vmem>>, %arg2: memref<128x128xbf16, #tpu.memory_space<vmem>>, %arg3: memref<1x128xf32, #tpu.memory_space<vmem>>, %arg4: memref<128x256xbf16, #tpu.memory_space<vmem>>, %arg5: memref<1x256xf32, #tpu.memory_space<vmem>>, %arg6: memref<256x384xbf16, #tpu.memory_space<vmem>>, %arg7: memref<1x384xf32, #tpu.memory_space<vmem>>, %arg8: memref<128x16xf32, #tpu.memory_space<vmem>>, %arg9: memref<384x1024xbf16, #tpu.memory_space<vmem>>, %arg10: memref<1x1024xf32, #tpu.memory_space<vmem>>, %arg11: memref<1024x128xbf16, #tpu.memory_space<vmem>>, %arg12: memref<1x128xf32, #tpu.memory_space<vmem>>, %arg13: memref<16x128xf32, #tpu.memory_space<vmem>>, %arg14: memref<16x384xf32, #tpu.memory_space<vmem>>) attributes {dimension_semantics = [], scalar_prefetch = 0 : i64, scratch_operands = 1 : i64, tpu.core_type = #tpu.core_type<tc>} {
    %c0 = arith.constant 0 : index
    %c0_0 = arith.constant 0 : index
    %0 = vector.load %arg0[%c0, %c0_0] : memref<128x128xbf16, #tpu.memory_space<vmem>>, vector<128x128xbf16>
    %c0_1 = arith.constant 0 : index
    %c0_2 = arith.constant 0 : index
    %1 = vector.load %arg1[%c0_1, %c0_2] : memref<128x128xbf16, #tpu.memory_space<vmem>>, vector<128x128xbf16>
    %c0_3 = arith.constant 0 : index
    %c0_4 = arith.constant 0 : index
    %2 = vector.load %arg2[%c0_3, %c0_4] : memref<128x128xbf16, #tpu.memory_space<vmem>>, vector<128x128xbf16>
    %cst = arith.constant dense<0.000000e+00> : vector<128x128xf32>
    %3 = tpu.matmul %1, %2, %cst {dimension_numbers = #tpu.dot_dimension_numbers<[1], [0], [0], [1], [0, 0, 1, 1], [], []>} : vector<128x128xbf16>, vector<128x128xbf16>, vector<128x128xf32> -> vector<128x128xf32>
    %4 = arith.truncf %3 : vector<128x128xf32> to vector<128x128xbf16>
    %cst_5 = arith.constant dense<0.000000e+00> : vector<128x128xf32>
    %5 = tpu.matmul %0, %4, %cst_5 {dimension_numbers = #tpu.dot_dimension_numbers<[1], [0], [0], [1], [0, 0, 1, 1], [], []>} : vector<128x128xbf16>, vector<128x128xbf16>, vector<128x128xf32> -> vector<128x128xf32>
    %c0_6 = arith.constant 0 : index
    %c0_7 = arith.constant 0 : index
    %6 = vector.load %arg3[%c0_6, %c0_7] : memref<1x128xf32, #tpu.memory_space<vmem>>, vector<1x128xf32>
    %7 = vector.broadcast %6 : vector<1x128xf32> to vector<128x128xf32>
    %8 = arith.addf %5, %7 : vector<128x128xf32>
    %cst_8 = arith.constant 0.000000e+00 : f32
    %9 = vector.broadcast %cst_8 : f32 to vector<128x128xf32>
    %10 = arith.maximumf %8, %9 : vector<128x128xf32>
    %11 = arith.truncf %10 : vector<128x128xf32> to vector<128x128xbf16>
    %c0_9 = arith.constant 0 : index
    %c0_10 = arith.constant 0 : index
    %12 = vector.load %arg4[%c0_9, %c0_10] : memref<128x256xbf16, #tpu.memory_space<vmem>>, vector<128x256xbf16>
    %cst_11 = arith.constant dense<0.000000e+00> : vector<128x256xf32>
    %13 = tpu.matmul %11, %12, %cst_11 {dimension_numbers = #tpu.dot_dimension_numbers<[1], [0], [0], [1], [0, 0, 1, 1], [], []>} : vector<128x128xbf16>, vector<128x256xbf16>, vector<128x256xf32> -> vector<128x256xf32>
    %14 = arith.truncf %13 : vector<128x256xf32> to vector<128x256xbf16>
    %cst_12 = arith.constant dense<0.000000e+00> : vector<128x256xf32>
    %15 = tpu.matmul %0, %14, %cst_12 {dimension_numbers = #tpu.dot_dimension_numbers<[1], [0], [0], [1], [0, 0, 1, 1], [], []>} : vector<128x128xbf16>, vector<128x256xbf16>, vector<128x256xf32> -> vector<128x256xf32>
    %c0_13 = arith.constant 0 : index
    %c0_14 = arith.constant 0 : index
    %16 = vector.load %arg5[%c0_13, %c0_14] : memref<1x256xf32, #tpu.memory_space<vmem>>, vector<1x256xf32>
    %17 = vector.broadcast %16 : vector<1x256xf32> to vector<128x256xf32>
    %18 = arith.addf %15, %17 : vector<128x256xf32>
    %cst_15 = arith.constant 0.000000e+00 : f32
    %19 = vector.broadcast %cst_15 : f32 to vector<128x256xf32>
    %20 = arith.maximumf %18, %19 : vector<128x256xf32>
    %21 = arith.truncf %20 : vector<128x256xf32> to vector<128x256xbf16>
    %c0_16 = arith.constant 0 : index
    %c0_17 = arith.constant 0 : index
    %22 = vector.load %arg6[%c0_16, %c0_17] : memref<256x384xbf16, #tpu.memory_space<vmem>>, vector<256x384xbf16>
    %cst_18 = arith.constant dense<0.000000e+00> : vector<128x384xf32>
    %23 = tpu.matmul %21, %22, %cst_18 {dimension_numbers = #tpu.dot_dimension_numbers<[1], [0], [0], [1], [0, 0, 1, 1], [], []>} : vector<128x256xbf16>, vector<256x384xbf16>, vector<128x384xf32> -> vector<128x384xf32>
    %24 = arith.truncf %23 : vector<128x384xf32> to vector<128x384xbf16>
    %cst_19 = arith.constant dense<0.000000e+00> : vector<128x384xf32>
    %25 = tpu.matmul %0, %24, %cst_19 {dimension_numbers = #tpu.dot_dimension_numbers<[1], [0], [0], [1], [0, 0, 1, 1], [], []>} : vector<128x128xbf16>, vector<128x384xbf16>, vector<128x384xf32> -> vector<128x384xf32>
    %c0_20 = arith.constant 0 : index
    %c0_21 = arith.constant 0 : index
    %26 = vector.load %arg7[%c0_20, %c0_21] : memref<1x384xf32, #tpu.memory_space<vmem>>, vector<1x384xf32>
    %27 = vector.broadcast %26 : vector<1x384xf32> to vector<128x384xf32>
    %28 = arith.addf %25, %27 : vector<128x384xf32>
    %cst_22 = arith.constant 0.000000e+00 : f32
    %29 = vector.broadcast %cst_22 : f32 to vector<128x384xf32>
    %30 = arith.maximumf %28, %29 : vector<128x384xf32>
    %31 = arith.truncf %30 : vector<128x384xf32> to vector<128x384xbf16>
    %32 = arith.extf %31 : vector<128x384xbf16> to vector<128x384xf32>
    %c0_23 = arith.constant 0 : index
    %c0_24 = arith.constant 0 : index
    %33 = vector.load %arg8[%c0_23, %c0_24] : memref<128x16xf32, #tpu.memory_space<vmem>>, vector<128x1xf32>
    %34 = vector.broadcast %33 : vector<128x1xf32> to vector<128x384xf32>
    %35 = arith.mulf %32, %34 : vector<128x384xf32>
    %cst_25 = arith.constant dense<0xFF800000> : vector<384xf32>
    %36 = vector.multi_reduction <maximumf>, %35, %cst_25 [0] : vector<128x384xf32> to vector<384xf32>
    %37 = vector.shape_cast %36 : vector<384xf32> to vector<1x384xf32>
    %c0_26 = arith.constant 0 : index
    %c0_27 = arith.constant 0 : index
    %38 = vector.load %arg14[%c0_26, %c0_27] : memref<16x384xf32, #tpu.memory_space<vmem>>, vector<1x384xf32>
    tpu.vector_store %arg14[%c0_26, %c0_27], %37 {strides = array<i32>} : memref<16x384xf32, #tpu.memory_space<vmem>>, vector<1x384xf32>,
    %c0_28 = arith.constant 0 : index
    %c1 = arith.constant 1 : index
    %39 = vector.load %arg8[%c0_28, %c1] : memref<128x16xf32, #tpu.memory_space<vmem>>, vector<128x1xf32>
    %40 = vector.broadcast %39 : vector<128x1xf32> to vector<128x384xf32>
    %41 = arith.mulf %32, %40 : vector<128x384xf32>
    %cst_29 = arith.constant dense<0xFF800000> : vector<384xf32>
    %42 = vector.multi_reduction <maximumf>, %41, %cst_29 [0] : vector<128x384xf32> to vector<384xf32>
    %43 = vector.shape_cast %42 : vector<384xf32> to vector<1x384xf32>
    %c1_30 = arith.constant 1 : index
    %c0_31 = arith.constant 0 : index
    %44 = vector.load %arg14[%c1_30, %c0_31] : memref<16x384xf32, #tpu.memory_space<vmem>>, vector<1x384xf32>
    tpu.vector_store %arg14[%c1_30, %c0_31], %43 {strides = array<i32>} : memref<16x384xf32, #tpu.memory_space<vmem>>, vector<1x384xf32>,
    %c0_32 = arith.constant 0 : index
    %c2 = arith.constant 2 : index
    %45 = vector.load %arg8[%c0_32, %c2] : memref<128x16xf32, #tpu.memory_space<vmem>>, vector<128x1xf32>
    %46 = vector.broadcast %45 : vector<128x1xf32> to vector<128x384xf32>
    %47 = arith.mulf %32, %46 : vector<128x384xf32>
    %cst_33 = arith.constant dense<0xFF800000> : vector<384xf32>
    %48 = vector.multi_reduction <maximumf>, %47, %cst_33 [0] : vector<128x384xf32> to vector<384xf32>
    %49 = vector.shape_cast %48 : vector<384xf32> to vector<1x384xf32>
    %c2_34 = arith.constant 2 : index
    %c0_35 = arith.constant 0 : index
    %50 = vector.load %arg14[%c2_34, %c0_35] : memref<16x384xf32, #tpu.memory_space<vmem>>, vector<1x384xf32>
    tpu.vector_store %arg14[%c2_34, %c0_35], %49 {strides = array<i32>} : memref<16x384xf32, #tpu.memory_space<vmem>>, vector<1x384xf32>,
    %c0_36 = arith.constant 0 : index
    %c3 = arith.constant 3 : index
    %51 = vector.load %arg8[%c0_36, %c3] : memref<128x16xf32, #tpu.memory_space<vmem>>, vector<128x1xf32>
    %52 = vector.broadcast %51 : vector<128x1xf32> to vector<128x384xf32>
    %53 = arith.mulf %32, %52 : vector<128x384xf32>
    %cst_37 = arith.constant dense<0xFF800000> : vector<384xf32>
    %54 = vector.multi_reduction <maximumf>, %53, %cst_37 [0] : vector<128x384xf32> to vector<384xf32>
    %55 = vector.shape_cast %54 : vector<384xf32> to vector<1x384xf32>
    %c3_38 = arith.constant 3 : index
    %c0_39 = arith.constant 0 : index
    %56 = vector.load %arg14[%c3_38, %c0_39] : memref<16x384xf32, #tpu.memory_space<vmem>>, vector<1x384xf32>
    tpu.vector_store %arg14[%c3_38, %c0_39], %55 {strides = array<i32>} : memref<16x384xf32, #tpu.memory_space<vmem>>, vector<1x384xf32>,
    %c0_40 = arith.constant 0 : index
    %c4 = arith.constant 4 : index
    %57 = vector.load %arg8[%c0_40, %c4] : memref<128x16xf32, #tpu.memory_space<vmem>>, vector<128x1xf32>
    %58 = vector.broadcast %57 : vector<128x1xf32> to vector<128x384xf32>
    %59 = arith.mulf %32, %58 : vector<128x384xf32>
    %cst_41 = arith.constant dense<0xFF800000> : vector<384xf32>
    %60 = vector.multi_reduction <maximumf>, %59, %cst_41 [0] : vector<128x384xf32> to vector<384xf32>
    %61 = vector.shape_cast %60 : vector<384xf32> to vector<1x384xf32>
    %c4_42 = arith.constant 4 : index
    %c0_43 = arith.constant 0 : index
    %62 = vector.load %arg14[%c4_42, %c0_43] : memref<16x384xf32, #tpu.memory_space<vmem>>, vector<1x384xf32>
    tpu.vector_store %arg14[%c4_42, %c0_43], %61 {strides = array<i32>} : memref<16x384xf32, #tpu.memory_space<vmem>>, vector<1x384xf32>,
    %c0_44 = arith.constant 0 : index
    %c5 = arith.constant 5 : index
    %63 = vector.load %arg8[%c0_44, %c5] : memref<128x16xf32, #tpu.memory_space<vmem>>, vector<128x1xf32>
    %64 = vector.broadcast %63 : vector<128x1xf32> to vector<128x384xf32>
    %65 = arith.mulf %32, %64 : vector<128x384xf32>
    %cst_45 = arith.constant dense<0xFF800000> : vector<384xf32>
    %66 = vector.multi_reduction <maximumf>, %65, %cst_45 [0] : vector<128x384xf32> to vector<384xf32>
    %67 = vector.shape_cast %66 : vector<384xf32> to vector<1x384xf32>
    %c5_46 = arith.constant 5 : index
    %c0_47 = arith.constant 0 : index
    %68 = vector.load %arg14[%c5_46, %c0_47] : memref<16x384xf32, #tpu.memory_space<vmem>>, vector<1x384xf32>
    tpu.vector_store %arg14[%c5_46, %c0_47], %67 {strides = array<i32>} : memref<16x384xf32, #tpu.memory_space<vmem>>, vector<1x384xf32>,
    %c0_48 = arith.constant 0 : index
    %c6 = arith.constant 6 : index
    %69 = vector.load %arg8[%c0_48, %c6] : memref<128x16xf32, #tpu.memory_space<vmem>>, vector<128x1xf32>
    %70 = vector.broadcast %69 : vector<128x1xf32> to vector<128x384xf32>
    %71 = arith.mulf %32, %70 : vector<128x384xf32>
    %cst_49 = arith.constant dense<0xFF800000> : vector<384xf32>
    %72 = vector.multi_reduction <maximumf>, %71, %cst_49 [0] : vector<128x384xf32> to vector<384xf32>
    %73 = vector.shape_cast %72 : vector<384xf32> to vector<1x384xf32>
    %c6_50 = arith.constant 6 : index
    %c0_51 = arith.constant 0 : index
    %74 = vector.load %arg14[%c6_50, %c0_51] : memref<16x384xf32, #tpu.memory_space<vmem>>, vector<1x384xf32>
    tpu.vector_store %arg14[%c6_50, %c0_51], %73 {strides = array<i32>} : memref<16x384xf32, #tpu.memory_space<vmem>>, vector<1x384xf32>,
    %c0_52 = arith.constant 0 : index
    %c7 = arith.constant 7 : index
    %75 = vector.load %arg8[%c0_52, %c7] : memref<128x16xf32, #tpu.memory_space<vmem>>, vector<128x1xf32>
    %76 = vector.broadcast %75 : vector<128x1xf32> to vector<128x384xf32>
    %77 = arith.mulf %32, %76 : vector<128x384xf32>
    %cst_53 = arith.constant dense<0xFF800000> : vector<384xf32>
    %78 = vector.multi_reduction <maximumf>, %77, %cst_53 [0] : vector<128x384xf32> to vector<384xf32>
    %79 = vector.shape_cast %78 : vector<384xf32> to vector<1x384xf32>
    %c7_54 = arith.constant 7 : index
    %c0_55 = arith.constant 0 : index
    %80 = vector.load %arg14[%c7_54, %c0_55] : memref<16x384xf32, #tpu.memory_space<vmem>>, vector<1x384xf32>
    tpu.vector_store %arg14[%c7_54, %c0_55], %79 {strides = array<i32>} : memref<16x384xf32, #tpu.memory_space<vmem>>, vector<1x384xf32>,
    %c0_56 = arith.constant 0 : index
    %c8 = arith.constant 8 : index
    %81 = vector.load %arg8[%c0_56, %c8] : memref<128x16xf32, #tpu.memory_space<vmem>>, vector<128x1xf32>
    %82 = vector.broadcast %81 : vector<128x1xf32> to vector<128x384xf32>
    %83 = arith.mulf %32, %82 : vector<128x384xf32>
    %cst_57 = arith.constant dense<0xFF800000> : vector<384xf32>
    %84 = vector.multi_reduction <maximumf>, %83, %cst_57 [0] : vector<128x384xf32> to vector<384xf32>
    %85 = vector.shape_cast %84 : vector<384xf32> to vector<1x384xf32>
    %c8_58 = arith.constant 8 : index
    %c0_59 = arith.constant 0 : index
    %86 = vector.load %arg14[%c8_58, %c0_59] : memref<16x384xf32, #tpu.memory_space<vmem>>, vector<1x384xf32>
    tpu.vector_store %arg14[%c8_58, %c0_59], %85 {strides = array<i32>} : memref<16x384xf32, #tpu.memory_space<vmem>>, vector<1x384xf32>,
    %c0_60 = arith.constant 0 : index
    %c9 = arith.constant 9 : index
    %87 = vector.load %arg8[%c0_60, %c9] : memref<128x16xf32, #tpu.memory_space<vmem>>, vector<128x1xf32>
    %88 = vector.broadcast %87 : vector<128x1xf32> to vector<128x384xf32>
    %89 = arith.mulf %32, %88 : vector<128x384xf32>
    %cst_61 = arith.constant dense<0xFF800000> : vector<384xf32>
    %90 = vector.multi_reduction <maximumf>, %89, %cst_61 [0] : vector<128x384xf32> to vector<384xf32>
    %91 = vector.shape_cast %90 : vector<384xf32> to vector<1x384xf32>
    %c9_62 = arith.constant 9 : index
    %c0_63 = arith.constant 0 : index
    %92 = vector.load %arg14[%c9_62, %c0_63] : memref<16x384xf32, #tpu.memory_space<vmem>>, vector<1x384xf32>
    tpu.vector_store %arg14[%c9_62, %c0_63], %91 {strides = array<i32>} : memref<16x384xf32, #tpu.memory_space<vmem>>, vector<1x384xf32>,
    %c0_64 = arith.constant 0 : index
    %c10 = arith.constant 10 : index
    %93 = vector.load %arg8[%c0_64, %c10] : memref<128x16xf32, #tpu.memory_space<vmem>>, vector<128x1xf32>
    %94 = vector.broadcast %93 : vector<128x1xf32> to vector<128x384xf32>
    %95 = arith.mulf %32, %94 : vector<128x384xf32>
    %cst_65 = arith.constant dense<0xFF800000> : vector<384xf32>
    %96 = vector.multi_reduction <maximumf>, %95, %cst_65 [0] : vector<128x384xf32> to vector<384xf32>
    %97 = vector.shape_cast %96 : vector<384xf32> to vector<1x384xf32>
    %c10_66 = arith.constant 10 : index
    %c0_67 = arith.constant 0 : index
    %98 = vector.load %arg14[%c10_66, %c0_67] : memref<16x384xf32, #tpu.memory_space<vmem>>, vector<1x384xf32>
    tpu.vector_store %arg14[%c10_66, %c0_67], %97 {strides = array<i32>} : memref<16x384xf32, #tpu.memory_space<vmem>>, vector<1x384xf32>,
    %c0_68 = arith.constant 0 : index
    %c11 = arith.constant 11 : index
    %99 = vector.load %arg8[%c0_68, %c11] : memref<128x16xf32, #tpu.memory_space<vmem>>, vector<128x1xf32>
    %100 = vector.broadcast %99 : vector<128x1xf32> to vector<128x384xf32>
    %101 = arith.mulf %32, %100 : vector<128x384xf32>
    %cst_69 = arith.constant dense<0xFF800000> : vector<384xf32>
    %102 = vector.multi_reduction <maximumf>, %101, %cst_69 [0] : vector<128x384xf32> to vector<384xf32>
    %103 = vector.shape_cast %102 : vector<384xf32> to vector<1x384xf32>
    %c11_70 = arith.constant 11 : index
    %c0_71 = arith.constant 0 : index
    %104 = vector.load %arg14[%c11_70, %c0_71] : memref<16x384xf32, #tpu.memory_space<vmem>>, vector<1x384xf32>
    tpu.vector_store %arg14[%c11_70, %c0_71], %103 {strides = array<i32>} : memref<16x384xf32, #tpu.memory_space<vmem>>, vector<1x384xf32>,
    %c0_72 = arith.constant 0 : index
    %c12 = arith.constant 12 : index
    %105 = vector.load %arg8[%c0_72, %c12] : memref<128x16xf32, #tpu.memory_space<vmem>>, vector<128x1xf32>
    %106 = vector.broadcast %105 : vector<128x1xf32> to vector<128x384xf32>
    %107 = arith.mulf %32, %106 : vector<128x384xf32>
    %cst_73 = arith.constant dense<0xFF800000> : vector<384xf32>
    %108 = vector.multi_reduction <maximumf>, %107, %cst_73 [0] : vector<128x384xf32> to vector<384xf32>
    %109 = vector.shape_cast %108 : vector<384xf32> to vector<1x384xf32>
    %c12_74 = arith.constant 12 : index
    %c0_75 = arith.constant 0 : index
    %110 = vector.load %arg14[%c12_74, %c0_75] : memref<16x384xf32, #tpu.memory_space<vmem>>, vector<1x384xf32>
    tpu.vector_store %arg14[%c12_74, %c0_75], %109 {strides = array<i32>} : memref<16x384xf32, #tpu.memory_space<vmem>>, vector<1x384xf32>,
    %c0_76 = arith.constant 0 : index
    %c13 = arith.constant 13 : index
    %111 = vector.load %arg8[%c0_76, %c13] : memref<128x16xf32, #tpu.memory_space<vmem>>, vector<128x1xf32>
    %112 = vector.broadcast %111 : vector<128x1xf32> to vector<128x384xf32>
    %113 = arith.mulf %32, %112 : vector<128x384xf32>
    %cst_77 = arith.constant dense<0xFF800000> : vector<384xf32>
    %114 = vector.multi_reduction <maximumf>, %113, %cst_77 [0] : vector<128x384xf32> to vector<384xf32>
    %115 = vector.shape_cast %114 : vector<384xf32> to vector<1x384xf32>
    %c13_78 = arith.constant 13 : index
    %c0_79 = arith.constant 0 : index
    %116 = vector.load %arg14[%c13_78, %c0_79] : memref<16x384xf32, #tpu.memory_space<vmem>>, vector<1x384xf32>
    tpu.vector_store %arg14[%c13_78, %c0_79], %115 {strides = array<i32>} : memref<16x384xf32, #tpu.memory_space<vmem>>, vector<1x384xf32>,
    %c0_80 = arith.constant 0 : index
    %c14 = arith.constant 14 : index
    %117 = vector.load %arg8[%c0_80, %c14] : memref<128x16xf32, #tpu.memory_space<vmem>>, vector<128x1xf32>
    %118 = vector.broadcast %117 : vector<128x1xf32> to vector<128x384xf32>
    %119 = arith.mulf %32, %118 : vector<128x384xf32>
    %cst_81 = arith.constant dense<0xFF800000> : vector<384xf32>
    %120 = vector.multi_reduction <maximumf>, %119, %cst_81 [0] : vector<128x384xf32> to vector<384xf32>
    %121 = vector.shape_cast %120 : vector<384xf32> to vector<1x384xf32>
    %c14_82 = arith.constant 14 : index
    %c0_83 = arith.constant 0 : index
    %122 = vector.load %arg14[%c14_82, %c0_83] : memref<16x384xf32, #tpu.memory_space<vmem>>, vector<1x384xf32>
    tpu.vector_store %arg14[%c14_82, %c0_83], %121 {strides = array<i32>} : memref<16x384xf32, #tpu.memory_space<vmem>>, vector<1x384xf32>,
    %c0_84 = arith.constant 0 : index
    %c15 = arith.constant 15 : index
    %123 = vector.load %arg8[%c0_84, %c15] : memref<128x16xf32, #tpu.memory_space<vmem>>, vector<128x1xf32>
    %124 = vector.broadcast %123 : vector<128x1xf32> to vector<128x384xf32>
    %125 = arith.mulf %32, %124 : vector<128x384xf32>
    %cst_85 = arith.constant dense<0xFF800000> : vector<384xf32>
    %126 = vector.multi_reduction <maximumf>, %125, %cst_85 [0] : vector<128x384xf32> to vector<384xf32>
    %127 = vector.shape_cast %126 : vector<384xf32> to vector<1x384xf32>
    %c15_86 = arith.constant 15 : index
    %c0_87 = arith.constant 0 : index
    %128 = vector.load %arg14[%c15_86, %c0_87] : memref<16x384xf32, #tpu.memory_space<vmem>>, vector<1x384xf32>
    tpu.vector_store %arg14[%c15_86, %c0_87], %127 {strides = array<i32>} : memref<16x384xf32, #tpu.memory_space<vmem>>, vector<1x384xf32>,
    %c0_88 = arith.constant 0 : index
    %c0_89 = arith.constant 0 : index
    %129 = vector.load %arg14[%c0_88, %c0_89] : memref<16x384xf32, #tpu.memory_space<vmem>>, vector<16x384xf32>
    %130 = arith.truncf %129 : vector<16x384xf32> to vector<16x384xbf16>
    %c0_90 = arith.constant 0 : index
    %c0_91 = arith.constant 0 : index
    %131 = vector.load %arg9[%c0_90, %c0_91] : memref<384x1024xbf16, #tpu.memory_space<vmem>>, vector<384x1024xbf16>
    %cst_92 = arith.constant dense<0.000000e+00> : vector<16x1024xf32>
    %132 = tpu.matmul %130, %131, %cst_92 {dimension_numbers = #tpu.dot_dimension_numbers<[1], [0], [0], [1], [0, 0, 1, 1], [], []>} : vector<16x384xbf16>, vector<384x1024xbf16>, vector<16x1024xf32> -> vector<16x1024xf32>
    %c0_93 = arith.constant 0 : index
    %c0_94 = arith.constant 0 : index
    %133 = vector.load %arg10[%c0_93, %c0_94] : memref<1x1024xf32, #tpu.memory_space<vmem>>, vector<1x1024xf32>
    %134 = vector.broadcast %133 : vector<1x1024xf32> to vector<16x1024xf32>
    %135 = arith.addf %132, %134 : vector<16x1024xf32>
    %cst_95 = arith.constant 0.000000e+00 : f32
    %136 = vector.broadcast %cst_95 : f32 to vector<16x1024xf32>
    %137 = arith.maximumf %135, %136 : vector<16x1024xf32>
    %138 = arith.truncf %137 : vector<16x1024xf32> to vector<16x1024xbf16>
    %c0_96 = arith.constant 0 : index
    %c0_97 = arith.constant 0 : index
    %139 = vector.load %arg11[%c0_96, %c0_97] : memref<1024x128xbf16, #tpu.memory_space<vmem>>, vector<1024x128xbf16>
    %cst_98 = arith.constant dense<0.000000e+00> : vector<16x128xf32>
    %140 = tpu.matmul %138, %139, %cst_98 {dimension_numbers = #tpu.dot_dimension_numbers<[1], [0], [0], [1], [0, 0, 1, 1], [], []>} : vector<16x1024xbf16>, vector<1024x128xbf16>, vector<16x128xf32> -> vector<16x128xf32>
    %c0_99 = arith.constant 0 : index
    %c0_100 = arith.constant 0 : index
    %141 = vector.load %arg12[%c0_99, %c0_100] : memref<1x128xf32, #tpu.memory_space<vmem>>, vector<1x128xf32>
    %142 = vector.broadcast %141 : vector<1x128xf32> to vector<16x128xf32>
    %143 = arith.addf %140, %142 : vector<16x128xf32>
    %c0_101 = arith.constant 0 : index
    %c0_102 = arith.constant 0 : index
    %144 = vector.load %arg13[%c0_101, %c0_102] : memref<16x128xf32, #tpu.memory_space<vmem>>, vector<16x128xf32>
    tpu.vector_store %arg13[%c0_101, %c0_102], %143 {strides = array<i32>} : memref<16x128xf32, #tpu.memory_space<vmem>>, vector<16x128xf32>,
    return
  }
}

</mosaic_0001>

<bundles_post_ra>
// kernel: tpu_custom_call.1
= control target key start
LH: loop header
LB: loop body
LE: loop exit
PB: predicated region body
PF: predicated region fallthrough
CT: control target
= control target key end

     0   :  { %18 = vsyncpa [#allocation4], 0  ;;  %s13000_s0 = inlined_call_operand.hbm [shape: bf16[128,128], index: 0, kind: input, shape index: {}]   ;;  %s13001_s1 = inlined_call_operand.hbm [shape: bf16[128,128], index: 1, kind: input, shape index: {}]   ;;  %s13002_s2 = inlined_call_operand.hbm [shape: bf16[128,128], index: 2, kind: input, shape index: {}]   ;;  %s13003_s3 = inlined_call_operand.vmem [shape: f32[1,128], index: 3, kind: input, shape index: {}]   ;;  %s13004_s4 = inlined_call_operand.vmem [shape: bf16[128,256], index: 4, kind: input, shape index: {}]   ;;  %s13005_s5 = inlined_call_operand.vmem [shape: f32[1,256], index: 5, kind: input, shape index: {}]   ;;  %s13006_s6 = inlined_call_operand.hbm [shape: bf16[256,384], index: 6, kind: input, shape index: {}]   ;;  %s13007_s7 = inlined_call_operand.vmem [shape: f32[1,384], index: 7, kind: input, shape index: {}]   ;;  %s13008_s8 = inlined_call_operand.vmem [shape: f32[128,16], index: 8, kind: input, shape index: {}]   ;;  %s13009_s9 = inlined_call_operand.hbm [shape: bf16[384,1024], index: 9, kind: input, shape index: {}]   ;;  %s13010_s10 = inlined_call_operand.vmem [shape: f32[1,1024], index: 10, kind: input, shape index: {}]   ;;  %s13011_s11 = inlined_call_operand.hbm [shape: bf16[1024,128], index: 11, kind: input, shape index: {}]   ;;  %s13012_s12 = inlined_call_operand.vmem [shape: f32[1,128], index: 12, kind: input, shape index: {}]   ;;  %s13013_s13 = inlined_call_operand.hbm [shape: f32[16,128], index: 13, kind: output, shape index: {}]  }
   0x1   :  { %19 = vsyncpa [#allocation7], 0 }
   0x2   :  { %20 = vsyncpa [#allocation10], 0 }
   0x3   :  { %21 = vsyncpa [#allocation13], 0 }
   0x4   :  { %22 = vsyncpa [#allocation5], 0  ;;  %s9074_s25 = smov [#allocation6]   ;;  %s9075_s27 = smov [#allocation9]  }
   0x5   :  { %s40_s26 = sshll.u32 %s9074_s25, 4  ;;  %s70_s28 = sshll.u32 %s9075_s27, 4  ;;  %s41_s26 = int_to_ptr.vmem [resolvable:$true] %s40_s26  ;;  %s9176_s28 = int_to_ptr.vmem [resolvable:$true] %s70_s28 }
   0x6   :  { %s8910_s14 = scalar_lea.hbm %s13001_s1, 1024 }
   0x7   :  { %p8911_p0 = scmp.ne.s32.totalorder %s13001_s1, %s8910_s14  ;;  %p8914_p1 = scmp.lt.u32.totalorder %s8910_s14, %s13001_s1 }
   0x9   :  { %p8916_p2 = pnand %p8914_p1, %p8911_p0 }
   0xb   :  { %8919 = shalt.err (!%p8916_p2)
}
   0xc   :  { %s8920_s19 = scalar_lea.vmem %s41_s26, 1024  ;;  %p8925_p4 = scmp.lt.s32.totalorder %s41_s26, %s41_s26 }
   0xd   :  { %p8921_p3 = scmp.ne.s32.totalorder %s41_s26, %s8920_s19  ;;  %p8926_p5 = scmp.lt.s32.totalorder %s8920_s19, %s8920_s19 }
   0xf   :  { %p8927_p6 = por %p8926_p5, %p8925_p4 }
  0x11   :  { %p8928_p7 = pnand %p8927_p6, %p8921_p3 }
  0x13   :  { %8931 = shalt.err (!%p8928_p7)
}
  0x14   :  { %s9076_s20 = smov 64   ;;  %s9077_s21 = smov 4  }
  0x15   :  { %46 = dma.hbm_to_vmem [thread:$0]  %s13001_s1, 1024, %s41_s26, [#allocation7], %s9076_s20, %s9076_s20, %s9077_s21  }
  0x16   :  { %s8932_s27 = scalar_lea.hbm %s13006_s6, 6144 }
  0x17   :  { %p8933_p8 = scmp.ne.s32.totalorder %s13006_s6, %s8932_s27  ;;  %p8936_p9 = scmp.lt.u32.totalorder %s8932_s27, %s13006_s6 }
  0x19   :  { %p8938_p10 = pnand %p8936_p9, %p8933_p8 }
  0x1b   :  { %8941 = shalt.err (!%p8938_p10)
}
  0x1c   :  { %s8942_s16 = scalar_lea.vmem %s9176_s28, 6144  ;;  %p8947_p12 = scmp.lt.s32.totalorder %s9176_s28, %s9176_s28 }
  0x1d   :  { %p8943_p11 = scmp.ne.s32.totalorder %s9176_s28, %s8942_s16  ;;  %p8948_p13 = scmp.lt.s32.totalorder %s8942_s16, %s8942_s16 }
  0x1f   :  { %p8949_p0 = por %p8948_p13, %p8947_p12 }
  0x21   :  { %p8950_p1 = pnand %p8949_p0, %p8943_p11 }
  0x23   :  { %8953 = shalt.err (!%p8950_p1)
}
  0x24   :  { %s9078_s1 = smov 192   ;;  %s9079_s26 = smov 12  }
  0x25   :  { %76 = dma.hbm_to_vmem [thread:$0]  %s13006_s6, 6144, %s9176_s28, [#allocation10], %s9078_s1, %s9078_s1, %s9079_s26  }
  0x26   :  { %s9080_s19 = smov [#allocation3]   ;;  %s9081_s23 = smov [#allocation8]  }
  0x27   :  { %s28_s22 = sshll.u32 %s9080_s19, 4  ;;  %s52_s24 = sshll.u32 %s9081_s23, 4  ;;  %s29_s22 = int_to_ptr.vmem [resolvable:$true] %s28_s22  ;;  %s9210_s24 = int_to_ptr.vmem [resolvable:$true] %s52_s24 }
  0x28   :  { %s8954_s29 = scalar_lea.hbm %s13000_s0, 1024 }
  0x29   :  { %p8955_p2 = scmp.ne.s32.totalorder %s13000_s0, %s8954_s29  ;;  %p8958_p3 = scmp.lt.u32.totalorder %s8954_s29, %s13000_s0 }
  0x2b   :  { %p8960_p4 = pnand %p8958_p3, %p8955_p2 }
  0x2d   :  { %8963 = shalt.err (!%p8960_p4)
}
  0x2e   :  { %s8964_s6 = scalar_lea.vmem %s29_s22, 1024  ;;  %p8969_p6 = scmp.lt.s32.totalorder %s29_s22, %s29_s22 }
  0x2f   :  { %p8965_p5 = scmp.ne.s32.totalorder %s29_s22, %s8964_s6  ;;  %p8970_p7 = scmp.lt.s32.totalorder %s8964_s6, %s8964_s6 }
  0x31   :  { %p8971_p8 = por %p8970_p7, %p8969_p6 }
  0x33   :  { %p8972_p9 = pnand %p8971_p8, %p8965_p5 }
  0x35   :  { %8975 = shalt.err (!%p8972_p9)
}
  0x36   :  { %34 = dma.hbm_to_vmem [thread:$0]  %s13000_s0, 1024, %s29_s22, [#allocation4], %s9076_s20, %s9076_s20, %s9077_s21  }
  0x37   :  { %s8976_s18 = scalar_lea.hbm %s13002_s2, 1024 }
  0x38   :  { %p8977_p10 = scmp.ne.s32.totalorder %s13002_s2, %s8976_s18  ;;  %p8980_p11 = scmp.lt.u32.totalorder %s8976_s18, %s13002_s2 }
  0x3a   :  { %p8982_p12 = pnand %p8980_p11, %p8977_p10 }
  0x3c   :  { %8985 = shalt.err (!%p8982_p12)
}
  0x3d   :  { %s8986_s29 = scalar_lea.vmem %s9210_s24, 1024  ;;  %p8991_p0 = scmp.lt.s32.totalorder %s9210_s24, %s9210_s24 }
  0x3e   :  { %p8987_p13 = scmp.ne.s32.totalorder %s9210_s24, %s8986_s29  ;;  %p8992_p1 = scmp.lt.s32.totalorder %s8986_s29, %s8986_s29 }
  0x40   :  { %p8993_p2 = por %p8992_p1, %p8991_p0 }
  0x42   :  { %p8994_p3 = pnand %p8993_p2, %p8987_p13 }
  0x44   :  { %8997 = shalt.err (!%p8994_p3)
}
  0x45   :  { %58 = dma.hbm_to_vmem [thread:$0]  %s13002_s2, 1024, %s9210_s24, [#allocation7], %s9076_s20, %s9076_s20, %s9077_s21  }
  0x46   :  { %s9082_s30 = smov [#allocation11]   ;;  %s8998_s6 = scalar_lea.hbm %s13009_s9, 24576 }
  0x47   :  { %s86_s14 = sshll.u32 %s9082_s30, 4  ;;  %p8999_p4 = scmp.ne.s32.totalorder %s13009_s9, %s8998_s6  ;;  %s87_s14 = int_to_ptr.vmem [resolvable:$true] %s86_s14 }
  0x48   :  { %p9002_p5 = scmp.lt.u32.totalorder %s8998_s6, %s13009_s9 }
  0x4a   :  { %p9004_p6 = pnand %p9002_p5, %p8999_p4 }
  0x4c   :  { %9007 = shalt.err (!%p9004_p6)
}
  0x4d   :  { %s9008_s18 = scalar_lea.vmem %s87_s14, 24576  ;;  %p9013_p8 = scmp.lt.s32.totalorder %s87_s14, %s87_s14 }
  0x4e   :  { %p9009_p7 = scmp.ne.s32.totalorder %s87_s14, %s9008_s18  ;;  %p9014_p9 = scmp.lt.s32.totalorder %s9008_s18, %s9008_s18 }
  0x50   :  { %p9015_p10 = por %p9014_p9, %p9013_p8 }
  0x52   :  { %p9016_p11 = pnand %p9015_p10, %p9009_p7 }
  0x54   :  { %9019 = shalt.err (!%p9016_p11)
}
  0x55   :  { %s9083_s2 = smov 512   ;;  %s9084_s24 = smov 32  }
  0x56   :  { %92 = dma.hbm_to_vmem [thread:$0]  %s13009_s9, 24576, %s87_s14, [#allocation10], %s9083_s2, %s9083_s2, %s9084_s24  }
  0x57   :  { %s9085_s25 = smov [#allocation12]   ;;  %s9020_s22 = scalar_lea.hbm %s13011_s11, 8192 }
  0x58   :  { %s100_s27 = sshll.u32 %s9085_s25, 4  ;;  %p9021_p12 = scmp.ne.s32.totalorder %s13011_s11, %s9020_s22  ;;  %s101_s27 = int_to_ptr.vmem [resolvable:$true] %s100_s27 }
  0x59   :  { %p9024_p13 = scmp.lt.u32.totalorder %s9020_s22, %s13011_s11 }
  0x5b   :  { %p9026_p0 = pnand %p9024_p13, %p9021_p12 }
  0x5d   :  { %9029 = shalt.err (!%p9026_p0)
}
  0x5e   :  { %s9030_s28 = scalar_lea.vmem %s101_s27, 8192  ;;  %p9035_p2 = scmp.lt.s32.totalorder %s101_s27, %s101_s27 }
  0x5f   :  { %p9031_p1 = scmp.ne.s32.totalorder %s101_s27, %s9030_s28  ;;  %p9036_p3 = scmp.lt.s32.totalorder %s9030_s28, %s9030_s28 }
  0x61   :  { %p9037_p4 = por %p9036_p3, %p9035_p2 }
  0x63   :  { %p9038_p5 = pnand %p9037_p4, %p9031_p1 }
  0x65   :  { %9041 = shalt.err (!%p9038_p5)
}
  0x66   :  { %106 = dma.hbm_to_vmem [thread:$0]  %s13011_s11, 8192, %s101_s27, [#allocation13], %s9076_s20, %s9076_s20, %s9077_s21  }
  0x67   :  { %9064 = dma.done.wait [#allocation4], 1024  }
  0x68   :  { %9065 = vsyncadd [#allocation4], 4294966272 }
  0x69   :  { %9066 = dma.done.wait [#allocation7], 2048  }
  0x6a   :  { %9067 = vsyncadd [#allocation7], 4294965248 }
  0x6b   :  { %9068 = dma.done.wait [#allocation10], 30720  }
  0x6c   :  { %9069 = vsyncadd [#allocation10], 4294936576 }
  0x6d   :  { %9070 = dma.done.wait [#allocation13], 8192  }
  0x6e   :  { %9071 = vsyncadd [#allocation13], 4294959104  ;;  %v8726_v0 = vld [vmem:[#allocation8] sm:$0xff]   ;;  %v8727_v1 = vld [vmem:[#allocation8 + $0x8] sm:$0xff]  }
  0x6f   :  { %8469 = vmatprep.subr.bf16.mxu0 %v8726_v0  ;;  %v8728_v2 = vld [vmem:[#allocation8 + $0x10] sm:$0xff]   ;;  %v8729_v3 = vld [vmem:[#allocation8 + $0x18] sm:$0xff]   ;;  %v8734_v4 = vld [vmem:[#allocation6] sm:$0xff]  }
  0x70   :  { %8470 = vmatpush3.bf16.msra.mxu0 %v8726_v0  ;;  %8485 = vmatprep.mubr.bf16.mxu0 %v8734_v4  ;;  %v8730_v5 = vld [vmem:[#allocation8 + $0x20] sm:$0xff]   ;;  %v8731_v6 = vld [vmem:[#allocation8 + $0x28] sm:$0xff]   ;;  %v8732_v7 = vld [vmem:[#allocation8 + $0x30] sm:$0xff]   ;;  %v13014_v0 = vmov 0  }
  0x71   :  { %8471 = vmatprep.subr.bf16.mxu0 %v8727_v1  ;;  %v8733_v8 = vld [vmem:[#allocation8 + $0x38] sm:$0xff]   ;;  %v8735_v9 = vld [vmem:[#allocation6 + $0x8] sm:$0xff]   ;;  %v8736_v10 = vld [vmem:[#allocation6 + $0x10] sm:$0xff]   ;;  %8630 = vset.pattern.permute.xlu1 %v13014_v0 }
  0x72   :  { %v8737_v11 = vld [vmem:[#allocation6 + $0x18] sm:$0xff]   ;;  %v8738_v12 = vld [vmem:[#allocation6 + $0x20] sm:$0xff]   ;;  %v8739_v13 = vld [vmem:[#allocation6 + $0x28] sm:$0xff]   ;;  %8629 = vset.pattern.permute.xlu0 %v13014_v0 }
  0x73   :  { %v8740_v14 = vld [vmem:[#allocation6 + $0x30] sm:$0xff]   ;;  %v8741_v15 = vld [vmem:[#allocation6 + $0x38] sm:$0xff]   ;;  %v9274_v16 = vld [vmem:[#allocation3] sm:$0xff]  }
  0x74   :  { %8472 = vmatpush3.bf16.msra.mxu0 %v8727_v1  ;;  %8517 = vmatprep.mubr.bf16.mxu1 %v9274_v16  ;;  %v8750_v17 = vld [vmem:[%s13004_s4] ss:$8 sps:$4 sm:$0xff]   ;;  %v8752_v18 = vld [vmem:[%s13004_s4 + $0x4] ss:$8 sps:$4 sm:$0xff]   ;;  %v8755_v19 = vld [vmem:[%s13004_s4 + $0x14] ss:$8 sps:$4 sm:$0xff]  }
  0x75   :  { %8473 = vmatprep.subr.bf16.mxu0 %v8728_v2  ;;  %v8753_v20 = vld [vmem:[%s13004_s4 + $0x10] ss:$8 sps:$4 sm:$0xff]   ;;  %v8758_v21 = vld [vmem:[%s13004_s4 + $0x24] ss:$8 sps:$4 sm:$0xff]   ;;  %v8756_v22 = vld [vmem:[%s13004_s4 + $0x20] ss:$8 sps:$4 sm:$0xff]  }
  0x76   :  { %v8761_v23 = vld [vmem:[%s13004_s4 + $0x34] ss:$8 sps:$4 sm:$0xff]   ;;  %v8759_v24 = vld [vmem:[%s13004_s4 + $0x30] ss:$8 sps:$4 sm:$0xff]   ;;  %v8764_v25 = vld [vmem:[%s13004_s4 + $0x44] ss:$8 sps:$4 sm:$0xff]  }
  0x77   :  { %v8762_v26 = vld [vmem:[%s13004_s4 + $0x40] ss:$8 sps:$4 sm:$0xff]   ;;  %v8767_v27 = vld [vmem:[%s13004_s4 + $0x54] ss:$8 sps:$4 sm:$0xff]   ;;  %v8765_v28 = vld [vmem:[%s13004_s4 + $0x50] ss:$8 sps:$4 sm:$0xff]  }
  0x78   :  { %8474 = vmatpush3.bf16.msra.mxu0 %v8728_v2  ;;  %v9313_v53 = vld [vmem:[#allocation3 + $0x8] sm:$0xff]   ;;  %v9315_v54 = vld [vmem:[#allocation3 + $0x10] sm:$0xff]   ;;  %v9319_v55 = vld [vmem:[#allocation3 + $0x18] sm:$0xff]  }
  0x79   :  { %8475 = vmatprep.subr.bf16.mxu0 %v8729_v3  ;;  %v9321_v56 = vld [vmem:[#allocation3 + $0x20] sm:$0xff]   ;;  %v9325_v57 = vld [vmem:[#allocation3 + $0x28] sm:$0xff]   ;;  %v9327_v58 = vld [vmem:[#allocation3 + $0x30] sm:$0xff]  }
  0x7a   :  { %v9331_v59 = vld [vmem:[#allocation3 + $0x38] sm:$0xff]   ;;  %v8773_v62 = vld [vmem:[%s13004_s4 + $0x74] ss:$8 sps:$4 sm:$0xff]   ;;  %v8771_v63 = vld [vmem:[%s13004_s4 + $0x70] ss:$8 sps:$4 sm:$0xff]  }
  0x7b   :  { %v8770_v60 = vld [vmem:[%s13004_s4 + $0x64] ss:$8 sps:$4 sm:$0xff]   ;;  %v8768_v61 = vld [vmem:[%s13004_s4 + $0x60] ss:$8 sps:$4 sm:$0xff]   ;;  %v9353_v1 = vld [vmem:[%s13008_s8 + $0x10] sm:$0xff] }
  0x7c   :  { %8476 = vmatpush3.bf16.msra.mxu0 %v8729_v3  ;;  %1880 = vperm.xlu1 %8630, %v9353_v1   ;;  %v9359_v2 = vld [vmem:[%s13008_s8 + $0x18] sm:$0xff]  ;;  %v9365_v3 = vld [vmem:[%s13008_s8 + $0x28] sm:$0xff] }
  0x7d   :  { %8477 = vmatprep.subr.bf16.mxu0 %v8730_v5  ;;  %v9371_v4 = vld [vmem:[%s13008_s8 + $0x38] sm:$0xff] }
  0x80   :  { %8478 = vmatpush3.bf16.msra.mxu0 %v8730_v5  ;;  %1885 = vperm.xlu1 %8630, %v9359_v2   ;;  %v9377_v5 = vld [vmem:[%s13008_s8 + $0x48] sm:$0xff] }
  0x81   :  { %8479 = vmatprep.subr.bf16.mxu0 %v8731_v6 }
  0x84   :  { %8480 = vmatpush3.bf16.msra.mxu0 %v8731_v6  ;;  %1895 = vperm.xlu1 %8630, %v9365_v3   ;;  %v7939_v6 = vld [vmem:[%s13003_s3] ss:$0 sm:$0xff] }
  0x85   :  { %8481 = vmatprep.subr.bf16.mxu0 %v8732_v7 }
  0x88   :  { %8482 = vmatpush3.bf16.msra.mxu0 %v8732_v7  ;;  %1905 = vperm.xlu1 %8630, %v9371_v4  }
  0x89   :  { %8483 = vmatprep.subr.bf16.mxu0 %v8733_v8 }
  0x8c   :  { %8484 = vmatpush3.bf16.msra.mxu0 %v8733_v8  ;;  %1915 = vperm.xlu1 %8630, %v9377_v5  }
  0x8d   :  { %649 = vmatprep.subr.bf16.mxu0 %v8752_v18 }
  0x8f   :  { %8486 = vmatmul.mubr.bf16.vlgmr.msra.gmra.mrb[0].mxu0 %v8735_v9 }
  0x90   :  { %8489 = vmatprep.mubr.bf16.mxu0 %v8736_v10  ;;  %650 = vmatpush1.bf16.msra.mxu0 %v8750_v17 }
  0x91   :  { %651 = vmatprep.subr.bf16.mxu0 %v8755_v19 }
  0x94   :  { %652 = vmatpush1.bf16.msra.mxu0 %v8753_v20 }
  0x95   :  { %653 = vmatprep.subr.bf16.mxu0 %v8758_v21 }
  0x97   :  { %8490 = vmatmul.mubr.bf16.gmra.mrb[4].mxu0 %v8737_v11 }
  0x98   :  { %8493 = vmatprep.mubr.bf16.mxu0 %v8738_v12  ;;  %654 = vmatpush1.bf16.msra.mxu0 %v8756_v22 }
  0x99   :  { %655 = vmatprep.subr.bf16.mxu0 %v8761_v23 }
  0x9c   :  { %656 = vmatpush1.bf16.msra.mxu0 %v8759_v24 }
  0x9d   :  { %657 = vmatprep.subr.bf16.mxu0 %v8764_v25 }
  0x9f   :  { %8494 = vmatmul.mubr.bf16.gmra.mrb[8].mxu0 %v8739_v13 }
  0xa0   :  { %8497 = vmatprep.mubr.bf16.mxu0 %v8740_v14  ;;  %658 = vmatpush1.bf16.msra.mxu0 %v8762_v26 }
  0xa1   :  { %659 = vmatprep.subr.bf16.mxu0 %v8767_v27 }
  0xa4   :  { %660 = vmatpush1.bf16.msra.mxu0 %v8765_v28 }
  0xa5   :  { %661 = vmatprep.subr.bf16.mxu0 %v8770_v60 }
  0xa7   :  { %8498 = vmatmul.mubr.bf16.gmra.mrb[12].mxu0 %v8741_v15 }
  0xa8   :  { %662 = vmatpush1.bf16.msra.mxu0 %v8768_v61  ;;  %681 = vmatprep.mubr.bf16.mxu0 %v13014_v0 }
  0xa9   :  { %663 = vmatprep.subr.bf16.mxu0 %v8773_v62 }
  0xac   :  { %664 = vmatpush1.bf16.msra.mxu0 %v8771_v63 }
 0x162   :  { %v8487_v29 = vpop.f32.mrb[0].mxu0 }
 0x163   :  { %v306_v30 = vpop.f32.mrb[1].mxu0 }
 0x164   :  { %v8488_v31 = vpop.f32.mrb[2].mxu0 }
 0x165   :  { %v370_v32 = vpack.c.bf16 %v8488_v31, %v8487_v29  ;;  %v309_v33 = vpop.f32.mrb[3].mxu0 }
 0x166   :  { %v369_v34 = vpack.c.bf16 %v309_v33, %v306_v30 }
 0x168   :  { %8501 = vmatprep.subr.bf16.mxu1 %v369_v34 }
 0x169   :  { %8502 = vmatpush3.bf16.msra.mxu1 %v369_v34 }
 0x16a   :  { %v8491_v35 = vpop.f32.mrb[4].mxu0  ;;  %8503 = vmatprep.subr.bf16.mxu1 %v370_v32 }
 0x16b   :  { %v322_v36 = vpop.f32.mrb[5].mxu0 }
 0x16c   :  { %v8492_v37 = vpop.f32.mrb[6].mxu0 }
 0x16d   :  { %v372_v38 = vpack.c.bf16 %v8492_v37, %v8491_v35  ;;  %v325_v39 = vpop.f32.mrb[7].mxu0  ;;  %8504 = vmatpush3.bf16.msra.mxu1 %v370_v32 }
 0x16e   :  { %v371_v40 = vpack.c.bf16 %v325_v39, %v322_v36 }
 0x170   :  { %8505 = vmatprep.subr.bf16.mxu1 %v371_v40 }
 0x171   :  { %8506 = vmatpush3.bf16.msra.mxu1 %v371_v40 }
 0x172   :  { %v8495_v41 = vpop.f32.mrb[8].mxu0  ;;  %8507 = vmatprep.subr.bf16.mxu1 %v372_v38 }
 0x173   :  { %v338_v42 = vpop.f32.mrb[9].mxu0 }
 0x174   :  { %v8496_v43 = vpop.f32.mrb[10].mxu0 }
 0x175   :  { %v374_v44 = vpack.c.bf16 %v8496_v43, %v8495_v41  ;;  %v341_v45 = vpop.f32.mrb[11].mxu0  ;;  %8508 = vmatpush3.bf16.msra.mxu1 %v372_v38 }
 0x176   :  { %v373_v46 = vpack.c.bf16 %v341_v45, %v338_v42 }
 0x178   :  { %8509 = vmatprep.subr.bf16.mxu1 %v373_v46 }
 0x179   :  { %8510 = vmatpush3.bf16.msra.mxu1 %v373_v46 }
 0x17a   :  { %v8499_v47 = vpop.f32.mrb[12].mxu0  ;;  %8511 = vmatprep.subr.bf16.mxu1 %v374_v44 }
 0x17b   :  { %v354_v48 = vpop.f32.mrb[13].mxu0 }
 0x17c   :  { %v8500_v49 = vpop.f32.mrb[14].mxu0 }
 0x17d   :  { %v376_v50 = vpack.c.bf16 %v8500_v49, %v8499_v47  ;;  %v357_v51 = vpop.f32.mrb[15].mxu0  ;;  %8512 = vmatpush3.bf16.msra.mxu1 %v374_v44 }
 0x17e   :  { %v375_v52 = vpack.c.bf16 %v357_v51, %v354_v48 }
 0x180   :  { %8513 = vmatprep.subr.bf16.mxu1 %v375_v52 }
 0x181   :  { %8514 = vmatpush3.bf16.msra.mxu1 %v375_v52 }
 0x182   :  { %8515 = vmatprep.subr.bf16.mxu1 %v376_v50 }
 0x185   :  { %8516 = vmatpush3.bf16.msra.mxu1 %v376_v50 }
 0x188   :  { %8518 = vmatmul.mubr.bf16.vlgmr.msra.gmra.mrb[0].mxu1 %v9313_v53 }
 0x189   :  { %8521 = vmatprep.mubr.bf16.mxu1 %v9315_v54 }
 0x190   :  { %8522 = vmatmul.mubr.bf16.gmra.mrb[4].mxu1 %v9319_v55 }
 0x191   :  { %8525 = vmatprep.mubr.bf16.mxu1 %v9321_v56 }
 0x198   :  { %8526 = vmatmul.mubr.bf16.gmra.mrb[8].mxu1 %v9325_v57 }
 0x199   :  { %8529 = vmatprep.mubr.bf16.mxu1 %v9327_v58 }
 0x1a0   :  { %8530 = vmatmul.mubr.bf16.gmra.mrb[12].mxu1 %v9331_v59 }
 0x1a1   :  { %822 = vmatprep.mubr.bf16.mxu1 %v13014_v0 }
 0x25b   :  { %v8519_v7 = vpop.f32.mrb[0].mxu1 }
 0x25c   :  { %v475_v8 = vadd.f32 %v8519_v7, %v7939_v6  ;;  %v466_v9 = vpop.f32.mrb[1].mxu1 }
 0x25d   :  { %v467_v10 = vadd.f32 %v7939_v6, %v466_v9  ;;  %v8520_v11 = vpop.f32.mrb[2].mxu1 }
 0x25e   :  { %v478_v12 = vadd.f32 %v8520_v11, %v7939_v6  ;;  %v469_v13 = vpop.f32.mrb[3].mxu1  ;;  %v531_v15 = vmax.f32 %v475_v8, 0.0 }
 0x25f   :  { %v470_v14 = vadd.f32 %v7939_v6, %v469_v13  ;;  %v529_v18 = vmax.f32 %v467_v10, 0.0 }
 0x260   :  { %v532_v17 = vmax.f32 %v478_v12, 0.0 }
 0x261   :  { %v530_v19 = vmax.f32 %v470_v14, 0.0  ;;  %v9399_v14 = vld [vmem:[%s13008_s8 + $0x68] sm:$0xff] }
 0x262   :  { %v546_v20 = vpack.c.bf16 %v532_v17, %v531_v15  ;;  %v9405_v15 = vld [vmem:[%s13008_s8 + $0x78] sm:$0xff]  ;;  %v9087_v17 = vmov 1  }
 0x263   :  { %v545_v21 = vpack.c.bf16 %v530_v19, %v529_v18  ;;  %v8523_v22 = vpop.f32.mrb[4].mxu1  ;;  %v9411_v18 = vld [vmem:[%s13008_s8 + $0x8] sm:$0xff]  ;;  %v9418_v19 = vld [vmem:[%s13008_s8 + $0x20] sm:$0xff] }
 0x264   :  { %v491_v23 = vadd.f32 %v8523_v22, %v7939_v6  ;;  %v482_v24 = vpop.f32.mrb[5].mxu1  ;;  %v2102_v22 = vld [vmem:[%s13008_s8 + $0x50] sm:$0xff] }
 0x265   :  { %682 = vmatmul.mubr.bf16.vlgmr.msra.gmra.mrb[16].mxu0 %v545_v21  ;;  %v483_v25 = vadd.f32 %v7939_v6, %v482_v24  ;;  %v8524_v26 = vpop.f32.mrb[6].mxu1  ;;  %v2100_v21 = vld [vmem:[%s13008_s8 + $0x40] sm:$0xff]  ;;  %v2106_v24 = vld [vmem:[%s13008_s8 + $0x70] sm:$0xff] }
 0x266   :  { %v535_v27 = vmax.f32 %v491_v23, 0.0  ;;  %v494_v28 = vadd.f32 %v8524_v26, %v7939_v6  ;;  %v485_v29 = vpop.f32.mrb[7].mxu1  ;;  %691 = vmatprep.mubr.bf16.mxu0 %v13014_v0  ;;  %v2104_v23 = vld [vmem:[%s13008_s8 + $0x60] sm:$0xff] }
 0x267   :  { %v533_v30 = vmax.f32 %v483_v25, 0.0  ;;  %v486_v31 = vadd.f32 %v7939_v6, %v485_v29  ;;  %v9088_v25 = vmov 2   ;;  %v9440_v26 = vld [vmem:[%s13008_s8] sm:$0xff] }
 0x268   :  { %v536_v32 = vmax.f32 %v494_v28, 0.0  ;;  %1870 = vperm.xlu0 %8629, %v9440_v26   ;;  %v9459_v28 = vpop.permute.xlu1 %1880 }
 0x269   :  { %v534_v33 = vmax.f32 %v486_v31, 0.0  ;;  %13442 = vst [vmem:[#allocation20_spill] sm:$0xff] %v9459_v28 }
 0x26a   :  { %v548_v34 = vpack.c.bf16 %v536_v32, %v535_v27  ;;  %v13027_v27 = vmov 3  }
 0x26b   :  { %v547_v35 = vpack.c.bf16 %v534_v33, %v533_v30  ;;  %v8527_v36 = vpop.f32.mrb[8].mxu1  ;;  %v13016_v30 = vmov 4   ;;  %v8774_v33 = vld [vmem:[#allocation9] ss:$12 sps:$4 sm:$0xff]  }
 0x26c   :  { %v507_v37 = vadd.f32 %v8527_v36, %v7939_v6  ;;  %v498_v38 = vpop.f32.mrb[9].mxu1  ;;  %1875 = vperm.xlu0 %8629, %v9411_v18   ;;  %v9461_v29 = vpop.permute.xlu1 %1885 }
 0x26d   :  { %692 = vmatmul.mubr.bf16.gmra.mrb[20].mxu0 %v546_v20  ;;  %v499_v39 = vadd.f32 %v7939_v6, %v498_v38  ;;  %v8528_v40 = vpop.f32.mrb[10].mxu1  ;;  %v2098_v20 = vld [vmem:[%s13008_s8 + $0x30] sm:$0xff]  ;;  %13443 = vst [vmem:[#allocation21_spill] sm:$0xff] %v9461_v29 }
 0x26e   :  { %701 = vmatprep.mubr.bf16.mxu0 %v13014_v0  ;;  %v539_v41 = vmax.f32 %v507_v37, 0.0  ;;  %v510_v42 = vadd.f32 %v8528_v40, %v7939_v6  ;;  %v501_v43 = vpop.f32.mrb[11].mxu1  ;;  %v8777_v37 = vld [vmem:[#allocation9 + $0x18] ss:$12 sps:$4 sm:$0xff]   ;;  %v8782_v38 = vld [vmem:[#allocation9 + $0x34] ss:$12 sps:$4 sm:$0xff]  }
 0x26f   :  { %v537_v44 = vmax.f32 %v499_v39, 0.0  ;;  %v502_v45 = vadd.f32 %v7939_v6, %v501_v43  ;;  %v8780_v43 = vld [vmem:[#allocation9 + $0x30] ss:$12 sps:$4 sm:$0xff]  }
 0x270   :  { %v540_v46 = vmax.f32 %v510_v42, 0.0  ;;  %1890 = vperm.xlu0 %8629, %v9418_v19   ;;  %v9465_v31 = vpop.permute.xlu1 %1895 }
 0x271   :  { %v538_v47 = vmax.f32 %v502_v45, 0.0  ;;  %13444 = vst [vmem:[#allocation22_spill] sm:$0xff] %v9465_v31 }
 0x272   :  { %v550_v48 = vpack.c.bf16 %v540_v46, %v539_v41  ;;  %v8785_v46 = vld [vmem:[#allocation9 + $0x4c] ss:$12 sps:$4 sm:$0xff]  }
 0x273   :  { %v549_v49 = vpack.c.bf16 %v538_v47, %v537_v44  ;;  %v8531_v50 = vpop.f32.mrb[12].mxu1 }
 0x274   :  { %v523_v51 = vadd.f32 %v8531_v50, %v7939_v6  ;;  %v514_v52 = vpop.f32.mrb[13].mxu1  ;;  %1900 = vperm.xlu0 %8629, %v2098_v20   ;;  %v9468_v32 = vpop.permute.xlu1 %1905  ;;  %v8788_v50 = vld [vmem:[#allocation9 + $0x64] ss:$12 sps:$4 sm:$0xff]  }
 0x275   :  { %702 = vmatmul.mubr.bf16.gmra.mrb[24].mxu0 %v547_v35  ;;  %v515_v60 = vadd.f32 %v7939_v6, %v514_v52  ;;  %v8532_v61 = vpop.f32.mrb[14].mxu1  ;;  %13445 = vst [vmem:[#allocation23_spill] sm:$0xff] %v9468_v32  ;;  %v8779_v35 = vld [vmem:[#allocation9 + $0x1c] ss:$12 sps:$4 sm:$0xff]  }
 0x276   :  { %711 = vmatprep.mubr.bf16.mxu0 %v13014_v0  ;;  %v543_v62 = vmax.f32 %v523_v51, 0.0  ;;  %v526_v63 = vadd.f32 %v8532_v61, %v7939_v6  ;;  %v517_v7 = vpop.f32.mrb[15].mxu1 }
 0x277   :  { %v541_v8 = vmax.f32 %v515_v60, 0.0  ;;  %v518_v9 = vadd.f32 %v7939_v6, %v517_v7  ;;  %v9393_v6 = vld [vmem:[%s13008_s8 + $0x58] sm:$0xff] }
 0x278   :  { %v544_v10 = vmax.f32 %v526_v63, 0.0  ;;  %1925 = vperm.xlu1 %8630, %v9393_v6   ;;  %1910 = vperm.xlu0 %8629, %v2100_v21   ;;  %v9471_v36 = vpop.permute.xlu1 %1915 }
 0x279   :  { %v542_v11 = vmax.f32 %v518_v9, 0.0  ;;  %13446 = vst [vmem:[#allocation24_spill] sm:$0xff] %v9471_v36 }
 0x27a   :  { %v552_v12 = vpack.c.bf16 %v544_v10, %v543_v62  ;;  %v8786_v62 = vld [vmem:[#allocation9 + $0x60] ss:$12 sps:$4 sm:$0xff]   ;;  %v8789_v10 = vld [vmem:[#allocation9 + $0x78] ss:$12 sps:$4 sm:$0xff]  }
 0x27b   :  { %v551_v13 = vpack.c.bf16 %v542_v11, %v541_v8 }
 0x27c   :  { %1935 = vperm.xlu1 %8630, %v9399_v14   ;;  %1920 = vperm.xlu0 %8629, %v2102_v22  }
 0x27d   :  { %712 = vmatmul.mubr.bf16.gmra.mrb[28].mxu0 %v548_v34  ;;  %v8776_v34 = vld [vmem:[#allocation9 + $0x4] ss:$12 sps:$4 sm:$0xff]  }
 0x27e   :  { %721 = vmatprep.mubr.bf16.mxu0 %v13014_v0  ;;  %1271 = vmatprep.subr.bf16.mxu0 %v8776_v34 }
 0x27f   :  { %1272 = vmatpush1.bf16.msra.mxu0 %v8774_v33  ;;  %v8795_v33 = vld [vmem:[#allocation9 + $0xa8] ss:$12 sps:$4 sm:$0xff]  }
 0x280   :  { %1945 = vperm.xlu1 %8630, %v9405_v15   ;;  %1930 = vperm.xlu0 %8629, %v2104_v23  }
 0x281   :  { %1273 = vmatprep.subr.bf16.mxu0 %v8779_v35  ;;  %v13041_v35 = vmov 5  }
 0x283   :  { %1274 = vmatpush1.bf16.msra.mxu0 %v8777_v37 }
 0x284   :  { %8632 = vset.pattern.permute.xlu1 %v9087_v17  ;;  %1940 = vperm.xlu0 %8629, %v2106_v24  }
 0x285   :  { %722 = vmatmul.mubr.bf16.gmra.mrb[32].mxu0 %v549_v49  ;;  %2115 = vperm.xlu1 %8632, %v9411_v18   ;;  %v8783_v49 = vld [vmem:[#allocation9 + $0x48] ss:$12 sps:$4 sm:$0xff]  }
 0x286   :  { %731 = vmatprep.mubr.bf16.mxu0 %v13014_v0  ;;  %1275 = vmatprep.subr.bf16.mxu0 %v8782_v38 }
 0x287   :  { %1276 = vmatpush1.bf16.msra.mxu0 %v8780_v43  ;;  %v8805_v43 = vld [vmem:[#allocation9 + $0xdc] ss:$12 sps:$4 sm:$0xff]  }
 0x288   :  { %8631 = vset.pattern.permute.xlu0 %v9087_v17  ;;  %1277 = vmatprep.subr.bf16.mxu0 %v8785_v46  ;;  %v8803_v46 = vld [vmem:[#allocation9 + $0xd8] ss:$12 sps:$4 sm:$0xff]  }
 0x289   :  { %2120 = vperm.xlu1 %8632, %v9353_v1   ;;  %2110 = vperm.xlu0 %8631, %v9440_v26  }
 0x28b   :  { %1278 = vmatpush1.bf16.msra.mxu0 %v8783_v49 }
 0x28c   :  { %1279 = vmatprep.subr.bf16.mxu0 %v8788_v50 }
 0x28d   :  { %732 = vmatmul.mubr.bf16.gmra.mrb[36].mxu0 %v550_v48  ;;  %2130 = vperm.xlu1 %8632, %v9418_v19  }
 0x28e   :  { %741 = vmatprep.mubr.bf16.mxu0 %v13014_v0 }
 0x28f   :  { %1280 = vmatpush1.bf16.msra.mxu0 %v8786_v62 }
 0x291   :  { %2140 = vperm.xlu1 %8632, %v2098_v20  }
 0x295   :  { %742 = vmatmul.mubr.bf16.gmra.mrb[40].mxu0 %v551_v13  ;;  %2150 = vperm.xlu1 %8632, %v2100_v21  }
 0x296   :  { %751 = vmatprep.mubr.bf16.mxu0 %v13014_v0 }
 0x299   :  { %2160 = vperm.xlu1 %8632, %v2102_v22  }
 0x29d   :  { %752 = vmatmul.mubr.bf16.gmra.mrb[44].mxu0 %v552_v12  ;;  %2170 = vperm.xlu1 %8632, %v2104_v23  }
 0x2a1   :  { %2180 = vperm.xlu1 %8632, %v2106_v24  }
 0x2a5   :  { %8633 = vset.pattern.permute.xlu1 %v9088_v25 }
 0x2a6   :  { %2347 = vperm.xlu1 %8633, %v9440_v26  }
 0x2aa   :  { %2357 = vperm.xlu1 %8633, %v9353_v1  }
 0x2ae   :  { %2362 = vperm.xlu1 %8633, %v9359_v2  }
 0x2b2   :  { %2372 = vperm.xlu1 %8633, %v9365_v3  }
 0x2b6   :  { %2382 = vperm.xlu1 %8633, %v9371_v4  }
 0x2ba   :  { %2392 = vperm.xlu1 %8633, %v9377_v5  }
 0x2be   :  { %2402 = vperm.xlu1 %8633, %v9393_v6  }
 0x2c2   :  { %2412 = vperm.xlu1 %8633, %v9399_v14  }
 0x2c6   :  { %2422 = vperm.xlu1 %8633, %v9405_v15  }
 0x2ca   :  { %8636 = vset.pattern.permute.xlu1 %v13027_v27 }
 0x2cb   :  { %2589 = vperm.xlu1 %8636, %v9411_v18  }
 0x2cf   :  { %2594 = vperm.xlu1 %8636, %v9353_v1  }
 0x2d3   :  { %2604 = vperm.xlu1 %8636, %v9418_v19  }
 0x2d7   :  { %2614 = vperm.xlu1 %8636, %v2098_v20   ;;  %v8792_v20 = vld [vmem:[#allocation9 + $0x90] ss:$12 sps:$4 sm:$0xff]  }
 0x2db   :  { %2624 = vperm.xlu1 %8636, %v2100_v21  }
 0x2df   :  { %2634 = vperm.xlu1 %8636, %v2102_v22  }
 0x2e3   :  { %2644 = vperm.xlu1 %8636, %v2104_v23  }
 0x2e7   :  { %2654 = vperm.xlu1 %8636, %v2106_v24  }
 0x2eb   :  { %8637 = vset.pattern.permute.xlu1 %v13016_v30 }
 0x2ec   :  { %2821 = vperm.xlu1 %8637, %v9440_v26  }
 0x2f0   :  { %2831 = vperm.xlu1 %8637, %v9353_v1  }
 0x2f4   :  { %2836 = vperm.xlu1 %8637, %v9359_v2  }
 0x2f7   :  { %v9474_v41 = vpop.permute.xlu1 %1925 }
 0x2f8   :  { %2846 = vperm.xlu1 %8637, %v9365_v3   ;;  %13447 = vst [vmem:[#allocation25_spill] sm:$0xff] %v9474_v41 }
 0x2fb   :  { %v9477_v48 = vpop.permute.xlu1 %1935 }
 0x2fc   :  { %2856 = vperm.xlu1 %8637, %v9371_v4   ;;  %13448 = vst [vmem:[#allocation26_spill] sm:$0xff] %v9477_v48  ;;  %v8791_v4 = vld [vmem:[#allocation9 + $0x7c] ss:$12 sps:$4 sm:$0xff]  }
 0x2fd   :  { %1281 = vmatprep.subr.bf16.mxu0 %v8791_v4  ;;  %v8815_v4 = vld [vmem:[#allocation9 + $0x10c] ss:$12 sps:$4 sm:$0xff]  }
 0x2fe   :  { %1282 = vmatpush1.bf16.msra.mxu0 %v8789_v10 }
 0x2ff   :  { %v9480_v60 = vpop.permute.xlu1 %1945 }
 0x300   :  { %2866 = vperm.xlu1 %8637, %v9377_v5   ;;  %13449 = vst [vmem:[#allocation27_spill] sm:$0xff] %v9480_v60  ;;  %v8794_v5 = vld [vmem:[#allocation9 + $0x94] ss:$12 sps:$4 sm:$0xff]  }
 0x301   :  { %1283 = vmatprep.subr.bf16.mxu0 %v8794_v5  ;;  %v8813_v5 = vld [vmem:[#allocation9 + $0x108] ss:$12 sps:$4 sm:$0xff]  }
 0x302   :  { %1284 = vmatpush1.bf16.msra.mxu0 %v8792_v20 }
 0x304   :  { %2876 = vperm.xlu1 %8637, %v9393_v6   ;;  %v9483_v9 = vpop.permute.xlu1 %2115  ;;  %v8797_v6 = vld [vmem:[#allocation9 + $0xac] ss:$12 sps:$4 sm:$0xff]  }
 0x305   :  { %13450 = vst [vmem:[#allocation28_spill] sm:$0xff] %v9483_v9  ;;  %1285 = vmatprep.subr.bf16.mxu0 %v8797_v6 }
 0x306   :  { %1286 = vmatpush1.bf16.msra.mxu0 %v8795_v33  ;;  %v8818_v33 = vld [vmem:[#allocation9 + $0x120] ss:$12 sps:$4 sm:$0xff]  }
 0x308   :  { %2886 = vperm.xlu1 %8637, %v9399_v14   ;;  %v9486_v13 = vpop.permute.xlu1 %2120  ;;  %v8800_v14 = vld [vmem:[#allocation9 + $0xc4] ss:$12 sps:$4 sm:$0xff]  }
 0x309   :  { %13451 = vst [vmem:[#allocation29_spill] sm:$0xff] %v9486_v13  ;;  %1287 = vmatprep.subr.bf16.mxu0 %v8800_v14 }
 0x30c   :  { %2896 = vperm.xlu1 %8637, %v9405_v15   ;;  %v9489_v24 = vpop.permute.xlu1 %2130  ;;  %v8798_v15 = vld [vmem:[#allocation9 + $0xc0] ss:$12 sps:$4 sm:$0xff]  }
 0x30d   :  { %13452 = vst [vmem:[#allocation30_spill] sm:$0xff] %v9489_v24  ;;  %1288 = vmatpush1.bf16.msra.mxu0 %v8798_v15  ;;  %v8823_v15 = vld [vmem:[#allocation9 + $0x138] ss:$12 sps:$4 sm:$0xff]  }
 0x30e   :  { %1289 = vmatprep.subr.bf16.mxu0 %v8805_v43 }
 0x310   :  { %8640 = vset.pattern.permute.xlu1 %v13041_v35  ;;  %v9493_v38 = vpop.permute.xlu1 %2140 }
 0x311   :  { %3063 = vperm.xlu1 %8640, %v9411_v18   ;;  %13453 = vst [vmem:[#allocation31_spill] sm:$0xff] %v9493_v38  ;;  %1290 = vmatpush1.bf16.msra.mxu0 %v8803_v46 }
 0x315   :  { %3068 = vperm.xlu1 %8640, %v9353_v1  }
 0x319   :  { %3078 = vperm.xlu1 %8640, %v9418_v19  }
 0x338   :  { %v683_v39 = vpop.f32.mrb[16].mxu0 }
 0x339   :  { %v685_v40 = vpop.f32.mrb[17].mxu0 }
 0x33a   :  { %v687_v42 = vpop.f32.mrb[18].mxu0 }
 0x33b   :  { %v762_v44 = vpack.c.bf16 %v687_v42, %v683_v39  ;;  %v689_v45 = vpop.f32.mrb[19].mxu0 }
 0x33c   :  { %v763_v47 = vpack.c.bf16 %v689_v45, %v685_v40  ;;  %v9496_v45 = vpop.permute.xlu1 %2150 }
 0x33d   :  { %13454 = vst [vmem:[#allocation32_spill] sm:$0xff] %v9496_v45 }
 0x33e   :  { %790 = vmatprep.subr.bf16.mxu1 %v763_v47  ;;  %v8810_v47 = vld [vmem:[#allocation9 + $0xf4] ss:$12 sps:$4 sm:$0xff]  }
 0x33f   :  { %791 = vmatpush1.bf16.msra.mxu1 %v762_v44  ;;  %1291 = vmatprep.subr.bf16.mxu0 %v8810_v47 }
 0x340   :  { %v693_v51 = vpop.f32.mrb[20].mxu0 }
 0x341   :  { %v695_v52 = vpop.f32.mrb[21].mxu0 }
 0x342   :  { %v697_v61 = vpop.f32.mrb[22].mxu0 }
 0x343   :  { %v764_v63 = vpack.c.bf16 %v697_v61, %v693_v51  ;;  %v699_v7 = vpop.f32.mrb[23].mxu0  ;;  %v9499_v51 = vpop.permute.xlu1 %2160 }
 0x344   :  { %v765_v8 = vpack.c.bf16 %v699_v7, %v695_v52  ;;  %13455 = vst [vmem:[#allocation33_spill] sm:$0xff] %v9499_v51 }
 0x346   :  { %792 = vmatprep.subr.bf16.mxu1 %v765_v8  ;;  %v13034_v8 = vmov 6  }
 0x347   :  { %793 = vmatpush1.bf16.msra.mxu1 %v764_v63  ;;  %v8808_v63 = vld [vmem:[#allocation9 + $0xf0] ss:$12 sps:$4 sm:$0xff]   ;;  %8641 = vset.pattern.permute.xlu1 %v13034_v8  ;;  %v9502_v10 = vpop.permute.xlu1 %2170 }
 0x348   :  { %v703_v11 = vpop.f32.mrb[24].mxu0  ;;  %13456 = vst [vmem:[#allocation34_spill] sm:$0xff] %v9502_v10  ;;  %3300 = vperm.xlu1 %8641, %v9411_v18   ;;  %1292 = vmatpush1.bf16.msra.mxu0 %v8808_v63 }
 0x349   :  { %v705_v12 = vpop.f32.mrb[25].mxu0  ;;  %1293 = vmatprep.subr.bf16.mxu0 %v8815_v4  ;;  %v13025_v4 = vmov 8  }
 0x34a   :  { %v707_v17 = vpop.f32.mrb[26].mxu0 }
 0x34b   :  { %v766_v21 = vpack.c.bf16 %v707_v17, %v703_v11  ;;  %v709_v22 = vpop.f32.mrb[27].mxu0  ;;  %v9505_v20 = vpop.permute.xlu1 %2180 }
 0x34c   :  { %v767_v23 = vpack.c.bf16 %v709_v22, %v705_v12  ;;  %v8820_v12 = vld [vmem:[#allocation9 + $0x124] ss:$12 sps:$4 sm:$0xff]   ;;  %13457 = vst [vmem:[#allocation35_spill] sm:$0xff] %v9505_v20  ;;  %3305 = vperm.xlu1 %8641, %v9353_v1   ;;  %1294 = vmatpush1.bf16.msra.mxu0 %v8813_v5 }
 0x34d   :  { %1295 = vmatprep.subr.bf16.mxu0 %v8820_v12 }
 0x34e   :  { %794 = vmatprep.subr.bf16.mxu1 %v767_v23 }
 0x34f   :  { %795 = vmatpush1.bf16.msra.mxu1 %v766_v21  ;;  %v9508_v14 = vpop.permute.xlu1 %2347 }
 0x350   :  { %v713_v34 = vpop.f32.mrb[28].mxu0  ;;  %13458 = vst [vmem:[#allocation36_spill] sm:$0xff] %v9508_v14  ;;  %1296 = vmatpush1.bf16.msra.mxu0 %v8818_v33  ;;  %v8811_v33 = vld [vmem:[#allocation9 + $0xf8] ss:$12 sps:$4 sm:$0xff]   ;;  %v13529_v14 = vmov 5  }
 0x351   :  { %v715_v37 = vpop.f32.mrb[29].mxu0 }
 0x352   :  { %v717_v39 = vpop.f32.mrb[30].mxu0 }
 0x353   :  { %v768_v40 = vpack.c.bf16 %v717_v39, %v713_v34  ;;  %v719_v42 = vpop.f32.mrb[31].mxu0  ;;  %v8825_v34 = vld [vmem:[#allocation9 + $0x13c] ss:$12 sps:$4 sm:$0xff]  }
 0x354   :  { %v769_v44 = vpack.c.bf16 %v719_v42, %v715_v37  ;;  %v13030_v37 = vmov 7   ;;  %v9512_v42 = vpop.permute.xlu1 %2357  ;;  %1297 = vmatprep.subr.bf16.mxu0 %v8825_v34 }
 0x355   :  { %8642 = vset.pattern.permute.xlu1 %v13030_v37  ;;  %13459 = vst [vmem:[#allocation37_spill] sm:$0xff] %v9512_v42  ;;  %1298 = vmatpush1.bf16.msra.mxu0 %v8823_v15  ;;  %v8816_v15 = vld [vmem:[#allocation9 + $0x110] ss:$12 sps:$4 sm:$0xff]  }
 0x356   :  { %796 = vmatprep.subr.bf16.mxu1 %v769_v44  ;;  %3532 = vperm.xlu1 %8642, %v9440_v26  }
 0x357   :  { %797 = vmatpush1.bf16.msra.mxu1 %v768_v40 }
 0x358   :  { %v723_v49 = vpop.f32.mrb[32].mxu0 }
 0x359   :  { %v725_v50 = vpop.f32.mrb[33].mxu0 }
 0x35a   :  { %v727_v52 = vpop.f32.mrb[34].mxu0  ;;  %3542 = vperm.xlu1 %8642, %v9353_v1  }
 0x35b   :  { %v770_v61 = vpack.c.bf16 %v727_v52, %v723_v49  ;;  %v729_v62 = vpop.f32.mrb[35].mxu0  ;;  %v9515_v49 = vpop.permute.xlu1 %2362 }
 0x35c   :  { %v771_v7 = vpack.c.bf16 %v729_v62, %v725_v50  ;;  %13460 = vst [vmem:[#allocation38_spill] sm:$0xff] %v9515_v49 }
 0x35e   :  { %798 = vmatprep.subr.bf16.mxu1 %v771_v7  ;;  %3547 = vperm.xlu1 %8642, %v9359_v2  }
 0x35f   :  { %799 = vmatpush1.bf16.msra.mxu1 %v770_v61  ;;  %v9518_v61 = vpop.permute.xlu1 %2372 }
 0x360   :  { %v733_v11 = vpop.f32.mrb[36].mxu0  ;;  %13461 = vst [vmem:[#allocation39_spill] sm:$0xff] %v9518_v61 }
 0x361   :  { %v735_v17 = vpop.f32.mrb[37].mxu0 }
 0x362   :  { %v737_v21 = vpop.f32.mrb[38].mxu0  ;;  %8643 = vset.pattern.permute.xlu1 %v13025_v4 }
 0x363   :  { %v772_v22 = vpack.c.bf16 %v737_v21, %v733_v11  ;;  %v739_v6 = vpop.f32.mrb[39].mxu0  ;;  %3774 = vperm.xlu1 %8643, %v9411_v18   ;;  %v8801_v11 = vld [vmem:[#allocation9 + $0xc8] ss:$12 sps:$4 sm:$0xff]   ;;  %v9522_v12 = vpop.permute.xlu1 %2382  ;;  %v8806_v21 = vld [vmem:[#allocation9 + $0xe0] ss:$12 sps:$4 sm:$0xff]  }
 0x364   :  { %v773_v23 = vpack.c.bf16 %v739_v6, %v735_v17  ;;  %13462 = vst [vmem:[#allocation40_spill] sm:$0xff] %v9522_v12  ;;  %v8802_v17 = vld [vmem:[#allocation9 + $0x8] ss:$12 sps:$4 sm:$0xff]   ;;  %v8807_v6 = vld [vmem:[#allocation9 + $0x20] ss:$12 sps:$4 sm:$0xff]  }
 0x366   :  { %800 = vmatprep.subr.bf16.mxu1 %v773_v23  ;;  %v13023_v23 = vmov 9  }
 0x367   :  { %801 = vmatpush1.bf16.msra.mxu1 %v772_v22  ;;  %3779 = vperm.xlu1 %8643, %v9353_v1   ;;  %v9525_v22 = vpop.permute.xlu1 %2392 }
 0x368   :  { %v743_v39 = vpop.f32.mrb[40].mxu0  ;;  %13463 = vst [vmem:[#allocation41_spill] sm:$0xff] %v9525_v22 }
 0x369   :  { %v745_v40 = vpop.f32.mrb[41].mxu0 }
 0x36a   :  { %v747_v43 = vpop.f32.mrb[42].mxu0 }
 0x36b   :  { %v774_v44 = vpack.c.bf16 %v747_v43, %v743_v39  ;;  %v749_v46 = vpop.f32.mrb[43].mxu0  ;;  %8644 = vset.pattern.permute.xlu1 %v13023_v23  ;;  %v9531_v34 = vpop.permute.xlu1 %2402  ;;  %v8812_v39 = vld [vmem:[#allocation9 + $0x38] ss:$12 sps:$4 sm:$0xff]   ;;  %v8821_v43 = vld [vmem:[#allocation9 + $0x128] ss:$12 sps:$4 sm:$0xff]  }
 0x36c   :  { %v775_v47 = vpack.c.bf16 %v749_v46, %v745_v40  ;;  %4006 = vperm.xlu1 %8644, %v9440_v26   ;;  %13464 = vst [vmem:[#allocation42_spill] sm:$0xff] %v9531_v34  ;;  %v8817_v40 = vld [vmem:[#allocation9 + $0x50] ss:$12 sps:$4 sm:$0xff]   ;;  %v8822_v46 = vld [vmem:[#allocation9 + $0x68] ss:$12 sps:$4 sm:$0xff]  }
 0x36e   :  { %802 = vmatprep.subr.bf16.mxu1 %v775_v47  ;;  %v8826_v47 = vld [vmem:[#allocation9 + $0x140] ss:$12 sps:$4 sm:$0xff]  }
 0x36f   :  { %803 = vmatpush1.bf16.msra.mxu1 %v774_v44 }
 0x370   :  { %v753_v50 = vpop.f32.mrb[44].mxu0  ;;  %4016 = vperm.xlu1 %8644, %v9353_v1  }
 0x371   :  { %v755_v52 = vpop.f32.mrb[45].mxu0 }
 0x372   :  { %v757_v62 = vpop.f32.mrb[46].mxu0 }
 0x373   :  { %v776_v63 = vpack.c.bf16 %v757_v62, %v753_v50  ;;  %v759_v7 = vpop.f32.mrb[47].mxu0  ;;  %v13019_v50 = vmov 10   ;;  %v13017_v62 = vmov 11  }
 0x374   :  { %v777_v5 = vpack.c.bf16 %v759_v7, %v755_v52  ;;  %4021 = vperm.xlu1 %8644, %v9359_v2   ;;  %v13021_v7 = vmov 12  }
 0x376   :  { %804 = vmatprep.subr.bf16.mxu1 %v777_v5 }
 0x377   :  { %805 = vmatpush1.bf16.msra.mxu1 %v776_v63 }
 0x378   :  { %8301 = vmatprep.subr.bf16.mxu1 %v8801_v11  ;;  %8645 = vset.pattern.permute.xlu1 %v13019_v50  ;;  %v13028_v11 = vmov 13  }
 0x379   :  { %4248 = vperm.xlu1 %8645, %v9411_v18  }
 0x37a   :  { %823 = vmatmul.mubr.bf16.vlgmr.msra.gmra.mrb[16].mxu1 %v9274_v16  ;;  %v9534_v16 = vpop.permute.xlu1 %2412 }
 0x37b   :  { %832 = vmatprep.mubr.bf16.mxu1 %v13014_v0  ;;  %8302 = vmatpush3.bf16.msra.mxu1 %v8802_v17  ;;  %13465 = vst [vmem:[#allocation43_spill] sm:$0xff] %v9534_v16  ;;  %v13526_v16 = vmov 15  }
 0x37c   :  { %8303 = vmatprep.subr.bf16.mxu1 %v8806_v21  ;;  %v13032_v21 = vmov 14  }
 0x37d   :  { %4253 = vperm.xlu1 %8645, %v9353_v1  }
 0x37e   :  { %v9539_v44 = vpop.permute.xlu1 %2422 }
 0x37f   :  { %8304 = vmatpush3.bf16.msra.mxu1 %v8807_v6  ;;  %13466 = vst [vmem:[#allocation44_spill] sm:$0xff] %v9539_v44 }
 0x380   :  { %8305 = vmatprep.subr.bf16.mxu1 %v8811_v33 }
 0x381   :  { %8646 = vset.pattern.permute.xlu1 %v13017_v62 }
 0x382   :  { %833 = vmatmul.mubr.bf16.gmra.mrb[20].mxu1 %v9313_v53  ;;  %v9544_v53 = vpop.permute.xlu1 %2589  ;;  %4480 = vperm.xlu1 %8646, %v9440_v26  }
 0x383   :  { %842 = vmatprep.mubr.bf16.mxu1 %v13014_v0  ;;  %8306 = vmatpush3.bf16.msra.mxu1 %v8812_v39  ;;  %13467 = vst [vmem:[#allocation45_spill] sm:$0xff] %v9544_v53  ;;  %v8827_v39 = vld [vmem:[#allocation9 + $0x80] ss:$12 sps:$4 sm:$0xff]  }
 0x384   :  { %8307 = vmatprep.subr.bf16.mxu1 %v8816_v15  ;;  %v8830_v15 = vld [vmem:[#allocation9 + $0x154] ss:$12 sps:$4 sm:$0xff]  }
 0x385   :  { %1299 = vmatprep.subr.bf16.mxu0 %v8830_v15 }
 0x386   :  { %v9548_v52 = vpop.permute.xlu1 %2594  ;;  %4490 = vperm.xlu1 %8646, %v9353_v1  }
 0x387   :  { %8308 = vmatpush3.bf16.msra.mxu1 %v8817_v40  ;;  %13468 = vst [vmem:[#allocation46_spill] sm:$0xff] %v9548_v52  ;;  %v8831_v40 = vld [vmem:[#allocation9 + $0x158] ss:$12 sps:$4 sm:$0xff]  }
 0x388   :  { %8309 = vmatprep.subr.bf16.mxu1 %v8821_v43  ;;  %v8828_v43 = vld [vmem:[#allocation9 + $0x150] ss:$12 sps:$4 sm:$0xff]  }
 0x389   :  { %1300 = vmatpush1.bf16.msra.mxu0 %v8828_v43 }
 0x38a   :  { %843 = vmatmul.mubr.bf16.gmra.mrb[24].mxu1 %v9315_v54  ;;  %v9552_v63 = vpop.permute.xlu1 %2604  ;;  %4495 = vperm.xlu1 %8646, %v9359_v2  }
 0x38b   :  { %852 = vmatprep.mubr.bf16.mxu1 %v13014_v0  ;;  %8310 = vmatpush3.bf16.msra.mxu1 %v8822_v46  ;;  %13469 = vst [vmem:[#allocation47_spill] sm:$0xff] %v9552_v63  ;;  %v8836_v46 = vld [vmem:[#allocation9 + $0x170] ss:$12 sps:$4 sm:$0xff]  }
 0x38c   :  { %8311 = vmatprep.subr.bf16.mxu1 %v8826_v47  ;;  %v8833_v47 = vld [vmem:[#allocation9 + $0x168] ss:$12 sps:$4 sm:$0xff]  }
 0x38e   :  { %v9556_v54 = vpop.permute.xlu1 %2614  ;;  %8647 = vset.pattern.permute.xlu1 %v13021_v7 }
 0x38f   :  { %13470 = vst [vmem:[#allocation48_spill] sm:$0xff] %v9556_v54  ;;  %4722 = vperm.xlu1 %8647, %v9411_v18   ;;  %8312 = vmatpush3.bf16.msra.mxu1 %v8827_v39 }
 0x390   :  { %8313 = vmatprep.subr.bf16.mxu1 %v8831_v40 }
 0x392   :  { %853 = vmatmul.mubr.bf16.gmra.mrb[28].mxu1 %v9319_v55  ;;  %v9562_v55 = vpop.permute.xlu1 %2624 }
 0x393   :  { %862 = vmatprep.mubr.bf16.mxu1 %v13014_v0  ;;  %13471 = vst [vmem:[#allocation49_spill] sm:$0xff] %v9562_v55  ;;  %4727 = vperm.xlu1 %8647, %v9353_v1  }
 0x396   :  { %v9567_v5 = vpop.permute.xlu1 %2634 }
 0x397   :  { %13472 = vst [vmem:[#allocation50_spill] sm:$0xff] %v9567_v5  ;;  %8648 = vset.pattern.permute.xlu1 %v13028_v11  ;;  %v13523_v5 = vmov 14  }
 0x398   :  { %4954 = vperm.xlu1 %8648, %v9440_v26  }
 0x39a   :  { %863 = vmatmul.mubr.bf16.gmra.mrb[32].mxu1 %v9321_v56  ;;  %v9571_v56 = vpop.permute.xlu1 %2644 }
 0x39b   :  { %872 = vmatprep.mubr.bf16.mxu1 %v13014_v0  ;;  %13473 = vst [vmem:[#allocation51_spill] sm:$0xff] %v9571_v56 }
 0x39c   :  { %4964 = vperm.xlu1 %8648, %v9353_v1  }
 0x3a0   :  { %4969 = vperm.xlu1 %8648, %v9359_v2  }
 0x3a2   :  { %873 = vmatmul.mubr.bf16.gmra.mrb[36].mxu1 %v9325_v57  ;;  %v9578_v57 = vpop.permute.xlu1 %2654 }
 0x3a3   :  { %882 = vmatprep.mubr.bf16.mxu1 %v13014_v0  ;;  %13474 = vst [vmem:[#allocation52_spill] sm:$0xff] %v9578_v57 }
 0x3a4   :  { %8649 = vset.pattern.permute.xlu1 %v13032_v21 }
 0x3a5   :  { %5196 = vperm.xlu1 %8649, %v9411_v18  }
 0x3a6   :  { %v9582_v17 = vpop.permute.xlu1 %2821 }
 0x3a7   :  { %13475 = vst [vmem:[#allocation53_spill] sm:$0xff] %v9582_v17  ;;  %v13518_v17 = vmov 4  }
 0x3a9   :  { %5201 = vperm.xlu1 %8649, %v9353_v1  }
 0x3aa   :  { %883 = vmatmul.mubr.bf16.gmra.mrb[40].mxu1 %v9327_v58  ;;  %v9586_v6 = vpop.permute.xlu1 %2831  ;;  %v13036_v58 = vmov 15  }
 0x3ab   :  { %892 = vmatprep.mubr.bf16.mxu1 %v13014_v0  ;;  %13476 = vst [vmem:[#allocation54_spill] sm:$0xff] %v9586_v6  ;;  %v8837_v0 = vld [vmem:[#allocation9 + $0xb0] ss:$12 sps:$4 sm:$0xff]  }
 0x3ad   :  { %8650 = vset.pattern.permute.xlu1 %v13036_v58 }
 0x3ae   :  { %5428 = vperm.xlu1 %8650, %v9440_v26   ;;  %v9591_v33 = vpop.permute.xlu1 %2836  ;;  %v8832_v26 = vld [vmem:[#allocation9 + $0x98] ss:$12 sps:$4 sm:$0xff]  }
 0x3af   :  { %13477 = vst [vmem:[#allocation55_spill] sm:$0xff] %v9591_v33  ;;  %8314 = vmatpush3.bf16.msra.mxu1 %v8832_v26  ;;  %v9639_v26 = vld [vmem:[%s13008_s8 + $0x20] sm:$0xff]  ;;  %v13515_v33 = vmov 13  }
 0x3b0   :  { %8315 = vmatprep.subr.bf16.mxu1 %v8836_v46 }
 0x3b2   :  { %893 = vmatmul.mubr.bf16.gmra.mrb[44].mxu1 %v9331_v59  ;;  %5438 = vperm.xlu1 %8650, %v9353_v1   ;;  %v9594_v59 = vpop.permute.xlu1 %2846 }
 0x3b3   :  { %13478 = vst [vmem:[#allocation56_spill] sm:$0xff] %v9594_v59  ;;  %8316 = vmatpush3.bf16.msra.mxu1 %v8837_v0  ;;  %v9619_v0 = vld [vmem:[%s13008_s8 + $0x28] sm:$0xff]  ;;  %v13070_v59 = vlaneseq }
 0x3b6   :  { %5443 = vperm.xlu1 %8650, %v9359_v2   ;;  %v9598_v18 = vpop.permute.xlu1 %2856  ;;  %v8835_v2 = vld [vmem:[#allocation9 + $0x16c] ss:$12 sps:$4 sm:$0xff]  }
 0x3b7   :  { %13479 = vst [vmem:[#allocation57_spill] sm:$0xff] %v9598_v18  ;;  %1301 = vmatprep.subr.bf16.mxu0 %v8835_v2  ;;  %v9644_v2 = vld [vmem:[%s13008_s8 + $0x38] sm:$0xff] }
 0x3b8   :  { %1302 = vmatpush1.bf16.msra.mxu0 %v8833_v47  ;;  %v9653_v47 = vld [vmem:[%s13008_s8 + $0x48] sm:$0xff] }
 0x3ba   :  { %8651 = vset.pattern.permute.xlu1 %v13034_v8  ;;  %v9601_v1 = vpop.permute.xlu1 %2866 }
 0x3bb   :  { %3315 = vperm.xlu1 %8651, %v9418_v19   ;;  %13480 = vst [vmem:[#allocation58_spill] sm:$0xff] %v9601_v1  ;;  %v13512_v1 = vmov 12  }
 0x3be   :  { %v9606_v39 = vpop.permute.xlu1 %2876 }
 0x3bf   :  { %3320 = vperm.xlu1 %8651, %v9365_v3   ;;  %13481 = vst [vmem:[#allocation59_spill] sm:$0xff] %v9606_v39 }
 0x3c2   :  { %v9610_v15 = vpop.permute.xlu1 %2886 }
 0x3c3   :  { %8652 = vset.pattern.permute.xlu1 %v13030_v37  ;;  %13482 = vst [vmem:[#allocation60_spill] sm:$0xff] %v9610_v15  ;;  %v13509_v15 = vmov 11  }
 0x3c4   :  { %3557 = vperm.xlu1 %8652, %v9365_v3   ;;  %v9625_v3 = vld [vmem:[%s13008_s8 + $0x18] sm:$0xff] }
 0x3c5   :  { %2125 = vperm.xlu0 %8631, %v9625_v3  }
 0x3c6   :  { %v9614_v40 = vpop.permute.xlu1 %2896 }
 0x3c7   :  { %13483 = vst [vmem:[#allocation61_spill] sm:$0xff] %v9614_v40  ;;  %v13504_v40 = vmov 9  }
 0x3c8   :  { %8653 = vset.pattern.permute.xlu1 %v13025_v4  ;;  %v9682_v4 = vld [vmem:[%s13008_s8 + $0x78] sm:$0xff] }
 0x3c9   :  { %3789 = vperm.xlu1 %8653, %v9418_v19   ;;  %2135 = vperm.xlu0 %8631, %v9619_v0  }
 0x3ca   :  { %v9627_v43 = vpop.permute.xlu1 %3063 }
 0x3cb   :  { %13484 = vst [vmem:[#allocation62_spill] sm:$0xff] %v9627_v43 }
 0x3cd   :  { %8654 = vset.pattern.permute.xlu1 %v13023_v23  ;;  %2145 = vperm.xlu0 %8631, %v9644_v2  }
 0x3ce   :  { %4026 = vperm.xlu1 %8654, %v9418_v19   ;;  %v9632_v19 = vpop.permute.xlu1 %3068 }
 0x3cf   :  { %13485 = vst [vmem:[#allocation63_spill] sm:$0xff] %v9632_v19  ;;  %v13501_v19 = vmov 8  }
 0x3d1   :  { %2155 = vperm.xlu0 %8631, %v9653_v47  }
 0x3d2   :  { %4031 = vperm.xlu1 %8654, %v9619_v0   ;;  %v9648_v46 = vpop.permute.xlu1 %3078 }
 0x3d3   :  { %13486 = vst [vmem:[#allocation64_spill] sm:$0xff] %v9648_v46  ;;  %v13500_v46 = vmov 3  }
 0x3d6   :  { %8655 = vset.pattern.permute.xlu1 %v13019_v50  ;;  %v9658_v30 = vpop.permute.xlu1 %3300 }
 0x3d7   :  { %4268 = vperm.xlu1 %8655, %v9619_v0   ;;  %13487 = vst [vmem:[#allocation65_spill] sm:$0xff] %v9658_v30 }
 0x3da   :  { %v9667_v50 = vpop.permute.xlu1 %3305 }
 0x3db   :  { %8656 = vset.pattern.permute.xlu1 %v13017_v62  ;;  %v9663_v62 = vld [vmem:[%s13008_s8 + $0x58] sm:$0xff]  ;;  %13488 = vst [vmem:[#allocation66_spill] sm:$0xff] %v9667_v50 }
 0x3dc   :  { %4500 = vperm.xlu1 %8656, %v9639_v26   ;;  %2165 = vperm.xlu0 %8631, %v9663_v62  }
 0x3de   :  { %v9676_v23 = vpop.permute.xlu1 %3532 }
 0x3df   :  { %13489 = vst [vmem:[#allocation67_spill] sm:$0xff] %v9676_v23  ;;  %v13497_v23 = vmov 7  }
 0x3e0   :  { %8657 = vset.pattern.permute.xlu1 %v13021_v7  ;;  %v9672_v7 = vld [vmem:[%s13008_s8 + $0x68] sm:$0xff] }
 0x3e1   :  { %4737 = vperm.xlu1 %8657, %v9639_v26   ;;  %2175 = vperm.xlu0 %8631, %v9672_v7  }
 0x3e2   :  { %v9685_v27 = vpop.permute.xlu1 %3542 }
 0x3e3   :  { %13490 = vst [vmem:[#allocation68_spill] sm:$0xff] %v9685_v27  ;;  %v13495_v27 = vmov 6  }
 0x3e5   :  { %4742 = vperm.xlu1 %8657, %v9619_v0   ;;  %2185 = vperm.xlu0 %8631, %v9682_v4  }
 0x3e6   :  { %v9697_v37 = vpop.permute.xlu1 %3547 }
 0x3e7   :  { %13491 = vst [vmem:[#allocation69_spill] sm:$0xff] %v9697_v37 }
 0x3e9   :  { %8658 = vset.pattern.permute.xlu1 %v13028_v11  ;;  %8634 = vset.pattern.permute.xlu0 %v9088_v25  ;;  %v9693_v11 = vld [vmem:[%s13008_s8 + $0x8] sm:$0xff]  ;;  %v9707_v25 = vld [vmem:[%s13008_s8 + $0x30] sm:$0xff] }
 0x3ea   :  { %4979 = vperm.xlu1 %8658, %v9619_v0   ;;  %2352 = vperm.xlu0 %8634, %v9693_v11  }
 0x3ee   :  { %8659 = vset.pattern.permute.xlu1 %v13032_v21  ;;  %2367 = vperm.xlu0 %8634, %v9639_v26   ;;  %v9701_v21 = vpop.permute.xlu1 %3774 }
 0x3ef   :  { %5211 = vperm.xlu1 %8659, %v9639_v26   ;;  %13492 = vst [vmem:[#allocation70_spill] sm:$0xff] %v9701_v21  ;;  %v9723_v21 = vld [vmem:[%s13008_s8 + $0x50] sm:$0xff] }
 0x3f2   :  { %2377 = vperm.xlu0 %8634, %v9707_v25   ;;  %v9710_v8 = vpop.permute.xlu1 %3779 }
 0x3f3   :  { %8660 = vset.pattern.permute.xlu1 %v13036_v58  ;;  %13493 = vst [vmem:[#allocation71_spill] sm:$0xff] %v9710_v8  ;;  %v9715_v58 = vld [vmem:[%s13008_s8 + $0x40] sm:$0xff] }
 0x3f4   :  { %5448 = vperm.xlu1 %8660, %v9639_v26  }
 0x3f6   :  { %2387 = vperm.xlu0 %8634, %v9715_v58   ;;  %v9725_v37 = vpop.permute.xlu1 %4006 }
 0x3f7   :  { %13494 = vst [vmem:[#allocation72_spill] sm:$0xff] %v9725_v37  ;;  %v9742_v37 = vld [vmem:[%s13008_s8 + $0x70] sm:$0xff] }
 0x3f8   :  { %5453 = vperm.xlu1 %8660, %v9619_v0  }
 0x3fa   :  { %2397 = vperm.xlu0 %8634, %v9723_v21   ;;  %v9735_v8 = vpop.permute.xlu1 %4016 }
 0x3fb   :  { %13496 = vst [vmem:[#allocation73_spill] sm:$0xff] %v9735_v8  ;;  %v9752_v8 = vld [vmem:[%s13008_s8] sm:$0xff] }
 0x3fc   :  { %8661 = vset.pattern.permute.xlu1 %v13041_v35  ;;  %v9733_v35 = vld [vmem:[%s13008_s8 + $0x60] sm:$0xff] }
 0x3fd   :  { %3093 = vperm.xlu1 %8661, %v9644_v2  }
 0x3fe   :  { %2407 = vperm.xlu0 %8634, %v9733_v35   ;;  %v9745_v50 = vpop.permute.xlu1 %4021 }
 0x3ff   :  { %13498 = vst [vmem:[#allocation74_spill] sm:$0xff] %v9745_v50 }
 0x401   :  { %8662 = vset.pattern.permute.xlu1 %v13495_v27 }
 0x402   :  { %3325 = vperm.xlu1 %8662, %v9707_v25   ;;  %2417 = vperm.xlu0 %8634, %v9742_v37   ;;  %v9754_v30 = vpop.permute.xlu1 %4248 }
 0x403   :  { %13499 = vst [vmem:[#allocation75_spill] sm:$0xff] %v9754_v30 }
 0x406   :  { %8663 = vset.pattern.permute.xlu1 %v13497_v23  ;;  %8635 = vset.pattern.permute.xlu0 %v13500_v46  ;;  %v9759_v43 = vpop.permute.xlu1 %4253  ;;  %v13506_v46 = vmov 10  }
 0x407   :  { %3562 = vperm.xlu1 %8663, %v9707_v25   ;;  %2584 = vperm.xlu0 %8635, %v9752_v8   ;;  %13502 = vst [vmem:[#allocation76_spill] sm:$0xff] %v9759_v43  ;;  %v9773_v43 = vpop.permute.xlu0 %1870 }
 0x408   :  { %13507 = vst [vmem:[#allocation79_spill] sm:$0xff] %v9773_v43 }
 0x40a   :  { %v9763_v50 = vpop.permute.xlu1 %4480 }
 0x40b   :  { %3567 = vperm.xlu1 %8663, %v9644_v2   ;;  %2599 = vperm.xlu0 %8635, %v9625_v3   ;;  %13503 = vst [vmem:[#allocation77_spill] sm:$0xff] %v9763_v50 }
 0x40e   :  { %v9768_v30 = vpop.permute.xlu1 %4490 }
 0x40f   :  { %8664 = vset.pattern.permute.xlu1 %v13501_v19  ;;  %2609 = vperm.xlu0 %8635, %v9619_v0   ;;  %13505 = vst [vmem:[#allocation78_spill] sm:$0xff] %v9768_v30  ;;  %v9784_v30 = vpop.permute.xlu0 %1875 }
 0x410   :  { %3804 = vperm.xlu1 %8664, %v9644_v2   ;;  %13511 = vst [vmem:[#allocation82_spill] sm:$0xff] %v9784_v30 }
 0x412   :  { %v9777_v50 = vpop.permute.xlu1 %4495 }
 0x413   :  { %2619 = vperm.xlu0 %8635, %v9644_v2   ;;  %13508 = vst [vmem:[#allocation80_spill] sm:$0xff] %v9777_v50  ;;  %v9791_v50 = vpop.permute.xlu0 %1890 }
 0x414   :  { %8665 = vset.pattern.permute.xlu1 %v13504_v40  ;;  %13514 = vst [vmem:[#allocation84_spill] sm:$0xff] %v9791_v50 }
 0x415   :  { %4036 = vperm.xlu1 %8665, %v9707_v25  }
 0x416   :  { %v9781_v39 = vpop.permute.xlu1 %4722 }
 0x417   :  { %2629 = vperm.xlu0 %8635, %v9653_v47   ;;  %13510 = vst [vmem:[#allocation81_spill] sm:$0xff] %v9781_v39  ;;  %v9796_v39 = vshrl.u32 %v13070_v59, 7  ;;  %v9803_v57 = vpop.permute.xlu0 %1900  ;;  %v778_v59 = vld [vmem:[%s13005_s5] sm:$0x3] }
 0x418   :  { %13519 = vst [vmem:[#allocation87_spill] sm:$0xff] %v9803_v57 }
 0x419   :  { %8666 = vset.pattern.permute.xlu1 %v13506_v46  ;;  %13516 = vst [vmem:[#allocation85_spill] sm:$0xff] %v9796_v39  ;;  %v9813_v56 = vsub.s32 1, %v9796_v39 }
 0x41a   :  { %4273 = vperm.xlu1 %8666, %v9707_v25   ;;  %v9789_v18 = vpop.permute.xlu1 %4727 }
 0x41b   :  { %2639 = vperm.xlu0 %8635, %v9663_v62   ;;  %13513 = vst [vmem:[#allocation83_spill] sm:$0xff] %v9789_v18  ;;  %v9806_v18 = vsub.s32 0, %v9796_v39  ;;  %13521 = vst [vmem:[#allocation89_spill] sm:$0xff] %v9813_v56  ;;  %v9822_v55 = vpop.permute.xlu0 %1910  ;;  %v9825_v54 = vrot.slane %v778_v59, %v9813_v56 }
 0x41c   :  { %13524 = vst [vmem:[#allocation91_spill] sm:$0xff] %v9822_v55 }
 0x41d   :  { %13520 = vst [vmem:[#allocation88_spill] sm:$0xff] %v9806_v18 }
 0x41e   :  { %4278 = vperm.xlu1 %8666, %v9644_v2   ;;  %v9799_v6 = vpop.permute.xlu1 %4954 }
 0x41f   :  { %2649 = vperm.xlu0 %8635, %v9672_v7   ;;  %13517 = vst [vmem:[#allocation86_spill] sm:$0xff] %v9799_v6 }
 0x422   :  { %8667 = vset.pattern.permute.xlu1 %v13509_v15  ;;  %v9816_v6 = vpop.permute.xlu1 %4964 }
 0x423   :  { %4515 = vperm.xlu1 %8667, %v9644_v2   ;;  %2659 = vperm.xlu0 %8635, %v9682_v4   ;;  %13522 = vst [vmem:[#allocation90_spill] sm:$0xff] %v9816_v6 }
 0x426   :  { %v9831_v44 = vpop.permute.xlu1 %4969 }
 0x427   :  { %8668 = vset.pattern.permute.xlu1 %v13512_v1  ;;  %8638 = vset.pattern.permute.xlu0 %v13518_v17  ;;  %v9819_v17 = vrot.slane %v778_v59, %v9806_v18  ;;  %13525 = vst [vmem:[#allocation92_spill] sm:$0xff] %v9831_v44  ;;  %v9837_v59 = vpop.permute.xlu0 %1920 }
 0x428   :  { %4747 = vperm.xlu1 %8668, %v9707_v25   ;;  %2826 = vperm.xlu0 %8638, %v9693_v11   ;;  %13527 = vst [vmem:[#allocation93_spill] sm:$0xff] %v9837_v59 }
 0x42a   :  { %v9840_v42 = vpop.permute.xlu1 %5196 }
 0x42b   :  { %13528 = vst [vmem:[#allocation94_spill] sm:$0xff] %v9840_v42  ;;  %v9846_v45 = vpop.permute.xlu0 %1930 }
 0x42c   :  { %8669 = vset.pattern.permute.xlu1 %v13515_v33  ;;  %2841 = vperm.xlu0 %8638, %v9639_v26   ;;  %13530 = vst [vmem:[#allocation95_spill] sm:$0xff] %v9846_v45 }
 0x42d   :  { %4984 = vperm.xlu1 %8669, %v9707_v25  }
 0x42f   :  { %v9855_v38 = vpop.permute.xlu0 %1940 }
 0x430   :  { %2851 = vperm.xlu0 %8638, %v9707_v25   ;;  %13532 = vst [vmem:[#allocation97_spill] sm:$0xff] %v9855_v38 }
 0x431   :  { %4989 = vperm.xlu1 %8669, %v9644_v2  }
 0x434   :  { %2861 = vperm.xlu0 %8638, %v9715_v58  }
 0x435   :  { %8670 = vset.pattern.permute.xlu1 %v13523_v5 }
 0x436   :  { %5226 = vperm.xlu1 %8670, %v9644_v2  }
 0x438   :  { %2871 = vperm.xlu0 %8638, %v9723_v21  }
 0x43a   :  { %8671 = vset.pattern.permute.xlu1 %v13526_v16 }
 0x43b   :  { %5458 = vperm.xlu1 %8671, %v9707_v25  }
 0x43c   :  { %2881 = vperm.xlu0 %8638, %v9733_v35  }
 0x43f   :  { %8672 = vset.pattern.permute.xlu1 %v13529_v14 }
 0x440   :  { %3098 = vperm.xlu1 %8672, %v9715_v58   ;;  %2891 = vperm.xlu0 %8638, %v9742_v37  }
 0x444   :  { %3103 = vperm.xlu1 %8672, %v9653_v47   ;;  %8639 = vset.pattern.permute.xlu0 %v13529_v14 }
 0x445   :  { %3058 = vperm.xlu0 %8639, %v9752_v8  }
 0x448   :  { %8673 = vset.pattern.permute.xlu1 %v13495_v27 }
 0x449   :  { %3340 = vperm.xlu1 %8673, %v9653_v47   ;;  %3073 = vperm.xlu0 %8639, %v9625_v3  }
 0x44d   :  { %v824_v63 = vpop.f32.mrb[16].mxu1  ;;  %8674 = vset.pattern.permute.xlu1 %v13497_v23  ;;  %3083 = vperm.xlu0 %8639, %v9619_v0  }
 0x44e   :  { %v825_v52 = vadd.f32 %v824_v63, %v9819_v17  ;;  %v826_v26 = vpop.f32.mrb[17].mxu1  ;;  %3572 = vperm.xlu1 %8674, %v9715_v58  }
 0x44f   :  { %v827_v6 = vadd.f32 %v826_v26, %v9825_v54  ;;  %v828_v53 = vpop.f32.mrb[18].mxu1 }
 0x450   :  { %v829_v34 = vadd.f32 %v828_v53, %v9819_v17  ;;  %v830_v22 = vpop.f32.mrb[19].mxu1  ;;  %v903_v63 = vmax.f32 %v825_v52, 0.0  ;;  %v9851_v52 = vpop.permute.xlu1 %5201 }
 0x451   :  { %v831_v12 = vadd.f32 %v830_v22, %v9825_v54  ;;  %v904_v49 = vmax.f32 %v827_v6, 0.0  ;;  %13531 = vst [vmem:[#allocation96_spill] sm:$0xff] %v9851_v52  ;;  %3088 = vperm.xlu0 %8639, %v9707_v25  }
 0x452   :  { %v905_v61 = vmax.f32 %v829_v34, 0.0  ;;  %8675 = vset.pattern.permute.xlu1 %v13501_v19 }
 0x453   :  { %v906_v26 = vmax.f32 %v831_v12, 0.0  ;;  %3809 = vperm.xlu1 %8675, %v9715_v58  }
 0x454   :  { %v935_v44 = vpack.c.bf16 %v905_v61, %v903_v63 }
 0x455   :  { %v936_v53 = vpack.c.bf16 %v906_v26, %v904_v49  ;;  %v834_v20 = vpop.f32.mrb[20].mxu1  ;;  %3113 = vperm.xlu0 %8639, %v9663_v62  }
 0x456   :  { %v835_v10 = vadd.f32 %v834_v20, %v9819_v17  ;;  %v836_v51 = vpop.f32.mrb[21].mxu1 }
 0x457   :  { %v837_v22 = vadd.f32 %v836_v51, %v9825_v54  ;;  %v838_v34 = vpop.f32.mrb[22].mxu1  ;;  %1303 = vmatprep.mubr.bf16.mxu0 %v936_v53  ;;  %1416 = vmatprep.mubr.bf16.mxu1 %v936_v53 }
 0x458   :  { %v839_v61 = vadd.f32 %v838_v34, %v9819_v17  ;;  %v840_v12 = vpop.f32.mrb[23].mxu1  ;;  %1304 = vmatmul.mubr.bf16.vlgmr.msra.gmra.mrb[48].mxu0 %v935_v44  ;;  %1417 = vmatmul.mubr.bf16.vlgmr.msra.gmra.mrb[48].mxu1 %v935_v44  ;;  %v907_v20 = vmax.f32 %v835_v10, 0.0 }
 0x459   :  { %v841_v49 = vadd.f32 %v840_v12, %v9825_v54  ;;  %v908_v63 = vmax.f32 %v837_v22, 0.0  ;;  %v9862_v22 = vpop.permute.xlu1 %5428  ;;  %3814 = vperm.xlu1 %8675, %v9653_v47   ;;  %3118 = vperm.xlu0 %8639, %v9733_v35  }
 0x45a   :  { %v909_v6 = vmax.f32 %v839_v61, 0.0  ;;  %13533 = vst [vmem:[#allocation98_spill] sm:$0xff] %v9862_v22 }
 0x45b   :  { %v910_v51 = vmax.f32 %v841_v49, 0.0 }
 0x45c   :  { %v937_v26 = vpack.c.bf16 %v909_v6, %v907_v20 }
 0x45d   :  { %v938_v53 = vpack.c.bf16 %v910_v51, %v908_v63  ;;  %v844_v34 = vpop.f32.mrb[24].mxu1  ;;  %v9869_v51 = vpop.permute.xlu0 %2110  ;;  %8676 = vset.pattern.permute.xlu1 %v13504_v40  ;;  %8694 = vset.pattern.permute.xlu0 %v13501_v19 }
 0x45e   :  { %v845_v44 = vadd.f32 %v844_v34, %v9819_v17  ;;  %v846_v12 = vpop.f32.mrb[25].mxu1  ;;  %13534 = vst [vmem:[#allocation99_spill] sm:$0xff] %v9869_v51  ;;  %4051 = vperm.xlu1 %8676, %v9653_v47   ;;  %3769 = vperm.xlu0 %8694, %v9752_v8  }
 0x45f   :  { %v847_v24 = vadd.f32 %v846_v12, %v9825_v54  ;;  %v848_v10 = vpop.f32.mrb[26].mxu1  ;;  %1313 = vmatprep.mubr.bf16.mxu0 %v938_v53  ;;  %1424 = vmatprep.mubr.bf16.mxu1 %v938_v53 }
 0x460   :  { %v849_v61 = vadd.f32 %v848_v10, %v9819_v17  ;;  %v850_v49 = vpop.f32.mrb[27].mxu1  ;;  %1314 = vmatmul.mubr.bf16.gmra.mrb[52].mxu0 %v937_v26  ;;  %1425 = vmatmul.mubr.bf16.gmra.mrb[52].mxu1 %v937_v26  ;;  %v911_v6 = vmax.f32 %v845_v44, 0.0  ;;  %v9872_v26 = vpop.permute.xlu1 %5438 }
 0x461   :  { %v851_v20 = vadd.f32 %v850_v49, %v9825_v54  ;;  %v912_v53 = vmax.f32 %v847_v24, 0.0  ;;  %13535 = vst [vmem:[#allocation100_spill] sm:$0xff] %v9872_v26 }
 0x462   :  { %v913_v63 = vmax.f32 %v849_v61, 0.0  ;;  %8677 = vset.pattern.permute.xlu1 %v13506_v46  ;;  %3784 = vperm.xlu0 %8694, %v9625_v3  }
 0x463   :  { %v914_v34 = vmax.f32 %v851_v20, 0.0  ;;  %4283 = vperm.xlu1 %8677, %v9715_v58  }
 0x464   :  { %v939_v12 = vpack.c.bf16 %v913_v63, %v911_v6  ;;  %v9878_v6 = vpop.permute.xlu0 %2125 }
 0x465   :  { %v940_v10 = vpack.c.bf16 %v914_v34, %v912_v53  ;;  %v854_v13 = vpop.f32.mrb[28].mxu1  ;;  %13536 = vst [vmem:[#allocation101_spill] sm:$0xff] %v9878_v6 }
 0x466   :  { %v855_v49 = vadd.f32 %v854_v13, %v9819_v17  ;;  %v856_v9 = vpop.f32.mrb[29].mxu1  ;;  %3794 = vperm.xlu0 %8694, %v9619_v0  }
 0x467   :  { %v857_v44 = vadd.f32 %v856_v9, %v9825_v54  ;;  %v858_v61 = vpop.f32.mrb[30].mxu1  ;;  %1323 = vmatprep.mubr.bf16.mxu0 %v940_v10  ;;  %1432 = vmatprep.mubr.bf16.mxu1 %v940_v10  ;;  %v9884_v10 = vpop.permute.xlu1 %5443 }
 0x468   :  { %v859_v24 = vadd.f32 %v858_v61, %v9819_v17  ;;  %v860_v20 = vpop.f32.mrb[31].mxu1  ;;  %1324 = vmatmul.mubr.bf16.gmra.mrb[56].mxu0 %v939_v12  ;;  %1433 = vmatmul.mubr.bf16.gmra.mrb[56].mxu1 %v939_v12  ;;  %v915_v13 = vmax.f32 %v855_v49, 0.0  ;;  %v9886_v51 = vpop.permute.xlu0 %2135 }
 0x469   :  { %v861_v63 = vadd.f32 %v860_v20, %v9825_v54  ;;  %v916_v9 = vmax.f32 %v857_v44, 0.0  ;;  %13537 = vst [vmem:[#allocation102_spill] sm:$0xff] %v9886_v51  ;;  %8678 = vset.pattern.permute.xlu1 %v13509_v15 }
 0x46a   :  { %v917_v53 = vmax.f32 %v859_v24, 0.0  ;;  %4520 = vperm.xlu1 %8678, %v9715_v58   ;;  %3799 = vperm.xlu0 %8694, %v9707_v25  }
 0x46b   :  { %v918_v34 = vmax.f32 %v861_v63, 0.0  ;;  %v9892_v44 = vpop.permute.xlu1 %3315 }
 0x46c   :  { %v941_v61 = vpack.c.bf16 %v917_v53, %v915_v13  ;;  %13538 = vst [vmem:[#allocation103_spill] sm:$0xff] %v9892_v44  ;;  %v9895_v53 = vpop.permute.xlu0 %2145 }
 0x46d   :  { %v942_v12 = vpack.c.bf16 %v918_v34, %v916_v9  ;;  %v864_v60 = vpop.f32.mrb[32].mxu1  ;;  %13539 = vst [vmem:[#allocation104_spill] sm:$0xff] %v9895_v53 }
 0x46e   :  { %v865_v6 = vadd.f32 %v864_v60, %v9819_v17  ;;  %v866_v20 = vpop.f32.mrb[33].mxu1  ;;  %4525 = vperm.xlu1 %8678, %v9653_v47   ;;  %3824 = vperm.xlu0 %8694, %v9663_v62  }
 0x46f   :  { %v867_v49 = vadd.f32 %v866_v20, %v9825_v54  ;;  %v868_v24 = vpop.f32.mrb[34].mxu1  ;;  %1333 = vmatprep.mubr.bf16.mxu0 %v942_v12  ;;  %1440 = vmatprep.mubr.bf16.mxu1 %v942_v12 }
 0x470   :  { %v869_v63 = vadd.f32 %v868_v24, %v9819_v17  ;;  %v870_v13 = vpop.f32.mrb[35].mxu1  ;;  %1334 = vmatmul.mubr.bf16.gmra.mrb[60].mxu0 %v941_v61  ;;  %1441 = vmatmul.mubr.bf16.gmra.mrb[60].mxu1 %v941_v61  ;;  %v919_v9 = vmax.f32 %v865_v6, 0.0  ;;  %v9901_v44 = vpop.permute.xlu0 %2155 }
 0x471   :  { %v871_v60 = vadd.f32 %v870_v13, %v9825_v54  ;;  %v920_v20 = vmax.f32 %v867_v49, 0.0  ;;  %13540 = vst [vmem:[#allocation105_spill] sm:$0xff] %v9901_v44  ;;  %v9903_v61 = vpop.permute.xlu1 %3320 }
 0x472   :  { %v921_v34 = vmax.f32 %v869_v63, 0.0  ;;  %13541 = vst [vmem:[#allocation106_spill] sm:$0xff] %v9903_v61  ;;  %8679 = vset.pattern.permute.xlu1 %v13512_v1  ;;  %3829 = vperm.xlu0 %8694, %v9733_v35  }
 0x473   :  { %v922_v51 = vmax.f32 %v871_v60, 0.0  ;;  %4762 = vperm.xlu1 %8679, %v9653_v47  }
 0x474   :  { %v943_v12 = vpack.c.bf16 %v921_v34, %v919_v9  ;;  %v9909_v9 = vpop.permute.xlu0 %2165 }
 0x475   :  { %v944_v24 = vpack.c.bf16 %v922_v51, %v920_v20  ;;  %v874_v38 = vpop.f32.mrb[36].mxu1  ;;  %13542 = vst [vmem:[#allocation107_spill] sm:$0xff] %v9909_v9 }
 0x476   :  { %v875_v53 = vadd.f32 %v874_v38, %v9819_v17  ;;  %v876_v13 = vpop.f32.mrb[37].mxu1  ;;  %v9913_v38 = vpop.permute.xlu1 %3557  ;;  %8698 = vset.pattern.permute.xlu0 %v13509_v15 }
 0x477   :  { %v877_v6 = vadd.f32 %v876_v13, %v9825_v54  ;;  %v878_v63 = vpop.f32.mrb[38].mxu1  ;;  %1343 = vmatprep.mubr.bf16.mxu0 %v944_v24  ;;  %1448 = vmatprep.mubr.bf16.mxu1 %v944_v24  ;;  %13543 = vst [vmem:[#allocation108_spill] sm:$0xff] %v9913_v38 }
 0x478   :  { %v879_v49 = vadd.f32 %v878_v63, %v9819_v17  ;;  %v880_v60 = vpop.f32.mrb[39].mxu1  ;;  %1344 = vmatmul.mubr.bf16.gmra.mrb[64].mxu0 %v943_v12  ;;  %1449 = vmatmul.mubr.bf16.gmra.mrb[64].mxu1 %v943_v12  ;;  %v923_v34 = vmax.f32 %v875_v53, 0.0  ;;  %v9918_v12 = vpop.permute.xlu0 %2175 }
 0x479   :  { %v881_v51 = vadd.f32 %v880_v60, %v9825_v54  ;;  %v924_v24 = vmax.f32 %v877_v6, 0.0  ;;  %13544 = vst [vmem:[#allocation109_spill] sm:$0xff] %v9918_v12  ;;  %8680 = vset.pattern.permute.xlu1 %v13515_v33  ;;  %4485 = vperm.xlu0 %8698, %v9693_v11  }
 0x47a   :  { %v925_v20 = vmax.f32 %v879_v49, 0.0  ;;  %v9923_v38 = vpop.permute.xlu1 %3789  ;;  %4994 = vperm.xlu1 %8680, %v9715_v58  }
 0x47b   :  { %v926_v13 = vmax.f32 %v881_v51, 0.0  ;;  %13545 = vst [vmem:[#allocation110_spill] sm:$0xff] %v9923_v38 }
 0x47c   :  { %v945_v63 = vpack.c.bf16 %v925_v20, %v923_v34  ;;  %v9926_v34 = vpop.permute.xlu0 %2185 }
 0x47d   :  { %v946_v61 = vpack.c.bf16 %v926_v13, %v924_v24  ;;  %v884_v9 = vpop.f32.mrb[40].mxu1  ;;  %13546 = vst [vmem:[#allocation111_spill] sm:$0xff] %v9926_v34  ;;  %4505 = vperm.xlu0 %8698, %v9619_v0  }
 0x47e   :  { %v885_v60 = vadd.f32 %v884_v9, %v9819_v17  ;;  %v886_v44 = vpop.f32.mrb[41].mxu1  ;;  %8681 = vset.pattern.permute.xlu1 %v13523_v5 }
 0x47f   :  { %v887_v53 = vadd.f32 %v886_v44, %v9825_v54  ;;  %v888_v49 = vpop.f32.mrb[42].mxu1  ;;  %1353 = vmatprep.mubr.bf16.mxu0 %v946_v61  ;;  %1456 = vmatprep.mubr.bf16.mxu1 %v946_v61 }
 0x480   :  { %v889_v6 = vadd.f32 %v888_v49, %v9819_v17  ;;  %v890_v51 = vpop.f32.mrb[43].mxu1  ;;  %1354 = vmatmul.mubr.bf16.gmra.mrb[68].mxu0 %v945_v63  ;;  %1457 = vmatmul.mubr.bf16.gmra.mrb[68].mxu1 %v945_v63  ;;  %v927_v9 = vmax.f32 %v885_v60, 0.0  ;;  %v9932_v49 = vpop.permute.xlu1 %4026 }
 0x481   :  { %v891_v20 = vadd.f32 %v890_v51, %v9825_v54  ;;  %v928_v24 = vmax.f32 %v887_v53, 0.0  ;;  %13547 = vst [vmem:[#allocation112_spill] sm:$0xff] %v9932_v49  ;;  %v9936_v34 = vpop.permute.xlu0 %2352  ;;  %5231 = vperm.xlu1 %8681, %v9715_v58   ;;  %4510 = vperm.xlu0 %8698, %v9707_v25  }
 0x482   :  { %v929_v44 = vmax.f32 %v889_v6, 0.0  ;;  %13548 = vst [vmem:[#allocation113_spill] sm:$0xff] %v9936_v34 }
 0x483   :  { %v930_v13 = vmax.f32 %v891_v20, 0.0 }
 0x484   :  { %v947_v61 = vpack.c.bf16 %v929_v44, %v927_v9 }
 0x485   :  { %v948_v12 = vpack.c.bf16 %v930_v13, %v928_v24  ;;  %v894_v38 = vpop.f32.mrb[44].mxu1  ;;  %5236 = vperm.xlu1 %8681, %v9653_v47   ;;  %4535 = vperm.xlu0 %8698, %v9663_v62  }
 0x486   :  { %v895_v63 = vadd.f32 %v894_v38, %v9819_v17  ;;  %v896_v51 = vpop.f32.mrb[45].mxu1 }
 0x487   :  { %v897_v48 = vadd.f32 %v896_v51, %v9825_v54  ;;  %v898_v60 = vpop.f32.mrb[46].mxu1  ;;  %1363 = vmatprep.mubr.bf16.mxu0 %v948_v12  ;;  %1464 = vmatprep.mubr.bf16.mxu1 %v948_v12  ;;  %v9944_v51 = vpop.permute.xlu1 %4031 }
 0x488   :  { %v899_v53 = vadd.f32 %v898_v60, %v9819_v17  ;;  %v900_v6 = vpop.f32.mrb[47].mxu1  ;;  %1364 = vmatmul.mubr.bf16.gmra.mrb[72].mxu0 %v947_v61  ;;  %1465 = vmatmul.mubr.bf16.gmra.mrb[72].mxu1 %v947_v61  ;;  %v931_v38 = vmax.f32 %v895_v63, 0.0  ;;  %13549 = vst [vmem:[#allocation114_spill] sm:$0xff] %v9944_v51  ;;  %v9946_v12 = vpop.permute.xlu0 %2367  ;;  %v13553_v61 = vmov 0   ;;  %v9957_v63 = vld [vmem:[#allocation3] sm:$0xff]  }
 0x489   :  { %v901_v20 = vadd.f32 %v900_v6, %v9825_v54  ;;  %v932_v44 = vmax.f32 %v897_v48, 0.0  ;;  %13550 = vst [vmem:[#allocation115_spill] sm:$0xff] %v9946_v12  ;;  %8682 = vset.pattern.permute.xlu1 %v13526_v16  ;;  %4540 = vperm.xlu0 %8698, %v9733_v35  }
 0x48a   :  { %v933_v9 = vmax.f32 %v899_v53, 0.0  ;;  %5473 = vperm.xlu1 %8682, %v9653_v47  }
 0x48b   :  { %v934_v24 = vmax.f32 %v901_v20, 0.0  ;;  %v9950_v54 = vpop.permute.xlu1 %4268 }
 0x48c   :  { %v949_v13 = vpack.c.bf16 %v933_v9, %v931_v38  ;;  %13551 = vst [vmem:[#allocation116_spill] sm:$0xff] %v9950_v54  ;;  %v9954_v48 = vpop.permute.xlu0 %2377 }
 0x48d   :  { %v950_v17 = vpack.c.bf16 %v934_v24, %v932_v44  ;;  %13552 = vst [vmem:[#allocation117_spill] sm:$0xff] %v9954_v48  ;;  %8702 = vset.pattern.permute.xlu0 %v13523_v5 }
 0x48e   :  { %8683 = vset.pattern.permute.xlu1 %v13529_v14  ;;  %5191 = vperm.xlu0 %8702, %v9752_v8  }
 0x48f   :  { %1373 = vmatprep.mubr.bf16.mxu0 %v950_v17  ;;  %1472 = vmatprep.mubr.bf16.mxu1 %v950_v17  ;;  %v9963_v60 = vpop.permute.xlu1 %4500 }
 0x490   :  { %1374 = vmatmul.mubr.bf16.gmra.mrb[76].mxu0 %v949_v13  ;;  %1473 = vmatmul.mubr.bf16.gmra.mrb[76].mxu1 %v949_v13  ;;  %13554 = vst [vmem:[#allocation118_spill] sm:$0xff] %v9963_v60  ;;  %v9966_v53 = vpop.permute.xlu0 %2387 }
 0x491   :  { %1554 = vmatprep.mubr.bf16.mxu0 %v13553_v61  ;;  %8549 = vmatprep.mubr.bf16.mxu1 %v9957_v63  ;;  %13555 = vst [vmem:[#allocation119_spill] sm:$0xff] %v9966_v53 }
 0x492   :  { %3108 = vperm.xlu1 %8683, %v9723_v21   ;;  %5206 = vperm.xlu0 %8702, %v9625_v3  }
 0x493   :  { %v9970_v6 = vpop.permute.xlu1 %4737 }
 0x494   :  { %13556 = vst [vmem:[#allocation120_spill] sm:$0xff] %v9970_v6  ;;  %v9974_v20 = vpop.permute.xlu0 %2397 }
 0x495   :  { %13557 = vst [vmem:[#allocation121_spill] sm:$0xff] %v9974_v20 }
 0x496   :  { %8684 = vset.pattern.permute.xlu1 %v13495_v27  ;;  %5216 = vperm.xlu0 %8702, %v9619_v0  }
 0x497   :  { %v9977_v38 = vpop.permute.xlu1 %4742  ;;  %3345 = vperm.xlu1 %8684, %v9723_v21  }
 0x498   :  { %13558 = vst [vmem:[#allocation122_spill] sm:$0xff] %v9977_v38  ;;  %v9982_v9 = vpop.permute.xlu0 %2407 }
 0x499   :  { %13559 = vst [vmem:[#allocation123_spill] sm:$0xff] %v9982_v9 }
 0x49a   :  { %5221 = vperm.xlu0 %8702, %v9707_v25  }
 0x49b   :  { %v9984_v44 = vpop.permute.xlu1 %4979  ;;  %3350 = vperm.xlu1 %8684, %v9663_v62  }
 0x49c   :  { %13560 = vst [vmem:[#allocation124_spill] sm:$0xff] %v9984_v44  ;;  %v9990_v47 = vpop.permute.xlu0 %2417 }
 0x49d   :  { %13561 = vst [vmem:[#allocation125_spill] sm:$0xff] %v9990_v47 }
 0x49e   :  { %5246 = vperm.xlu0 %8702, %v9663_v62  }
 0x49f   :  { %v9993_v24 = vpop.permute.xlu1 %5211  ;;  %8685 = vset.pattern.permute.xlu1 %v13497_v23 }
 0x4a0   :  { %13562 = vst [vmem:[#allocation126_spill] sm:$0xff] %v9993_v24  ;;  %v9996_v13 = vpop.permute.xlu0 %2584  ;;  %3587 = vperm.xlu1 %8685, %v9663_v62  }
 0x4a1   :  { %13563 = vst [vmem:[#allocation127_spill] sm:$0xff] %v9996_v13 }
 0x4a2   :  { %5251 = vperm.xlu0 %8702, %v9733_v35  }
 0x4a3   :  { %v10000_v17 = vpop.permute.xlu1 %5448 }
 0x4a4   :  { %13564 = vst [vmem:[#allocation128_spill] sm:$0xff] %v10000_v17  ;;  %v10003_v44 = vpop.permute.xlu0 %2599  ;;  %8686 = vset.pattern.permute.xlu1 %v13501_v19 }
 0x4a5   :  { %13565 = vst [vmem:[#allocation129_spill] sm:$0xff] %v10003_v44  ;;  %3819 = vperm.xlu1 %8686, %v9723_v21  }
 0x4a6   :  { %8706 = vset.pattern.permute.xlu0 %v13495_v27 }
 0x4a7   :  { %v10011_v6 = vpop.permute.xlu1 %5453  ;;  %3295 = vperm.xlu0 %8706, %v9752_v8  }
 0x4a8   :  { %v10007_v38 = vpop.permute.xlu0 %2609  ;;  %13567 = vst [vmem:[#allocation131_spill] sm:$0xff] %v10011_v6 }
 0x4a9   :  { %13566 = vst [vmem:[#allocation130_spill] sm:$0xff] %v10007_v38  ;;  %8687 = vset.pattern.permute.xlu1 %v13504_v40 }
 0x4aa   :  { %4056 = vperm.xlu1 %8687, %v9723_v21  }
 0x4ab   :  { %v10017_v54 = vpop.permute.xlu1 %3093  ;;  %3310 = vperm.xlu0 %8706, %v9625_v3  }
 0x4ac   :  { %v10013_v60 = vpop.permute.xlu0 %2619  ;;  %13569 = vst [vmem:[#allocation133_spill] sm:$0xff] %v10017_v54 }
 0x4ad   :  { %13568 = vst [vmem:[#allocation132_spill] sm:$0xff] %v10013_v60 }
 0x4ae   :  { %4061 = vperm.xlu1 %8687, %v9663_v62  }
 0x4af   :  { %v10024_v51 = vpop.permute.xlu1 %3325  ;;  %3330 = vperm.xlu0 %8706, %v9644_v2  }
 0x4b0   :  { %v10020_v0 = vpop.permute.xlu0 %2629  ;;  %13571 = vst [vmem:[#allocation135_spill] sm:$0xff] %v10024_v51 }
 0x4b1   :  { %13570 = vst [vmem:[#allocation134_spill] sm:$0xff] %v10020_v0 }
 0x4b2   :  { %8688 = vset.pattern.permute.xlu1 %v13506_v46 }
 0x4b3   :  { %4298 = vperm.xlu1 %8688, %v9663_v62   ;;  %v10034_v54 = vpop.permute.xlu1 %3562  ;;  %3335 = vperm.xlu0 %8706, %v9715_v58  }
 0x4b4   :  { %v10026_v25 = vpop.permute.xlu0 %2639  ;;  %13574 = vst [vmem:[#allocation138_spill] sm:$0xff] %v10034_v54 }
 0x4b5   :  { %13572 = vst [vmem:[#allocation136_spill] sm:$0xff] %v10026_v25 }
 0x4b7   :  { %8689 = vset.pattern.permute.xlu1 %v13509_v15  ;;  %v10042_v25 = vpop.permute.xlu1 %3567  ;;  %3360 = vperm.xlu0 %8706, %v9672_v7  }
 0x4b8   :  { %v10032_v49 = vpop.permute.xlu0 %2649  ;;  %4530 = vperm.xlu1 %8689, %v9723_v21   ;;  %13576 = vst [vmem:[#allocation140_spill] sm:$0xff] %v10042_v25 }
 0x4b9   :  { %13573 = vst [vmem:[#allocation137_spill] sm:$0xff] %v10032_v49 }
 0x4bb   :  { %v10049_v54 = vpop.permute.xlu1 %3804  ;;  %3365 = vperm.xlu0 %8706, %v9742_v37  }
 0x4bc   :  { %v10039_v51 = vpop.permute.xlu0 %2659  ;;  %8690 = vset.pattern.permute.xlu1 %v13512_v1  ;;  %13578 = vst [vmem:[#allocation142_spill] sm:$0xff] %v10049_v54 }
 0x4bd   :  { %13575 = vst [vmem:[#allocation139_spill] sm:$0xff] %v10039_v51  ;;  %4767 = vperm.xlu1 %8690, %v9723_v21  }
 0x4bf   :  { %v10058_v2 = vpop.permute.xlu1 %4036  ;;  %8710 = vset.pattern.permute.xlu0 %v13497_v23 }
 0x4c0   :  { %v10045_v0 = vpop.permute.xlu0 %2826  ;;  %13581 = vst [vmem:[#allocation145_spill] sm:$0xff] %v10058_v2  ;;  %3537 = vperm.xlu0 %8710, %v9693_v11   ;;  %v10073_v2 = vld [vmem:[%s13008_s8 + $0x20] sm:$0xff] }
 0x4c1   :  { %13577 = vst [vmem:[#allocation141_spill] sm:$0xff] %v10045_v0  ;;  %4772 = vperm.xlu1 %8690, %v9663_v62  }
 0x4c3   :  { %v10068_v54 = vpop.permute.xlu1 %4273 }
 0x4c4   :  { %v10051_v3 = vpop.permute.xlu0 %2841  ;;  %13583 = vst [vmem:[#allocation147_spill] sm:$0xff] %v10068_v54  ;;  %3552 = vperm.xlu0 %8710, %v10073_v2  }
 0x4c5   :  { %13579 = vst [vmem:[#allocation143_spill] sm:$0xff] %v10051_v3  ;;  %8691 = vset.pattern.permute.xlu1 %v13515_v33 }
 0x4c6   :  { %5009 = vperm.xlu1 %8691, %v9663_v62  }
 0x4c7   :  { %v10087_v54 = vpop.permute.xlu1 %4278 }
 0x4c8   :  { %v10055_v51 = vpop.permute.xlu0 %2851  ;;  %13586 = vst [vmem:[#allocation150_spill] sm:$0xff] %v10087_v54 }
 0x4c9   :  { %13580 = vst [vmem:[#allocation144_spill] sm:$0xff] %v10055_v51 }
 0x4ca   :  { %8692 = vset.pattern.permute.xlu1 %v13523_v5 }
 0x4cb   :  { %5241 = vperm.xlu1 %8692, %v9723_v21  }
 0x4cc   :  { %v10062_v25 = vpop.permute.xlu0 %2861 }
 0x4cd   :  { %13582 = vst [vmem:[#allocation146_spill] sm:$0xff] %v10062_v25  ;;  %v10083_v25 = vld [vmem:[%s13008_s8 + $0x48] sm:$0xff] }
 0x4ce   :  { %3577 = vperm.xlu0 %8710, %v10083_v25  }
 0x4cf   :  { %8693 = vset.pattern.permute.xlu1 %v13526_v16 }
 0x4d0   :  { %v10075_v51 = vpop.permute.xlu0 %2871  ;;  %5478 = vperm.xlu1 %8693, %v9723_v21  }
 0x4d1   :  { %13584 = vst [vmem:[#allocation148_spill] sm:$0xff] %v10075_v51  ;;  %v10091_v51 = vpop.permute.xlu1 %4515 }
 0x4d2   :  { %13587 = vst [vmem:[#allocation151_spill] sm:$0xff] %v10091_v51  ;;  %3582 = vperm.xlu0 %8710, %v9723_v21   ;;  %v10121_v21 = vld [vmem:[%s13008_s8 + $0x68] sm:$0xff] }
 0x4d4   :  { %v10085_v3 = vpop.permute.xlu0 %2881  ;;  %5483 = vperm.xlu1 %8693, %v9663_v62   ;;  %v10110_v62 = vld [vmem:[%s13008_s8 + $0x38] sm:$0xff] }
 0x4d5   :  { %13585 = vst [vmem:[#allocation149_spill] sm:$0xff] %v10085_v3  ;;  %v10099_v49 = vpop.permute.xlu1 %4747 }
 0x4d6   :  { %3607 = vperm.xlu0 %8710, %v9682_v4   ;;  %13589 = vst [vmem:[#allocation153_spill] sm:$0xff] %v10099_v49 }
 0x4d8   :  { %v10093_v0 = vpop.permute.xlu0 %2891  ;;  %8695 = vset.pattern.permute.xlu1 %v13529_v14 }
 0x4d9   :  { %13588 = vst [vmem:[#allocation152_spill] sm:$0xff] %v10093_v0  ;;  %3123 = vperm.xlu1 %8695, %v9672_v7   ;;  %v10112_v7 = vpop.permute.xlu1 %4984 }
 0x4da   :  { %8713 = vset.pattern.permute.xlu0 %v13504_v40  ;;  %13591 = vst [vmem:[#allocation155_spill] sm:$0xff] %v10112_v7 }
 0x4db   :  { %4011 = vperm.xlu0 %8713, %v9693_v11  }
 0x4dc   :  { %v10101_v3 = vpop.permute.xlu0 %3058 }
 0x4dd   :  { %13590 = vst [vmem:[#allocation154_spill] sm:$0xff] %v10101_v3  ;;  %8696 = vset.pattern.permute.xlu1 %v13495_v27  ;;  %v10125_v11 = vpop.permute.xlu1 %4989 }
 0x4de   :  { %3355 = vperm.xlu1 %8696, %v9733_v35   ;;  %13593 = vst [vmem:[#allocation157_spill] sm:$0xff] %v10125_v11 }
 0x4df   :  { %4041 = vperm.xlu0 %8713, %v10110_v62  }
 0x4e0   :  { %v10115_v4 = vpop.permute.xlu0 %3073 }
 0x4e1   :  { %13592 = vst [vmem:[#allocation156_spill] sm:$0xff] %v10115_v4  ;;  %v10131_v7 = vpop.permute.xlu1 %5226 }
 0x4e2   :  { %8697 = vset.pattern.permute.xlu1 %v13497_v23  ;;  %13595 = vst [vmem:[#allocation159_spill] sm:$0xff] %v10131_v7 }
 0x4e3   :  { %3592 = vperm.xlu1 %8697, %v9733_v35   ;;  %4046 = vperm.xlu0 %8713, %v9715_v58   ;;  %v4228_v58 = vld [vmem:[%s13008_s8 + $0x18] sm:$0xff] }
 0x4e4   :  { %v10127_v49 = vpop.permute.xlu0 %3083 }
 0x4e5   :  { %13594 = vst [vmem:[#allocation158_spill] sm:$0xff] %v10127_v49  ;;  %v10140_v11 = vpop.permute.xlu1 %5458 }
 0x4e6   :  { %13597 = vst [vmem:[#allocation161_spill] sm:$0xff] %v10140_v11 }
 0x4e7   :  { %3597 = vperm.xlu1 %8697, %v10121_v21   ;;  %4071 = vperm.xlu0 %8713, %v10121_v21  }
 0x4e8   :  { %v10135_v51 = vpop.permute.xlu0 %3088 }
 0x4e9   :  { %13596 = vst [vmem:[#allocation160_spill] sm:$0xff] %v10135_v51  ;;  %v10151_v51 = vpop.permute.xlu1 %3098 }
 0x4ea   :  { %13599 = vst [vmem:[#allocation163_spill] sm:$0xff] %v10151_v51 }
 0x4eb   :  { %8699 = vset.pattern.permute.xlu1 %v13501_v19  ;;  %4076 = vperm.xlu0 %8713, %v9742_v37  }
 0x4ec   :  { %3834 = vperm.xlu1 %8699, %v10121_v21   ;;  %v10142_v54 = vpop.permute.xlu0 %3113 }
 0x4ed   :  { %13598 = vst [vmem:[#allocation162_spill] sm:$0xff] %v10142_v54  ;;  %v10157_v54 = vpop.permute.xlu1 %3103 }
 0x4ee   :  { %13601 = vst [vmem:[#allocation165_spill] sm:$0xff] %v10157_v54 }
 0x4ef   :  { %8715 = vset.pattern.permute.xlu0 %v13506_v46 }
 0x4f0   :  { %8700 = vset.pattern.permute.xlu1 %v13504_v40  ;;  %4243 = vperm.xlu0 %8715, %v9752_v8   ;;  %v10153_v37 = vpop.permute.xlu0 %3118  ;;  %v4711_v8 = vld [vmem:[%s13008_s8 + $0x60] sm:$0xff] }
 0x4f1   :  { %4066 = vperm.xlu1 %8700, %v9733_v35   ;;  %13600 = vst [vmem:[#allocation164_spill] sm:$0xff] %v10153_v37  ;;  %v10167_v51 = vpop.permute.xlu1 %3340  ;;  %v10172_v37 = vld [vmem:[%s13008_s8 + $0x50] sm:$0xff] }
 0x4f2   :  { %13603 = vst [vmem:[#allocation167_spill] sm:$0xff] %v10167_v51  ;;  %v4699_v51 = vld [vmem:[%s13008_s8] sm:$0xff] }
 0x4f4   :  { %4258 = vperm.xlu0 %8715, %v4228_v58  }
 0x4f5   :  { %8701 = vset.pattern.permute.xlu1 %v13506_v46  ;;  %v10183_v49 = vpop.permute.xlu1 %3572 }
 0x4f6   :  { %4303 = vperm.xlu1 %8701, %v9733_v35   ;;  %v10161_v35 = vpop.permute.xlu0 %3769  ;;  %13605 = vst [vmem:[#allocation169_spill] sm:$0xff] %v10183_v49 }
 0x4f7   :  { %13602 = vst [vmem:[#allocation166_spill] sm:$0xff] %v10161_v35  ;;  %v10181_v35 = vld [vmem:[%s13008_s8 + $0x78] sm:$0xff] }
 0x4f8   :  { %4263 = vperm.xlu0 %8715, %v10073_v2  }
 0x4fa   :  { %4308 = vperm.xlu1 %8701, %v10121_v21   ;;  %v10176_v54 = vpop.permute.xlu0 %3784 }
 0x4fb   :  { %13604 = vst [vmem:[#allocation168_spill] sm:$0xff] %v10176_v54  ;;  %v10194_v54 = vpop.permute.xlu1 %3809 }
 0x4fc   :  { %4288 = vperm.xlu0 %8715, %v10083_v25   ;;  %13607 = vst [vmem:[#allocation171_spill] sm:$0xff] %v10194_v54 }
 0x4fe   :  { %8703 = vset.pattern.permute.xlu1 %v13509_v15  ;;  %v10190_v4 = vpop.permute.xlu0 %3794 }
 0x4ff   :  { %4545 = vperm.xlu1 %8703, %v10121_v21   ;;  %13606 = vst [vmem:[#allocation170_spill] sm:$0xff] %v10190_v4  ;;  %v10200_v3 = vpop.permute.xlu1 %3814  ;;  %v10207_v4 = vld [vmem:[%s13008_s8 + $0x40] sm:$0xff] }
 0x500   :  { %4293 = vperm.xlu0 %8715, %v10172_v37   ;;  %13609 = vst [vmem:[#allocation173_spill] sm:$0xff] %v10200_v3 }
 0x502   :  { %v10197_v49 = vpop.permute.xlu0 %3799 }
 0x503   :  { %8704 = vset.pattern.permute.xlu1 %v13512_v1  ;;  %13608 = vst [vmem:[#allocation172_spill] sm:$0xff] %v10197_v49 }
 0x504   :  { %4777 = vperm.xlu1 %8704, %v4711_v8   ;;  %4318 = vperm.xlu0 %8715, %v10181_v35  }
 0x506   :  { %v10211_v54 = vpop.permute.xlu0 %3824 }
 0x507   :  { %13611 = vst [vmem:[#allocation175_spill] sm:$0xff] %v10211_v54 }
 0x508   :  { %8705 = vset.pattern.permute.xlu1 %v13515_v33  ;;  %8718 = vset.pattern.permute.xlu0 %v13512_v1 }
 0x509   :  { %5014 = vperm.xlu1 %8705, %v4711_v8   ;;  %4717 = vperm.xlu0 %8718, %v4699_v51   ;;  %v10209_v51 = vpop.permute.xlu1 %4051 }
 0x50a   :  { %13610 = vst [vmem:[#allocation174_spill] sm:$0xff] %v10209_v51  ;;  %v10224_v48 = vpop.permute.xlu0 %3829 }
 0x50b   :  { %13613 = vst [vmem:[#allocation177_spill] sm:$0xff] %v10224_v48 }
 0x50d   :  { %5019 = vperm.xlu1 %8705, %v10121_v21   ;;  %4732 = vperm.xlu0 %8718, %v4228_v58   ;;  %v10216_v58 = vld [vmem:[%s13008_s8 + $0x70] sm:$0xff]  ;;  %v10222_v53 = vpop.permute.xlu1 %4283 }
 0x50e   :  { %13612 = vst [vmem:[#allocation176_spill] sm:$0xff] %v10222_v53 }
 0x511   :  { %8707 = vset.pattern.permute.xlu1 %v13523_v5  ;;  %4752 = vperm.xlu0 %8718, %v10110_v62  }
 0x512   :  { %5256 = vperm.xlu1 %8707, %v10121_v21  }
 0x515   :  { %4757 = vperm.xlu0 %8718, %v10207_v4  }
 0x516   :  { %8708 = vset.pattern.permute.xlu1 %v13526_v16 }
 0x517   :  { %5488 = vperm.xlu1 %8708, %v4711_v8  }
 0x519   :  { %4782 = vperm.xlu0 %8718, %v10121_v21  }
 0x51b   :  { %8709 = vset.pattern.permute.xlu1 %v13529_v14 }
 0x51c   :  { %3128 = vperm.xlu1 %8709, %v10216_v58  }
 0x51d   :  { %4787 = vperm.xlu0 %8718, %v10216_v58  }
 0x520   :  { %3133 = vperm.xlu1 %8709, %v10181_v35  }
 0x521   :  { %8720 = vset.pattern.permute.xlu0 %v13515_v33 }
 0x524   :  { %8711 = vset.pattern.permute.xlu1 %v13495_v27 }
 0x525   :  { %3370 = vperm.xlu1 %8711, %v10181_v35  }
 0x529   :  { %8712 = vset.pattern.permute.xlu1 %v13497_v23 }
 0x52a   :  { %3602 = vperm.xlu1 %8712, %v10216_v58  }
 0x52b   :  { %v1305_v49 = vpop.f32.mrb[48].mxu0  ;;  %v8317_v0 = vpop.f32.mrb[48].mxu1 }
 0x52c   :  { %v1307_v3 = vpop.f32.mrb[49].mxu0  ;;  %v8318_v60 = vpop.f32.mrb[49].mxu1 }
 0x52d   :  { %v8319_v8 = vadd.f32 %v8318_v60, %v8317_v0  ;;  %v1309_v38 = vpop.f32.mrb[50].mxu0  ;;  %v8320_v44 = vpop.f32.mrb[50].mxu1 }
 0x52e   :  { %v1481_v13 = vpack.c.bf16 %v1309_v38, %v1305_v49  ;;  %v1311_v51 = vpop.f32.mrb[51].mxu0  ;;  %v8321_v47 = vpop.f32.mrb[51].mxu1  ;;  %8714 = vset.pattern.permute.xlu1 %v13501_v19 }
 0x52f   :  { %v1482_v54 = vpack.c.bf16 %v1311_v51, %v1307_v3  ;;  %v8322_v9 = vadd.f32 %v8321_v47, %v8320_v44  ;;  %v10232_v3 = vld [vmem:[%s13008_s8 + $0x8] sm:$0xff]  ;;  %3839 = vperm.xlu1 %8714, %v10216_v58  }
 0x530   :  { %4959 = vperm.xlu0 %8720, %v10232_v3  }
 0x531   :  { %v1483_v20 = vpack.c.bf16 %v8322_v9, %v8319_v8  ;;  %1522 = vmatprep.subr.bf16.mxu0 %v1482_v54 }
 0x532   :  { %1523 = vmatpush1.bf16.msra.mxu0 %v1481_v13 }
 0x533   :  { %v1315_v60 = vpop.f32.mrb[52].mxu0  ;;  %v8323_v14 = vpop.f32.mrb[52].mxu1  ;;  %8533 = vmatprep.subr.bf16.mxu1 %v1483_v20  ;;  %3844 = vperm.xlu1 %8714, %v10181_v35  }
 0x534   :  { %v1317_v49 = vpop.f32.mrb[53].mxu0  ;;  %v8324_v38 = vpop.f32.mrb[53].mxu1  ;;  %8534 = vmatpush3.bf16.msra.mxu1 %v1483_v20  ;;  %4974 = vperm.xlu0 %8720, %v10073_v2  }
 0x535   :  { %v8325_v44 = vadd.f32 %v8324_v38, %v8323_v14  ;;  %v1319_v47 = vpop.f32.mrb[54].mxu0  ;;  %v8326_v0 = vpop.f32.mrb[54].mxu1 }
 0x536   :  { %v1484_v9 = vpack.c.bf16 %v1319_v47, %v1315_v60  ;;  %v1321_v54 = vpop.f32.mrb[55].mxu0  ;;  %v8327_v13 = vpop.f32.mrb[55].mxu1 }
 0x537   :  { %v1485_v51 = vpack.c.bf16 %v1321_v54, %v1317_v49  ;;  %v8328_v8 = vadd.f32 %v8327_v13, %v8326_v0  ;;  %v10237_v60 = vpop.permute.xlu1 %4520  ;;  %v10239_v14 = vpop.permute.xlu0 %4485  ;;  %8716 = vset.pattern.permute.xlu1 %v13504_v40 }
 0x538   :  { %13614 = vst [vmem:[#allocation178_spill] sm:$0xff] %v10237_v60  ;;  %13615 = vst [vmem:[#allocation179_spill] sm:$0xff] %v10239_v14  ;;  %4999 = vperm.xlu0 %8720, %v10083_v25   ;;  %4081 = vperm.xlu1 %8716, %v10181_v35  }
 0x539   :  { %v1486_v20 = vpack.c.bf16 %v8328_v8, %v8325_v44  ;;  %1524 = vmatprep.subr.bf16.mxu0 %v1485_v51 }
 0x53a   :  { %1525 = vmatpush1.bf16.msra.mxu0 %v1484_v9 }
 0x53b   :  { %v1325_v27 = vpop.f32.mrb[56].mxu0  ;;  %v8329_v38 = vpop.f32.mrb[56].mxu1  ;;  %8535 = vmatprep.subr.bf16.mxu1 %v1486_v20 }
 0x53c   :  { %v1327_v49 = vpop.f32.mrb[57].mxu0  ;;  %v8330_v47 = vpop.f32.mrb[57].mxu1  ;;  %8536 = vmatpush3.bf16.msra.mxu1 %v1486_v20  ;;  %5004 = vperm.xlu0 %8720, %v10172_v37  }
 0x53d   :  { %v8331_v0 = vadd.f32 %v8330_v47, %v8329_v38  ;;  %v1329_v44 = vpop.f32.mrb[58].mxu0  ;;  %v8332_v54 = vpop.f32.mrb[58].mxu1  ;;  %8717 = vset.pattern.permute.xlu1 %v13506_v46 }
 0x53e   :  { %v1487_v9 = vpack.c.bf16 %v1329_v44, %v1325_v27  ;;  %v1331_v13 = vpop.f32.mrb[59].mxu0  ;;  %v8333_v51 = vpop.f32.mrb[59].mxu1  ;;  %4313 = vperm.xlu1 %8717, %v10216_v58  }
 0x53f   :  { %v1488_v8 = vpack.c.bf16 %v1331_v13, %v1327_v49  ;;  %v8334_v60 = vadd.f32 %v8333_v51, %v8332_v54  ;;  %v10246_v23 = vpop.permute.xlu1 %4525  ;;  %v10248_v20 = vpop.permute.xlu0 %4505 }
 0x540   :  { %13616 = vst [vmem:[#allocation180_spill] sm:$0xff] %v10246_v23  ;;  %13617 = vst [vmem:[#allocation181_spill] sm:$0xff] %v10248_v20  ;;  %5029 = vperm.xlu0 %8720, %v10181_v35  }
 0x541   :  { %v1489_v14 = vpack.c.bf16 %v8334_v60, %v8331_v0  ;;  %1526 = vmatprep.subr.bf16.mxu0 %v1488_v8 }
 0x542   :  { %1527 = vmatpush1.bf16.msra.mxu0 %v1487_v9  ;;  %8719 = vset.pattern.permute.xlu1 %v13509_v15 }
 0x543   :  { %v1335_v38 = vpop.f32.mrb[60].mxu0  ;;  %v8335_v2 = vpop.f32.mrb[60].mxu1  ;;  %8537 = vmatprep.subr.bf16.mxu1 %v1489_v14  ;;  %4550 = vperm.xlu1 %8719, %v10216_v58  }
 0x544   :  { %v1337_v27 = vpop.f32.mrb[61].mxu0  ;;  %v8336_v47 = vpop.f32.mrb[61].mxu1  ;;  %8538 = vmatpush3.bf16.msra.mxu1 %v1489_v14  ;;  %8723 = vset.pattern.permute.xlu0 %v13526_v16 }
 0x545   :  { %v8337_v49 = vadd.f32 %v8336_v47, %v8335_v2  ;;  %v1339_v44 = vpop.f32.mrb[62].mxu0  ;;  %v8338_v19 = vpop.f32.mrb[62].mxu1  ;;  %5433 = vperm.xlu0 %8723, %v10232_v3  }
 0x546   :  { %v1490_v60 = vpack.c.bf16 %v1339_v44, %v1335_v38  ;;  %v1341_v0 = vpop.f32.mrb[63].mxu0  ;;  %v8339_v54 = vpop.f32.mrb[63].mxu1 }
 0x547   :  { %v1491_v9 = vpack.c.bf16 %v1341_v0, %v1337_v27  ;;  %v8340_v13 = vadd.f32 %v8339_v54, %v8338_v19  ;;  %v10254_v25 = vpop.permute.xlu1 %4762  ;;  %v10256_v14 = vpop.permute.xlu0 %4510  ;;  %4555 = vperm.xlu1 %8719, %v10181_v35  }
 0x548   :  { %13618 = vst [vmem:[#allocation182_spill] sm:$0xff] %v10254_v25  ;;  %13619 = vst [vmem:[#allocation183_spill] sm:$0xff] %v10256_v14 }
 0x549   :  { %v1492_v51 = vpack.c.bf16 %v8340_v13, %v8337_v49  ;;  %1528 = vmatprep.subr.bf16.mxu0 %v1491_v9  ;;  %5463 = vperm.xlu0 %8723, %v10110_v62  }
 0x54a   :  { %1529 = vmatpush1.bf16.msra.mxu0 %v1490_v60 }
 0x54b   :  { %v1345_v8 = vpop.f32.mrb[64].mxu0  ;;  %v8341_v2 = vpop.f32.mrb[64].mxu1  ;;  %8539 = vmatprep.subr.bf16.mxu1 %v1492_v51  ;;  %8721 = vset.pattern.permute.xlu1 %v13512_v1 }
 0x54c   :  { %v1347_v38 = vpop.f32.mrb[65].mxu0  ;;  %v8342_v37 = vpop.f32.mrb[65].mxu1  ;;  %8540 = vmatpush3.bf16.msra.mxu1 %v1492_v51  ;;  %4792 = vperm.xlu1 %8721, %v10181_v35  }
 0x54d   :  { %v8343_v27 = vadd.f32 %v8342_v37, %v8341_v2  ;;  %v1349_v47 = vpop.f32.mrb[66].mxu0  ;;  %v8344_v49 = vpop.f32.mrb[66].mxu1  ;;  %5468 = vperm.xlu0 %8723, %v10207_v4  }
 0x54e   :  { %v1493_v44 = vpack.c.bf16 %v1349_v47, %v1345_v8  ;;  %v1351_v40 = vpop.f32.mrb[67].mxu0  ;;  %v8345_v19 = vpop.f32.mrb[67].mxu1 }
 0x54f   :  { %v1494_v60 = vpack.c.bf16 %v1351_v40, %v1347_v38  ;;  %v8346_v0 = vadd.f32 %v8345_v19, %v8344_v49  ;;  %v10264_v9 = vpop.permute.xlu1 %4994  ;;  %v10266_v13 = vpop.permute.xlu0 %4535 }
 0x550   :  { %13620 = vst [vmem:[#allocation184_spill] sm:$0xff] %v10264_v9  ;;  %13621 = vst [vmem:[#allocation185_spill] sm:$0xff] %v10266_v13  ;;  %8722 = vset.pattern.permute.xlu1 %v13515_v33 }
 0x551   :  { %v1495_v54 = vpack.c.bf16 %v8346_v0, %v8343_v27  ;;  %1530 = vmatprep.subr.bf16.mxu0 %v1494_v60  ;;  %5493 = vperm.xlu0 %8723, %v10121_v21  }
 0x552   :  { %1531 = vmatpush1.bf16.msra.mxu0 %v1493_v44  ;;  %5024 = vperm.xlu1 %8722, %v10216_v58  }
 0x553   :  { %v1355_v51 = vpop.f32.mrb[68].mxu0  ;;  %v8347_v8 = vpop.f32.mrb[68].mxu1  ;;  %8541 = vmatprep.subr.bf16.mxu1 %v1495_v54 }
 0x554   :  { %v1357_v46 = vpop.f32.mrb[69].mxu0  ;;  %v8348_v2 = vpop.f32.mrb[69].mxu1  ;;  %8542 = vmatpush3.bf16.msra.mxu1 %v1495_v54 }
 0x555   :  { %v8349_v38 = vadd.f32 %v8348_v2, %v8347_v8  ;;  %v1359_v37 = vpop.f32.mrb[70].mxu0  ;;  %v8350_v3 = vpop.f32.mrb[70].mxu1  ;;  %5498 = vperm.xlu0 %8723, %v10216_v58  }
 0x556   :  { %v1496_v27 = vpack.c.bf16 %v1359_v37, %v1355_v51  ;;  %v1361_v47 = vpop.f32.mrb[71].mxu0  ;;  %v8351_v49 = vpop.f32.mrb[71].mxu1  ;;  %8724 = vset.pattern.permute.xlu1 %v13523_v5 }
 0x557   :  { %v1497_v44 = vpack.c.bf16 %v1361_v47, %v1357_v46  ;;  %v8352_v40 = vadd.f32 %v8351_v49, %v8350_v3  ;;  %v10273_v15 = vpop.permute.xlu1 %5231  ;;  %v10275_v60 = vpop.permute.xlu0 %4540  ;;  %5261 = vperm.xlu1 %8724, %v10216_v58   ;;  %v8904_v58 = vld [vmem:[#allocation3 + $0x10] sm:$0xff]  }
 0x558   :  { %13622 = vst [vmem:[#allocation186_spill] sm:$0xff] %v10273_v15  ;;  %13623 = vst [vmem:[#allocation187_spill] sm:$0xff] %v10275_v60 }
 0x559   :  { %v1498_v19 = vpack.c.bf16 %v8352_v40, %v8349_v38  ;;  %1532 = vmatprep.subr.bf16.mxu0 %v1497_v44 }
 0x55a   :  { %1533 = vmatpush1.bf16.msra.mxu0 %v1496_v27 }
 0x55b   :  { %v1365_v0 = vpop.f32.mrb[72].mxu0  ;;  %v8353_v54 = vpop.f32.mrb[72].mxu1  ;;  %8543 = vmatprep.subr.bf16.mxu1 %v1498_v19  ;;  %5266 = vperm.xlu1 %8724, %v10181_v35  }
 0x55c   :  { %v1367_v62 = vpop.f32.mrb[73].mxu0  ;;  %v8354_v51 = vpop.f32.mrb[73].mxu1  ;;  %8544 = vmatpush3.bf16.msra.mxu1 %v1498_v19 }
 0x55d   :  { %v8355_v8 = vadd.f32 %v8354_v51, %v8353_v54  ;;  %v1369_v46 = vpop.f32.mrb[74].mxu0  ;;  %v8356_v2 = vpop.f32.mrb[74].mxu1 }
 0x55e   :  { %v1499_v4 = vpack.c.bf16 %v1369_v46, %v1365_v0  ;;  %v1371_v38 = vpop.f32.mrb[75].mxu0  ;;  %v8357_v37 = vpop.f32.mrb[75].mxu1 }
 0x55f   :  { %v1500_v3 = vpack.c.bf16 %v1371_v38, %v1367_v62  ;;  %v8358_v27 = vadd.f32 %v8357_v37, %v8356_v2  ;;  %v10281_v49 = vpop.permute.xlu1 %5236  ;;  %v10283_v1 = vpop.permute.xlu0 %5191  ;;  %8725 = vset.pattern.permute.xlu1 %v13526_v16 }
 0x560   :  { %13624 = vst [vmem:[#allocation188_spill] sm:$0xff] %v10281_v49  ;;  %13625 = vst [vmem:[#allocation189_spill] sm:$0xff] %v10283_v1  ;;  %5503 = vperm.xlu1 %8725, %v10181_v35   ;;  %v8907_v35 = vld [vmem:[#allocation3 + $0x28] sm:$0xff]  }
 0x561   :  { %v1501_v47 = vpack.c.bf16 %v8358_v27, %v8355_v8  ;;  %1534 = vmatprep.subr.bf16.mxu0 %v1500_v3  ;;  %v8903_v27 = vld [vmem:[#allocation3 + $0x8] sm:$0xff]  }
 0x562   :  { %1535 = vmatpush1.bf16.msra.mxu0 %v1499_v4 }
 0x563   :  { %v1375_v44 = vpop.f32.mrb[76].mxu0  ;;  %v8359_v40 = vpop.f32.mrb[76].mxu1  ;;  %8545 = vmatprep.subr.bf16.mxu1 %v1501_v47 }
 0x564   :  { %v1377_v21 = vpop.f32.mrb[77].mxu0  ;;  %v8360_v19 = vpop.f32.mrb[77].mxu1  ;;  %8546 = vmatpush3.bf16.msra.mxu1 %v1501_v47 }
 0x565   :  { %v8361_v0 = vadd.f32 %v8360_v19, %v8359_v40  ;;  %v1379_v54 = vpop.f32.mrb[78].mxu0  ;;  %v8362_v62 = vpop.f32.mrb[78].mxu1  ;;  %v8906_v40 = vld [vmem:[#allocation3 + $0x20] sm:$0xff]  }
 0x566   :  { %v1502_v51 = vpack.c.bf16 %v1379_v54, %v1375_v44  ;;  %v1381_v33 = vpop.f32.mrb[79].mxu0  ;;  %v8363_v8 = vpop.f32.mrb[79].mxu1 }
 0x567   :  { %v1503_v46 = vpack.c.bf16 %v1381_v33, %v1377_v21  ;;  %v8364_v2 = vadd.f32 %v8363_v8, %v8362_v62  ;;  %v10288_v4 = vpop.permute.xlu1 %5473  ;;  %v10291_v38 = vpop.permute.xlu0 %5206  ;;  %v8909_v33 = vld [vmem:[#allocation3 + $0x38] sm:$0xff]  }
 0x568   :  { %13626 = vst [vmem:[#allocation190_spill] sm:$0xff] %v10288_v4  ;;  %13627 = vst [vmem:[#allocation191_spill] sm:$0xff] %v10291_v38 }
 0x569   :  { %v1504_v37 = vpack.c.bf16 %v8364_v2, %v8361_v0  ;;  %1536 = vmatprep.subr.bf16.mxu0 %v1503_v46  ;;  %v8908_v0 = vld [vmem:[#allocation3 + $0x30] sm:$0xff]  }
 0x56a   :  { %1537 = vmatpush1.bf16.msra.mxu0 %v1502_v51 }
 0x56b   :  { %8547 = vmatprep.subr.bf16.mxu1 %v1504_v37  ;;  %v10295_v3 = vpop.permute.xlu1 %3108  ;;  %v10298_v5 = vpop.permute.xlu0 %5216 }
 0x56c   :  { %8548 = vmatpush3.bf16.msra.mxu1 %v1504_v37  ;;  %13628 = vst [vmem:[#allocation192_spill] sm:$0xff] %v10295_v3  ;;  %13629 = vst [vmem:[#allocation193_spill] sm:$0xff] %v10298_v5 }
 0x56d   :  { %1555 = vmatmul.mubr.bf16.vlgmr.msra.gmra.mrb[80].mxu0 %v9957_v63  ;;  %v8905_v63 = vld [vmem:[#allocation3 + $0x18] sm:$0xff]  }
 0x56e   :  { %1564 = vmatprep.mubr.bf16.mxu0 %v13553_v61 }
 0x56f   :  { %8550 = vmatmul.mubr.bf16.vlgmr.msra.gmra.mrb[80].mxu1 %v8903_v27  ;;  %v10302_v47 = vpop.permute.xlu1 %3345  ;;  %v10304_v44 = vpop.permute.xlu0 %5221 }
 0x570   :  { %8553 = vmatprep.mubr.bf16.mxu1 %v8904_v58  ;;  %13630 = vst [vmem:[#allocation194_spill] sm:$0xff] %v10302_v47  ;;  %13631 = vst [vmem:[#allocation195_spill] sm:$0xff] %v10304_v44 }
 0x573   :  { %v10307_v21 = vpop.permute.xlu1 %3350  ;;  %v10309_v19 = vpop.permute.xlu0 %5246 }
 0x574   :  { %13632 = vst [vmem:[#allocation196_spill] sm:$0xff] %v10307_v21  ;;  %13633 = vst [vmem:[#allocation197_spill] sm:$0xff] %v10309_v19 }
 0x575   :  { %1565 = vmatmul.mubr.bf16.gmra.mrb[84].mxu0 %v8903_v27 }
 0x576   :  { %1574 = vmatprep.mubr.bf16.mxu0 %v13553_v61 }
 0x577   :  { %8554 = vmatmul.mubr.bf16.gmra.mrb[84].mxu1 %v8905_v63  ;;  %v10311_v16 = vpop.permute.xlu1 %3587  ;;  %v10314_v54 = vpop.permute.xlu0 %5251 }
 0x578   :  { %8557 = vmatprep.mubr.bf16.mxu1 %v8906_v40  ;;  %13634 = vst [vmem:[#allocation198_spill] sm:$0xff] %v10311_v16  ;;  %13635 = vst [vmem:[#allocation199_spill] sm:$0xff] %v10314_v54 }
 0x57b   :  { %v10316_v62 = vpop.permute.xlu1 %3819  ;;  %v10319_v51 = vpop.permute.xlu0 %3295 }
 0x57c   :  { %13636 = vst [vmem:[#allocation200_spill] sm:$0xff] %v10316_v62  ;;  %13637 = vst [vmem:[#allocation201_spill] sm:$0xff] %v10319_v51  ;;  %v5693_v51 = vld [vmem:[#allocation11 + $0x128] sm:$0xff] }
 0x57d   :  { %1575 = vmatmul.mubr.bf16.gmra.mrb[88].mxu0 %v8904_v58 }
 0x57e   :  { %1584 = vmatprep.mubr.bf16.mxu0 %v13553_v61 }
 0x57f   :  { %8558 = vmatmul.mubr.bf16.gmra.mrb[88].mxu1 %v8907_v35  ;;  %v10321_v8 = vpop.permute.xlu1 %4056  ;;  %v10323_v46 = vpop.permute.xlu0 %3310 }
 0x580   :  { %8561 = vmatprep.mubr.bf16.mxu1 %v8908_v0  ;;  %13638 = vst [vmem:[#allocation202_spill] sm:$0xff] %v10321_v8  ;;  %13639 = vst [vmem:[#allocation203_spill] sm:$0xff] %v10323_v46 }
 0x583   :  { %v10326_v2 = vpop.permute.xlu1 %4061  ;;  %v10328_v37 = vpop.permute.xlu0 %3330 }
 0x584   :  { %13640 = vst [vmem:[#allocation204_spill] sm:$0xff] %v10326_v2  ;;  %13641 = vst [vmem:[#allocation205_spill] sm:$0xff] %v10328_v37  ;;  %v5673_v37 = vld [vmem:[#allocation11 + $0x88] sm:$0xff] }
 0x585   :  { %1585 = vmatmul.mubr.bf16.gmra.mrb[92].mxu0 %v8905_v63 }
 0x586   :  { %1594 = vmatprep.mubr.bf16.mxu0 %v13553_v61 }
 0x587   :  { %8562 = vmatmul.mubr.bf16.gmra.mrb[92].mxu1 %v8909_v33  ;;  %v10330_v27 = vpop.permute.xlu1 %4298  ;;  %v10333_v58 = vpop.permute.xlu0 %3335 }
 0x588   :  { %13642 = vst [vmem:[#allocation206_spill] sm:$0xff] %v10330_v27  ;;  %13643 = vst [vmem:[#allocation207_spill] sm:$0xff] %v10333_v58  ;;  %v5676_v58 = vld [vmem:[#allocation11 + $0xa0] sm:$0xff] }
 0x58b   :  { %v10335_v63 = vpop.permute.xlu1 %4530  ;;  %v10338_v9 = vpop.permute.xlu0 %3360 }
 0x58c   :  { %13644 = vst [vmem:[#allocation208_spill] sm:$0xff] %v10335_v63  ;;  %13645 = vst [vmem:[#allocation209_spill] sm:$0xff] %v10338_v9  ;;  %v5669_v9 = vld [vmem:[#allocation11 + $0x68] sm:$0xff] }
 0x58d   :  { %1595 = vmatmul.mubr.bf16.gmra.mrb[96].mxu0 %v8906_v40 }
 0x58e   :  { %1604 = vmatprep.mubr.bf16.mxu0 %v13553_v61 }
 0x58f   :  { %v10340_v40 = vpop.permute.xlu1 %4767  ;;  %v10342_v25 = vpop.permute.xlu0 %3365 }
 0x590   :  { %13646 = vst [vmem:[#allocation210_spill] sm:$0xff] %v10340_v40  ;;  %13647 = vst [vmem:[#allocation211_spill] sm:$0xff] %v10342_v25 }
 0x593   :  { %v10344_v60 = vpop.permute.xlu1 %4772  ;;  %v10346_v13 = vpop.permute.xlu0 %3537 }
 0x594   :  { %13648 = vst [vmem:[#allocation212_spill] sm:$0xff] %v10344_v60  ;;  %13649 = vst [vmem:[#allocation213_spill] sm:$0xff] %v10346_v13  ;;  %v5661_v13 = vld [vmem:[#allocation11 + $0x28] sm:$0xff] }
 0x595   :  { %1605 = vmatmul.mubr.bf16.gmra.mrb[100].mxu0 %v8907_v35 }
 0x596   :  { %1614 = vmatprep.mubr.bf16.mxu0 %v13553_v61 }
 0x597   :  { %v10348_v35 = vpop.permute.xlu1 %5009  ;;  %v10350_v23 = vpop.permute.xlu0 %3552 }
 0x598   :  { %13650 = vst [vmem:[#allocation214_spill] sm:$0xff] %v10348_v35  ;;  %13651 = vst [vmem:[#allocation215_spill] sm:$0xff] %v10350_v23  ;;  %v5657_v23 = vld [vmem:[#allocation11 + $0x8] sm:$0xff] }
 0x599   :  { %v8014_v25 = vcombine.low %v5657_v23, %v5661_v13 }
 0x59b   :  { %v10352_v14 = vpop.permute.xlu1 %5241 }
 0x59c   :  { %13652 = vst [vmem:[#allocation216_spill] sm:$0xff] %v10352_v14 }
 0x59d   :  { %1615 = vmatmul.mubr.bf16.gmra.mrb[104].mxu0 %v8908_v0  ;;  %v10354_v0 = vpop.permute.xlu0 %3577 }
 0x59e   :  { %1624 = vmatprep.mubr.bf16.mxu0 %v13553_v61  ;;  %13653 = vst [vmem:[#allocation217_spill] sm:$0xff] %v10354_v0 }
 0x59f   :  { %v10356_v61 = vpop.permute.xlu1 %5478 }
 0x5a0   :  { %13654 = vst [vmem:[#allocation218_spill] sm:$0xff] %v10356_v61 }
 0x5a1   :  { %v10358_v63 = vpop.permute.xlu0 %3582 }
 0x5a2   :  { %13655 = vst [vmem:[#allocation219_spill] sm:$0xff] %v10358_v63 }
 0x5a3   :  { %v10360_v40 = vpop.permute.xlu1 %5483 }
 0x5a4   :  { %13656 = vst [vmem:[#allocation220_spill] sm:$0xff] %v10360_v40 }
 0x5a5   :  { %1625 = vmatmul.mubr.bf16.gmra.mrb[108].mxu0 %v8909_v33  ;;  %v10362_v20 = vpop.permute.xlu0 %3607 }
 0x5a6   :  { %13657 = vst [vmem:[#allocation221_spill] sm:$0xff] %v10362_v20 }
 0x5a7   :  { %v10364_v33 = vpop.permute.xlu1 %3123 }
 0x5a8   :  { %13658 = vst [vmem:[#allocation222_spill] sm:$0xff] %v10364_v33 }
 0x5a9   :  { %v10366_v60 = vpop.permute.xlu0 %4011 }
 0x5aa   :  { %13659 = vst [vmem:[#allocation223_spill] sm:$0xff] %v10366_v60 }
 0x5ab   :  { %v10368_v27 = vpop.permute.xlu1 %3355 }
 0x5ac   :  { %13660 = vst [vmem:[#allocation224_spill] sm:$0xff] %v10368_v27 }
 0x5ad   :  { %v10370_v35 = vpop.permute.xlu0 %4041 }
 0x5ae   :  { %13661 = vst [vmem:[#allocation225_spill] sm:$0xff] %v10370_v35 }
 0x5af   :  { %v10372_v53 = vpop.permute.xlu1 %3592 }
 0x5b0   :  { %13662 = vst [vmem:[#allocation226_spill] sm:$0xff] %v10372_v53 }
 0x5b1   :  { %v10374_v2 = vpop.permute.xlu0 %4046 }
 0x5b2   :  { %13663 = vst [vmem:[#allocation227_spill] sm:$0xff] %v10374_v2 }
 0x5b3   :  { %v10376_v8 = vpop.permute.xlu1 %3597 }
 0x5b4   :  { %13664 = vst [vmem:[#allocation228_spill] sm:$0xff] %v10376_v8 }
 0x5b5   :  { %v10378_v48 = vpop.permute.xlu0 %4071 }
 0x5b6   :  { %13665 = vst [vmem:[#allocation229_spill] sm:$0xff] %v10378_v48 }
 0x5b7   :  { %v10380_v62 = vpop.permute.xlu1 %3834 }
 0x5b8   :  { %13666 = vst [vmem:[#allocation230_spill] sm:$0xff] %v10380_v62 }
 0x5b9   :  { %v10382_v16 = vpop.permute.xlu0 %4076 }
 0x5ba   :  { %13667 = vst [vmem:[#allocation231_spill] sm:$0xff] %v10382_v16 }
 0x5bb   :  { %v10384_v20 = vpop.permute.xlu1 %4066 }
 0x5bc   :  { %13668 = vst [vmem:[#allocation232_spill] sm:$0xff] %v10384_v20  ;;  %v5656_v20 = vld [vmem:[#allocation11] sm:$0xff] }
 0x5bd   :  { %v10386_v63 = vpop.permute.xlu0 %4243 }
 0x5be   :  { %13669 = vst [vmem:[#allocation233_spill] sm:$0xff] %v10386_v63  ;;  %v5660_v63 = vld [vmem:[#allocation11 + $0x20] sm:$0xff] }
 0x5bf   :  { %v10388_v60 = vpop.permute.xlu1 %4303 }
 0x5c0   :  { %13670 = vst [vmem:[#allocation234_spill] sm:$0xff] %v10388_v60 }
 0x5c1   :  { %v10390_v0 = vpop.permute.xlu0 %4258 }
 0x5c2   :  { %13671 = vst [vmem:[#allocation235_spill] sm:$0xff] %v10390_v0  ;;  %v8013_v0 = vcombine.high %v5656_v20, %v5660_v63 }
 0x5c3   :  { %v10392_v35 = vpop.permute.xlu1 %4308 }
 0x5c4   :  { %13672 = vst [vmem:[#allocation236_spill] sm:$0xff] %v10392_v35  ;;  %6850 = vmatprep.subr.bf16.mxu0 %v8013_v0  ;;  %v5681_v0 = vld [vmem:[#allocation11 + $0xc8] sm:$0xff] }
 0x5c5   :  { %v10394_v53 = vpop.permute.xlu0 %4263 }
 0x5c6   :  { %13673 = vst [vmem:[#allocation237_spill] sm:$0xff] %v10394_v53  ;;  %v8012_v53 = vcombine.low %v5656_v20, %v5660_v63 }
 0x5c7   :  { %v10396_v2 = vpop.permute.xlu1 %4545 }
 0x5c8   :  { %13674 = vst [vmem:[#allocation238_spill] sm:$0xff] %v10396_v2  ;;  %v8015_v2 = vcombine.high %v5657_v23, %v5661_v13  ;;  %6851 = vmatpush1.bf16.msra.mxu0 %v8012_v53  ;;  %v5677_v23 = vld [vmem:[#allocation11 + $0xa8] sm:$0xff]  ;;  %v5680_v13 = vld [vmem:[#allocation11 + $0xc0] sm:$0xff] }
 0x5c9   :  { %v10398_v8 = vpop.permute.xlu0 %4288  ;;  %v8031_v63 = vcombine.high %v5673_v37, %v5677_v23 }
 0x5ca   :  { %13675 = vst [vmem:[#allocation239_spill] sm:$0xff] %v10398_v8  ;;  %6936 = vmatprep.subr.bf16.mxu1 %v8015_v2  ;;  %v5668_v8 = vld [vmem:[#allocation11 + $0x60] sm:$0xff] }
 0x5cb   :  { %v10400_v48 = vpop.permute.xlu1 %4777  ;;  %6937 = vmatpush1.bf16.msra.mxu1 %v8014_v25  ;;  %v5684_v2 = vld [vmem:[#allocation11 + $0xe0] sm:$0xff] }
 0x5cc   :  { %13676 = vst [vmem:[#allocation240_spill] sm:$0xff] %v10400_v48  ;;  %v5664_v48 = vld [vmem:[#allocation11 + $0x40] sm:$0xff]  ;;  %v8036_v33 = vcombine.low %v5680_v13, %v5684_v2 }
 0x5cd   :  { %v10402_v62 = vpop.permute.xlu0 %4293  ;;  %v8020_v27 = vcombine.low %v5664_v48, %v5668_v8 }
 0x5ce   :  { %13677 = vst [vmem:[#allocation241_spill] sm:$0xff] %v10402_v62  ;;  %v5665_v62 = vld [vmem:[#allocation11 + $0x48] sm:$0xff] }
 0x5cf   :  { %v10404_v16 = vpop.permute.xlu1 %5014  ;;  %v8022_v21 = vcombine.low %v5665_v62, %v5669_v9  ;;  %v8023_v47 = vcombine.high %v5665_v62, %v5669_v9  ;;  %v8030_v9 = vcombine.low %v5673_v37, %v5677_v23  ;;  %v8037_v62 = vcombine.high %v5680_v13, %v5684_v2  ;;  %v5696_v37 = vld [vmem:[#allocation11 + $0x140] sm:$0xff]  ;;  %v5701_v23 = vld [vmem:[#allocation11 + $0x168] sm:$0xff] }
 0x5d0   :  { %13678 = vst [vmem:[#allocation242_spill] sm:$0xff] %v10404_v16  ;;  %v8021_v16 = vcombine.high %v5664_v48, %v5668_v8  ;;  %v5685_v48 = vld [vmem:[#allocation11 + $0xe8] sm:$0xff] }
 0x5d1   :  { %v10406_v60 = vpop.permute.xlu0 %4318  ;;  %6938 = vmatprep.subr.bf16.mxu1 %v8023_v47  ;;  %v8039_v8 = vcombine.high %v5681_v0, %v5685_v48 }
 0x5d2   :  { %13679 = vst [vmem:[#allocation243_spill] sm:$0xff] %v10406_v60  ;;  %v5672_v60 = vld [vmem:[#allocation11 + $0x80] sm:$0xff]  ;;  %6852 = vmatprep.subr.bf16.mxu0 %v8021_v16  ;;  %6939 = vmatpush1.bf16.msra.mxu1 %v8022_v21 }
 0x5d3   :  { %v10408_v35 = vpop.permute.xlu1 %5019  ;;  %v8029_v20 = vcombine.high %v5672_v60, %v5676_v58  ;;  %6853 = vmatpush1.bf16.msra.mxu0 %v8020_v27  ;;  %v8028_v25 = vcombine.low %v5672_v60, %v5676_v58  ;;  %6940 = vmatprep.subr.bf16.mxu1 %v8031_v63  ;;  %v5692_v16 = vld [vmem:[#allocation11 + $0x120] sm:$0xff]  ;;  %v8038_v60 = vcombine.low %v5681_v0, %v5685_v48  ;;  %v5705_v48 = vld [vmem:[#allocation11 + $0x188] sm:$0xff] }
 0x5d4   :  { %13680 = vst [vmem:[#allocation244_spill] sm:$0xff] %v10408_v35  ;;  %v5688_v35 = vld [vmem:[#allocation11 + $0x100] sm:$0xff] }
 0x5d5   :  { %v10410_v46 = vpop.permute.xlu0 %4717  ;;  %6854 = vmatprep.subr.bf16.mxu0 %v8029_v20  ;;  %v8045_v47 = vcombine.high %v5688_v35, %v5692_v16  ;;  %v5700_v58 = vld [vmem:[#allocation11 + $0x160] sm:$0xff]  ;;  %v5697_v20 = vld [vmem:[#allocation11 + $0x148] sm:$0xff]  ;;  %v8044_v63 = vcombine.low %v5688_v35, %v5692_v16 }
 0x5d6   :  { %13681 = vst [vmem:[#allocation245_spill] sm:$0xff] %v10410_v46  ;;  %v5689_v46 = vld [vmem:[#allocation11 + $0x108] sm:$0xff]  ;;  %6941 = vmatpush1.bf16.msra.mxu1 %v8030_v9  ;;  %v8053_v13 = vcombine.high %v5696_v37, %v5700_v58  ;;  %v8055_v2 = vcombine.high %v5697_v20, %v5701_v23  ;;  %v5704_v9 = vld [vmem:[#allocation11 + $0x180] sm:$0xff]  ;;  %v8052_v12 = vcombine.low %v5696_v37, %v5700_v58 }
 0x5d7   :  { %v10412_v53 = vpop.permute.xlu1 %5256  ;;  %6855 = vmatpush1.bf16.msra.mxu0 %v8028_v25  ;;  %6942 = vmatprep.subr.bf16.mxu1 %v8039_v8  ;;  %v8047_v21 = vcombine.high %v5689_v46, %v5693_v51  ;;  %v8046_v25 = vcombine.low %v5689_v46, %v5693_v51  ;;  %v5712_v51 = vld [vmem:[#allocation11 + $0x1c0] sm:$0xff] }
 0x5d8   :  { %13682 = vst [vmem:[#allocation246_spill] sm:$0xff] %v10412_v53  ;;  %6856 = vmatprep.subr.bf16.mxu0 %v8037_v62  ;;  %v5708_v62 = vld [vmem:[#allocation11 + $0x1a0] sm:$0xff] }
 0x5d9   :  { %v10414_v3 = vpop.permute.xlu0 %4732  ;;  %v8061_v35 = vcombine.high %v5704_v9, %v5708_v62  ;;  %v5716_v46 = vld [vmem:[#allocation11 + $0x1e0] sm:$0xff] }
 0x5da   :  { %13683 = vst [vmem:[#allocation247_spill] sm:$0xff] %v10414_v3  ;;  %6943 = vmatpush1.bf16.msra.mxu1 %v8038_v60  ;;  %v5709_v3 = vld [vmem:[#allocation11 + $0x1a8] sm:$0xff]  ;;  %v5720_v58 = vld [vmem:[#allocation11 + $0x200] sm:$0xff] }
 0x5db   :  { %v10416_v27 = vpop.permute.xlu1 %5488  ;;  %6857 = vmatpush1.bf16.msra.mxu0 %v8036_v33  ;;  %6944 = vmatprep.subr.bf16.mxu1 %v8047_v21  ;;  %v8054_v33 = vcombine.low %v5697_v20, %v5701_v23  ;;  %v8063_v16 = vcombine.high %v5705_v48, %v5709_v3  ;;  %v5713_v60 = vld [vmem:[#allocation11 + $0x1c8] sm:$0xff]  ;;  %v8060_v21 = vcombine.low %v5704_v9, %v5708_v62  ;;  %v5724_v20 = vld [vmem:[#allocation11 + $0x220] sm:$0xff] }
 0x5dc   :  { %13684 = vst [vmem:[#allocation248_spill] sm:$0xff] %v10416_v27  ;;  %6858 = vmatprep.subr.bf16.mxu0 %v8045_v47  ;;  %v5717_v47 = vld [vmem:[#allocation11 + $0x1e8] sm:$0xff]  ;;  %v5728_v62 = vld [vmem:[#allocation11 + $0x240] sm:$0xff] }
 0x5dd   :  { %v10418_v0 = vpop.permute.xlu0 %4752  ;;  %v8071_v37 = vcombine.high %v5713_v60, %v5717_v47  ;;  %v5721_v23 = vld [vmem:[#allocation11 + $0x208] sm:$0xff] }
 0x5de   :  { %13685 = vst [vmem:[#allocation249_spill] sm:$0xff] %v10418_v0  ;;  %6945 = vmatpush1.bf16.msra.mxu1 %v8046_v25  ;;  %v8062_v0 = vcombine.low %v5705_v48, %v5709_v3  ;;  %v5725_v25 = vld [vmem:[#allocation11 + $0x228] sm:$0xff] }
 0x5df   :  { %v10420_v8 = vpop.permute.xlu1 %3128  ;;  %6859 = vmatpush1.bf16.msra.mxu0 %v8044_v63  ;;  %6946 = vmatprep.subr.bf16.mxu1 %v8055_v2  ;;  %v8077_v2 = vcombine.high %v5720_v58, %v5724_v20  ;;  %v8079_v9 = vcombine.high %v5721_v23, %v5725_v25  ;;  %v5729_v48 = vld [vmem:[#allocation11 + $0x248] sm:$0xff] }
 0x5e0   :  { %13686 = vst [vmem:[#allocation250_spill] sm:$0xff] %v10420_v8  ;;  %6860 = vmatprep.subr.bf16.mxu0 %v8053_v13  ;;  %v8069_v8 = vcombine.high %v5712_v51, %v5716_v46  ;;  %v8068_v13 = vcombine.low %v5712_v51, %v5716_v46  ;;  %v5740_v46 = vld [vmem:[#allocation11 + $0x2a0] sm:$0xff] }
 0x5e1   :  { %v10422_v34 = vpop.permute.xlu0 %4757 }
 0x5e2   :  { %13687 = vst [vmem:[#allocation251_spill] sm:$0xff] %v10422_v34  ;;  %6947 = vmatpush1.bf16.msra.mxu1 %v8054_v33  ;;  %v5732_v33 = vld [vmem:[#allocation11 + $0x260] sm:$0xff]  ;;  %v8076_v34 = vcombine.low %v5720_v58, %v5724_v20 }
 0x5e3   :  { %6861 = vmatpush1.bf16.msra.mxu0 %v8052_v12  ;;  %v10424_v63 = vpop.permute.xlu1 %3133  ;;  %6948 = vmatprep.subr.bf16.mxu1 %v8063_v16  ;;  %v8070_v12 = vcombine.low %v5713_v60, %v5717_v47  ;;  %v8085_v51 = vcombine.high %v5728_v62, %v5732_v33  ;;  %v5737_v60 = vld [vmem:[#allocation11 + $0x288] sm:$0xff]  ;;  %v5744_v20 = vld [vmem:[#allocation11 + $0x2c0] sm:$0xff] }
 0x5e4   :  { %6862 = vmatprep.subr.bf16.mxu0 %v8061_v35  ;;  %13688 = vst [vmem:[#allocation252_spill] sm:$0xff] %v10424_v63  ;;  %v5733_v35 = vld [vmem:[#allocation11 + $0x268] sm:$0xff] }
 0x5e5   :  { %v10426_v3 = vpop.permute.xlu0 %4782  ;;  %v5741_v47 = vld [vmem:[#allocation11 + $0x2a8] sm:$0xff] }
 0x5e6   :  { %6949 = vmatpush1.bf16.msra.mxu1 %v8062_v0  ;;  %13689 = vst [vmem:[#allocation253_spill] sm:$0xff] %v10426_v3  ;;  %v8087_v0 = vcombine.high %v5729_v48, %v5733_v35  ;;  %v8086_v3 = vcombine.low %v5729_v48, %v5733_v35  ;;  %v8095_v58 = vcombine.high %v5737_v60, %v5741_v47  ;;  %v5753_v35 = vld [vmem:[#allocation11 + $0x308] sm:$0xff] }
 0x5e7   :  { %6863 = vmatpush1.bf16.msra.mxu0 %v8060_v21  ;;  %6950 = vmatprep.subr.bf16.mxu1 %v8071_v37  ;;  %v10428_v16 = vpop.permute.xlu1 %3370  ;;  %v8078_v21 = vcombine.low %v5721_v23, %v5725_v25  ;;  %v8084_v37 = vcombine.low %v5728_v62, %v5732_v33  ;;  %v5748_v23 = vld [vmem:[#allocation11 + $0x2e0] sm:$0xff]  ;;  %v5745_v25 = vld [vmem:[#allocation11 + $0x2c8] sm:$0xff] }
 0x5e8   :  { %6864 = vmatprep.subr.bf16.mxu0 %v8069_v8  ;;  %13690 = vst [vmem:[#allocation254_spill] sm:$0xff] %v10428_v16  ;;  %v5736_v8 = vld [vmem:[#allocation11 + $0x280] sm:$0xff] }
 0x5e9   :  { %v10430_v63 = vpop.permute.xlu0 %4787  ;;  %v8093_v16 = vcombine.high %v5736_v8, %v5740_v46  ;;  %v5752_v33 = vld [vmem:[#allocation11 + $0x300] sm:$0xff] }
 0x5ea   :  { %6951 = vmatpush1.bf16.msra.mxu1 %v8070_v12  ;;  %13691 = vst [vmem:[#allocation255_spill] sm:$0xff] %v10430_v63  ;;  %v5749_v12 = vld [vmem:[#allocation11 + $0x2e8] sm:$0xff]  ;;  %v8100_v63 = vcombine.low %v5744_v20, %v5748_v23 }
 0x5eb   :  { %6865 = vmatpush1.bf16.msra.mxu0 %v8068_v13  ;;  %6952 = vmatprep.subr.bf16.mxu1 %v8079_v9  ;;  %v10432_v13 = vpop.permute.xlu1 %3602  ;;  %v8101_v9 = vcombine.high %v5744_v20, %v5748_v23  ;;  %v8103_v62 = vcombine.high %v5745_v25, %v5749_v12  ;;  %v5768_v23 = vld [vmem:[#allocation11 + $0x380] sm:$0xff] }
 0x5ec   :  { %6866 = vmatprep.subr.bf16.mxu0 %v8077_v2  ;;  %13692 = vst [vmem:[#allocation256_spill] sm:$0xff] %v10432_v13  ;;  %v8092_v2 = vcombine.low %v5736_v8, %v5740_v46  ;;  %v5764_v46 = vld [vmem:[#allocation11 + $0x360] sm:$0xff] }
 0x5ed   :  { %v10434_v48 = vpop.permute.xlu0 %4959 }
 0x5ee   :  { %6953 = vmatpush1.bf16.msra.mxu1 %v8078_v21  ;;  %v5756_v21 = vld [vmem:[#allocation11 + $0x320] sm:$0xff]  ;;  %13693 = vst [vmem:[#allocation257_spill] sm:$0xff] %v10434_v48 }
 0x5ef   :  { %6867 = vmatpush1.bf16.msra.mxu0 %v8076_v34  ;;  %6954 = vmatprep.subr.bf16.mxu1 %v8087_v0  ;;  %v8094_v34 = vcombine.low %v5737_v60, %v5741_v47  ;;  %v10436_v0 = vpop.permute.xlu1 %3839  ;;  %v8109_v8 = vcombine.high %v5752_v33, %v5756_v21  ;;  %v5761_v60 = vld [vmem:[#allocation11 + $0x348] sm:$0xff] }
 0x5f0   :  { %6868 = vmatprep.subr.bf16.mxu0 %v8085_v51  ;;  %v5757_v51 = vld [vmem:[#allocation11 + $0x328] sm:$0xff]  ;;  %13694 = vst [vmem:[#allocation258_spill] sm:$0xff] %v10436_v0 }
 0x5f1   :  { %v5765_v47 = vld [vmem:[#allocation11 + $0x368] sm:$0xff]  ;;  %v10438_v13 = vpop.permute.xlu0 %4974  ;;  %v8110_v48 = vcombine.low %v5753_v35, %v5757_v51 }
 0x5f2   :  { %6955 = vmatpush1.bf16.msra.mxu1 %v8086_v3  ;;  %v8111_v3 = vcombine.high %v5753_v35, %v5757_v51  ;;  %13695 = vst [vmem:[#allocation259_spill] sm:$0xff] %v10438_v13  ;;  %v8119_v20 = vcombine.high %v5761_v60, %v5765_v47  ;;  %v1505_v35 = vld [vmem:[%s13007_s7] sm:$0x7]  ;;  %v13245_v13 = vsub.s32 2, %v9796_v39 }
 0x5f3   :  { %6869 = vmatpush1.bf16.msra.mxu0 %v8084_v37  ;;  %6956 = vmatprep.subr.bf16.mxu1 %v8095_v58  ;;  %v8102_v37 = vcombine.low %v5745_v25, %v5749_v12  ;;  %v8108_v58 = vcombine.low %v5752_v33, %v5756_v21  ;;  %v5772_v25 = vld [vmem:[#allocation11 + $0x3a0] sm:$0xff]  ;;  %v5769_v12 = vld [vmem:[#allocation11 + $0x388] sm:$0xff] }
 0x5f4   :  { %6870 = vmatprep.subr.bf16.mxu0 %v8093_v16  ;;  %v5760_v16 = vld [vmem:[#allocation11 + $0x340] sm:$0xff] }
 0x5f5   :  { %v8117_v0 = vcombine.high %v5760_v16, %v5764_v46  ;;  %v5776_v21 = vld [vmem:[#allocation11 + $0x3c0] sm:$0xff]  ;;  %v10445_v51 = vpop.permute.xlu0 %4999 }
 0x5f6   :  { %6957 = vmatpush1.bf16.msra.mxu1 %v8094_v34  ;;  %v5773_v34 = vld [vmem:[#allocation11 + $0x3a8] sm:$0xff]  ;;  %13697 = vst [vmem:[#allocation261_spill] sm:$0xff] %v10445_v51 }
 0x5f7   :  { %6871 = vmatpush1.bf16.msra.mxu0 %v8092_v2  ;;  %6958 = vmatprep.subr.bf16.mxu1 %v8103_v62  ;;  %v10440_v2 = vpop.permute.xlu1 %3844  ;;  %v8125_v62 = vcombine.high %v5768_v23, %v5772_v25  ;;  %v8127_v33 = vcombine.high %v5769_v12, %v5773_v34 }
 0x5f8   :  { %6872 = vmatprep.subr.bf16.mxu0 %v8101_v9  ;;  %13696 = vst [vmem:[#allocation260_spill] sm:$0xff] %v10440_v2  ;;  %v8116_v9 = vcombine.low %v5760_v16, %v5764_v46  ;;  %v10451_v46 = vrot.slane %v1505_v35, %v9806_v18 }
 0x5fa   :  { %6959 = vmatpush1.bf16.msra.mxu1 %v8102_v37  ;;  %v5780_v37 = vld [vmem:[#allocation11 + $0x3e0] sm:$0xff] }
 0x5fb   :  { %6873 = vmatpush1.bf16.msra.mxu0 %v8100_v63  ;;  %6960 = vmatprep.subr.bf16.mxu1 %v8111_v3  ;;  %v8118_v63 = vcombine.low %v5761_v60, %v5765_v47  ;;  %v5781_v3 = vld [vmem:[#allocation11 + $0x3e8] sm:$0xff]  ;;  %v8133_v16 = vcombine.high %v5776_v21, %v5780_v37  ;;  %v10454_v47 = vrot.slane %v1505_v35, %v9813_v56 }
 0x5fc   :  { %6874 = vmatprep.subr.bf16.mxu0 %v8109_v8  ;;  %v5777_v8 = vld [vmem:[#allocation11 + $0x3c8] sm:$0xff]  ;;  %v8132_v51 = vcombine.low %v5776_v21, %v5780_v37 }
 0x5fd   :  { %v8135_v60 = vcombine.high %v5777_v8, %v5781_v3 }
 0x5fe   :  { %6961 = vmatpush1.bf16.msra.mxu1 %v8110_v48  ;;  %v8124_v48 = vcombine.low %v5768_v23, %v5772_v25  ;;  %v10460_v23 = vpop.permute.xlu0 %5004  ;;  %v8134_v25 = vcombine.low %v5777_v8, %v5781_v3 }
 0x5ff   :  { %6875 = vmatpush1.bf16.msra.mxu0 %v8108_v58  ;;  %6962 = vmatprep.subr.bf16.mxu1 %v8119_v20  ;;  %v10448_v58 = vpop.permute.xlu1 %4081  ;;  %v10458_v20 = vrot.slane %v1505_v35, %v13245_v13  ;;  %13699 = vst [vmem:[#allocation263_spill] sm:$0xff] %v10460_v23 }
 0x600   :  { %6876 = vmatprep.subr.bf16.mxu0 %v8117_v0  ;;  %13698 = vst [vmem:[#allocation262_spill] sm:$0xff] %v10448_v58  ;;  %v8126_v0 = vcombine.low %v5769_v12, %v5773_v34 }
 0x602   :  { %6963 = vmatpush1.bf16.msra.mxu1 %v8118_v63  ;;  %v10472_v45 = vpop.permute.xlu0 %5029 }
 0x603   :  { %6877 = vmatpush1.bf16.msra.mxu0 %v8116_v9  ;;  %6964 = vmatprep.subr.bf16.mxu1 %v8127_v33  ;;  %v10463_v63 = vpop.permute.xlu1 %4313  ;;  %13701 = vst [vmem:[#allocation265_spill] sm:$0xff] %v10472_v45 }
 0x604   :  { %6878 = vmatprep.subr.bf16.mxu0 %v8125_v62  ;;  %13700 = vst [vmem:[#allocation264_spill] sm:$0xff] %v10463_v63 }
 0x606   :  { %6965 = vmatpush1.bf16.msra.mxu1 %v8126_v0 }
 0x607   :  { %6879 = vmatpush1.bf16.msra.mxu0 %v8124_v48  ;;  %6966 = vmatprep.subr.bf16.mxu1 %v8135_v60 }
 0x608   :  { %6880 = vmatprep.subr.bf16.mxu0 %v8133_v16 }
 0x60a   :  { %6967 = vmatpush1.bf16.msra.mxu1 %v8134_v25 }
 0x60b   :  { %6881 = vmatpush1.bf16.msra.mxu0 %v8132_v51 }
 0x640   :  { %v1556_v9 = vpop.f32.mrb[80].mxu0 }
 0x641   :  { %v1557_v12 = vadd.f32 %v1556_v9, %v10451_v46  ;;  %v1558_v34 = vpop.f32.mrb[81].mxu0 }
 0x642   :  { %v1559_v62 = vadd.f32 %v1558_v34, %v10454_v47  ;;  %v1560_v33 = vpop.f32.mrb[82].mxu0  ;;  %v8551_v56 = vpop.f32.mrb[80].mxu1 }
 0x643   :  { %v1561_v35 = vadd.f32 %v1560_v33, %v10451_v46  ;;  %v1678_v21 = vadd.f32 %v8551_v56, %v10458_v20  ;;  %v1562_v37 = vpop.f32.mrb[83].mxu0  ;;  %v1669_v48 = vpop.f32.mrb[81].mxu1  ;;  %v1732_v16 = vmax.f32 %v1557_v12, 0.0 }
 0x644   :  { %v1563_v0 = vadd.f32 %v1562_v37, %v10454_v47  ;;  %v1670_v8 = vadd.f32 %v1669_v48, %v10458_v20  ;;  %v8552_v3 = vpop.f32.mrb[82].mxu1  ;;  %v1733_v18 = vmax.f32 %v1559_v62, 0.0 }
 0x645   :  { %v1735_v9 = vmax.f32 %v1561_v35, 0.0  ;;  %v1740_v60 = vmax.f32 %v1678_v21, 0.0  ;;  %v1681_v34 = vadd.f32 %v8552_v3, %v10458_v20  ;;  %v1672_v13 = vpop.f32.mrb[83].mxu1  ;;  %v10475_v35 = vpop.permute.xlu1 %4550 }
 0x646   :  { %v1736_v23 = vmax.f32 %v1563_v0, 0.0  ;;  %v1734_v33 = vmax.f32 %v1670_v8, 0.0  ;;  %v1673_v56 = vadd.f32 %v1672_v13, %v10458_v20  ;;  %13702 = vst [vmem:[#allocation266_spill] sm:$0xff] %v10475_v35  ;;  %v9102_v0 = vmov 1966171168  }
 0x647   :  { %v1780_v63 = vpack.c.bf16 %v1735_v9, %v1732_v16  ;;  %v1743_v58 = vmax.f32 %v1681_v34, 0.0  ;;  %v2064_v8 = vunpack.c.l.s4 %v9102_v0 }
 0x648   :  { %v1781_v51 = vpack.c.bf16 %v1736_v23, %v1733_v18  ;;  %v1737_v2 = vmax.f32 %v1673_v56, 0.0  ;;  %v1566_v37 = vpop.f32.mrb[84].mxu0 }
 0x649   :  { %v1785_v48 = vpack.c.bf16 %v1743_v58, %v1740_v60  ;;  %v1567_v25 = vadd.f32 %v1566_v37, %v10451_v46  ;;  %v1568_v12 = vpop.f32.mrb[85].mxu0  ;;  %v2065_v0 = vunpack.c.0.s8 %v2064_v8  ;;  %v10483_v59 = vunpack.c.h.bf16 %v1780_v63  ;;  %v5434_v8 = vpop.permute.xlu0 %5433 }
 0x64a   :  { %v1782_v21 = vpack.c.bf16 %v1737_v2, %v1734_v33  ;;  %v1570_v3 = vpop.f32.mrb[86].mxu0  ;;  %v8555_v62 = vpop.f32.mrb[84].mxu1  ;;  %v1569_v13 = vadd.f32 %v1568_v12, %v10454_v47 }
 0x64b   :  { %v1571_v16 = vadd.f32 %v1570_v3, %v10451_v46  ;;  %v1572_v18 = vpop.f32.mrb[87].mxu0  ;;  %v1685_v23 = vpop.f32.mrb[85].mxu1  ;;  %v1738_v9 = vmax.f32 %v1567_v25, 0.0  ;;  %v1694_v34 = vadd.f32 %v8555_v62, %v10458_v20  ;;  %13703 = vst [vmem:[#allocation267_spill] sm:$0xff] %v10483_v59  ;;  %v10485_v25 = vunpack.c.h.bf16 %v1781_v51 }
 0x64c   :  { %v8556_v58 = vpop.f32.mrb[86].mxu1  ;;  %v1573_v56 = vadd.f32 %v1572_v18, %v10454_v47  ;;  %v1686_v37 = vadd.f32 %v1685_v23, %v10458_v20  ;;  %v1739_v35 = vmax.f32 %v1569_v13, 0.0  ;;  %v10488_v18 = vpop.permute.xlu1 %4555  ;;  %v10490_v23 = vunpack.c.h.bf16 %v1782_v21 }
 0x64d   :  { %v1741_v60 = vmax.f32 %v1571_v16, 0.0  ;;  %v1697_v2 = vadd.f32 %v8556_v58, %v10458_v20  ;;  %v1688_v33 = vpop.f32.mrb[87].mxu1  ;;  %v1752_v45 = vmax.f32 %v1694_v34, 0.0  ;;  %13704 = vst [vmem:[#allocation268_spill] sm:$0xff] %v10485_v25  ;;  %13705 = vst [vmem:[#allocation269_spill] sm:$0xff] %v10488_v18  ;;  %v10496_v34 = vunpack.c.l.bf16 %v1782_v21 }
 0x64e   :  { %v1742_v41 = vmax.f32 %v1573_v56, 0.0  ;;  %v1746_v62 = vmax.f32 %v1686_v37, 0.0  ;;  %v1689_v16 = vadd.f32 %v1688_v33, %v10458_v20  ;;  %13706 = vst [vmem:[#allocation270_spill] sm:$0xff] %v10490_v23  ;;  %v10499_v37 = vsub.s32 %v2065_v0, %v9796_v39 }
 0x64f   :  { %v1783_v12 = vpack.c.bf16 %v1741_v60, %v1738_v9  ;;  %v1755_v3 = vmax.f32 %v1697_v2, 0.0  ;;  %v10494_v9 = vunpack.c.h.bf16 %v1785_v48  ;;  %13708 = vst [vmem:[#allocation272_spill] sm:$0xff] %v10496_v34  ;;  %v10501_v33 = vunpack.c.l.bf16 %v1780_v63 }
 0x650   :  { %v1576_v36 = vpop.f32.mrb[88].mxu0  ;;  %v1784_v58 = vpack.c.bf16 %v1742_v41, %v1739_v35  ;;  %v1749_v60 = vmax.f32 %v1689_v16, 0.0  ;;  %13709 = vst [vmem:[#allocation273_spill] sm:$0xff] %v10499_v37  ;;  %v10503_v18 = vunpack.c.l.bf16 %v1781_v51  ;;  %v10507_v32 = vunpack.c.l.bf16 %v1785_v48  ;;  %v10526_v50 = vpop.permute.xlu1 %4792 }
 0x651   :  { %v10492_v55 = vpack.c.bf16 %v1755_v3, %v1752_v45  ;;  %v1578_v13 = vpop.f32.mrb[89].mxu0  ;;  %13707 = vst [vmem:[#allocation271_spill] sm:$0xff] %v10494_v9  ;;  %13710 = vst [vmem:[#allocation274_spill] sm:$0xff] %v10501_v33  ;;  %v1577_v41 = vadd.f32 %v1576_v36, %v10451_v46  ;;  %v10510_v21 = vmul.f32 %v5434_v8, %v10483_v59  ;;  %v10521_v48 = vunpack.c.h.bf16 %v1783_v12 }
 0x652   :  { %v1580_v56 = vpop.f32.mrb[90].mxu0  ;;  %v8559_v2 = vpop.f32.mrb[88].mxu1  ;;  %13711 = vst [vmem:[#allocation275_spill] sm:$0xff] %v10503_v18  ;;  %v1579_v45 = vadd.f32 %v1578_v13, %v10454_v47  ;;  %13712 = vst [vmem:[#allocation276_spill] sm:$0xff] %v10507_v32  ;;  %v10513_v16 = vmul.f32 %v5434_v8, %v10485_v25  ;;  %v1788_v0 = vpack.c.bf16 %v1749_v60, %v1746_v62  ;;  %v10534_v59 = vunpack.c.h.bf16 %v1784_v58 }
 0x653   :  { %v1582_v35 = vpop.f32.mrb[91].mxu0  ;;  %v1701_v3 = vpop.f32.mrb[89].mxu1  ;;  %13713 = vst [vmem:[#allocation277_spill] sm:$0xff] %v10510_v21  ;;  %v10516_v63 = vmul.f32 %v5434_v8, %v10490_v23  ;;  %v1581_v51 = vadd.f32 %v1580_v56, %v10451_v46  ;;  %v1710_v36 = vadd.f32 %v8559_v2, %v10458_v20  ;;  %13715 = vst [vmem:[#allocation279_spill] sm:$0xff] %v10521_v48  ;;  %v1744_v8 = vmax.f32 %v1577_v41, 0.0 }
 0x654   :  { %13714 = vst [vmem:[#allocation278_spill] sm:$0xff] %v10513_v16  ;;  %v8560_v39 = vpop.f32.mrb[90].mxu1  ;;  %v1583_v13 = vadd.f32 %v1582_v35, %v10454_v47  ;;  %v5517_v57 = vmul.f32 %v9884_v10, %v10494_v9  ;;  %v1702_v31 = vadd.f32 %v1701_v3, %v10458_v20  ;;  %13716 = vst [vmem:[#allocation280_spill] sm:$0xff] %v10526_v50  ;;  %v1745_v60 = vmax.f32 %v1579_v45, 0.0 }
 0x655   :  { %v1704_v37 = vpop.f32.mrb[91].mxu1  ;;  %v10530_v62 = vmul.f32 %v9862_v22, %v10496_v34  ;;  %v1747_v56 = vmax.f32 %v1581_v51, 0.0  ;;  %v1764_v29 = vmax.f32 %v1710_v36, 0.0  ;;  %v1713_v28 = vadd.f32 %v8560_v39, %v10458_v20  ;;  %13717 = vst [vmem:[#allocation281_spill] sm:$0xff] %v10534_v59 }
 0x656   :  { %v1748_v2 = vmax.f32 %v1583_v13, 0.0  ;;  %v1758_v35 = vmax.f32 %v1702_v31, 0.0  ;;  %v1705_v25 = vadd.f32 %v1704_v37, %v10458_v20  ;;  %v10536_v3 = vunpack.c.h.bf16 %v1788_v0 }
 0x657   :  { %v10538_v50 = vpack.c.bf16 %v1747_v56, %v1744_v8  ;;  %v1767_v41 = vmax.f32 %v1713_v28, 0.0  ;;  %v10544_v13 = vunpack.c.l.bf16 %v1783_v12  ;;  %v10546_v37 = vunpack.c.l.bf16 %v1784_v58  ;;  %v10556_v56 = vpop.permute.xlu1 %5024 }
 0x658   :  { %v1586_v30 = vpop.f32.mrb[92].mxu0  ;;  %13718 = vst [vmem:[#allocation282_spill] sm:$0xff] %v10536_v3  ;;  %v10540_v18 = vpack.c.bf16 %v1748_v2, %v1745_v60  ;;  %v1761_v45 = vmax.f32 %v1705_v25, 0.0  ;;  %v5597_v43 = vmax.f32 %v10516_v63, %v5517_v57  ;;  %v5514_v60 = vmul.f32 %v9872_v26, %v10507_v32  ;;  %13724 = vst [vmem:[#allocation288_spill] sm:$0xff] %v10556_v56 }
 0x659   :  { %v1588_v22 = vpop.f32.mrb[93].mxu0  ;;  %v1587_v51 = vadd.f32 %v1586_v30, %v10451_v46  ;;  %13720 = vst [vmem:[#allocation284_spill] sm:$0xff] %v10544_v13  ;;  %13721 = vst [vmem:[#allocation285_spill] sm:$0xff] %v10546_v37  ;;  %v10552_v28 = vunpack.c.h.bf16 %v10492_v55  ;;  %v10554_v25 = vunpack.c.l.bf16 %v1788_v0  ;;  %v1797_v30 = vpack.c.bf16 %v1767_v41, %v1764_v29  ;;  %v10571_v0 = vpop.permute.xlu0 %5463 }
 0x65a   :  { %13719 = vst [vmem:[#allocation283_spill] sm:$0xff] %v10540_v18  ;;  %v1589_v31 = vadd.f32 %v1588_v22, %v10454_v47  ;;  %v1590_v36 = vpop.f32.mrb[94].mxu0  ;;  %v8563_v39 = vpop.f32.mrb[92].mxu1  ;;  %v1794_v22 = vpack.c.bf16 %v1761_v45, %v1758_v35  ;;  %v5523_v58 = vmul.f32 %v10011_v6, %v10536_v3  ;;  %v10565_v37 = vmul.f32 %v9884_v10, %v10521_v48 }
 0x65b   :  { %v1592_v33 = vpop.f32.mrb[95].mxu0  ;;  %v1717_v8 = vpop.f32.mrb[93].mxu1  ;;  %13722 = vst [vmem:[#allocation286_spill] sm:$0xff] %v10552_v28  ;;  %13723 = vst [vmem:[#allocation287_spill] sm:$0xff] %v10554_v25  ;;  %v1591_v57 = vadd.f32 %v1590_v36, %v10451_v46  ;;  %v1726_v63 = vadd.f32 %v8563_v39, %v10458_v20  ;;  %v10569_v29 = vmul.f32 %v9884_v10, %v10534_v59  ;;  %v1750_v35 = vmax.f32 %v1587_v51, 0.0 }
 0x65c   :  { %v8564_v12 = vpop.f32.mrb[94].mxu1  ;;  %v1593_v2 = vadd.f32 %v1592_v33, %v10454_v47  ;;  %13725 = vst [vmem:[#allocation289_spill] sm:$0xff] %v10565_v37  ;;  %13727 = vst [vmem:[#allocation291_spill] sm:$0xff] %v10571_v0  ;;  %v1751_v41 = vmax.f32 %v1589_v31, 0.0  ;;  %v10573_v45 = vunpack.c.h.bf16 %v1794_v22  ;;  %v1718_v39 = vadd.f32 %v1717_v8, %v10458_v20  ;;  %v10593_v18 = vpop.permute.xlu1 %5261 }
 0x65d   :  { %v1720_v26 = vpop.f32.mrb[95].mxu1  ;;  %13726 = vst [vmem:[#allocation290_spill] sm:$0xff] %v10569_v29  ;;  %v1753_v36 = vmax.f32 %v1591_v57, 0.0  ;;  %v10577_v33 = vunpack.c.l.bf16 %v10492_v55  ;;  %v1776_v56 = vmax.f32 %v1726_v63, 0.0  ;;  %v1729_v48 = vadd.f32 %v8564_v12, %v10458_v20  ;;  %13731 = vst [vmem:[#allocation295_spill] sm:$0xff] %v10593_v18 }
 0x65e   :  { %13728 = vst [vmem:[#allocation292_spill] sm:$0xff] %v10573_v45  ;;  %v1754_v6 = vmax.f32 %v1593_v2, 0.0  ;;  %v5520_v10 = vmul.f32 %v10000_v17, %v10554_v25  ;;  %v5529_v51 = vmul.f32 %v10571_v0, %v10552_v28  ;;  %v5599_v31 = vmax.f32 %v5597_v43, %v5523_v58 }
 0x65f   :  { %13729 = vst [vmem:[#allocation293_spill] sm:$0xff] %v10577_v33  ;;  %v10584_v13 = vpack.c.bf16 %v1753_v36, %v1750_v35  ;;  %v10590_v8 = vunpack.c.l.bf16 %v1794_v22  ;;  %v1779_v63 = vmax.f32 %v1729_v48, 0.0  ;;  %v5596_v12 = vmax.f32 %v10530_v62, %v5514_v60  ;;  %v10602_v35 = vpop.permute.xlu0 %5468 }
 0x660   :  { %v1596_v59 = vpop.f32.mrb[96].mxu0  ;;  %v10586_v57 = vpack.c.bf16 %v1754_v6, %v1751_v41  ;;  %v10598_v43 = vunpack.c.l.bf16 %v10538_v50  ;;  %v5535_v6 = vmul.f32 %v10288_v4, %v10573_v45  ;;  %v1770_v58 = vmax.f32 %v1718_v39, 0.0  ;;  %13733 = vst [vmem:[#allocation297_spill] sm:$0xff] %v10602_v35  ;;  %v10625_v21 = vpop.permute.xlu1 %5266 }
 0x661   :  { %v1598_v2 = vpop.f32.mrb[97].mxu0  ;;  %13730 = vst [vmem:[#allocation294_spill] sm:$0xff] %v10590_v8  ;;  %v1803_v41 = vpack.c.bf16 %v1779_v63, %v1776_v56  ;;  %v5598_v48 = vmax.f32 %v5596_v12, %v5520_v10  ;;  %v1721_v62 = vadd.f32 %v1720_v26, %v10458_v20  ;;  %v5271_v60 = vmul.f32 %v10283_v1, %v10496_v34 }
 0x662   :  { %v1600_v17 = vpop.f32.mrb[98].mxu0  ;;  %13732 = vst [vmem:[#allocation296_spill] sm:$0xff] %v10598_v43  ;;  %v10607_v36 = vunpack.c.l.bf16 %v1797_v30  ;;  %v5601_v0 = vmax.f32 %v5599_v31, %v5529_v51  ;;  %v5277_v55 = vmul.f32 %v9851_v52, %v10507_v32  ;;  %v5283_v29 = vmul.f32 %v9993_v24, %v10554_v25  ;;  %13736 = vst [vmem:[#allocation300_spill] sm:$0xff] %v10625_v21  ;;  %v13778_v52 = vld [vmem:[#allocation279_spill] sm:$0xff] }
 0x663   :  { %v1602_v22 = vpop.f32.mrb[99].mxu0  ;;  %v10613_v39 = vunpack.c.h.bf16 %v1797_v30  ;;  %v5526_v56 = vmul.f32 %v10140_v11, %v10577_v33  ;;  %v5532_v26 = vmul.f32 %v10602_v35, %v10590_v8  ;;  %v1773_v20 = vmax.f32 %v1721_v62, 0.0 }
 0x664   :  { %13734 = vst [vmem:[#allocation298_spill] sm:$0xff] %v10607_v36  ;;  %v5603_v10 = vmax.f32 %v5601_v0, %v5535_v6  ;;  %v5289_v63 = vmul.f32 %v10304_v44, %v10577_v33  ;;  %v5359_v51 = vmax.f32 %v5271_v60, %v5277_v55  ;;  %v1597_v31 = vadd.f32 %v1596_v59, %v10451_v46  ;;  %v10632_v6 = vpop.permute.xlu0 %5493 }
 0x665   :  { %13735 = vst [vmem:[#allocation299_spill] sm:$0xff] %v10613_v39  ;;  %v5600_v12 = vmax.f32 %v5598_v48, %v5526_v56  ;;  %v1800_v16 = vpack.c.bf16 %v1773_v20, %v1770_v58  ;;  %v5295_v30 = vmul.f32 %v10273_v15, %v10590_v8  ;;  %v1601_v37 = vadd.f32 %v1600_v17, %v10451_v46 }
 0x666   :  { %v10627_v11 = vunpack.c.l.bf16 %v1803_v41  ;;  %v5361_v62 = vmax.f32 %v5359_v51, %v5283_v29  ;;  %v1599_v0 = vadd.f32 %v1598_v2, %v10454_v47  ;;  %v5274_v55 = vmul.f32 %v9840_v42, %v10490_v23  ;;  %13737 = vst [vmem:[#allocation301_spill] sm:$0xff] %v10632_v6  ;;  %v13779_v42 = vld [vmem:[#allocation21_spill] sm:$0xff] }
 0x667   :  { %v5602_v58 = vmax.f32 %v5600_v12, %v5532_v26  ;;  %v10634_v48 = vunpack.c.l.bf16 %v1800_v16  ;;  %v1756_v60 = vmax.f32 %v1597_v31, 0.0  ;;  %v1759_v56 = vmax.f32 %v1601_v37, 0.0 }
 0x668   :  { %v1606_v4 = vpop.f32.mrb[100].mxu0  ;;  %v10636_v20 = vunpack.c.h.bf16 %v1800_v16  ;;  %v5363_v35 = vmax.f32 %v5361_v62, %v5289_v63  ;;  %v5280_v29 = vmul.f32 %v10291_v38, %v10494_v9  ;;  %v5286_v2 = vmul.f32 %v10298_v5, %v10536_v3 }
 0x669   :  { %v1608_v59 = vpop.f32.mrb[101].mxu0  ;;  %13738 = vst [vmem:[#allocation302_spill] sm:$0xff] %v10634_v48  ;;  %v10642_v15 = vunpack.c.h.bf16 %v1803_v41  ;;  %v5538_v26 = vmul.f32 %v10356_v61, %v10607_v36  ;;  %v5301_v31 = vmul.f32 %v10352_v14, %v10607_v36  ;;  %v10648_v37 = vpack.c.bf16 %v1759_v56, %v1756_v60 }
 0x66a   :  { %v1610_v17 = vpop.f32.mrb[102].mxu0  ;;  %13739 = vst [vmem:[#allocation303_spill] sm:$0xff] %v10636_v20  ;;  %v10652_v16 = vmul.f32 %v10593_v18, %v10627_v11  ;;  %v5365_v63 = vmax.f32 %v5363_v35, %v5295_v30  ;;  %v1757_v12 = vmax.f32 %v1599_v0, 0.0  ;;  %v5360_v62 = vmax.f32 %v5274_v55, %v5280_v29  ;;  %v10665_v30 = vpop.permute.xlu1 %5503 }
 0x66b   :  { %v1612_v51 = vpop.f32.mrb[103].mxu0  ;;  %13740 = vst [vmem:[#allocation304_spill] sm:$0xff] %v10642_v15  ;;  %v5604_v44 = vmax.f32 %v5602_v58, %v5538_v26  ;;  %v5307_v41 = vmul.f32 %v10314_v54, %v10634_v48  ;;  %v5292_v5 = vmul.f32 %v10131_v7, %v10552_v28  ;;  %v5298_v61 = vmul.f32 %v10281_v49, %v10573_v45  ;;  %v10667_v0 = vpop.permute.xlu0 %5498 }
 0x66c   :  { %v5362_v14 = vmax.f32 %v5360_v62, %v5286_v2  ;;  %v5541_v60 = vmul.f32 %v10360_v40, %v10613_v39  ;;  %v5547_v56 = vmul.f32 %v10632_v6, %v10636_v20  ;;  %v1603_v35 = vadd.f32 %v1602_v22, %v10454_v47  ;;  %13741 = vst [vmem:[#allocation305_spill] sm:$0xff] %v10665_v30 }
 0x66d   :  { %13742 = vst [vmem:[#allocation306_spill] sm:$0xff] %v10667_v0  ;;  %v5304_v55 = vmul.f32 %v10309_v19, %v10613_v39  ;;  %v5310_v58 = vmul.f32 %v10412_v53, %v10636_v20  ;;  %v5544_v29 = vmul.f32 %v10416_v27, %v10634_v48  ;;  %v1607_v2 = vadd.f32 %v1606_v4, %v10451_v46 }
 0x66e   :  { %v5367_v62 = vmax.f32 %v5365_v63, %v5301_v31  ;;  %v5364_v6 = vmax.f32 %v5362_v14, %v5292_v5  ;;  %v5605_v40 = vmax.f32 %v5603_v10, %v5541_v60  ;;  %v1760_v22 = vmax.f32 %v1603_v35, 0.0 }
 0x66f   :  { %v5553_v54 = vmul.f32 %v10665_v30, %v10642_v15  ;;  %v5550_v19 = vmul.f32 %v10667_v0, %v10627_v11  ;;  %v1609_v49 = vadd.f32 %v1608_v59, %v10454_v47  ;;  %v1611_v53 = vadd.f32 %v1610_v17, %v10451_v46  ;;  %v13777_v0 = vld [vmem:[#allocation285_spill] sm:$0xff] }
 0x670   :  { %v1616_v26 = vpop.f32.mrb[104].mxu0  ;;  %v5369_v27 = vmax.f32 %v5367_v62, %v5307_v41  ;;  %v5366_v24 = vmax.f32 %v5364_v6, %v5298_v61  ;;  %v5607_v4 = vmax.f32 %v5605_v40, %v5547_v56  ;;  %v1793_v38 = vpack.c.bf16 %v1760_v22, %v1757_v12  ;;  %v13744_v22 = vld [vmem:[#allocation283_spill] sm:$0xff] }
 0x671   :  { %v1618_v18 = vpop.f32.mrb[105].mxu0  ;;  %v5606_v14 = vmax.f32 %v5604_v44, %v5544_v29  ;;  %v1762_v5 = vmax.f32 %v1607_v2, 0.0  ;;  %v1765_v10 = vmax.f32 %v1611_v53, 0.0  ;;  %v1613_v63 = vadd.f32 %v1612_v51, %v10454_v47 }
 0x672   :  { %v1620_v7 = vpop.f32.mrb[106].mxu0  ;;  %v10684_v60 = vunpack.c.h.bf16 %v10538_v50  ;;  %v5316_v35 = vmul.f32 %v10625_v21, %v10642_v15  ;;  %v5368_v59 = vmax.f32 %v5366_v24, %v5304_v55  ;;  %v1617_v17 = vadd.f32 %v1616_v26, %v10451_v46 }
 0x673   :  { %v1622_v31 = vpop.f32.mrb[107].mxu0  ;;  %v1763_v30 = vmax.f32 %v1609_v49, 0.0  ;;  %v1795_v41 = vpack.c.bf16 %v1765_v10, %v1762_v5  ;;  %v1766_v61 = vmax.f32 %v1613_v63, 0.0  ;;  %v1619_v40 = vadd.f32 %v1618_v18, %v10454_v47 }
 0x674   :  { %13743 = vst [vmem:[#allocation307_spill] sm:$0xff] %v10684_v60  ;;  %v5371_v44 = vmax.f32 %v5369_v27, %v10652_v16  ;;  %v5370_v6 = vmax.f32 %v5368_v59, %v5310_v58  ;;  %v1621_v53 = vadd.f32 %v1620_v7, %v10451_v46  ;;  %v1623_v51 = vadd.f32 %v1622_v31, %v10454_v47 }
 0x675   :  { %v5609_v50 = vmax.f32 %v5607_v4, %v5553_v54  ;;  %v5608_v12 = vmax.f32 %v5606_v14, %v5550_v19  ;;  %v1796_v56 = vpack.c.bf16 %v1766_v61, %v1763_v30  ;;  %v1768_v29 = vmax.f32 %v1617_v17, 0.0 }
 0x676   :  { %v5372_v24 = vmax.f32 %v5370_v6, %v5316_v35  ;;  %v1769_v55 = vmax.f32 %v1619_v40, 0.0  ;;  %v1771_v26 = vmax.f32 %v1621_v53, 0.0  ;;  %v1772_v49 = vmax.f32 %v1623_v51, 0.0 }
 0x677   :  { %v10694_v5 = vunpack.c.l.bf16 %v13744_v22  ;;  %v10697_v27 = vunpack.c.h.bf16 %v13744_v22  ;;  %v10700_v7 = vunpack.c.l.bf16 %v10584_v13  ;;  %v10705_v31 = vunpack.c.h.bf16 %v10584_v13  ;;  %v13764_v22 = vld [vmem:[#allocation274_spill] sm:$0xff] }
 0x678   :  { %v1626_v2 = vpop.f32.mrb[108].mxu0  ;;  %v5373_v18 = vmax.f32 %v5371_v44, %v5372_v24  ;;  %v1798_v16 = vpack.c.bf16 %v1771_v26, %v1768_v29  ;;  %v1799_v30 = vpack.c.bf16 %v1772_v49, %v1769_v55  ;;  %v10707_v14 = vmax.f32 %v5608_v12, %v5609_v50  ;;  %v13776_v50 = vld [vmem:[#allocation20_spill] sm:$0xff] }
 0x679   :  { %v1628_v62 = vpop.f32.mrb[109].mxu0  ;;  %13745 = vst [vmem:[#allocation283_spill] sm:$0xff] %v10694_v5  ;;  %13746 = vst [vmem:[#allocation308_spill] sm:$0xff] %v10697_v27  ;;  %v1627_v54 = vadd.f32 %v1626_v2, %v10451_v46  ;;  %v10712_v35 = vunpack.c.l.bf16 %v10586_v57  ;;  %v10715_v59 = vunpack.c.h.bf16 %v10586_v57  ;;  %v10718_v17 = vunpack.c.l.bf16 %v10648_v37 }
 0x67a   :  { %13747 = vst [vmem:[#allocation309_spill] sm:$0xff] %v10700_v7  ;;  %v1630_v19 = vpop.f32.mrb[110].mxu0  ;;  %v1629_v58 = vadd.f32 %v1628_v62, %v10454_v47  ;;  %13748 = vst [vmem:[#allocation310_spill] sm:$0xff] %v10705_v31  ;;  %v5374_v61 = vrot.slane %v5373_v18, 4  ;;  %v10721_v40 = vunpack.c.h.bf16 %v10648_v37  ;;  %v10723_v13 = vunpack.c.l.bf16 %v1793_v38 }
 0x67b   :  { %v1632_v4 = vpop.f32.mrb[111].mxu0  ;;  %13749 = vst [vmem:[#allocation311_spill] sm:$0xff] %v10707_v14  ;;  %v1631_v10 = vadd.f32 %v1630_v19, %v10451_v46  ;;  %13750 = vst [vmem:[#allocation312_spill] sm:$0xff] %v10712_v35  ;;  %v1774_v44 = vmax.f32 %v1627_v54, 0.0  ;;  %v10725_v53 = vunpack.c.h.bf16 %v1793_v38  ;;  %v10728_v57 = vunpack.c.l.bf16 %v1795_v41  ;;  %v13765_v54 = vld [vmem:[#allocation79_spill] sm:$0xff] }
 0x67c   :  { %v1633_v63 = vadd.f32 %v1632_v4, %v10454_v47  ;;  %13751 = vst [vmem:[#allocation313_spill] sm:$0xff] %v10715_v59  ;;  %13752 = vst [vmem:[#allocation314_spill] sm:$0xff] %v10718_v17  ;;  %v5375_v46 = vmax.f32 %v5373_v18, %v5374_v61  ;;  %v1775_v47 = vmax.f32 %v1629_v58, 0.0  ;;  %v10730_v12 = vunpack.c.h.bf16 %v1795_v41  ;;  %v13766_v41 = vld [vmem:[#allocation275_spill] sm:$0xff]  ;;  %v13768_v4 = vld [vmem:[#allocation82_spill] sm:$0xff] }
 0x67d   :  { %13753 = vst [vmem:[#allocation315_spill] sm:$0xff] %v10721_v40  ;;  %13754 = vst [vmem:[#allocation316_spill] sm:$0xff] %v10723_v13  ;;  %v1777_v6 = vmax.f32 %v1631_v10, 0.0  ;;  %v10732_v24 = vunpack.c.l.bf16 %v1796_v56  ;;  %v10734_v37 = vunpack.c.h.bf16 %v1796_v56  ;;  %v10736_v26 = vunpack.c.l.bf16 %v1798_v16  ;;  %v13767_v56 = vld [vmem:[#allocation267_spill] sm:$0xff]  ;;  %v13771_v61 = vld [vmem:[#allocation268_spill] sm:$0xff] }
 0x67e   :  { %13755 = vst [vmem:[#allocation317_spill] sm:$0xff] %v10725_v53  ;;  %v1778_v51 = vmax.f32 %v1633_v63, 0.0  ;;  %13756 = vst [vmem:[#allocation318_spill] sm:$0xff] %v10728_v57  ;;  %v5376_v2 = vrot.slane %v5375_v46, 2  ;;  %v10738_v49 = vunpack.c.h.bf16 %v1798_v16  ;;  %v10740_v38 = vunpack.c.l.bf16 %v1799_v30 }
 0x67f   :  { %13757 = vst [vmem:[#allocation319_spill] sm:$0xff] %v10730_v12  ;;  %v1801_v29 = vpack.c.bf16 %v1777_v6, %v1774_v44  ;;  %13758 = vst [vmem:[#allocation320_spill] sm:$0xff] %v10732_v24  ;;  %v10742_v62 = vunpack.c.h.bf16 %v1799_v30  ;;  %v1948_v19 = vmul.f32 %v13765_v54, %v13764_v22  ;;  %v1949_v18 = vmul.f32 %v13765_v54, %v13766_v41 }
 0x680   :  { %13759 = vst [vmem:[#allocation321_spill] sm:$0xff] %v10734_v37  ;;  %v1802_v55 = vpack.c.bf16 %v1778_v51, %v1775_v47  ;;  %13760 = vst [vmem:[#allocation322_spill] sm:$0xff] %v10736_v26  ;;  %v1950_v58 = vmul.f32 %v13765_v54, %v10496_v34  ;;  %v1951_v10 = vmul.f32 %v13768_v4, %v13767_v56  ;;  %v13775_v54 = vld [vmem:[#allocation284_spill] sm:$0xff] }
 0x681   :  { %13761 = vst [vmem:[#allocation323_spill] sm:$0xff] %v10738_v49  ;;  %13762 = vst [vmem:[#allocation324_spill] sm:$0xff] %v10740_v38  ;;  %v10752_v63 = vunpack.c.l.bf16 %v1801_v29  ;;  %v10754_v16 = vunpack.c.h.bf16 %v1801_v29  ;;  %v1952_v30 = vmul.f32 %v13768_v4, %v13771_v61  ;;  %v1953_v44 = vmul.f32 %v13768_v4, %v10490_v23  ;;  %v13780_v61 = vld [vmem:[#allocation281_spill] sm:$0xff] }
 0x682   :  { %13763 = vst [vmem:[#allocation325_spill] sm:$0xff] %v10742_v62  ;;  %v10760_v6 = vmax.f32 %v5375_v46, %v5376_v2  ;;  %v10762_v47 = vunpack.c.l.bf16 %v1802_v55  ;;  %v10764_v51 = vunpack.c.h.bf16 %v1802_v55  ;;  %v1954_v14 = vmul.f32 %v13776_v50, %v13775_v54  ;;  %v13781_v55 = vld [vmem:[#allocation84_spill] sm:$0xff] }
 0x683   :  { %13769 = vst [vmem:[#allocation79_spill] sm:$0xff] %v10752_v63  ;;  %13770 = vst [vmem:[#allocation82_spill] sm:$0xff] %v10754_v16  ;;  %v1955_v21 = vmul.f32 %v13776_v50, %v13777_v0  ;;  %v1956_v29 = vmul.f32 %v13776_v50, %v10507_v32  ;;  %v1957_v1 = vmul.f32 %v13779_v42, %v13778_v52  ;;  %v13782_v50 = vld [vmem:[#allocation22_spill] sm:$0xff] }
 0x684   :  { %13772 = vst [vmem:[#allocation326_spill] sm:$0xff] %v10760_v6  ;;  %13773 = vst [vmem:[#allocation327_spill] sm:$0xff] %v10762_v47  ;;  %v1958_v46 = vmul.f32 %v13779_v42, %v13780_v61  ;;  %v1959_v2 = vmul.f32 %v13779_v42, %v10494_v9  ;;  %v1960_v4 = vmul.f32 %v13781_v55, %v10598_v43  ;;  %v13783_v42 = vld [vmem:[#allocation87_spill] sm:$0xff] }
 0x685   :  { %13774 = vst [vmem:[#allocation328_spill] sm:$0xff] %v10764_v51  ;;  %v1961_v6 = vmul.f32 %v13781_v55, %v10694_v5  ;;  %v1962_v0 = vmul.f32 %v13781_v55, %v10554_v25  ;;  %v1963_v32 = vmul.f32 %v13782_v50, %v10684_v60  ;;  %v1964_v52 = vmul.f32 %v13782_v50, %v10697_v27  ;;  %v13784_v55 = vld [vmem:[#allocation23_spill] sm:$0xff] }
 0x686   :  { %v1965_v61 = vmul.f32 %v13782_v50, %v10536_v3  ;;  %v1966_v9 = vmul.f32 %v13783_v42, %v10700_v7  ;;  %v1967_v43 = vmul.f32 %v13783_v42, %v10712_v35  ;;  %v1968_v5 = vmul.f32 %v13783_v42, %v10577_v33  ;;  %v13785_v50 = vld [vmem:[#allocation91_spill] sm:$0xff]  ;;  %v13786_v42 = vld [vmem:[#allocation24_spill] sm:$0xff] }
 0x687   :  { %v1969_v25 = vmul.f32 %v13784_v55, %v10705_v31  ;;  %v1970_v60 = vmul.f32 %v13784_v55, %v10715_v59  ;;  %v1971_v27 = vmul.f32 %v13784_v55, %v10552_v28  ;;  %v1972_v3 = vmul.f32 %v13785_v50, %v10718_v17  ;;  %v13787_v55 = vld [vmem:[#allocation93_spill] sm:$0xff] }
 0x688   :  { %v1973_v7 = vmul.f32 %v13785_v50, %v10723_v13  ;;  %v1974_v35 = vmul.f32 %v13785_v50, %v10590_v8  ;;  %v1975_v33 = vmul.f32 %v13786_v42, %v10721_v40  ;;  %v1976_v31 = vmul.f32 %v13786_v42, %v10725_v53  ;;  %v13788_v50 = vld [vmem:[#allocation25_spill] sm:$0xff] }
 0x689   :  { %v1977_v59 = vmul.f32 %v13786_v42, %v10573_v45  ;;  %v1978_v28 = vmul.f32 %v13787_v55, %v10728_v57  ;;  %v1979_v17 = vmul.f32 %v13787_v55, %v10732_v24  ;;  %v1980_v13 = vmul.f32 %v13787_v55, %v10607_v36  ;;  %v13789_v42 = vld [vmem:[#allocation95_spill] sm:$0xff]  ;;  %v13790_v55 = vld [vmem:[#allocation26_spill] sm:$0xff] }
 0x68a   :  { %v1981_v8 = vmul.f32 %v13788_v50, %v10730_v12  ;;  %v1982_v40 = vmul.f32 %v13788_v50, %v10734_v37  ;;  %v1983_v53 = vmul.f32 %v13788_v50, %v10613_v39  ;;  %v1984_v45 = vmul.f32 %v13789_v42, %v10736_v26  ;;  %v13791_v50 = vld [vmem:[#allocation97_spill] sm:$0xff] }
 0x68b   :  { %v1985_v57 = vmul.f32 %v13789_v42, %v10740_v38  ;;  %v1986_v24 = vmul.f32 %v13789_v42, %v10634_v48  ;;  %v1987_v36 = vmul.f32 %v13790_v55, %v10738_v49  ;;  %v1988_v12 = vmul.f32 %v13790_v55, %v10742_v62 }
 0x68c   :  { %v1989_v37 = vmul.f32 %v13790_v55, %v10636_v20  ;;  %v1990_v39 = vmul.f32 %v13791_v50, %v10752_v63  ;;  %v1996_v54 = vmax.f32 %v1948_v19, %v1954_v14  ;;  %v1997_v26 = vmax.f32 %v1951_v10, %v1957_v1  ;;  %v13792_v55 = vld [vmem:[#allocation27_spill] sm:$0xff] }
 0x68d   :  { %v2017_v23 = vmax.f32 %v1949_v18, %v1955_v21  ;;  %v2018_v56 = vmax.f32 %v1952_v30, %v1958_v46  ;;  %v1991_v38 = vmul.f32 %v13791_v50, %v10762_v47  ;;  %v1992_v42 = vmul.f32 %v13791_v50, %v10627_v11 }
 0x68e   :  { %v2038_v49 = vmax.f32 %v1950_v58, %v1956_v29  ;;  %v2039_v48 = vmax.f32 %v1953_v44, %v1959_v2  ;;  %v1998_v34 = vmax.f32 %v1996_v54, %v1960_v4  ;;  %v1999_v62 = vmax.f32 %v1997_v26, %v1963_v32  ;;  %v13793_v32 = vld [vmem:[#allocation274_spill] sm:$0xff] }
 0x68f   :  { %v2019_v41 = vmax.f32 %v2017_v23, %v1961_v6  ;;  %v2020_v22 = vmax.f32 %v2018_v56, %v1964_v52  ;;  %v1993_v20 = vmul.f32 %v13792_v55, %v10754_v16  ;;  %v1994_v1 = vmul.f32 %v13792_v55, %v10764_v51  ;;  %v13794_v23 = vld [vmem:[#allocation99_spill] sm:$0xff] }
 0x690   :  { %v2040_v21 = vmax.f32 %v2038_v49, %v1962_v0  ;;  %v2041_v14 = vmax.f32 %v2039_v48, %v1965_v61  ;;  %v2000_v19 = vmax.f32 %v1998_v34, %v1966_v9  ;;  %v2001_v18 = vmax.f32 %v1999_v62, %v1969_v25  ;;  %v13795_v48 = vld [vmem:[#allocation275_spill] sm:$0xff]  ;;  %v13796_v34 = vld [vmem:[#allocation272_spill] sm:$0xff] }
 0x691   :  { %v2021_v10 = vmax.f32 %v2019_v41, %v1967_v43  ;;  %v2022_v30 = vmax.f32 %v2020_v22, %v1970_v60  ;;  %v1995_v58 = vmul.f32 %v13792_v55, %v10642_v15  ;;  %v10852_v52 = vmul.f32 %v13794_v23, %v13793_v32 }
 0x692   :  { %v2042_v44 = vmax.f32 %v2040_v21, %v1968_v5  ;;  %v2043_v54 = vmax.f32 %v2041_v14, %v1971_v27  ;;  %v2002_v26 = vmax.f32 %v2000_v19, %v1972_v3  ;;  %v2003_v56 = vmax.f32 %v2001_v18, %v1975_v33  ;;  %v13797_v3 = vld [vmem:[#allocation267_spill] sm:$0xff]  ;;  %v13798_v33 = vld [vmem:[#allocation28_spill] sm:$0xff] }
 0x693   :  { %v2023_v6 = vmax.f32 %v2021_v10, %v1973_v7  ;;  %v2024_v29 = vmax.f32 %v2022_v30, %v1976_v31  ;;  %v10856_v9 = vmul.f32 %v13794_v23, %v13795_v48  ;;  %v10860_v25 = vmul.f32 %v13794_v23, %v13796_v34  ;;  %v13799_v31 = vld [vmem:[#allocation268_spill] sm:$0xff]  ;;  %v13805_v18 = vld [vmem:[#allocation279_spill] sm:$0xff]  ;;  %v13806_v10 = vld [vmem:[#allocation101_spill] sm:$0xff] }
 0x694   :  { %v2044_v46 = vmax.f32 %v2042_v44, %v1974_v35  ;;  %v2045_v0 = vmax.f32 %v2043_v54, %v1977_v59  ;;  %v2004_v43 = vmax.f32 %v2002_v26, %v1978_v28  ;;  %v2005_v60 = vmax.f32 %v2003_v56, %v1981_v8  ;;  %v13800_v28 = vld [vmem:[#allocation270_spill] sm:$0xff]  ;;  %v13811_v23 = vld [vmem:[#allocation283_spill] sm:$0xff]  ;;  %v13852_v48 = vld [vmem:[#allocation109_spill] sm:$0xff] }
 0x695   :  { %v2025_v5 = vmax.f32 %v2023_v6, %v1979_v17  ;;  %v2026_v27 = vmax.f32 %v2024_v29, %v1982_v40  ;;  %v10864_v7 = vmul.f32 %v13798_v33, %v13797_v3  ;;  %v10868_v35 = vmul.f32 %v13798_v33, %v13799_v31  ;;  %v13801_v17 = vld [vmem:[#allocation284_spill] sm:$0xff]  ;;  %v13802_v40 = vld [vmem:[#allocation29_spill] sm:$0xff]  ;;  %v13810_v44 = vld [vmem:[#allocation30_spill] sm:$0xff] }
 0x696   :  { %v2046_v49 = vmax.f32 %v2044_v46, %v1980_v13  ;;  %v2047_v62 = vmax.f32 %v2045_v0, %v1983_v53  ;;  %v2006_v59 = vmax.f32 %v2004_v43, %v1984_v45  ;;  %v2007_v22 = vmax.f32 %v2005_v60, %v1987_v36  ;;  %v13803_v45 = vld [vmem:[#allocation285_spill] sm:$0xff]  ;;  %v13812_v29 = vld [vmem:[#allocation287_spill] sm:$0xff]  ;;  %v13814_v43 = vld [vmem:[#allocation102_spill] sm:$0xff] }
 0x697   :  { %v2027_v41 = vmax.f32 %v2025_v5, %v1985_v57  ;;  %v2028_v61 = vmax.f32 %v2026_v27, %v1988_v12  ;;  %v10872_v8 = vmul.f32 %v13798_v33, %v13800_v28  ;;  %v10876_v13 = vmul.f32 %v13802_v40, %v13801_v17  ;;  %v13804_v57 = vld [vmem:[#allocation276_spill] sm:$0xff]  ;;  %v13813_v0 = vld [vmem:[#allocation307_spill] sm:$0xff]  ;;  %v13850_v28 = vld [vmem:[#allocation302_spill] sm:$0xff] }
 0x698   :  { %v2048_v2 = vmax.f32 %v2046_v49, %v1986_v24  ;;  %v2049_v4 = vmax.f32 %v2047_v62, %v1989_v37  ;;  %v2008_v53 = vmax.f32 %v2006_v59, %v1990_v39  ;;  %v2009_v50 = vmax.f32 %v2007_v22, %v1993_v20  ;;  %v13807_v39 = vld [vmem:[#allocation281_spill] sm:$0xff]  ;;  %v13815_v27 = vld [vmem:[#allocation308_spill] sm:$0xff]  ;;  %v13816_v62 = vld [vmem:[#allocation282_spill] sm:$0xff] }
 0x699   :  { %v2029_v55 = vmax.f32 %v2027_v41, %v1991_v38  ;;  %v2030_v21 = vmax.f32 %v2028_v61, %v1994_v1  ;;  %v10880_v36 = vmul.f32 %v13802_v40, %v13803_v45  ;;  %v10884_v12 = vmul.f32 %v13802_v40, %v13804_v57  ;;  %v13817_v59 = vld [vmem:[#allocation309_spill] sm:$0xff]  ;;  %v13818_v22 = vld [vmem:[#allocation31_spill] sm:$0xff]  ;;  %v13849_v17 = vld [vmem:[#allocation324_spill] sm:$0xff] }
 0x69a   :  { %v2050_v14 = vmax.f32 %v2048_v2, %v1992_v42  ;;  %v2051_v19 = vmax.f32 %v2049_v4, %v1995_v58  ;;  %v2010_v24 = vmax.f32 %v2008_v53, %v2009_v50  ;;  %v10888_v30 = vmul.f32 %v13806_v10, %v13805_v18  ;;  %v13808_v42 = vld [vmem:[#allocation271_spill] sm:$0xff]  ;;  %v13809_v58 = vld [vmem:[#allocation296_spill] sm:$0xff]  ;;  %v13820_v53 = vld [vmem:[#allocation293_spill] sm:$0xff] }
 0x69b   :  { %v2031_v37 = vmax.f32 %v2029_v55, %v2030_v21  ;;  %v10892_v20 = vmul.f32 %v13806_v10, %v13807_v39  ;;  %v10896_v1 = vmul.f32 %v13806_v10, %v13808_v42  ;;  %v2200_v54 = vmul.f32 %v13810_v44, %v13809_v58  ;;  %v13819_v4 = vld [vmem:[#allocation312_spill] sm:$0xff]  ;;  %v13821_v21 = vld [vmem:[#allocation310_spill] sm:$0xff]  ;;  %v13823_v10 = vld [vmem:[#allocation313_spill] sm:$0xff] }
 0x69c   :  { %v2052_v38 = vmax.f32 %v2050_v14, %v2051_v19  ;;  %v2201_v26 = vmul.f32 %v13810_v44, %v13811_v23  ;;  %v2011_v56 = vrot.slane %v2010_v24, 4  ;;  %v2202_v46 = vmul.f32 %v13810_v44, %v13812_v29  ;;  %v13822_v14 = vld [vmem:[#allocation104_spill] sm:$0xff]  ;;  %v13833_v42 = vld [vmem:[#allocation318_spill] sm:$0xff]  ;;  %v13840_v45 = vld [vmem:[#allocation107_spill] sm:$0xff] }
 0x69d   :  { %v2032_v6 = vrot.slane %v2031_v37, 4  ;;  %v2203_v60 = vmul.f32 %v13814_v43, %v13813_v0  ;;  %v2204_v49 = vmul.f32 %v13814_v43, %v13815_v27  ;;  %v2205_v33 = vmul.f32 %v13814_v43, %v13816_v62  ;;  %v13824_v43 = vld [vmem:[#allocation286_spill] sm:$0xff]  ;;  %v13827_v62 = vld [vmem:[#allocation316_spill] sm:$0xff]  ;;  %v13830_v27 = vld [vmem:[#allocation105_spill] sm:$0xff] }
 0x69e   :  { %v2053_v5 = vrot.slane %v2052_v38, 4  ;;  %v10912_v41 = vmul.f32 %v13818_v22, %v13817_v59  ;;  %v2012_v61 = vmax.f32 %v2010_v24, %v2011_v56  ;;  %v10916_v40 = vmul.f32 %v13818_v22, %v13819_v4  ;;  %v13826_v4 = vld [vmem:[#allocation32_spill] sm:$0xff]  ;;  %v13831_v0 = vld [vmem:[#allocation317_spill] sm:$0xff]  ;;  %v13851_v34 = vld [vmem:[#allocation323_spill] sm:$0xff] }
 0x69f   :  { %v2033_v2 = vmax.f32 %v2031_v37, %v2032_v6  ;;  %v10920_v50 = vmul.f32 %v13818_v22, %v13820_v53  ;;  %v2209_v19 = vmul.f32 %v13822_v14, %v13821_v21  ;;  %v10926_v44 = vmul.f32 %v13822_v14, %v13823_v10  ;;  %v13825_v6 = vld [vmem:[#allocation314_spill] sm:$0xff]  ;;  %v13829_v53 = vld [vmem:[#allocation315_spill] sm:$0xff]  ;;  %v13832_v23 = vld [vmem:[#allocation292_spill] sm:$0xff] }
 0x6a0   :  { %v2054_v55 = vmax.f32 %v2052_v38, %v2053_v5  ;;  %v10930_v24 = vmul.f32 %v13822_v14, %v13824_v43  ;;  %v2013_v37 = vrot.slane %v2012_v61, 2  ;;  %v2212_v59 = vmul.f32 %v13826_v4, %v13825_v6  ;;  %v13828_v5 = vld [vmem:[#allocation294_spill] sm:$0xff]  ;;  %v13834_v6 = vld [vmem:[#allocation33_spill] sm:$0xff] }
 0x6a1   :  { %v2034_v56 = vrot.slane %v2033_v2, 2  ;;  %v2213_v22 = vmul.f32 %v13826_v4, %v13827_v62  ;;  %v2214_v21 = vmul.f32 %v13826_v4, %v13828_v5  ;;  %v2215_v10 = vmul.f32 %v13830_v27, %v13829_v53  ;;  %v13835_v62 = vld [vmem:[#allocation320_spill] sm:$0xff]  ;;  %v13837_v4 = vld [vmem:[#allocation298_spill] sm:$0xff]  ;;  %v13839_v53 = vld [vmem:[#allocation319_spill] sm:$0xff] }
 0x6a2   :  { %v2055_v38 = vrot.slane %v2054_v55, 2  ;;  %v2216_v29 = vmul.f32 %v13830_v27, %v13831_v0  ;;  %v2014_v14 = vmax.f32 %v2012_v61, %v2013_v37  ;;  %v2217_v58 = vmul.f32 %v13830_v27, %v13832_v23  ;;  %v13841_v37 = vld [vmem:[#allocation321_spill] sm:$0xff]  ;;  %v13847_v23 = vld [vmem:[#allocation322_spill] sm:$0xff] }
 0x6a3   :  { %v2035_v43 = vmax.f32 %v2033_v2, %v2034_v56  ;;  %v2218_v39 = vmul.f32 %v13834_v6, %v13833_v42  ;;  %v10948_v57 = vmul.f32 %v13834_v6, %v13835_v62  ;;  %v10952_v5 = vmul.f32 %v13834_v6, %v13837_v4  ;;  %v13842_v56 = vld [vmem:[#allocation299_spill] sm:$0xff]  ;;  %v13848_v6 = vld [vmem:[#allocation34_spill] sm:$0xff] }
 0x6a4   :  { %v2056_v18 = vmax.f32 %v2054_v55, %v2055_v38  ;;  %v2221_v0 = vmul.f32 %v13840_v45, %v13839_v53  ;;  %v2015_v61 = vrot.slane %v2014_v14, 1  ;;  %v2222_v27 = vmul.f32 %v13840_v45, %v13841_v37 }
 0x6a5   :  { %13836 = vst [vmem:[#allocation20_spill] sm:$0xff] %v10948_v57  ;;  %13838 = vst [vmem:[#allocation21_spill] sm:$0xff] %v10952_v5  ;;  %v2036_v2 = vrot.slane %v2035_v43, 1  ;;  %v2223_v42 = vmul.f32 %v13840_v45, %v13842_v56  ;;  %v13843_v38 = vlaneseq  ;;  %v13844_v62 = vmov 0  ;;  %v13853_v56 = vld [vmem:[#allocation325_spill] sm:$0xff]  ;;  %v13854_v5 = vld [vmem:[#allocation303_spill] sm:$0xff] }
 0x6a6   :  { %v2057_v55 = vrot.slane %v2056_v18, 1  ;;  %v2224_v4 = vmul.f32 %v13848_v6, %v13847_v23  ;;  %v2225_v53 = vmul.f32 %v13848_v6, %v13849_v17  ;;  %v2226_v31 = vmul.f32 %v13848_v6, %v13850_v28  ;;  %v13855_v23 = vld [vmem:[#allocation35_spill] sm:$0xff] }
 0x6a7   :  { %vm10961_vm0 = vcmp.lt.s32.totalorder %v13843_v38, 384  ;;  %v2016_v3 = vmax.f32 %v2014_v14, %v2015_v61  ;;  %v2037_v37 = vmax.f32 %v2035_v43, %v2036_v2  ;;  %v2227_v45 = vmul.f32 %v13852_v48, %v13851_v34 }
 0x6a8   :  { %v13845_v62 = vsel %vm10961_vm0, 4294967295, %v13844_v62  ;;  %v2228_v38 = vmul.f32 %v13852_v48, %v13853_v56  ;;  %v2058_v32 = vmax.f32 %v2056_v18, %v2057_v55  ;;  %v2229_v15 = vmul.f32 %v13852_v48, %v13854_v5  ;;  %v13856_v18 = vld [vmem:[#allocation273_spill] sm:$0xff] }
 0x6a9   :  { %13846 = vst [vmem:[#allocation84_spill] sm:$0xff] %v13845_v62  ;;  %v2230_v57 = vmul.f32 %v13855_v23, %v10752_v63  ;;  %v2236_v17 = vmax.f32 %v10852_v52, %v10876_v13  ;;  %v2062_v51 = vcombine.low %v2016_v3, %v2037_v37  ;;  %v2237_v43 = vmax.f32 %v10864_v7, %v10888_v30 }
 0x6aa   :  { %v2257_v14 = vmax.f32 %v10856_v9, %v10880_v36  ;;  %v2258_v61 = vmax.f32 %v10868_v35, %v10892_v20  ;;  %v2076_v2 = vrot.slane %v2058_v32, %v13856_v18  ;;  %v2278_v48 = vmax.f32 %v10860_v25, %v10884_v12 }
 0x6ab   :  { %v2238_v55 = vmax.f32 %v2236_v17, %v2200_v54  ;;  %v2279_v6 = vmax.f32 %v10872_v8, %v10896_v1  ;;  %v2069_v52 = vrot.slane %v2062_v51, %v13856_v18  ;;  %v2239_v3 = vmax.f32 %v2237_v43, %v2203_v60  ;;  %v13860_v43 = vld [vmem:[#allocation304_spill] sm:$0xff] }
 0x6ac   :  { %v2259_v13 = vmax.f32 %v2257_v14, %v2201_v26  ;;  %v2260_v7 = vmax.f32 %v2258_v61, %v2204_v49  ;;  %v2231_v9 = vmul.f32 %v13855_v23, %v10762_v47  ;;  %v2280_v35 = vmax.f32 %v2278_v48, %v2202_v46  ;;  %v13857_v49 = vld [vmem:[#allocation111_spill] sm:$0xff] }
 0x6ad   :  { %v2240_v36 = vmax.f32 %v2238_v55, %v10912_v41  ;;  %v2281_v30 = vmax.f32 %v2279_v6, %v2205_v33  ;;  %v2077_v32 = vcombine.low %v2069_v52, %v2076_v2  ;;  %v2241_v17 = vmax.f32 %v2239_v3, %v2209_v19  ;;  %v13862_v2 = vld [vmem:[#allocation274_spill] sm:$0xff]  ;;  %v13863_v55 = vld [vmem:[#allocation36_spill] sm:$0xff]  ;;  %v13864_v3 = vld [vmem:[#allocation275_spill] sm:$0xff] }
 0x6ae   :  { %v2261_v20 = vmax.f32 %v2259_v13, %v10916_v40  ;;  %v2262_v25 = vmax.f32 %v2260_v7, %v10926_v44  ;;  %v2232_v8 = vmul.f32 %v13855_v23, %v10627_v11  ;;  %v2282_v12 = vmax.f32 %v2280_v35, %v10920_v50  ;;  %v13858_v23 = vld [vmem:[#allocation328_spill] sm:$0xff]  ;;  %v13867_v35 = vld [vmem:[#allocation113_spill] sm:$0xff] }
 0x6af   :  { %v2242_v51 = vmax.f32 %v2240_v36, %v2212_v59  ;;  %v2283_v1 = vmax.f32 %v2281_v30, %v10930_v24  ;;  %v2084_v54 = vrot.slane %v2077_v32, %v13856_v18  ;;  %v2243_v26 = vmax.f32 %v2241_v17, %v2215_v10  ;;  %v13859_v44 = vld [vmem:[#allocation20_spill] sm:$0xff]  ;;  %v13869_v17 = vld [vmem:[#allocation270_spill] sm:$0xff] }
 0x6b0   :  { %v2263_v60 = vmax.f32 %v2261_v20, %v2213_v22  ;;  %v2264_v46 = vmax.f32 %v2262_v25, %v2216_v29  ;;  %v2233_v33 = vmul.f32 %v13857_v49, %v10754_v16  ;;  %v2284_v40 = vmax.f32 %v2282_v12, %v2214_v21  ;;  %v13861_v22 = vld [vmem:[#allocation21_spill] sm:$0xff]  ;;  %v13865_v36 = vld [vmem:[#allocation272_spill] sm:$0xff] }
 0x6b1   :  { %v2244_v41 = vmax.f32 %v2242_v51, %v2218_v39  ;;  %v2285_v19 = vmax.f32 %v2283_v1, %v2217_v58  ;;  %2090 = vst.msk [vmem:[#allocation2] ss:$8 sm:$0x7] %vm10961_vm0, %v2084_v54  ;;  %v2234_v59 = vmul.f32 %v13857_v49, %v13858_v23  ;;  %v2245_v50 = vmax.f32 %v2243_v26, %v2221_v0  ;;  %v13870_v20 = vld [vmem:[#allocation284_spill] sm:$0xff]  ;;  %v13871_v25 = vld [vmem:[#allocation37_spill] sm:$0xff] }
 0x6b2   :  { %v2265_v24 = vmax.f32 %v2263_v60, %v13859_v44  ;;  %v2266_v37 = vmax.f32 %v2264_v46, %v2222_v27  ;;  %v2235_v10 = vmul.f32 %v13857_v49, %v13860_v43  ;;  %v2286_v14 = vmax.f32 %v2284_v40, %v13861_v22  ;;  %v13872_v12 = vld [vmem:[#allocation285_spill] sm:$0xff]  ;;  %v13873_v54 = vld [vmem:[#allocation276_spill] sm:$0xff]  ;;  %v13874_v60 = vld [vmem:[#allocation279_spill] sm:$0xff] }
 0x6b3   :  { %v2246_v29 = vmax.f32 %v2244_v41, %v2224_v4  ;;  %v2287_v61 = vmax.f32 %v2285_v19, %v2223_v42  ;;  %v2247_v39 = vmax.f32 %v2245_v50, %v2227_v45  ;;  %v11015_v48 = vmul.f32 %v13863_v55, %v13862_v2  ;;  %v13875_v46 = vld [vmem:[#allocation38_spill] sm:$0xff]  ;;  %v13876_v40 = vld [vmem:[#allocation281_spill] sm:$0xff] }
 0x6b4   :  { %v2267_v21 = vmax.f32 %v2265_v24, %v2225_v53  ;;  %v2268_v58 = vmax.f32 %v2266_v37, %v2228_v38  ;;  %v2288_v52 = vmax.f32 %v2286_v14, %v2226_v31  ;;  %v11019_v27 = vmul.f32 %v13863_v55, %v13864_v3  ;;  %v13866_v38 = vld [vmem:[#allocation267_spill] sm:$0xff]  ;;  %v13878_v24 = vld [vmem:[#allocation296_spill] sm:$0xff]  ;;  %v13911_v43 = vld [vmem:[#allocation322_spill] sm:$0xff] }
 0x6b5   :  { %v2248_v6 = vmax.f32 %v2246_v29, %v2230_v57  ;;  %v2289_v0 = vmax.f32 %v2287_v61, %v2229_v15  ;;  %v2249_v13 = vmax.f32 %v2247_v39, %v2233_v33  ;;  %v11023_v42 = vmul.f32 %v13863_v55, %v13865_v36  ;;  %v13868_v57 = vld [vmem:[#allocation268_spill] sm:$0xff]  ;;  %v13879_v37 = vld [vmem:[#allocation115_spill] sm:$0xff]  ;;  %v13909_v36 = vld [vmem:[#allocation321_spill] sm:$0xff] }
 0x6b6   :  { %v2269_v7 = vmax.f32 %v2267_v21, %v2231_v9  ;;  %v2270_v4 = vmax.f32 %v2268_v58, %v2234_v59  ;;  %v2290_v53 = vmax.f32 %v2288_v52, %v2232_v8  ;;  %v11027_v30 = vmul.f32 %v13867_v35, %v13866_v38  ;;  %v13877_v59 = vld [vmem:[#allocation271_spill] sm:$0xff]  ;;  %v13884_v52 = vld [vmem:[#allocation308_spill] sm:$0xff] }
 0x6b7   :  { %v2291_v45 = vmax.f32 %v2289_v0, %v2235_v10  ;;  %v11031_v15 = vmul.f32 %v13867_v35, %v13868_v57  ;;  %v2250_v31 = vmax.f32 %v2248_v6, %v2249_v13  ;;  %v11035_v9 = vmul.f32 %v13867_v35, %v13869_v17  ;;  %v13880_v29 = vld [vmem:[#allocation283_spill] sm:$0xff] }
 0x6b8   :  { %v2271_v32 = vmax.f32 %v2269_v7, %v2270_v4  ;;  %v11039_v51 = vmul.f32 %v13871_v25, %v13870_v20  ;;  %v11043_v1 = vmul.f32 %v13871_v25, %v13872_v12  ;;  %v11047_v26 = vmul.f32 %v13871_v25, %v13873_v54  ;;  %v13881_v14 = vld [vmem:[#allocation287_spill] sm:$0xff]  ;;  %v13885_v7 = vld [vmem:[#allocation282_spill] sm:$0xff]  ;;  %v13888_v25 = vld [vmem:[#allocation312_spill] sm:$0xff] }
 0x6b9   :  { %v2292_v8 = vmax.f32 %v2290_v53, %v2291_v45  ;;  %v11051_v49 = vmul.f32 %v13875_v46, %v13874_v60  ;;  %v2251_v33 = vrot.slane %v2250_v31, 4  ;;  %v11055_v19 = vmul.f32 %v13875_v46, %v13876_v40  ;;  %v13882_v58 = vld [vmem:[#allocation307_spill] sm:$0xff]  ;;  %v13886_v53 = vld [vmem:[#allocation309_spill] sm:$0xff]  ;;  %v13897_v40 = vld [vmem:[#allocation316_spill] sm:$0xff] }
 0x6ba   :  { %v2272_v41 = vrot.slane %v2271_v32, 4  ;;  %v11059_v50 = vmul.f32 %v13875_v46, %v13877_v59  ;;  %v2437_v10 = vmul.f32 %v13879_v37, %v13878_v24  ;;  %v2438_v22 = vmul.f32 %v13879_v37, %v13880_v29  ;;  %v13883_v55 = vld [vmem:[#allocation39_spill] sm:$0xff]  ;;  %v13887_v45 = vld [vmem:[#allocation117_spill] sm:$0xff] }
 0x6bb   :  { %v2293_v44 = vrot.slane %v2292_v8, 4  ;;  %v2439_v61 = vmul.f32 %v13879_v37, %v13881_v14  ;;  %v2252_v39 = vmax.f32 %v2250_v31, %v2251_v33  ;;  %v2440_v6 = vmul.f32 %v13883_v55, %v13882_v58  ;;  %v13889_v33 = vld [vmem:[#allocation293_spill] sm:$0xff]  ;;  %v13890_v37 = vld [vmem:[#allocation310_spill] sm:$0xff]  ;;  %v13899_v54 = vld [vmem:[#allocation315_spill] sm:$0xff] }
 0x6bc   :  { %v2273_v21 = vmax.f32 %v2271_v32, %v2272_v41  ;;  %v2441_v0 = vmul.f32 %v13883_v55, %v13884_v52  ;;  %v2442_v4 = vmul.f32 %v13883_v55, %v13885_v7  ;;  %v11075_v35 = vmul.f32 %v13887_v45, %v13886_v53  ;;  %v13891_v52 = vld [vmem:[#allocation40_spill] sm:$0xff]  ;;  %v13892_v58 = vld [vmem:[#allocation313_spill] sm:$0xff]  ;;  %v13893_v7 = vld [vmem:[#allocation286_spill] sm:$0xff] }
 0x6bd   :  { %v2294_v13 = vmax.f32 %v2292_v8, %v2293_v44  ;;  %v11079_v46 = vmul.f32 %v13887_v45, %v13888_v25  ;;  %v2253_v31 = vrot.slane %v2252_v39, 2  ;;  %v11083_v41 = vmul.f32 %v13887_v45, %v13889_v33  ;;  %v13895_v14 = vld [vmem:[#allocation314_spill] sm:$0xff]  ;;  %v13896_v25 = vld [vmem:[#allocation119_spill] sm:$0xff]  ;;  %v13900_v12 = vld [vmem:[#allocation41_spill] sm:$0xff] }
 0x6be   :  { %v2274_v32 = vrot.slane %v2273_v21, 2  ;;  %v2446_v8 = vmul.f32 %v13891_v52, %v13890_v37  ;;  %v2447_v55 = vmul.f32 %v13891_v52, %v13892_v58  ;;  %v11091_v53 = vmul.f32 %v13891_v52, %v13893_v7  ;;  %v13898_v33 = vld [vmem:[#allocation294_spill] sm:$0xff]  ;;  %v13901_v58 = vld [vmem:[#allocation317_spill] sm:$0xff]  ;;  %v13902_v52 = vld [vmem:[#allocation292_spill] sm:$0xff] }
 0x6bf   :  { %v2295_v44 = vrot.slane %v2294_v13, 2  ;;  %v2449_v29 = vmul.f32 %v13896_v25, %v13895_v14  ;;  %v2254_v24 = vmax.f32 %v2252_v39, %v2253_v31  ;;  %v2450_v45 = vmul.f32 %v13896_v25, %v13897_v40  ;;  %v13903_v39 = vld [vmem:[#allocation318_spill] sm:$0xff] }
 0x6c0   :  { %13894 = vst [vmem:[#allocation22_spill] sm:$0xff] %v11091_v53  ;;  %v2275_v59 = vmax.f32 %v2273_v21, %v2274_v32  ;;  %v2451_v60 = vmul.f32 %v13896_v25, %v13898_v33  ;;  %v2452_v20 = vmul.f32 %v13900_v12, %v13899_v54  ;;  %v2453_v17 = vmul.f32 %v13900_v12, %v13901_v58  ;;  %v13904_v21 = vld [vmem:[#allocation121_spill] sm:$0xff]  ;;  %v13905_v32 = vld [vmem:[#allocation320_spill] sm:$0xff]  ;;  %v13906_v25 = vld [vmem:[#allocation298_spill] sm:$0xff] }
 0x6c1   :  { %v2296_v37 = vmax.f32 %v2294_v13, %v2295_v44  ;;  %v2454_v7 = vmul.f32 %v13900_v12, %v13902_v52  ;;  %v2255_v57 = vrot.slane %v2254_v24, 1  ;;  %v2455_v31 = vmul.f32 %v13904_v21, %v13903_v39  ;;  %v13907_v44 = vld [vmem:[#allocation319_spill] sm:$0xff]  ;;  %v13908_v54 = vld [vmem:[#allocation42_spill] sm:$0xff] }
 0x6c2   :  { %v2276_v14 = vrot.slane %v2275_v59, 1  ;;  %v2456_v40 = vmul.f32 %v13904_v21, %v13905_v32  ;;  %v2457_v13 = vmul.f32 %v13904_v21, %v13906_v25  ;;  %v2458_v33 = vmul.f32 %v13908_v54, %v13907_v44  ;;  %v13910_v52 = vld [vmem:[#allocation299_spill] sm:$0xff]  ;;  %v13913_v32 = vld [vmem:[#allocation324_spill] sm:$0xff] }
 0x6c3   :  { %v2297_v38 = vrot.slane %v2296_v37, 1  ;;  %v2459_v58 = vmul.f32 %v13908_v54, %v13909_v36  ;;  %v2256_v3 = vmax.f32 %v2254_v24, %v2255_v57  ;;  %v2460_v2 = vmul.f32 %v13908_v54, %v13910_v52  ;;  %v13912_v39 = vld [vmem:[#allocation123_spill] sm:$0xff] }
 0x6c4   :  { %v2277_v12 = vmax.f32 %v2275_v59, %v2276_v14  ;;  %v2461_v23 = vmul.f32 %v13912_v39, %v13911_v43  ;;  %v2462_v16 = vmul.f32 %v13912_v39, %v13913_v32  ;;  %v2463_v21 = vmul.f32 %v13912_v39, %v13850_v28  ;;  %v13914_v44 = vld [vmem:[#allocation43_spill] sm:$0xff]  ;;  %v13915_v59 = vld [vmem:[#allocation125_spill] sm:$0xff] }
 0x6c5   :  { %v2298_v62 = vmax.f32 %v2296_v37, %v2297_v38  ;;  %v2464_v25 = vmul.f32 %v13914_v44, %v13851_v34  ;;  %v2465_v57 = vmul.f32 %v13914_v44, %v13853_v56  ;;  %v2466_v54 = vmul.f32 %v13914_v44, %v13854_v5 }
 0x6c6   :  { %v2302_v53 = vcombine.low %v2256_v3, %v2277_v12  ;;  %v2467_v24 = vmul.f32 %v13915_v59, %v10752_v63  ;;  %v2473_v14 = vmax.f32 %v11015_v48, %v11039_v51  ;;  %v2474_v37 = vmax.f32 %v11027_v30, %v11051_v49 }
 0x6c7   :  { %v2316_v38 = vrot.slane %v2298_v62, %v13856_v18  ;;  %v2494_v3 = vmax.f32 %v11019_v27, %v11043_v1  ;;  %v2495_v12 = vmax.f32 %v11031_v15, %v11055_v19  ;;  %v2515_v44 = vmax.f32 %v11023_v42, %v11047_v26 }
 0x6c8   :  { %v2309_v39 = vrot.slane %v2302_v53, %v13856_v18  ;;  %v2516_v62 = vmax.f32 %v11035_v9, %v11059_v50  ;;  %v2468_v48 = vmul.f32 %v13915_v59, %v10762_v47  ;;  %v2475_v51 = vmax.f32 %v2473_v14, %v2437_v10  ;;  %v13916_v10 = vld [vmem:[#allocation22_spill] sm:$0xff] }
 0x6c9   :  { %v2476_v63 = vmax.f32 %v2474_v37, %v2440_v6  ;;  %v2496_v30 = vmax.f32 %v2494_v3, %v2438_v22  ;;  %v2497_v5 = vmax.f32 %v2495_v12, %v2441_v0  ;;  %v2517_v27 = vmax.f32 %v2515_v44, %v2439_v61  ;;  %v13917_v22 = vld [vmem:[#allocation82_spill] sm:$0xff] }
 0x6ca   :  { %v2317_v49 = vcombine.low %v2309_v39, %v2316_v38  ;;  %v2518_v1 = vmax.f32 %v2516_v62, %v2442_v4  ;;  %v2469_v53 = vmul.f32 %v13915_v59, %v10627_v11  ;;  %v2477_v15 = vmax.f32 %v2475_v51, %v11075_v35  ;;  %v13918_v38 = vld [vmem:[#allocation44_spill] sm:$0xff] }
 0x6cb   :  { %v2478_v19 = vmax.f32 %v2476_v63, %v2446_v8  ;;  %v2498_v42 = vmax.f32 %v2496_v30, %v11079_v46  ;;  %v2499_v26 = vmax.f32 %v2497_v5, %v2447_v55  ;;  %v2519_v50 = vmax.f32 %v2517_v27, %v11083_v41  ;;  %v13920_v35 = vld [vmem:[#allocation328_spill] sm:$0xff]  ;;  %v13924_v27 = vld [vmem:[#allocation275_spill] sm:$0xff] }
 0x6cc   :  { %v2324_v9 = vrot.slane %v2317_v49, %v13856_v18  ;;  %v2520_v6 = vmax.f32 %v2518_v1, %v13916_v10  ;;  %v2470_v0 = vmul.f32 %v13918_v38, %v13917_v22  ;;  %v2479_v61 = vmax.f32 %v2477_v15, %v2449_v29  ;;  %v13921_v5 = vld [vmem:[#allocation304_spill] sm:$0xff]  ;;  %v13927_v15 = vld [vmem:[#allocation45_spill] sm:$0xff] }
 0x6cd   :  { %v2480_v4 = vmax.f32 %v2478_v19, %v2452_v20  ;;  %v2500_v14 = vmax.f32 %v2498_v42, %v2450_v45  ;;  %v2471_v63 = vmul.f32 %v13918_v38, %v13920_v35  ;;  %v2501_v46 = vmax.f32 %v2499_v26, %v2453_v17  ;;  %v13922_v20 = vld [vmem:[#allocation274_spill] sm:$0xff]  ;;  %v13923_v45 = vld [vmem:[#allocation127_spill] sm:$0xff]  ;;  %v13928_v42 = vld [vmem:[#allocation268_spill] sm:$0xff] }
 0x6ce   :  { %2327 = vst.msk [vmem:[#allocation2 + $0x1] ss:$8 sm:$0x7] %vm10961_vm0, %v2324_v9  ;;  %v2521_v8 = vmax.f32 %v2519_v50, %v2451_v60  ;;  %v2522_v59 = vmax.f32 %v2520_v6, %v2454_v7  ;;  %v2472_v41 = vmul.f32 %v13918_v38, %v13921_v5  ;;  %v2481_v55 = vmax.f32 %v2479_v61, %v2455_v31  ;;  %v13925_v31 = vld [vmem:[#allocation272_spill] sm:$0xff]  ;;  %v13934_v61 = vld [vmem:[#allocation279_spill] sm:$0xff] }
 0x6cf   :  { %v2482_v3 = vmax.f32 %v2480_v4, %v2458_v33  ;;  %v2502_v39 = vmax.f32 %v2500_v14, %v2456_v40  ;;  %v2503_v12 = vmax.f32 %v2501_v46, %v2459_v58  ;;  %v11164_v62 = vmul.f32 %v13923_v45, %v13922_v20  ;;  %v13930_v26 = vld [vmem:[#allocation284_spill] sm:$0xff]  ;;  %v13935_v4 = vld [vmem:[#allocation129_spill] sm:$0xff]  ;;  %v13965_v20 = vld [vmem:[#allocation298_spill] sm:$0xff] }
 0x6d0   :  { %v2523_v44 = vmax.f32 %v2521_v8, %v2457_v13  ;;  %v2524_v29 = vmax.f32 %v2522_v59, %v2460_v2  ;;  %v2483_v51 = vmax.f32 %v2481_v55, %v2461_v23  ;;  %v11168_v17 = vmul.f32 %v13923_v45, %v13924_v27  ;;  %v13926_v13 = vld [vmem:[#allocation267_spill] sm:$0xff]  ;;  %v13933_v38 = vld [vmem:[#allocation276_spill] sm:$0xff]  ;;  %v13936_v46 = vld [vmem:[#allocation281_spill] sm:$0xff] }
 0x6d1   :  { %v2484_v30 = vmax.f32 %v2482_v3, %v2464_v25  ;;  %v2504_v49 = vmax.f32 %v2502_v39, %v2462_v16  ;;  %v2505_v60 = vmax.f32 %v2503_v12, %v2465_v57  ;;  %v11172_v40 = vmul.f32 %v13923_v45, %v13925_v31  ;;  %v13929_v57 = vld [vmem:[#allocation270_spill] sm:$0xff]  ;;  %v13937_v59 = vld [vmem:[#allocation271_spill] sm:$0xff]  ;;  %v13938_v55 = vld [vmem:[#allocation296_spill] sm:$0xff] }
 0x6d2   :  { %v2525_v7 = vmax.f32 %v2523_v44, %v2463_v21  ;;  %v2526_v1 = vmax.f32 %v2524_v29, %v2466_v54  ;;  %v2485_v58 = vmax.f32 %v2483_v51, %v2467_v24  ;;  %v11176_v19 = vmul.f32 %v13927_v15, %v13926_v13  ;;  %v13931_v24 = vld [vmem:[#allocation46_spill] sm:$0xff]  ;;  %v13939_v3 = vld [vmem:[#allocation47_spill] sm:$0xff]  ;;  %v13961_v31 = vld [vmem:[#allocation292_spill] sm:$0xff] }
 0x6d3   :  { %v2486_v2 = vmax.f32 %v2484_v30, %v2470_v0  ;;  %v2506_v33 = vmax.f32 %v2504_v49, %v2468_v48  ;;  %v2507_v23 = vmax.f32 %v2505_v60, %v2471_v63  ;;  %v11180_v9 = vmul.f32 %v13927_v15, %v13928_v42  ;;  %v13932_v48 = vld [vmem:[#allocation285_spill] sm:$0xff]  ;;  %v13940_v29 = vld [vmem:[#allocation283_spill] sm:$0xff]  ;;  %v13964_v27 = vld [vmem:[#allocation320_spill] sm:$0xff] }
 0x6d4   :  { %v2527_v16 = vmax.f32 %v2525_v7, %v2469_v53  ;;  %v2528_v25 = vmax.f32 %v2526_v1, %v2472_v41  ;;  %v11184_v54 = vmul.f32 %v13927_v15, %v13929_v57  ;;  %v11188_v50 = vmul.f32 %v13931_v24, %v13930_v26  ;;  %v13941_v51 = vld [vmem:[#allocation287_spill] sm:$0xff]  ;;  %v13943_v7 = vld [vmem:[#allocation130_spill] sm:$0xff]  ;;  %v13960_v42 = vld [vmem:[#allocation317_spill] sm:$0xff] }
 0x6d5   :  { %v2487_v21 = vmax.f32 %v2485_v58, %v2486_v2  ;;  %v11192_v10 = vmul.f32 %v13931_v24, %v13932_v48  ;;  %v2508_v6 = vmax.f32 %v2506_v33, %v2507_v23  ;;  %v11196_v0 = vmul.f32 %v13931_v24, %v13933_v38  ;;  %v13942_v60 = vld [vmem:[#allocation307_spill] sm:$0xff]  ;;  %v13944_v58 = vld [vmem:[#allocation308_spill] sm:$0xff]  ;;  %v13945_v33 = vld [vmem:[#allocation282_spill] sm:$0xff] }
 0x6d6   :  { %v2529_v53 = vmax.f32 %v2527_v16, %v2528_v25  ;;  %v11200_v14 = vmul.f32 %v13935_v4, %v13934_v61  ;;  %v11204_v8 = vmul.f32 %v13935_v4, %v13936_v46  ;;  %v11208_v41 = vmul.f32 %v13935_v4, %v13937_v59  ;;  %v13946_v25 = vld [vmem:[#allocation309_spill] sm:$0xff]  ;;  %v13947_v24 = vld [vmem:[#allocation48_spill] sm:$0xff]  ;;  %v13959_v48 = vld [vmem:[#allocation134_spill] sm:$0xff] }
 0x6d7   :  { %v2488_v63 = vrot.slane %v2487_v21, 4  ;;  %v2674_v39 = vmul.f32 %v13939_v3, %v13938_v55  ;;  %v2509_v12 = vrot.slane %v2508_v6, 4  ;;  %v2675_v45 = vmul.f32 %v13939_v3, %v13940_v29  ;;  %v13948_v55 = vld [vmem:[#allocation312_spill] sm:$0xff]  ;;  %v13952_v59 = vld [vmem:[#allocation313_spill] sm:$0xff] }
 0x6d8   :  { %v2530_v44 = vrot.slane %v2529_v53, 4  ;;  %v2676_v30 = vmul.f32 %v13939_v3, %v13941_v51  ;;  %v2677_v1 = vmul.f32 %v13943_v7, %v13942_v60  ;;  %v2678_v2 = vmul.f32 %v13943_v7, %v13944_v58  ;;  %v13950_v60 = vld [vmem:[#allocation310_spill] sm:$0xff]  ;;  %v13951_v51 = vld [vmem:[#allocation132_spill] sm:$0xff] }
 0x6d9   :  { %v2489_v49 = vmax.f32 %v2487_v21, %v2488_v63  ;;  %v2679_v15 = vmul.f32 %v13943_v7, %v13945_v33  ;;  %v2510_v23 = vmax.f32 %v2508_v6, %v2509_v12  ;;  %v2680_v4 = vmul.f32 %v13947_v24, %v13946_v25  ;;  %v13949_v21 = vld [vmem:[#allocation293_spill] sm:$0xff]  ;;  %v13953_v12 = vld [vmem:[#allocation286_spill] sm:$0xff]  ;;  %v13956_v61 = vld [vmem:[#allocation316_spill] sm:$0xff] }
 0x6da   :  { %v2531_v16 = vmax.f32 %v2529_v53, %v2530_v44  ;;  %v11226_v29 = vmul.f32 %v13947_v24, %v13948_v55  ;;  %v11230_v63 = vmul.f32 %v13947_v24, %v13949_v21  ;;  %v2683_v58 = vmul.f32 %v13951_v51, %v13950_v60  ;;  %v13954_v25 = vld [vmem:[#allocation314_spill] sm:$0xff]  ;;  %v13955_v55 = vld [vmem:[#allocation49_spill] sm:$0xff]  ;;  %v13958_v60 = vld [vmem:[#allocation315_spill] sm:$0xff] }
 0x6db   :  { %v2490_v3 = vrot.slane %v2489_v49, 2  ;;  %v11236_v7 = vmul.f32 %v13951_v51, %v13952_v59  ;;  %v2511_v6 = vrot.slane %v2510_v23, 2  ;;  %v2685_v44 = vmul.f32 %v13951_v51, %v13953_v12  ;;  %v13957_v21 = vld [vmem:[#allocation294_spill] sm:$0xff] }
 0x6dc   :  { %v2532_v53 = vrot.slane %v2531_v16, 2  ;;  %v2686_v33 = vmul.f32 %v13955_v55, %v13954_v25  ;;  %v2687_v24 = vmul.f32 %v13955_v55, %v13956_v61  ;;  %v2688_v38 = vmul.f32 %v13955_v55, %v13957_v21  ;;  %v13962_v25 = vld [vmem:[#allocation318_spill] sm:$0xff] }
 0x6dd   :  { %v2491_v46 = vmax.f32 %v2489_v49, %v2490_v3  ;;  %v2689_v26 = vmul.f32 %v13959_v48, %v13958_v60  ;;  %v2512_v59 = vmax.f32 %v2510_v23, %v2511_v6  ;;  %v2690_v13 = vmul.f32 %v13959_v48, %v13960_v42  ;;  %v13963_v49 = vld [vmem:[#allocation50_spill] sm:$0xff]  ;;  %v13968_v6 = vld [vmem:[#allocation136_spill] sm:$0xff] }
 0x6de   :  { %v2533_v57 = vmax.f32 %v2531_v16, %v2532_v53  ;;  %v2691_v51 = vmul.f32 %v13959_v48, %v13961_v31  ;;  %v2692_v3 = vmul.f32 %v13963_v49, %v13962_v25  ;;  %v2693_v61 = vmul.f32 %v13963_v49, %v13964_v27  ;;  %v13967_v16 = vld [vmem:[#allocation319_spill] sm:$0xff] }
 0x6df   :  { %v2492_v12 = vrot.slane %v2491_v46, 1  ;;  %v11258_v55 = vmul.f32 %v13963_v49, %v13965_v20  ;;  %v2513_v60 = vrot.slane %v2512_v59, 1  ;;  %v2695_v53 = vmul.f32 %v13968_v6, %v13967_v16  ;;  %v13969_v25 = vld [vmem:[#allocation51_spill] sm:$0xff]  ;;  %v13970_v16 = vld [vmem:[#allocation137_spill] sm:$0xff] }
 0x6e0   :  { %v2534_v23 = vrot.slane %v2533_v57, 1  ;;  %v2696_v42 = vmul.f32 %v13968_v6, %v13909_v36  ;;  %v2697_v31 = vmul.f32 %v13968_v6, %v13910_v52  ;;  %v2698_v21 = vmul.f32 %v13969_v25, %v13911_v43  ;;  %v13972_v52 = vld [vmem:[#allocation79_spill] sm:$0xff]  ;;  %v13973_v36 = vld [vmem:[#allocation52_spill] sm:$0xff] }
 0x6e1   :  { %13966 = vst [vmem:[#allocation87_spill] sm:$0xff] %v11258_v55  ;;  %v2493_v48 = vmax.f32 %v2491_v46, %v2492_v12  ;;  %v2699_v27 = vmul.f32 %v13969_v25, %v13913_v32  ;;  %v2514_v49 = vmax.f32 %v2512_v59, %v2513_v60  ;;  %v2700_v55 = vmul.f32 %v13969_v25, %v13850_v28  ;;  %v13971_v12 = vld [vmem:[#allocation303_spill] sm:$0xff] }
 0x6e2   :  { %v2535_v20 = vmax.f32 %v2533_v57, %v2534_v23  ;;  %v2701_v5 = vmul.f32 %v13970_v16, %v13851_v34  ;;  %v2702_v46 = vmul.f32 %v13970_v16, %v13853_v56  ;;  %v2703_v6 = vmul.f32 %v13970_v16, %v13971_v12 }
 0x6e3   :  { %v2704_v43 = vmul.f32 %v13973_v36, %v13972_v52  ;;  %v2710_v32 = vmax.f32 %v11164_v62, %v11188_v50  ;;  %v2539_v59 = vcombine.low %v2493_v48, %v2514_v49  ;;  %v2705_v57 = vmul.f32 %v13973_v36, %v10762_v47 }
 0x6e4   :  { %v2711_v60 = vmax.f32 %v11176_v19, %v11200_v14  ;;  %v2731_v25 = vmax.f32 %v11168_v17, %v11192_v10  ;;  %v2732_v16 = vmax.f32 %v11180_v9, %v11204_v8  ;;  %v2752_v52 = vmax.f32 %v11172_v40, %v11196_v0 }
 0x6e5   :  { %v2712_v23 = vmax.f32 %v2710_v32, %v2674_v39  ;;  %v2753_v62 = vmax.f32 %v11184_v54, %v11208_v41  ;;  %v2546_v50 = vrot.slane %v2539_v59, %v13856_v18  ;;  %v2553_v48 = vrot.slane %v2535_v20, %v13856_v18  ;;  %v13974_v39 = vld [vmem:[#allocation139_spill] sm:$0xff] }
 0x6e6   :  { %v2713_v49 = vmax.f32 %v2711_v60, %v2677_v1  ;;  %v2733_v47 = vmax.f32 %v2731_v25, %v2675_v45  ;;  %v2734_v14 = vmax.f32 %v2732_v16, %v2678_v2  ;;  %v2754_v12 = vmax.f32 %v2752_v52, %v2676_v30  ;;  %v13979_v59 = vld [vmem:[#allocation275_spill] sm:$0xff] }
 0x6e7   :  { %v2714_v19 = vmax.f32 %v2712_v23, %v2680_v4  ;;  %v2755_v17 = vmax.f32 %v2753_v62, %v2679_v15  ;;  %v2554_v32 = vcombine.low %v2546_v50, %v2553_v48  ;;  %v2706_v9 = vmul.f32 %v13973_v36, %v10627_v11 }
 0x6e8   :  { %v2715_v10 = vmax.f32 %v2713_v49, %v2683_v58  ;;  %v2735_v40 = vmax.f32 %v2733_v47, %v11226_v29  ;;  %v2736_v54 = vmax.f32 %v2734_v14, %v11236_v7  ;;  %v2756_v8 = vmax.f32 %v2754_v12, %v11230_v63  ;;  %v13975_v29 = vld [vmem:[#allocation304_spill] sm:$0xff] }
 0x6e9   :  { %v2716_v0 = vmax.f32 %v2714_v19, %v2686_v33  ;;  %v2757_v41 = vmax.f32 %v2755_v17, %v2685_v44  ;;  %v2561_v20 = vrot.slane %v2554_v32, %v13856_v18  ;;  %v2707_v45 = vmul.f32 %v13974_v39, %v13917_v22  ;;  %v13976_v44 = vld [vmem:[#allocation87_spill] sm:$0xff]  ;;  %v13983_v19 = vld [vmem:[#allocation268_spill] sm:$0xff]  ;;  %v13987_v32 = vld [vmem:[#allocation285_spill] sm:$0xff] }
 0x6ea   :  { %v2717_v52 = vmax.f32 %v2715_v10, %v2689_v26  ;;  %v2737_v30 = vmax.f32 %v2735_v40, %v2687_v24  ;;  %v2738_v2 = vmax.f32 %v2736_v54, %v2690_v13  ;;  %v2758_v15 = vmax.f32 %v2756_v8, %v2688_v38  ;;  %v13977_v38 = vld [vmem:[#allocation274_spill] sm:$0xff]  ;;  %v13989_v8 = vld [vmem:[#allocation279_spill] sm:$0xff] }
 0x6eb   :  { %v2718_v1 = vmax.f32 %v2716_v0, %v2692_v3  ;;  %v2759_v36 = vmax.f32 %v2757_v41, %v2691_v51  ;;  %2564 = vst.msk [vmem:[#allocation2 + $0x2] ss:$8 sm:$0x7] %vm10961_vm0, %v2561_v20  ;;  %v2708_v47 = vmul.f32 %v13974_v39, %v13920_v35  ;;  %v2709_v58 = vmul.f32 %v13974_v39, %v13975_v29  ;;  %v13978_v51 = vld [vmem:[#allocation53_spill] sm:$0xff]  ;;  %v13988_v0 = vld [vmem:[#allocation276_spill] sm:$0xff]  ;;  %v13990_v41 = vld [vmem:[#allocation55_spill] sm:$0xff] }
 0x6ec   :  { %v2719_v33 = vmax.f32 %v2717_v52, %v2695_v53  ;;  %v2739_v4 = vmax.f32 %v2737_v30, %v2693_v61  ;;  %v2740_v7 = vmax.f32 %v2738_v2, %v2696_v42  ;;  %v2760_v26 = vmax.f32 %v2758_v15, %v13976_v44  ;;  %v13980_v42 = vld [vmem:[#allocation272_spill] sm:$0xff]  ;;  %v13992_v30 = vld [vmem:[#allocation271_spill] sm:$0xff] }
 0x6ed   :  { %v2720_v63 = vmax.f32 %v2718_v1, %v2698_v21  ;;  %v2761_v24 = vmax.f32 %v2759_v36, %v2697_v31  ;;  %v11313_v12 = vmul.f32 %v13978_v51, %v13977_v38  ;;  %v11317_v60 = vmul.f32 %v13978_v51, %v13979_v59  ;;  %v13993_v2 = vld [vmem:[#allocation296_spill] sm:$0xff]  ;;  %v13994_v15 = vld [vmem:[#allocation143_spill] sm:$0xff] }
 0x6ee   :  { %v2721_v3 = vmax.f32 %v2719_v33, %v2701_v5  ;;  %v2741_v13 = vmax.f32 %v2739_v4, %v2699_v27  ;;  %v2742_v23 = vmax.f32 %v2740_v7, %v2702_v46  ;;  %v2762_v16 = vmax.f32 %v2760_v26, %v2700_v55  ;;  %v13981_v5 = vld [vmem:[#allocation267_spill] sm:$0xff]  ;;  %v13982_v27 = vld [vmem:[#allocation141_spill] sm:$0xff]  ;;  %v13984_v55 = vld [vmem:[#allocation270_spill] sm:$0xff] }
 0x6ef   :  { %v2722_v25 = vmax.f32 %v2720_v63, %v2704_v43  ;;  %v2763_v53 = vmax.f32 %v2761_v24, %v2703_v6  ;;  %v11321_v62 = vmul.f32 %v13978_v51, %v13980_v42  ;;  %v11325_v31 = vmul.f32 %v13982_v27, %v13981_v5  ;;  %v13985_v6 = vld [vmem:[#allocation284_spill] sm:$0xff]  ;;  %v13995_v33 = vld [vmem:[#allocation283_spill] sm:$0xff]  ;;  %v14027_v5 = vld [vmem:[#allocation149_spill] sm:$0xff] }
 0x6f0   :  { %v2723_v61 = vmax.f32 %v2721_v3, %v2707_v45  ;;  %v2743_v21 = vmax.f32 %v2741_v13, %v2705_v57  ;;  %v2744_v50 = vmax.f32 %v2742_v23, %v2708_v47  ;;  %v2764_v48 = vmax.f32 %v2762_v16, %v2706_v9  ;;  %v13986_v57 = vld [vmem:[#allocation54_spill] sm:$0xff]  ;;  %v13991_v45 = vld [vmem:[#allocation281_spill] sm:$0xff]  ;;  %v13996_v63 = vld [vmem:[#allocation287_spill] sm:$0xff] }
 0x6f1   :  { %v2765_v49 = vmax.f32 %v2763_v53, %v2709_v58  ;;  %v11329_v14 = vmul.f32 %v13982_v27, %v13983_v19  ;;  %v11333_v46 = vmul.f32 %v13982_v27, %v13984_v55  ;;  %v11337_v17 = vmul.f32 %v13986_v57, %v13985_v6  ;;  %v13997_v26 = vld [vmem:[#allocation307_spill] sm:$0xff]  ;;  %v13998_v24 = vld [vmem:[#allocation56_spill] sm:$0xff]  ;;  %v14020_v55 = vld [vmem:[#allocation298_spill] sm:$0xff] }
 0x6f2   :  { %v2724_v43 = vmax.f32 %v2722_v25, %v2723_v61  ;;  %v11341_v10 = vmul.f32 %v13986_v57, %v13987_v32  ;;  %v2745_v40 = vmax.f32 %v2743_v21, %v2744_v50  ;;  %v11345_v54 = vmul.f32 %v13986_v57, %v13988_v0  ;;  %v13999_v13 = vld [vmem:[#allocation308_spill] sm:$0xff]  ;;  %v14000_v25 = vld [vmem:[#allocation282_spill] sm:$0xff]  ;;  %v14001_v61 = vld [vmem:[#allocation309_spill] sm:$0xff] }
 0x6f3   :  { %v2766_v9 = vmax.f32 %v2764_v48, %v2765_v49  ;;  %v11349_v20 = vmul.f32 %v13990_v41, %v13989_v8  ;;  %v11353_v52 = vmul.f32 %v13990_v41, %v13991_v45  ;;  %v11357_v1 = vmul.f32 %v13990_v41, %v13992_v30  ;;  %v14002_v21 = vld [vmem:[#allocation144_spill] sm:$0xff]  ;;  %v14005_v41 = vld [vmem:[#allocation310_spill] sm:$0xff]  ;;  %v14015_v8 = vld [vmem:[#allocation317_spill] sm:$0xff] }
 0x6f4   :  { %v2725_v39 = vrot.slane %v2724_v43, 4  ;;  %v2911_v36 = vmul.f32 %v13994_v15, %v13993_v2  ;;  %v2746_v47 = vrot.slane %v2745_v40, 4  ;;  %v2912_v4 = vmul.f32 %v13994_v15, %v13995_v33  ;;  %v14003_v50 = vld [vmem:[#allocation312_spill] sm:$0xff]  ;;  %v14014_v2 = vld [vmem:[#allocation58_spill] sm:$0xff] }
 0x6f5   :  { %v2767_v58 = vrot.slane %v2766_v9, 4  ;;  %v2913_v7 = vmul.f32 %v13994_v15, %v13996_v63  ;;  %v2914_v3 = vmul.f32 %v13998_v24, %v13997_v26  ;;  %v2915_v51 = vmul.f32 %v13998_v24, %v13999_v13  ;;  %v14007_v13 = vld [vmem:[#allocation313_spill] sm:$0xff]  ;;  %v14011_v63 = vld [vmem:[#allocation316_spill] sm:$0xff] }
 0x6f6   :  { %v2726_v44 = vmax.f32 %v2724_v43, %v2725_v39  ;;  %v2916_v23 = vmul.f32 %v13998_v24, %v14000_v25  ;;  %v2747_v16 = vmax.f32 %v2745_v40, %v2746_v47  ;;  %v2917_v27 = vmul.f32 %v14002_v21, %v14001_v61  ;;  %v14004_v43 = vld [vmem:[#allocation293_spill] sm:$0xff]  ;;  %v14008_v47 = vld [vmem:[#allocation286_spill] sm:$0xff]  ;;  %v14016_v32 = vld [vmem:[#allocation292_spill] sm:$0xff] }
 0x6f7   :  { %v2768_v53 = vmax.f32 %v2766_v9, %v2767_v58  ;;  %v11375_v48 = vmul.f32 %v14002_v21, %v14003_v50  ;;  %v11379_v57 = vmul.f32 %v14002_v21, %v14004_v43  ;;  %v14006_v39 = vld [vmem:[#allocation57_spill] sm:$0xff]  ;;  %v14009_v61 = vld [vmem:[#allocation314_spill] sm:$0xff]  ;;  %v2927_v0 = vmul.f32 %v14014_v2, %v14015_v8  ;;  %v14019_v6 = vld [vmem:[#allocation320_spill] sm:$0xff] }
 0x6f8   :  { %v2727_v49 = vrot.slane %v2726_v44, 2  ;;  %v2920_v15 = vmul.f32 %v14006_v39, %v14005_v41  ;;  %v11385_v24 = vmul.f32 %v14006_v39, %v14007_v13  ;;  %v2748_v40 = vrot.slane %v2747_v16, 2  ;;  %v14010_v50 = vld [vmem:[#allocation146_spill] sm:$0xff]  ;;  %v14013_v41 = vld [vmem:[#allocation315_spill] sm:$0xff]  ;;  %v14024_v8 = vld [vmem:[#allocation321_spill] sm:$0xff] }
 0x6f9   :  { %v2769_v9 = vrot.slane %v2768_v53, 2  ;;  %v2922_v58 = vmul.f32 %v14006_v39, %v14008_v47  ;;  %v2923_v25 = vmul.f32 %v14010_v50, %v14009_v61  ;;  %v2924_v21 = vmul.f32 %v14010_v50, %v14011_v63  ;;  %v14012_v43 = vld [vmem:[#allocation294_spill] sm:$0xff] }
 0x6fa   :  { %v2728_v26 = vmax.f32 %v2726_v44, %v2727_v49  ;;  %v2925_v33 = vmul.f32 %v14010_v50, %v14012_v43  ;;  %v2926_v30 = vmul.f32 %v14014_v2, %v14013_v41  ;;  %v2749_v13 = vmax.f32 %v2747_v16, %v2748_v40  ;;  %v14017_v61 = vld [vmem:[#allocation318_spill] sm:$0xff]  ;;  %v14018_v44 = vld [vmem:[#allocation148_spill] sm:$0xff]  ;;  %v14023_v40 = vld [vmem:[#allocation59_spill] sm:$0xff] }
 0x6fb   :  { %v2770_v45 = vmax.f32 %v2768_v53, %v2769_v9  ;;  %v2928_v39 = vmul.f32 %v14014_v2, %v14016_v32  ;;  %v2929_v49 = vmul.f32 %v14018_v44, %v14017_v61  ;;  %v2930_v63 = vmul.f32 %v14018_v44, %v14019_v6  ;;  %v14022_v53 = vld [vmem:[#allocation319_spill] sm:$0xff]  ;;  %v14026_v61 = vld [vmem:[#allocation322_spill] sm:$0xff]  ;;  %v14028_v6 = vld [vmem:[#allocation324_spill] sm:$0xff] }
 0x6fc   :  { %v2729_v47 = vrot.slane %v2728_v26, 1  ;;  %v11407_v50 = vmul.f32 %v14018_v44, %v14020_v55  ;;  %v2750_v41 = vrot.slane %v2749_v13, 1  ;;  %v2932_v9 = vmul.f32 %v14023_v40, %v14022_v53  ;;  %v14025_v32 = vld [vmem:[#allocation299_spill] sm:$0xff]  ;;  %v14029_v53 = vld [vmem:[#allocation60_spill] sm:$0xff] }
 0x6fd   :  { %v2771_v16 = vrot.slane %v2770_v45, 1  ;;  %v2933_v43 = vmul.f32 %v14023_v40, %v14024_v8  ;;  %v2934_v19 = vmul.f32 %v14023_v40, %v14025_v32  ;;  %v2935_v42 = vmul.f32 %v14027_v5, %v14026_v61  ;;  %v14031_v32 = vld [vmem:[#allocation79_spill] sm:$0xff]  ;;  %v14032_v8 = vld [vmem:[#allocation152_spill] sm:$0xff] }
 0x6fe   :  { %14021 = vst [vmem:[#allocation23_spill] sm:$0xff] %v11407_v50  ;;  %v2730_v2 = vmax.f32 %v2728_v26, %v2729_v47  ;;  %v2936_v59 = vmul.f32 %v14027_v5, %v14028_v6  ;;  %v2751_v44 = vmax.f32 %v2749_v13, %v2750_v41  ;;  %v2937_v38 = vmul.f32 %v14027_v5, %v13850_v28  ;;  %v14030_v47 = vld [vmem:[#allocation303_spill] sm:$0xff] }
 0x6ff   :  { %v2772_v55 = vmax.f32 %v2770_v45, %v2771_v16  ;;  %v2938_v50 = vmul.f32 %v14029_v53, %v13851_v34  ;;  %v2939_v26 = vmul.f32 %v14029_v53, %v13853_v56  ;;  %v2940_v40 = vmul.f32 %v14029_v53, %v14030_v47  ;;  %v14033_v45 = vld [vmem:[#allocation327_spill] sm:$0xff] }
 0x700   :  { %v2941_v61 = vmul.f32 %v14032_v8, %v14031_v32  ;;  %v2947_v6 = vmax.f32 %v11313_v12, %v11337_v17  ;;  %v2776_v13 = vcombine.low %v2730_v2, %v2751_v44  ;;  %v2942_v41 = vmul.f32 %v14032_v8, %v14033_v45 }
 0x701   :  { %v2948_v5 = vmax.f32 %v11325_v31, %v11349_v20  ;;  %v2968_v16 = vmax.f32 %v11317_v60, %v11341_v10  ;;  %v2969_v53 = vmax.f32 %v11329_v14, %v11353_v52  ;;  %v2989_v32 = vmax.f32 %v11321_v62, %v11345_v54 }
 0x702   :  { %v2949_v56 = vmax.f32 %v2947_v6, %v2911_v36  ;;  %v2990_v12 = vmax.f32 %v11333_v46, %v11357_v1  ;;  %v2783_v17 = vrot.slane %v2776_v13, %v13856_v18  ;;  %v2790_v2 = vrot.slane %v2772_v55, %v13856_v18 }
 0x703   :  { %v2950_v44 = vmax.f32 %v2948_v5, %v2914_v3  ;;  %v2970_v45 = vmax.f32 %v2968_v16, %v2912_v4  ;;  %v2971_v20 = vmax.f32 %v2969_v53, %v2915_v51  ;;  %v2991_v47 = vmax.f32 %v2989_v32, %v2913_v7 }
 0x704   :  { %v2951_v31 = vmax.f32 %v2949_v56, %v2917_v27  ;;  %v2992_v60 = vmax.f32 %v2990_v12, %v2916_v23  ;;  %v2791_v6 = vcombine.low %v2783_v17, %v2790_v2  ;;  %v2943_v14 = vmul.f32 %v14032_v8, %v10627_v11  ;;  %v14034_v56 = vld [vmem:[#allocation61_spill] sm:$0xff] }
 0x705   :  { %v2952_v10 = vmax.f32 %v2950_v44, %v2920_v15  ;;  %v2972_v62 = vmax.f32 %v2970_v45, %v11375_v48  ;;  %v2973_v46 = vmax.f32 %v2971_v20, %v11385_v24  ;;  %v2993_v52 = vmax.f32 %v2991_v47, %v11379_v57  ;;  %v14035_v24 = vld [vmem:[#allocation23_spill] sm:$0xff]  ;;  %v14042_v44 = vld [vmem:[#allocation268_spill] sm:$0xff] }
 0x706   :  { %v2953_v54 = vmax.f32 %v2951_v31, %v2923_v25  ;;  %v2994_v1 = vmax.f32 %v2992_v60, %v2922_v58  ;;  %v2798_v55 = vrot.slane %v2791_v6, %v13856_v18  ;;  %v2944_v36 = vmul.f32 %v14034_v56, %v13917_v22  ;;  %v14038_v47 = vld [vmem:[#allocation275_spill] sm:$0xff]  ;;  %v14046_v60 = vld [vmem:[#allocation285_spill] sm:$0xff] }
 0x707   :  { %v2954_v32 = vmax.f32 %v2952_v10, %v2926_v30  ;;  %v2974_v4 = vmax.f32 %v2972_v62, %v2924_v21  ;;  %v2975_v3 = vmax.f32 %v2973_v46, %v2927_v0  ;;  %v2995_v51 = vmax.f32 %v2993_v52, %v2925_v33  ;;  %v14036_v33 = vld [vmem:[#allocation274_spill] sm:$0xff]  ;;  %v14047_v62 = vld [vmem:[#allocation276_spill] sm:$0xff]  ;;  %v14048_v46 = vld [vmem:[#allocation279_spill] sm:$0xff] }
 0x708   :  { %v2955_v7 = vmax.f32 %v2953_v54, %v2929_v49  ;;  %v2996_v8 = vmax.f32 %v2994_v1, %v2928_v39  ;;  %2801 = vst.msk [vmem:[#allocation2 + $0x3] ss:$8 sm:$0x7] %vm10961_vm0, %v2798_v55  ;;  %v2945_v25 = vmul.f32 %v14034_v56, %v13920_v35  ;;  %v2946_v23 = vmul.f32 %v14034_v56, %v13975_v29  ;;  %v14037_v39 = vld [vmem:[#allocation154_spill] sm:$0xff]  ;;  %v14049_v52 = vld [vmem:[#allocation156_spill] sm:$0xff]  ;;  %v14050_v56 = vld [vmem:[#allocation281_spill] sm:$0xff] }
 0x709   :  { %v2956_v27 = vmax.f32 %v2954_v32, %v2932_v9  ;;  %v2976_v48 = vmax.f32 %v2974_v4, %v2930_v63  ;;  %v2977_v15 = vmax.f32 %v2975_v3, %v2933_v43  ;;  %v2997_v30 = vmax.f32 %v2995_v51, %v14035_v24  ;;  %v14039_v43 = vld [vmem:[#allocation272_spill] sm:$0xff]  ;;  %v14051_v32 = vld [vmem:[#allocation271_spill] sm:$0xff] }
 0x70a   :  { %v2957_v57 = vmax.f32 %v2955_v7, %v2935_v42  ;;  %v2998_v58 = vmax.f32 %v2996_v8, %v2934_v19  ;;  %v11462_v49 = vmul.f32 %v14037_v39, %v14036_v33  ;;  %v11466_v13 = vmul.f32 %v14037_v39, %v14038_v47  ;;  %v14040_v19 = vld [vmem:[#allocation267_spill] sm:$0xff]  ;;  %v14052_v7 = vld [vmem:[#allocation296_spill] sm:$0xff] }
 0x70b   :  { %v2958_v21 = vmax.f32 %v2956_v27, %v2938_v50  ;;  %v2978_v0 = vmax.f32 %v2976_v48, %v2936_v59  ;;  %v2979_v5 = vmax.f32 %v2977_v15, %v2939_v26  ;;  %v2999_v16 = vmax.f32 %v2997_v30, %v2937_v38  ;;  %v14041_v59 = vld [vmem:[#allocation62_spill] sm:$0xff]  ;;  %v14053_v3 = vld [vmem:[#allocation64_spill] sm:$0xff]  ;;  %v14055_v48 = vld [vmem:[#allocation287_spill] sm:$0xff] }
 0x70c   :  { %v2959_v45 = vmax.f32 %v2957_v57, %v2941_v61  ;;  %v3000_v9 = vmax.f32 %v2998_v58, %v2940_v40  ;;  %v11470_v53 = vmul.f32 %v14037_v39, %v14039_v43  ;;  %v11474_v50 = vmul.f32 %v14041_v59, %v14040_v19  ;;  %v14043_v38 = vld [vmem:[#allocation270_spill] sm:$0xff]  ;;  %v14044_v40 = vld [vmem:[#allocation284_spill] sm:$0xff]  ;;  %v14056_v24 = vld [vmem:[#allocation307_spill] sm:$0xff] }
 0x70d   :  { %v2960_v63 = vmax.f32 %v2958_v21, %v2944_v36  ;;  %v2980_v42 = vmax.f32 %v2978_v0, %v2942_v41  ;;  %v2981_v12 = vmax.f32 %v2979_v5, %v2945_v25  ;;  %v3001_v17 = vmax.f32 %v2999_v16, %v2943_v14  ;;  %v14045_v41 = vld [vmem:[#allocation63_spill] sm:$0xff]  ;;  %v14057_v30 = vld [vmem:[#allocation158_spill] sm:$0xff]  ;;  %v14058_v21 = vld [vmem:[#allocation308_spill] sm:$0xff] }
 0x70e   :  { %v3002_v2 = vmax.f32 %v3000_v9, %v2946_v23  ;;  %v11478_v31 = vmul.f32 %v14041_v59, %v14042_v44  ;;  %v11482_v26 = vmul.f32 %v14041_v59, %v14043_v38  ;;  %v11486_v20 = vmul.f32 %v14045_v41, %v14044_v40  ;;  %v14054_v23 = vld [vmem:[#allocation283_spill] sm:$0xff]  ;;  %v14059_v39 = vld [vmem:[#allocation282_spill] sm:$0xff]  ;;  %v14060_v9 = vld [vmem:[#allocation309_spill] sm:$0xff] }
 0x70f   :  { %v2961_v61 = vmax.f32 %v2959_v45, %v2960_v63  ;;  %v11490_v6 = vmul.f32 %v14045_v41, %v14046_v60  ;;  %v2982_v10 = vmax.f32 %v2980_v42, %v2981_v12  ;;  %v11494_v54 = vmul.f32 %v14045_v41, %v14047_v62  ;;  %v14061_v63 = vld [vmem:[#allocation160_spill] sm:$0xff]  ;;  %v14064_v41 = vld [vmem:[#allocation310_spill] sm:$0xff] }
 0x710   :  { %v3003_v14 = vmax.f32 %v3001_v17, %v3002_v2  ;;  %v11498_v1 = vmul.f32 %v14049_v52, %v14048_v46  ;;  %v11502_v36 = vmul.f32 %v14049_v52, %v14050_v56  ;;  %v11506_v4 = vmul.f32 %v14049_v52, %v14051_v32  ;;  %v14062_v59 = vld [vmem:[#allocation312_spill] sm:$0xff]  ;;  %v14063_v2 = vld [vmem:[#allocation293_spill] sm:$0xff]  ;;  %v14079_v40 = vld [vmem:[#allocation298_spill] sm:$0xff] }
 0x711   :  { %v2962_v55 = vrot.slane %v2961_v61, 4  ;;  %v3148_v51 = vmul.f32 %v14053_v3, %v14052_v7  ;;  %v2983_v8 = vrot.slane %v2982_v10, 4  ;;  %v3149_v27 = vmul.f32 %v14053_v3, %v14054_v23  ;;  %v14065_v52 = vld [vmem:[#allocation133_spill] sm:$0xff]  ;;  %v14075_v62 = vld [vmem:[#allocation292_spill] sm:$0xff] }
 0x712   :  { %v3004_v25 = vrot.slane %v3003_v14, 4  ;;  %v3150_v57 = vmul.f32 %v14053_v3, %v14055_v48  ;;  %v3151_v58 = vmul.f32 %v14057_v30, %v14056_v24  ;;  %v3152_v0 = vmul.f32 %v14057_v30, %v14058_v21  ;;  %v14066_v3 = vld [vmem:[#allocation313_spill] sm:$0xff]  ;;  %v14070_v24 = vld [vmem:[#allocation316_spill] sm:$0xff] }
 0x713   :  { %v2963_v15 = vmax.f32 %v2961_v61, %v2962_v55  ;;  %v3153_v45 = vmul.f32 %v14057_v30, %v14059_v39  ;;  %v2984_v5 = vmax.f32 %v2982_v10, %v2983_v8  ;;  %v3154_v42 = vmul.f32 %v14061_v63, %v14060_v9  ;;  %v14067_v8 = vld [vmem:[#allocation286_spill] sm:$0xff]  ;;  %v14073_v23 = vld [vmem:[#allocation165_spill] sm:$0xff]  ;;  %v14078_v60 = vld [vmem:[#allocation320_spill] sm:$0xff] }
 0x714   :  { %v3005_v16 = vmax.f32 %v3003_v14, %v3004_v25  ;;  %v11524_v12 = vmul.f32 %v14061_v63, %v14062_v59  ;;  %v11528_v61 = vmul.f32 %v14061_v63, %v14063_v2  ;;  %v3157_v55 = vmul.f32 %v14065_v52, %v14064_v41  ;;  %v14068_v9 = vld [vmem:[#allocation314_spill] sm:$0xff]  ;;  %v14069_v59 = vld [vmem:[#allocation163_spill] sm:$0xff]  ;;  %v14074_v56 = vld [vmem:[#allocation317_spill] sm:$0xff] }
 0x715   :  { %v2964_v17 = vrot.slane %v2963_v15, 2  ;;  %v11534_v30 = vmul.f32 %v14065_v52, %v14066_v3  ;;  %v2985_v10 = vrot.slane %v2984_v5, 2  ;;  %v3159_v25 = vmul.f32 %v14065_v52, %v14067_v8  ;;  %v14071_v2 = vld [vmem:[#allocation294_spill] sm:$0xff]  ;;  %v14072_v41 = vld [vmem:[#allocation315_spill] sm:$0xff]  ;;  %v14086_v44 = vld [vmem:[#allocation164_spill] sm:$0xff] }
 0x716   :  { %v3006_v14 = vrot.slane %v3005_v16, 2  ;;  %v3160_v39 = vmul.f32 %v14069_v59, %v14068_v9  ;;  %v3161_v63 = vmul.f32 %v14069_v59, %v14070_v24  ;;  %v3162_v48 = vmul.f32 %v14069_v59, %v14071_v2  ;;  %v14076_v9 = vld [vmem:[#allocation318_spill] sm:$0xff] }
 0x717   :  { %v2965_v21 = vmax.f32 %v2963_v15, %v2964_v17  ;;  %v3163_v7 = vmul.f32 %v14073_v23, %v14072_v41  ;;  %v2986_v3 = vmax.f32 %v2984_v5, %v2985_v10  ;;  %v3164_v46 = vmul.f32 %v14073_v23, %v14074_v56  ;;  %v14077_v15 = vld [vmem:[#allocation192_spill] sm:$0xff]  ;;  %v14082_v10 = vld [vmem:[#allocation162_spill] sm:$0xff]  ;;  %v14083_v56 = vld [vmem:[#allocation321_spill] sm:$0xff] }
 0x718   :  { %v3007_v32 = vmax.f32 %v3005_v16, %v3006_v14  ;;  %v3165_v52 = vmul.f32 %v14073_v23, %v14075_v62  ;;  %v3166_v17 = vmul.f32 %v14077_v15, %v14076_v9  ;;  %v3167_v24 = vmul.f32 %v14077_v15, %v14078_v60  ;;  %v14081_v16 = vld [vmem:[#allocation319_spill] sm:$0xff]  ;;  %v14085_v9 = vld [vmem:[#allocation322_spill] sm:$0xff]  ;;  %v14087_v60 = vld [vmem:[#allocation324_spill] sm:$0xff] }
 0x719   :  { %v2966_v8 = vrot.slane %v2965_v21, 1  ;;  %v11556_v59 = vmul.f32 %v14077_v15, %v14079_v40  ;;  %v2987_v41 = vrot.slane %v2986_v3, 1  ;;  %v3169_v14 = vmul.f32 %v14082_v10, %v14081_v16  ;;  %v14084_v62 = vld [vmem:[#allocation299_spill] sm:$0xff]  ;;  %v14088_v16 = vld [vmem:[#allocation222_spill] sm:$0xff] }
 0x71a   :  { %v3008_v5 = vrot.slane %v3007_v32, 1  ;;  %v3170_v2 = vmul.f32 %v14082_v10, %v14083_v56  ;;  %v3171_v38 = vmul.f32 %v14082_v10, %v14084_v62  ;;  %v3172_v19 = vmul.f32 %v14086_v44, %v14085_v9  ;;  %v14091_v62 = vld [vmem:[#allocation79_spill] sm:$0xff]  ;;  %v14092_v56 = vld [vmem:[#allocation250_spill] sm:$0xff] }
 0x71b   :  { %14080 = vst [vmem:[#allocation91_spill] sm:$0xff] %v11556_v59  ;;  %v2967_v23 = vmax.f32 %v2965_v21, %v2966_v8  ;;  %v3173_v43 = vmul.f32 %v14086_v44, %v14087_v60  ;;  %v2988_v15 = vmax.f32 %v2986_v3, %v2987_v41  ;;  %v3174_v47 = vmul.f32 %v14086_v44, %v13850_v28  ;;  %v14089_v59 = vld [vmem:[#allocation325_spill] sm:$0xff]  ;;  %v14090_v8 = vld [vmem:[#allocation303_spill] sm:$0xff] }
 0x71c   :  { %v3009_v40 = vmax.f32 %v3007_v32, %v3008_v5  ;;  %v3175_v33 = vmul.f32 %v14088_v16, %v13851_v34  ;;  %v3176_v21 = vmul.f32 %v14088_v16, %v14089_v59  ;;  %v3177_v10 = vmul.f32 %v14088_v16, %v14090_v8  ;;  %v14093_v32 = vld [vmem:[#allocation327_spill] sm:$0xff] }
 0x71d   :  { %v3178_v9 = vmul.f32 %v14092_v56, %v14091_v62  ;;  %v3184_v60 = vmax.f32 %v11462_v49, %v11486_v20  ;;  %v3013_v41 = vcombine.low %v2967_v23, %v2988_v15  ;;  %v3179_v3 = vmul.f32 %v14092_v56, %v14093_v32 }
 0x71e   :  { %v3185_v44 = vmax.f32 %v11474_v50, %v11498_v1  ;;  %v3205_v5 = vmax.f32 %v11466_v13, %v11490_v6  ;;  %v3206_v16 = vmax.f32 %v11478_v31, %v11502_v36  ;;  %v3226_v62 = vmax.f32 %v11470_v53, %v11494_v54 }
 0x71f   :  { %v3186_v59 = vmax.f32 %v3184_v60, %v3148_v51  ;;  %v3227_v49 = vmax.f32 %v11482_v26, %v11506_v4  ;;  %v3020_v20 = vrot.slane %v3013_v41, %v13856_v18  ;;  %v3027_v23 = vrot.slane %v3009_v40, %v13856_v18  ;;  %v14094_v51 = vld [vmem:[#allocation252_spill] sm:$0xff] }
 0x720   :  { %v3187_v15 = vmax.f32 %v3185_v44, %v3151_v58  ;;  %v3207_v32 = vmax.f32 %v3205_v5, %v3149_v27  ;;  %v3208_v1 = vmax.f32 %v3206_v16, %v3152_v0  ;;  %v3228_v8 = vmax.f32 %v3226_v62, %v3150_v57 }
 0x721   :  { %v3188_v50 = vmax.f32 %v3186_v59, %v3154_v42  ;;  %v3229_v13 = vmax.f32 %v3227_v49, %v3153_v45  ;;  %v3028_v60 = vcombine.low %v3020_v20, %v3027_v23  ;;  %v3180_v31 = vmul.f32 %v14092_v56, %v10627_v11 }
 0x722   :  { %v3189_v6 = vmax.f32 %v3187_v15, %v3157_v55  ;;  %v3209_v53 = vmax.f32 %v3207_v32, %v11524_v12  ;;  %v3210_v26 = vmax.f32 %v3208_v1, %v11534_v30  ;;  %v3230_v36 = vmax.f32 %v3228_v8, %v11528_v61  ;;  %v14098_v8 = vld [vmem:[#allocation275_spill] sm:$0xff]  ;;  %v14102_v15 = vld [vmem:[#allocation268_spill] sm:$0xff] }
 0x723   :  { %v3190_v54 = vmax.f32 %v3188_v50, %v3160_v39  ;;  %v3231_v4 = vmax.f32 %v3229_v13, %v3159_v25  ;;  %v3035_v40 = vrot.slane %v3028_v60, %v13856_v18  ;;  %v3181_v27 = vmul.f32 %v14094_v51, %v13917_v22  ;;  %v14095_v25 = vld [vmem:[#allocation91_spill] sm:$0xff]  ;;  %v14106_v13 = vld [vmem:[#allocation285_spill] sm:$0xff] }
 0x724   :  { %v3191_v62 = vmax.f32 %v3189_v6, %v3163_v7  ;;  %v3211_v57 = vmax.f32 %v3209_v53, %v3161_v63  ;;  %v3212_v0 = vmax.f32 %v3210_v26, %v3164_v46  ;;  %v3232_v45 = vmax.f32 %v3230_v36, %v3162_v48  ;;  %v14096_v48 = vld [vmem:[#allocation274_spill] sm:$0xff]  ;;  %v14107_v53 = vld [vmem:[#allocation276_spill] sm:$0xff]  ;;  %v14108_v26 = vld [vmem:[#allocation279_spill] sm:$0xff] }
 0x725   :  { %v3192_v58 = vmax.f32 %v3190_v54, %v3166_v17  ;;  %v3233_v56 = vmax.f32 %v3231_v4, %v3165_v52  ;;  %3038 = vst.msk [vmem:[#allocation2 + $0x4] ss:$8 sm:$0x7] %vm10961_vm0, %v3035_v40  ;;  %v3182_v39 = vmul.f32 %v14094_v51, %v13920_v35  ;;  %v3183_v42 = vmul.f32 %v14094_v51, %v13975_v29  ;;  %v14097_v52 = vld [vmem:[#allocation201_spill] sm:$0xff]  ;;  %v14109_v36 = vld [vmem:[#allocation203_spill] sm:$0xff] }
 0x726   :  { %v3193_v12 = vmax.f32 %v3191_v62, %v3169_v14  ;;  %v3213_v61 = vmax.f32 %v3211_v57, %v3167_v24  ;;  %v3214_v30 = vmax.f32 %v3212_v0, %v3170_v2  ;;  %v3234_v7 = vmax.f32 %v3232_v45, %v14095_v25  ;;  %v14099_v2 = vld [vmem:[#allocation272_spill] sm:$0xff]  ;;  %v14110_v51 = vld [vmem:[#allocation281_spill] sm:$0xff]  ;;  %v14111_v62 = vld [vmem:[#allocation271_spill] sm:$0xff] }
 0x727   :  { %v3194_v55 = vmax.f32 %v3192_v58, %v3172_v19  ;;  %v3235_v63 = vmax.f32 %v3233_v56, %v3171_v38  ;;  %v11611_v59 = vmul.f32 %v14097_v52, %v14096_v48  ;;  %v11615_v41 = vmul.f32 %v14097_v52, %v14098_v8  ;;  %v14112_v58 = vld [vmem:[#allocation296_spill] sm:$0xff]  ;;  %v14113_v0 = vld [vmem:[#allocation103_spill] sm:$0xff] }
 0x728   :  { %v3195_v17 = vmax.f32 %v3193_v12, %v3175_v33  ;;  %v3215_v46 = vmax.f32 %v3213_v61, %v3173_v43  ;;  %v3216_v44 = vmax.f32 %v3214_v30, %v3176_v21  ;;  %v3236_v5 = vmax.f32 %v3234_v7, %v3174_v47  ;;  %v14100_v33 = vld [vmem:[#allocation267_spill] sm:$0xff]  ;;  %v14101_v43 = vld [vmem:[#allocation65_spill] sm:$0xff]  ;;  %v14103_v47 = vld [vmem:[#allocation270_spill] sm:$0xff] }
 0x729   :  { %v3196_v32 = vmax.f32 %v3194_v55, %v3178_v9  ;;  %v3237_v14 = vmax.f32 %v3235_v63, %v3177_v10  ;;  %v11619_v16 = vmul.f32 %v14097_v52, %v14099_v2  ;;  %v11623_v38 = vmul.f32 %v14101_v43, %v14100_v33  ;;  %v14104_v10 = vld [vmem:[#allocation284_spill] sm:$0xff]  ;;  %v14115_v61 = vld [vmem:[#allocation287_spill] sm:$0xff]  ;;  %v14117_v7 = vld [vmem:[#allocation106_spill] sm:$0xff] }
 0x72a   :  { %v3197_v24 = vmax.f32 %v3195_v17, %v3181_v27  ;;  %v3217_v19 = vmax.f32 %v3215_v46, %v3179_v3  ;;  %v3218_v49 = vmax.f32 %v3216_v44, %v3182_v39  ;;  %v3238_v20 = vmax.f32 %v3236_v5, %v3180_v31  ;;  %v14105_v3 = vld [vmem:[#allocation66_spill] sm:$0xff]  ;;  %v14116_v25 = vld [vmem:[#allocation307_spill] sm:$0xff]  ;;  %v14118_v17 = vld [vmem:[#allocation308_spill] sm:$0xff] }
 0x72b   :  { %v3239_v23 = vmax.f32 %v3237_v14, %v3183_v42  ;;  %v11627_v50 = vmul.f32 %v14101_v43, %v14102_v15  ;;  %v11631_v21 = vmul.f32 %v14101_v43, %v14103_v47  ;;  %v11635_v1 = vmul.f32 %v14105_v3, %v14104_v10  ;;  %v14114_v42 = vld [vmem:[#allocation283_spill] sm:$0xff]  ;;  %v14119_v52 = vld [vmem:[#allocation282_spill] sm:$0xff]  ;;  %v14120_v14 = vld [vmem:[#allocation309_spill] sm:$0xff] }
 0x72c   :  { %v3198_v9 = vmax.f32 %v3196_v32, %v3197_v24  ;;  %v11639_v60 = vmul.f32 %v14105_v3, %v14106_v13  ;;  %v3219_v6 = vmax.f32 %v3217_v19, %v3218_v49  ;;  %v11643_v54 = vmul.f32 %v14105_v3, %v14107_v53  ;;  %v14121_v24 = vld [vmem:[#allocation135_spill] sm:$0xff]  ;;  %v14122_v43 = vld [vmem:[#allocation312_spill] sm:$0xff]  ;;  %v14124_v3 = vld [vmem:[#allocation310_spill] sm:$0xff] }
 0x72d   :  { %v3240_v31 = vmax.f32 %v3238_v20, %v3239_v23  ;;  %v11647_v4 = vmul.f32 %v14109_v36, %v14108_v26  ;;  %v11651_v27 = vmul.f32 %v14109_v36, %v14110_v51  ;;  %v11655_v57 = vmul.f32 %v14109_v36, %v14111_v62  ;;  %v14123_v23 = vld [vmem:[#allocation293_spill] sm:$0xff]  ;;  %v14135_v53 = vld [vmem:[#allocation292_spill] sm:$0xff]  ;;  %v14139_v10 = vld [vmem:[#allocation298_spill] sm:$0xff] }
 0x72e   :  { %v3199_v40 = vrot.slane %v3198_v9, 4  ;;  %v3385_v45 = vmul.f32 %v14113_v0, %v14112_v58  ;;  %v3220_v56 = vrot.slane %v3219_v6, 4  ;;  %v3386_v12 = vmul.f32 %v14113_v0, %v14114_v42  ;;  %v14125_v36 = vld [vmem:[#allocation205_spill] sm:$0xff]  ;;  %v14133_v42 = vld [vmem:[#allocation167_spill] sm:$0xff]  ;;  %v14138_v13 = vld [vmem:[#allocation320_spill] sm:$0xff] }
 0x72f   :  { %v3241_v39 = vrot.slane %v3240_v31, 4  ;;  %v3387_v55 = vmul.f32 %v14113_v0, %v14115_v61  ;;  %v3388_v63 = vmul.f32 %v14117_v7, %v14116_v25  ;;  %v3389_v46 = vmul.f32 %v14117_v7, %v14118_v17  ;;  %v14126_v0 = vld [vmem:[#allocation313_spill] sm:$0xff]  ;;  %v14130_v25 = vld [vmem:[#allocation316_spill] sm:$0xff] }
 0x730   :  { %v3200_v30 = vmax.f32 %v3198_v9, %v3199_v40  ;;  %v3390_v32 = vmul.f32 %v14117_v7, %v14119_v52  ;;  %v3221_v44 = vmax.f32 %v3219_v6, %v3220_v56  ;;  %v3391_v19 = vmul.f32 %v14121_v24, %v14120_v14  ;;  %v14127_v56 = vld [vmem:[#allocation286_spill] sm:$0xff]  ;;  %v14134_v51 = vld [vmem:[#allocation317_spill] sm:$0xff]  ;;  %v14146_v15 = vld [vmem:[#allocation224_spill] sm:$0xff] }
 0x731   :  { %v3242_v5 = vmax.f32 %v3240_v31, %v3241_v39  ;;  %v11673_v49 = vmul.f32 %v14121_v24, %v14122_v43  ;;  %v11677_v9 = vmul.f32 %v14121_v24, %v14123_v23  ;;  %v3394_v40 = vmul.f32 %v14125_v36, %v14124_v3  ;;  %v14128_v14 = vld [vmem:[#allocation314_spill] sm:$0xff]  ;;  %v14129_v43 = vld [vmem:[#allocation207_spill] sm:$0xff] }
 0x732   :  { %v3201_v20 = vrot.slane %v3200_v30, 2  ;;  %v11683_v7 = vmul.f32 %v14125_v36, %v14126_v0  ;;  %v3222_v6 = vrot.slane %v3221_v44, 2  ;;  %v3396_v39 = vmul.f32 %v14125_v36, %v14127_v56  ;;  %v14131_v23 = vld [vmem:[#allocation294_spill] sm:$0xff]  ;;  %v14132_v3 = vld [vmem:[#allocation315_spill] sm:$0xff] }
 0x733   :  { %v3243_v31 = vrot.slane %v3242_v5, 2  ;;  %v3397_v52 = vmul.f32 %v14129_v43, %v14128_v14  ;;  %v3398_v24 = vmul.f32 %v14129_v43, %v14130_v25  ;;  %v3399_v61 = vmul.f32 %v14129_v43, %v14131_v23  ;;  %v14136_v14 = vld [vmem:[#allocation318_spill] sm:$0xff] }
 0x734   :  { %v3202_v17 = vmax.f32 %v3200_v30, %v3201_v20  ;;  %v3400_v58 = vmul.f32 %v14133_v42, %v14132_v3  ;;  %v3223_v0 = vmax.f32 %v3221_v44, %v3222_v6  ;;  %v3401_v26 = vmul.f32 %v14133_v42, %v14134_v51  ;;  %v14137_v30 = vld [vmem:[#allocation194_spill] sm:$0xff]  ;;  %v14142_v6 = vld [vmem:[#allocation196_spill] sm:$0xff]  ;;  %v14143_v51 = vld [vmem:[#allocation321_spill] sm:$0xff] }
 0x735   :  { %v3244_v62 = vmax.f32 %v3242_v5, %v3243_v31  ;;  %v3402_v36 = vmul.f32 %v14133_v42, %v14135_v53  ;;  %v3403_v20 = vmul.f32 %v14137_v30, %v14136_v14  ;;  %v3404_v25 = vmul.f32 %v14137_v30, %v14138_v13  ;;  %v14141_v5 = vld [vmem:[#allocation319_spill] sm:$0xff]  ;;  %v14145_v14 = vld [vmem:[#allocation322_spill] sm:$0xff]  ;;  %v14147_v13 = vld [vmem:[#allocation324_spill] sm:$0xff] }
 0x736   :  { %v3203_v56 = vrot.slane %v3202_v17, 1  ;;  %v11705_v43 = vmul.f32 %v14137_v30, %v14139_v10  ;;  %v3224_v3 = vrot.slane %v3223_v0, 1  ;;  %v3406_v31 = vmul.f32 %v14142_v6, %v14141_v5  ;;  %v14144_v53 = vld [vmem:[#allocation299_spill] sm:$0xff]  ;;  %v14148_v5 = vld [vmem:[#allocation209_spill] sm:$0xff] }
 0x737   :  { %v3245_v44 = vrot.slane %v3244_v62, 1  ;;  %v3407_v23 = vmul.f32 %v14142_v6, %v14143_v51  ;;  %v3408_v47 = vmul.f32 %v14142_v6, %v14144_v53  ;;  %v3409_v33 = vmul.f32 %v14146_v15, %v14145_v14  ;;  %v14151_v53 = vld [vmem:[#allocation79_spill] sm:$0xff] }
 0x738   :  { %14140 = vst [vmem:[#allocation24_spill] sm:$0xff] %v11705_v43  ;;  %v3204_v42 = vmax.f32 %v3202_v17, %v3203_v56  ;;  %v3410_v2 = vmul.f32 %v14146_v15, %v14147_v13  ;;  %v3225_v30 = vmax.f32 %v3223_v0, %v3224_v3  ;;  %v3411_v8 = vmul.f32 %v14146_v15, %v13850_v28  ;;  %v14149_v43 = vld [vmem:[#allocation325_spill] sm:$0xff]  ;;  %v14150_v56 = vld [vmem:[#allocation303_spill] sm:$0xff] }
 0x739   :  { %v3246_v10 = vmax.f32 %v3244_v62, %v3245_v44  ;;  %v3412_v48 = vmul.f32 %v14148_v5, %v13851_v34  ;;  %v3413_v17 = vmul.f32 %v14148_v5, %v14149_v43  ;;  %v3414_v6 = vmul.f32 %v14148_v5, %v14150_v56  ;;  %v14152_v51 = vld [vmem:[#allocation211_spill] sm:$0xff] }
 0x73a   :  { %v3415_v14 = vmul.f32 %v14152_v51, %v14151_v53  ;;  %v3421_v13 = vmax.f32 %v11611_v59, %v11635_v1  ;;  %v3250_v3 = vcombine.low %v3204_v42, %v3225_v30  ;;  %v14153_v62 = vld [vmem:[#allocation327_spill] sm:$0xff]  ;;  %v3422_v15 = vmax.f32 %v11623_v38, %v11647_v4 }
 0x73b   :  { %v3416_v0 = vmul.f32 %v14152_v51, %v14153_v62  ;;  %v3442_v44 = vmax.f32 %v11615_v41, %v11639_v60  ;;  %v3443_v5 = vmax.f32 %v11627_v50, %v11651_v27  ;;  %v3463_v53 = vmax.f32 %v11619_v16, %v11643_v54 }
 0x73c   :  { %v3423_v43 = vmax.f32 %v3421_v13, %v3385_v45  ;;  %v3464_v59 = vmax.f32 %v11631_v21, %v11655_v57  ;;  %v3257_v1 = vrot.slane %v3250_v3, %v13856_v18  ;;  %v3264_v42 = vrot.slane %v3246_v10, %v13856_v18  ;;  %v14154_v45 = vld [vmem:[#allocation254_spill] sm:$0xff] }
 0x73d   :  { %v3424_v30 = vmax.f32 %v3422_v15, %v3388_v63  ;;  %v3444_v62 = vmax.f32 %v3442_v44, %v3386_v12  ;;  %v3445_v4 = vmax.f32 %v3443_v5, %v3389_v46  ;;  %v3465_v56 = vmax.f32 %v3463_v53, %v3387_v55 }
 0x73e   :  { %v3425_v38 = vmax.f32 %v3423_v43, %v3391_v19  ;;  %v3466_v41 = vmax.f32 %v3464_v59, %v3390_v32  ;;  %v3265_v13 = vcombine.low %v3257_v1, %v3264_v42  ;;  %v3417_v50 = vmul.f32 %v14152_v51, %v10627_v11 }
 0x73f   :  { %v3426_v60 = vmax.f32 %v3424_v30, %v3394_v40  ;;  %v3446_v16 = vmax.f32 %v3444_v62, %v11673_v49  ;;  %v3447_v21 = vmax.f32 %v3445_v4, %v11683_v7  ;;  %v3467_v27 = vmax.f32 %v3465_v56, %v11677_v9  ;;  %v14158_v56 = vld [vmem:[#allocation275_spill] sm:$0xff]  ;;  %v14162_v30 = vld [vmem:[#allocation268_spill] sm:$0xff] }
 0x740   :  { %v3427_v54 = vmax.f32 %v3425_v38, %v3397_v52  ;;  %v3468_v57 = vmax.f32 %v3466_v41, %v3396_v39  ;;  %v3272_v10 = vrot.slane %v3265_v13, %v13856_v18  ;;  %v3418_v12 = vmul.f32 %v14154_v45, %v13917_v22  ;;  %v14155_v39 = vld [vmem:[#allocation24_spill] sm:$0xff]  ;;  %v14166_v41 = vld [vmem:[#allocation285_spill] sm:$0xff] }
 0x741   :  { %v3428_v53 = vmax.f32 %v3426_v60, %v3400_v58  ;;  %v3448_v55 = vmax.f32 %v3446_v16, %v3398_v24  ;;  %v3449_v46 = vmax.f32 %v3447_v21, %v3401_v26  ;;  %v3469_v32 = vmax.f32 %v3467_v27, %v3399_v61  ;;  %v14156_v61 = vld [vmem:[#allocation274_spill] sm:$0xff]  ;;  %v14167_v16 = vld [vmem:[#allocation276_spill] sm:$0xff]  ;;  %v14168_v21 = vld [vmem:[#allocation279_spill] sm:$0xff] }
 0x742   :  { %v3429_v63 = vmax.f32 %v3427_v54, %v3403_v20  ;;  %v3470_v51 = vmax.f32 %v3468_v57, %v3402_v36  ;;  %3275 = vst.msk [vmem:[#allocation2 + $0x5] ss:$8 sm:$0x7] %vm10961_vm0, %v3272_v10  ;;  %v3419_v52 = vmul.f32 %v14154_v45, %v13920_v35  ;;  %v3420_v19 = vmul.f32 %v14154_v45, %v13975_v29  ;;  %v14157_v36 = vld [vmem:[#allocation67_spill] sm:$0xff]  ;;  %v14169_v27 = vld [vmem:[#allocation69_spill] sm:$0xff] }
 0x743   :  { %v3430_v49 = vmax.f32 %v3428_v53, %v3406_v31  ;;  %v3450_v9 = vmax.f32 %v3448_v55, %v3404_v25  ;;  %v3451_v7 = vmax.f32 %v3449_v46, %v3407_v23  ;;  %v3471_v58 = vmax.f32 %v3469_v32, %v14155_v39  ;;  %v14159_v23 = vld [vmem:[#allocation272_spill] sm:$0xff]  ;;  %v14170_v45 = vld [vmem:[#allocation281_spill] sm:$0xff]  ;;  %v14171_v53 = vld [vmem:[#allocation271_spill] sm:$0xff] }
 0x744   :  { %v3431_v40 = vmax.f32 %v3429_v63, %v3409_v33  ;;  %v3472_v24 = vmax.f32 %v3470_v51, %v3408_v47  ;;  %v11760_v43 = vmul.f32 %v14157_v36, %v14156_v61  ;;  %v11764_v3 = vmul.f32 %v14157_v36, %v14158_v56  ;;  %v14172_v63 = vld [vmem:[#allocation296_spill] sm:$0xff]  ;;  %v14173_v46 = vld [vmem:[#allocation215_spill] sm:$0xff] }
 0x745   :  { %v3432_v20 = vmax.f32 %v3430_v49, %v3412_v48  ;;  %v3452_v26 = vmax.f32 %v3450_v9, %v3410_v2  ;;  %v3453_v15 = vmax.f32 %v3451_v7, %v3413_v17  ;;  %v3473_v44 = vmax.f32 %v3471_v58, %v3411_v8  ;;  %v14160_v48 = vld [vmem:[#allocation267_spill] sm:$0xff]  ;;  %v14161_v2 = vld [vmem:[#allocation213_spill] sm:$0xff]  ;;  %v14163_v8 = vld [vmem:[#allocation270_spill] sm:$0xff] }
 0x746   :  { %v3433_v62 = vmax.f32 %v3431_v40, %v3415_v14  ;;  %v3474_v31 = vmax.f32 %v3472_v24, %v3414_v6  ;;  %v11768_v5 = vmul.f32 %v14157_v36, %v14159_v23  ;;  %v11772_v47 = vmul.f32 %v14161_v2, %v14160_v48  ;;  %v14164_v6 = vld [vmem:[#allocation284_spill] sm:$0xff]  ;;  %v14175_v9 = vld [vmem:[#allocation287_spill] sm:$0xff]  ;;  %v14179_v36 = vld [vmem:[#allocation282_spill] sm:$0xff] }
 0x747   :  { %v3434_v25 = vmax.f32 %v3432_v20, %v3418_v12  ;;  %v3454_v33 = vmax.f32 %v3452_v26, %v3416_v0  ;;  %v3455_v59 = vmax.f32 %v3453_v15, %v3419_v52  ;;  %v3475_v1 = vmax.f32 %v3473_v44, %v3417_v50  ;;  %v14165_v0 = vld [vmem:[#allocation68_spill] sm:$0xff]  ;;  %v14176_v39 = vld [vmem:[#allocation307_spill] sm:$0xff] }
 0x748   :  { %v3476_v42 = vmax.f32 %v3474_v31, %v3420_v19  ;;  %v11776_v38 = vmul.f32 %v14161_v2, %v14162_v30  ;;  %v11780_v17 = vmul.f32 %v14161_v2, %v14163_v8  ;;  %v11784_v4 = vmul.f32 %v14165_v0, %v14164_v6  ;;  %v14174_v19 = vld [vmem:[#allocation283_spill] sm:$0xff]  ;;  %v14177_v58 = vld [vmem:[#allocation108_spill] sm:$0xff]  ;;  %v14180_v31 = vld [vmem:[#allocation309_spill] sm:$0xff] }
 0x749   :  { %v3435_v14 = vmax.f32 %v3433_v62, %v3434_v25  ;;  %v11788_v13 = vmul.f32 %v14165_v0, %v14166_v41  ;;  %v3456_v60 = vmax.f32 %v3454_v33, %v3455_v59  ;;  %v11792_v54 = vmul.f32 %v14165_v0, %v14167_v16  ;;  %v14178_v20 = vld [vmem:[#allocation308_spill] sm:$0xff]  ;;  %v14181_v25 = vld [vmem:[#allocation138_spill] sm:$0xff] }
 0x74a   :  { %v3477_v50 = vmax.f32 %v3475_v1, %v3476_v42  ;;  %v11796_v57 = vmul.f32 %v14169_v27, %v14168_v21  ;;  %v11800_v12 = vmul.f32 %v14169_v27, %v14170_v45  ;;  %v11804_v55 = vmul.f32 %v14169_v27, %v14171_v53  ;;  %v14182_v2 = vld [vmem:[#allocation312_spill] sm:$0xff]  ;;  %v14183_v42 = vld [vmem:[#allocation293_spill] sm:$0xff]  ;;  %v14184_v0 = vld [vmem:[#allocation310_spill] sm:$0xff] }
 0x74b   :  { %v3436_v10 = vrot.slane %v3435_v14, 4  ;;  %v3622_v32 = vmul.f32 %v14173_v46, %v14172_v63  ;;  %v3457_v51 = vrot.slane %v3456_v60, 4  ;;  %v3623_v49 = vmul.f32 %v14173_v46, %v14174_v19  ;;  %v14185_v27 = vld [vmem:[#allocation140_spill] sm:$0xff]  ;;  %v14193_v19 = vld [vmem:[#allocation217_spill] sm:$0xff]  ;;  %v14199_v6 = vld [vmem:[#allocation298_spill] sm:$0xff] }
 0x74c   :  { %v3478_v52 = vrot.slane %v3477_v50, 4  ;;  %v3624_v40 = vmul.f32 %v14173_v46, %v14175_v9  ;;  %v3625_v24 = vmul.f32 %v14177_v58, %v14176_v39  ;;  %v3626_v26 = vmul.f32 %v14177_v58, %v14178_v20  ;;  %v14186_v46 = vld [vmem:[#allocation313_spill] sm:$0xff]  ;;  %v14190_v39 = vld [vmem:[#allocation316_spill] sm:$0xff]  ;;  %v14206_v30 = vld [vmem:[#allocation226_spill] sm:$0xff] }
 0x74d   :  { %v3437_v7 = vmax.f32 %v3435_v14, %v3436_v10  ;;  %v3627_v62 = vmul.f32 %v14177_v58, %v14179_v36  ;;  %v3458_v15 = vmax.f32 %v3456_v60, %v3457_v51  ;;  %v3628_v33 = vmul.f32 %v14181_v25, %v14180_v31  ;;  %v14187_v51 = vld [vmem:[#allocation286_spill] sm:$0xff]  ;;  %v14194_v45 = vld [vmem:[#allocation317_spill] sm:$0xff]  ;;  %v14195_v16 = vld [vmem:[#allocation292_spill] sm:$0xff] }
 0x74e   :  { %v3479_v44 = vmax.f32 %v3477_v50, %v3478_v52  ;;  %v11822_v59 = vmul.f32 %v14181_v25, %v14182_v2  ;;  %v11826_v14 = vmul.f32 %v14181_v25, %v14183_v42  ;;  %v3631_v10 = vmul.f32 %v14185_v27, %v14184_v0  ;;  %v14188_v31 = vld [vmem:[#allocation314_spill] sm:$0xff]  ;;  %v14189_v2 = vld [vmem:[#allocation169_spill] sm:$0xff]  ;;  %v14192_v0 = vld [vmem:[#allocation315_spill] sm:$0xff] }
 0x74f   :  { %v3438_v1 = vrot.slane %v3437_v7, 2  ;;  %v11832_v58 = vmul.f32 %v14185_v27, %v14186_v46  ;;  %v3459_v60 = vrot.slane %v3458_v15, 2  ;;  %v3633_v52 = vmul.f32 %v14185_v27, %v14187_v51  ;;  %v14191_v42 = vld [vmem:[#allocation294_spill] sm:$0xff]  ;;  %v14198_v41 = vld [vmem:[#allocation320_spill] sm:$0xff] }
 0x750   :  { %v3480_v50 = vrot.slane %v3479_v44, 2  ;;  %v3634_v36 = vmul.f32 %v14189_v2, %v14188_v31  ;;  %v3635_v25 = vmul.f32 %v14189_v2, %v14190_v39  ;;  %v3636_v9 = vmul.f32 %v14189_v2, %v14191_v42  ;;  %v14196_v31 = vld [vmem:[#allocation318_spill] sm:$0xff] }
 0x751   :  { %v3439_v20 = vmax.f32 %v3437_v7, %v3438_v1  ;;  %v3637_v63 = vmul.f32 %v14193_v19, %v14192_v0  ;;  %v3460_v46 = vmax.f32 %v3458_v15, %v3459_v60  ;;  %v3638_v21 = vmul.f32 %v14193_v19, %v14194_v45  ;;  %v14197_v7 = vld [vmem:[#allocation219_spill] sm:$0xff]  ;;  %v14202_v60 = vld [vmem:[#allocation198_spill] sm:$0xff]  ;;  %v14203_v45 = vld [vmem:[#allocation321_spill] sm:$0xff] }
 0x752   :  { %v3481_v53 = vmax.f32 %v3479_v44, %v3480_v50  ;;  %v3639_v27 = vmul.f32 %v14193_v19, %v14195_v16  ;;  %v3640_v1 = vmul.f32 %v14197_v7, %v14196_v31  ;;  %v3641_v39 = vmul.f32 %v14197_v7, %v14198_v41  ;;  %v14201_v44 = vld [vmem:[#allocation319_spill] sm:$0xff]  ;;  %v14205_v31 = vld [vmem:[#allocation322_spill] sm:$0xff]  ;;  %v14207_v41 = vld [vmem:[#allocation324_spill] sm:$0xff] }
 0x753   :  { %v3440_v51 = vrot.slane %v3439_v20, 1  ;;  %v11854_v2 = vmul.f32 %v14197_v7, %v14199_v6  ;;  %v3461_v0 = vrot.slane %v3460_v46, 1  ;;  %v3643_v50 = vmul.f32 %v14202_v60, %v14201_v44  ;;  %v14204_v16 = vld [vmem:[#allocation299_spill] sm:$0xff]  ;;  %v14208_v44 = vld [vmem:[#allocation228_spill] sm:$0xff] }
 0x754   :  { %v3482_v15 = vrot.slane %v3481_v53, 1  ;;  %v3644_v42 = vmul.f32 %v14202_v60, %v14203_v45  ;;  %v3645_v8 = vmul.f32 %v14202_v60, %v14204_v16  ;;  %v3646_v48 = vmul.f32 %v14206_v30, %v14205_v31  ;;  %v14211_v16 = vld [vmem:[#allocation79_spill] sm:$0xff]  ;;  %v14212_v45 = vld [vmem:[#allocation256_spill] sm:$0xff] }
 0x755   :  { %14200 = vst [vmem:[#allocation93_spill] sm:$0xff] %v11854_v2  ;;  %v3441_v19 = vmax.f32 %v3439_v20, %v3440_v51  ;;  %v3647_v23 = vmul.f32 %v14206_v30, %v14207_v41  ;;  %v3462_v7 = vmax.f32 %v3460_v46, %v3461_v0  ;;  %v3648_v56 = vmul.f32 %v14206_v30, %v13850_v28  ;;  %v14209_v2 = vld [vmem:[#allocation325_spill] sm:$0xff]  ;;  %v14210_v51 = vld [vmem:[#allocation303_spill] sm:$0xff] }
 0x756   :  { %v3483_v6 = vmax.f32 %v3481_v53, %v3482_v15  ;;  %v3649_v61 = vmul.f32 %v14208_v44, %v13851_v34  ;;  %v3650_v20 = vmul.f32 %v14208_v44, %v14209_v2  ;;  %v3651_v60 = vmul.f32 %v14208_v44, %v14210_v51  ;;  %v14213_v53 = vld [vmem:[#allocation327_spill] sm:$0xff] }
 0x757   :  { %v3652_v31 = vmul.f32 %v14212_v45, %v14211_v16  ;;  %v3658_v41 = vmax.f32 %v11760_v43, %v11784_v4  ;;  %v3487_v0 = vcombine.low %v3441_v19, %v3462_v7  ;;  %v3653_v46 = vmul.f32 %v14212_v45, %v14213_v53 }
 0x758   :  { %v3659_v30 = vmax.f32 %v11772_v47, %v11796_v57  ;;  %v3679_v15 = vmax.f32 %v11764_v3, %v11788_v13  ;;  %v3680_v44 = vmax.f32 %v11776_v38, %v11800_v12  ;;  %v3700_v16 = vmax.f32 %v11768_v5, %v11792_v54 }
 0x759   :  { %v3660_v2 = vmax.f32 %v3658_v41, %v3622_v32  ;;  %v3701_v43 = vmax.f32 %v11780_v17, %v11804_v55  ;;  %v3494_v4 = vrot.slane %v3487_v0, %v13856_v18  ;;  %v3501_v19 = vrot.slane %v3483_v6, %v13856_v18  ;;  %v14214_v32 = vld [vmem:[#allocation221_spill] sm:$0xff] }
 0x75a   :  { %v3661_v7 = vmax.f32 %v3659_v30, %v3625_v24  ;;  %v3681_v53 = vmax.f32 %v3679_v15, %v3623_v49  ;;  %v3682_v57 = vmax.f32 %v3680_v44, %v3626_v26  ;;  %v3702_v51 = vmax.f32 %v3700_v16, %v3624_v40 }
 0x75b   :  { %v3662_v47 = vmax.f32 %v3660_v2, %v3628_v33  ;;  %v3703_v3 = vmax.f32 %v3701_v43, %v3627_v62  ;;  %v3502_v41 = vcombine.low %v3494_v4, %v3501_v19  ;;  %v3654_v38 = vmul.f32 %v14212_v45, %v10627_v11 }
 0x75c   :  { %v3663_v13 = vmax.f32 %v3661_v7, %v3631_v10  ;;  %v3683_v5 = vmax.f32 %v3681_v53, %v11822_v59  ;;  %v3684_v17 = vmax.f32 %v3682_v57, %v11832_v58  ;;  %v3704_v12 = vmax.f32 %v3702_v51, %v11826_v14  ;;  %v14218_v51 = vld [vmem:[#allocation275_spill] sm:$0xff]  ;;  %v14222_v7 = vld [vmem:[#allocation268_spill] sm:$0xff] }
 0x75d   :  { %v3664_v54 = vmax.f32 %v3662_v47, %v3634_v36  ;;  %v3705_v55 = vmax.f32 %v3703_v3, %v3633_v52  ;;  %v3509_v6 = vrot.slane %v3502_v41, %v13856_v18  ;;  %v3655_v49 = vmul.f32 %v14214_v32, %v13917_v22  ;;  %v14215_v52 = vld [vmem:[#allocation93_spill] sm:$0xff] }
 0x75e   :  { %v3665_v16 = vmax.f32 %v3663_v13, %v3637_v63  ;;  %v3685_v40 = vmax.f32 %v3683_v5, %v3635_v25  ;;  %v3686_v26 = vmax.f32 %v3684_v17, %v3638_v21  ;;  %v3706_v62 = vmax.f32 %v3704_v12, %v3636_v9  ;;  %v14216_v9 = vld [vmem:[#allocation274_spill] sm:$0xff]  ;;  %v14226_v3 = vld [vmem:[#allocation285_spill] sm:$0xff]  ;;  %v14227_v5 = vld [vmem:[#allocation276_spill] sm:$0xff] }
 0x75f   :  { %v3666_v24 = vmax.f32 %v3664_v54, %v3640_v1  ;;  %v3707_v45 = vmax.f32 %v3705_v55, %v3639_v27  ;;  %3512 = vst.msk [vmem:[#allocation2 + $0x6] ss:$8 sm:$0x7] %vm10961_vm0, %v3509_v6  ;;  %v3656_v36 = vmul.f32 %v14214_v32, %v13920_v35  ;;  %v3657_v33 = vmul.f32 %v14214_v32, %v13975_v29  ;;  %v14217_v27 = vld [vmem:[#allocation166_spill] sm:$0xff]  ;;  %v14228_v17 = vld [vmem:[#allocation279_spill] sm:$0xff]  ;;  %v14229_v12 = vld [vmem:[#allocation168_spill] sm:$0xff] }
 0x760   :  { %v3667_v59 = vmax.f32 %v3665_v16, %v3643_v50  ;;  %v3687_v14 = vmax.f32 %v3685_v40, %v3641_v39  ;;  %v3688_v58 = vmax.f32 %v3686_v26, %v3644_v42  ;;  %v3708_v63 = vmax.f32 %v3706_v62, %v14215_v52  ;;  %v14219_v42 = vld [vmem:[#allocation272_spill] sm:$0xff]  ;;  %v14230_v32 = vld [vmem:[#allocation281_spill] sm:$0xff]  ;;  %v14231_v16 = vld [vmem:[#allocation271_spill] sm:$0xff] }
 0x761   :  { %v3668_v10 = vmax.f32 %v3666_v24, %v3646_v48  ;;  %v3709_v25 = vmax.f32 %v3707_v45, %v3645_v8  ;;  %v11909_v2 = vmul.f32 %v14217_v27, %v14216_v9  ;;  %v11913_v0 = vmul.f32 %v14217_v27, %v14218_v51  ;;  %v14232_v24 = vld [vmem:[#allocation296_spill] sm:$0xff]  ;;  %v14233_v26 = vld [vmem:[#allocation110_spill] sm:$0xff]  ;;  %v14236_v52 = vld [vmem:[#allocation307_spill] sm:$0xff] }
 0x762   :  { %v3669_v1 = vmax.f32 %v3667_v59, %v3649_v61  ;;  %v3689_v21 = vmax.f32 %v3687_v14, %v3647_v23  ;;  %v3690_v30 = vmax.f32 %v3688_v58, %v3650_v20  ;;  %v3710_v15 = vmax.f32 %v3708_v63, %v3648_v56  ;;  %v14220_v61 = vld [vmem:[#allocation267_spill] sm:$0xff]  ;;  %v14221_v23 = vld [vmem:[#allocation70_spill] sm:$0xff] }
 0x763   :  { %v3670_v53 = vmax.f32 %v3668_v10, %v3652_v31  ;;  %v3711_v50 = vmax.f32 %v3709_v25, %v3651_v60  ;;  %v11917_v44 = vmul.f32 %v14217_v27, %v14219_v42  ;;  %v11921_v8 = vmul.f32 %v14221_v23, %v14220_v61  ;;  %v14223_v56 = vld [vmem:[#allocation270_spill] sm:$0xff]  ;;  %v14224_v60 = vld [vmem:[#allocation284_spill] sm:$0xff]  ;;  %v14235_v14 = vld [vmem:[#allocation287_spill] sm:$0xff] }
 0x764   :  { %v3671_v39 = vmax.f32 %v3669_v1, %v3655_v49  ;;  %v3691_v48 = vmax.f32 %v3689_v21, %v3653_v46  ;;  %v3692_v43 = vmax.f32 %v3690_v30, %v3656_v36  ;;  %v3712_v4 = vmax.f32 %v3710_v15, %v3654_v38  ;;  %v14225_v46 = vld [vmem:[#allocation71_spill] sm:$0xff]  ;;  %v14237_v63 = vld [vmem:[#allocation170_spill] sm:$0xff]  ;;  %v14238_v1 = vld [vmem:[#allocation308_spill] sm:$0xff] }
 0x765   :  { %v3713_v19 = vmax.f32 %v3711_v50, %v3657_v33  ;;  %v11925_v47 = vmul.f32 %v14221_v23, %v14222_v7  ;;  %v11929_v20 = vmul.f32 %v14221_v23, %v14223_v56  ;;  %v11933_v57 = vmul.f32 %v14225_v46, %v14224_v60  ;;  %v14234_v33 = vld [vmem:[#allocation283_spill] sm:$0xff]  ;;  %v14239_v27 = vld [vmem:[#allocation282_spill] sm:$0xff]  ;;  %v14240_v50 = vld [vmem:[#allocation309_spill] sm:$0xff] }
 0x766   :  { %v3672_v31 = vmax.f32 %v3670_v53, %v3671_v39  ;;  %v11937_v41 = vmul.f32 %v14225_v46, %v14226_v3  ;;  %v3693_v13 = vmax.f32 %v3691_v48, %v3692_v43  ;;  %v11941_v54 = vmul.f32 %v14225_v46, %v14227_v5  ;;  %v14241_v39 = vld [vmem:[#allocation172_spill] sm:$0xff]  ;;  %v14244_v46 = vld [vmem:[#allocation310_spill] sm:$0xff]  ;;  %v14266_v7 = vld [vmem:[#allocation177_spill] sm:$0xff] }
 0x767   :  { %v3714_v38 = vmax.f32 %v3712_v4, %v3713_v19  ;;  %v11945_v55 = vmul.f32 %v14229_v12, %v14228_v17  ;;  %v11949_v49 = vmul.f32 %v14229_v12, %v14230_v32  ;;  %v11953_v40 = vmul.f32 %v14229_v12, %v14231_v16  ;;  %v14242_v23 = vld [vmem:[#allocation312_spill] sm:$0xff]  ;;  %v14243_v19 = vld [vmem:[#allocation293_spill] sm:$0xff]  ;;  %v14245_v12 = vld [vmem:[#allocation142_spill] sm:$0xff] }
 0x768   :  { %v3673_v6 = vrot.slane %v3672_v31, 4  ;;  %v3859_v62 = vmul.f32 %v14233_v26, %v14232_v24  ;;  %v3694_v45 = vrot.slane %v3693_v13, 4  ;;  %v3860_v59 = vmul.f32 %v14233_v26, %v14234_v33  ;;  %v14253_v33 = vld [vmem:[#allocation173_spill] sm:$0xff]  ;;  %v14255_v5 = vld [vmem:[#allocation292_spill] sm:$0xff]  ;;  %v14259_v60 = vld [vmem:[#allocation298_spill] sm:$0xff] }
 0x769   :  { %v3715_v36 = vrot.slane %v3714_v38, 4  ;;  %v3861_v10 = vmul.f32 %v14233_v26, %v14235_v14  ;;  %v3862_v25 = vmul.f32 %v14237_v63, %v14236_v52  ;;  %v3863_v21 = vmul.f32 %v14237_v63, %v14238_v1  ;;  %v14246_v26 = vld [vmem:[#allocation313_spill] sm:$0xff]  ;;  %v14250_v52 = vld [vmem:[#allocation316_spill] sm:$0xff] }
 0x76a   :  { %v3674_v58 = vmax.f32 %v3672_v31, %v3673_v6  ;;  %v3864_v53 = vmul.f32 %v14237_v63, %v14239_v27  ;;  %v3695_v30 = vmax.f32 %v3693_v13, %v3694_v45  ;;  %v3865_v48 = vmul.f32 %v14241_v39, %v14240_v50  ;;  %v14247_v45 = vld [vmem:[#allocation286_spill] sm:$0xff]  ;;  %v14254_v32 = vld [vmem:[#allocation317_spill] sm:$0xff]  ;;  %v14258_v3 = vld [vmem:[#allocation320_spill] sm:$0xff] }
 0x76b   :  { %v3716_v15 = vmax.f32 %v3714_v38, %v3715_v36  ;;  %v11971_v43 = vmul.f32 %v14241_v39, %v14242_v23  ;;  %v11975_v31 = vmul.f32 %v14241_v39, %v14243_v19  ;;  %v3868_v6 = vmul.f32 %v14245_v12, %v14244_v46  ;;  %v14248_v50 = vld [vmem:[#allocation314_spill] sm:$0xff]  ;;  %v14249_v23 = vld [vmem:[#allocation171_spill] sm:$0xff] }
 0x76c   :  { %v3675_v4 = vrot.slane %v3674_v58, 2  ;;  %v11981_v63 = vmul.f32 %v14245_v12, %v14246_v26  ;;  %v3696_v13 = vrot.slane %v3695_v30, 2  ;;  %v3870_v36 = vmul.f32 %v14245_v12, %v14247_v45  ;;  %v14251_v19 = vld [vmem:[#allocation294_spill] sm:$0xff]  ;;  %v14252_v46 = vld [vmem:[#allocation315_spill] sm:$0xff] }
 0x76d   :  { %v3717_v38 = vrot.slane %v3716_v15, 2  ;;  %v3871_v27 = vmul.f32 %v14249_v23, %v14248_v50  ;;  %v3872_v39 = vmul.f32 %v14249_v23, %v14250_v52  ;;  %v3873_v14 = vmul.f32 %v14249_v23, %v14251_v19  ;;  %v14256_v50 = vld [vmem:[#allocation318_spill] sm:$0xff] }
 0x76e   :  { %v3676_v1 = vmax.f32 %v3674_v58, %v3675_v4  ;;  %v3874_v24 = vmul.f32 %v14253_v33, %v14252_v46  ;;  %v3697_v26 = vmax.f32 %v3695_v30, %v3696_v13  ;;  %v3875_v17 = vmul.f32 %v14253_v33, %v14254_v32  ;;  %v14257_v58 = vld [vmem:[#allocation200_spill] sm:$0xff]  ;;  %v14262_v13 = vld [vmem:[#allocation175_spill] sm:$0xff]  ;;  %v14263_v32 = vld [vmem:[#allocation321_spill] sm:$0xff] }
 0x76f   :  { %v3718_v16 = vmax.f32 %v3716_v15, %v3717_v38  ;;  %v3876_v12 = vmul.f32 %v14253_v33, %v14255_v5  ;;  %v3877_v4 = vmul.f32 %v14257_v58, %v14256_v50  ;;  %v3878_v52 = vmul.f32 %v14257_v58, %v14258_v3  ;;  %v14261_v15 = vld [vmem:[#allocation319_spill] sm:$0xff]  ;;  %v14265_v50 = vld [vmem:[#allocation322_spill] sm:$0xff]  ;;  %v14267_v3 = vld [vmem:[#allocation324_spill] sm:$0xff] }
 0x770   :  { %v3677_v45 = vrot.slane %v3676_v1, 1  ;;  %v12003_v23 = vmul.f32 %v14257_v58, %v14259_v60  ;;  %v3698_v46 = vrot.slane %v3697_v26, 1  ;;  %v3880_v38 = vmul.f32 %v14262_v13, %v14261_v15  ;;  %v14264_v5 = vld [vmem:[#allocation299_spill] sm:$0xff]  ;;  %v14268_v15 = vld [vmem:[#allocation230_spill] sm:$0xff] }
 0x771   :  { %v3719_v30 = vrot.slane %v3718_v16, 1  ;;  %v3881_v19 = vmul.f32 %v14262_v13, %v14263_v32  ;;  %v3882_v56 = vmul.f32 %v14262_v13, %v14264_v5  ;;  %v3883_v61 = vmul.f32 %v14266_v7, %v14265_v50  ;;  %v14271_v5 = vld [vmem:[#allocation79_spill] sm:$0xff]  ;;  %v14272_v32 = vld [vmem:[#allocation258_spill] sm:$0xff] }
 0x772   :  { %14260 = vst [vmem:[#allocation25_spill] sm:$0xff] %v12003_v23  ;;  %v3678_v33 = vmax.f32 %v3676_v1, %v3677_v45  ;;  %v3884_v42 = vmul.f32 %v14266_v7, %v14267_v3  ;;  %v3699_v58 = vmax.f32 %v3697_v26, %v3698_v46  ;;  %v3885_v51 = vmul.f32 %v14266_v7, %v13850_v28  ;;  %v14269_v23 = vld [vmem:[#allocation325_spill] sm:$0xff]  ;;  %v14270_v45 = vld [vmem:[#allocation303_spill] sm:$0xff] }
 0x773   :  { %v3720_v60 = vmax.f32 %v3718_v16, %v3719_v30  ;;  %v3886_v9 = vmul.f32 %v14268_v15, %v13851_v34  ;;  %v3887_v1 = vmul.f32 %v14268_v15, %v14269_v23  ;;  %v3888_v13 = vmul.f32 %v14268_v15, %v14270_v45  ;;  %v14273_v16 = vld [vmem:[#allocation327_spill] sm:$0xff] }
 0x774   :  { %v3889_v50 = vmul.f32 %v14272_v32, %v14271_v5  ;;  %v3895_v3 = vmax.f32 %v11909_v2, %v11933_v57  ;;  %v3724_v46 = vcombine.low %v3678_v33, %v3699_v58  ;;  %v3890_v26 = vmul.f32 %v14272_v32, %v14273_v16 }
 0x775   :  { %v3896_v7 = vmax.f32 %v11921_v8, %v11945_v55  ;;  %v3916_v30 = vmax.f32 %v11913_v0, %v11937_v41  ;;  %v3917_v15 = vmax.f32 %v11925_v47, %v11949_v49  ;;  %v3937_v5 = vmax.f32 %v11917_v44, %v11941_v54 }
 0x776   :  { %v3897_v23 = vmax.f32 %v3895_v3, %v3859_v62  ;;  %v3938_v2 = vmax.f32 %v11929_v20, %v11953_v40  ;;  %v3731_v57 = vrot.slane %v3724_v46, %v13856_v18  ;;  %v3738_v33 = vrot.slane %v3720_v60, %v13856_v18  ;;  %v14274_v62 = vld [vmem:[#allocation260_spill] sm:$0xff] }
 0x777   :  { %v3898_v58 = vmax.f32 %v3896_v7, %v3862_v25  ;;  %v3918_v16 = vmax.f32 %v3916_v30, %v3860_v59  ;;  %v3919_v55 = vmax.f32 %v3917_v15, %v3863_v21  ;;  %v3939_v45 = vmax.f32 %v3937_v5, %v3861_v10 }
 0x778   :  { %v3899_v8 = vmax.f32 %v3897_v23, %v3865_v48  ;;  %v3940_v0 = vmax.f32 %v3938_v2, %v3864_v53  ;;  %v3739_v3 = vcombine.low %v3731_v57, %v3738_v33  ;;  %v3891_v47 = vmul.f32 %v14272_v32, %v10627_v11 }
 0x779   :  { %v3900_v41 = vmax.f32 %v3898_v58, %v3868_v6  ;;  %v3920_v44 = vmax.f32 %v3918_v16, %v11971_v43  ;;  %v3921_v20 = vmax.f32 %v3919_v55, %v11981_v63  ;;  %v3941_v49 = vmax.f32 %v3939_v45, %v11975_v31  ;;  %v14278_v45 = vld [vmem:[#allocation275_spill] sm:$0xff]  ;;  %v14282_v58 = vld [vmem:[#allocation268_spill] sm:$0xff] }
 0x77a   :  { %v3901_v54 = vmax.f32 %v3899_v8, %v3871_v27  ;;  %v3942_v40 = vmax.f32 %v3940_v0, %v3870_v36  ;;  %v3746_v60 = vrot.slane %v3739_v3, %v13856_v18  ;;  %v3892_v59 = vmul.f32 %v14274_v62, %v13917_v22  ;;  %v14275_v36 = vld [vmem:[#allocation25_spill] sm:$0xff] }
 0x77b   :  { %v3902_v5 = vmax.f32 %v3900_v41, %v3874_v24  ;;  %v3922_v10 = vmax.f32 %v3920_v44, %v3872_v39  ;;  %v3923_v21 = vmax.f32 %v3921_v20, %v3875_v17  ;;  %v3943_v53 = vmax.f32 %v3941_v49, %v3873_v14  ;;  %v14276_v14 = vld [vmem:[#allocation274_spill] sm:$0xff]  ;;  %v14286_v0 = vld [vmem:[#allocation285_spill] sm:$0xff]  ;;  %v14287_v44 = vld [vmem:[#allocation276_spill] sm:$0xff] }
 0x77c   :  { %v3903_v25 = vmax.f32 %v3901_v54, %v3877_v4  ;;  %v3944_v32 = vmax.f32 %v3942_v40, %v3876_v12  ;;  %3749 = vst.msk [vmem:[#allocation2 + $0x7] ss:$8 sm:$0x7] %vm10961_vm0, %v3746_v60  ;;  %v3893_v27 = vmul.f32 %v14274_v62, %v13920_v35  ;;  %v3894_v48 = vmul.f32 %v14274_v62, %v13975_v29  ;;  %v14277_v12 = vld [vmem:[#allocation72_spill] sm:$0xff]  ;;  %v14288_v20 = vld [vmem:[#allocation279_spill] sm:$0xff]  ;;  %v14289_v49 = vld [vmem:[#allocation74_spill] sm:$0xff] }
 0x77d   :  { %v3904_v43 = vmax.f32 %v3902_v5, %v3880_v38  ;;  %v3924_v31 = vmax.f32 %v3922_v10, %v3878_v52  ;;  %v3925_v63 = vmax.f32 %v3923_v21, %v3881_v19  ;;  %v3945_v24 = vmax.f32 %v3943_v53, %v14275_v36  ;;  %v14279_v19 = vld [vmem:[#allocation272_spill] sm:$0xff]  ;;  %v14290_v62 = vld [vmem:[#allocation281_spill] sm:$0xff]  ;;  %v14291_v5 = vld [vmem:[#allocation271_spill] sm:$0xff] }
 0x77e   :  { %v3905_v6 = vmax.f32 %v3903_v25, %v3883_v61  ;;  %v3946_v39 = vmax.f32 %v3944_v32, %v3882_v56  ;;  %v12058_v23 = vmul.f32 %v14277_v12, %v14276_v14  ;;  %v12062_v46 = vmul.f32 %v14277_v12, %v14278_v45  ;;  %v14292_v25 = vld [vmem:[#allocation296_spill] sm:$0xff]  ;;  %v14296_v36 = vld [vmem:[#allocation307_spill] sm:$0xff] }
 0x77f   :  { %v3906_v4 = vmax.f32 %v3904_v43, %v3886_v9  ;;  %v3926_v17 = vmax.f32 %v3924_v31, %v3884_v42  ;;  %v3927_v7 = vmax.f32 %v3925_v63, %v3887_v1  ;;  %v3947_v30 = vmax.f32 %v3945_v24, %v3885_v51  ;;  %v14280_v9 = vld [vmem:[#allocation267_spill] sm:$0xff]  ;;  %v14283_v51 = vld [vmem:[#allocation270_spill] sm:$0xff]  ;;  %v14293_v21 = vld [vmem:[#allocation112_spill] sm:$0xff] }
 0x780   :  { %v3907_v16 = vmax.f32 %v3905_v6, %v3889_v50  ;;  %v3948_v38 = vmax.f32 %v3946_v39, %v3888_v13  ;;  %v12066_v15 = vmul.f32 %v14277_v12, %v14279_v19  ;;  %v14281_v42 = vld [vmem:[#allocation223_spill] sm:$0xff]  ;;  %v14284_v13 = vld [vmem:[#allocation284_spill] sm:$0xff]  ;;  %v12094_v40 = vmul.f32 %v14289_v49, %v14288_v20  ;;  %v14297_v24 = vld [vmem:[#allocation114_spill] sm:$0xff] }
 0x781   :  { %v3908_v52 = vmax.f32 %v3906_v4, %v3892_v59  ;;  %v3928_v61 = vmax.f32 %v3926_v17, %v3890_v26  ;;  %v12070_v56 = vmul.f32 %v14281_v42, %v14280_v9  ;;  %v3929_v2 = vmax.f32 %v3927_v7, %v3893_v27  ;;  %v14285_v26 = vld [vmem:[#allocation73_spill] sm:$0xff]  ;;  %v14295_v31 = vld [vmem:[#allocation287_spill] sm:$0xff]  ;;  %v14298_v4 = vld [vmem:[#allocation308_spill] sm:$0xff] }
 0x782   :  { %v3949_v57 = vmax.f32 %v3947_v30, %v3891_v47  ;;  %v3950_v33 = vmax.f32 %v3948_v38, %v3894_v48  ;;  %v12074_v8 = vmul.f32 %v14281_v42, %v14282_v58  ;;  %v12078_v1 = vmul.f32 %v14281_v42, %v14283_v51  ;;  %v14294_v48 = vld [vmem:[#allocation283_spill] sm:$0xff]  ;;  %v14299_v12 = vld [vmem:[#allocation282_spill] sm:$0xff]  ;;  %v14300_v38 = vld [vmem:[#allocation309_spill] sm:$0xff] }
 0x783   :  { %v3909_v50 = vmax.f32 %v3907_v16, %v3908_v52  ;;  %v12082_v55 = vmul.f32 %v14285_v26, %v14284_v13  ;;  %v12086_v3 = vmul.f32 %v14285_v26, %v14286_v0  ;;  %v3930_v41 = vmax.f32 %v3928_v61, %v3929_v2  ;;  %v14301_v52 = vld [vmem:[#allocation145_spill] sm:$0xff]  ;;  %v14302_v42 = vld [vmem:[#allocation312_spill] sm:$0xff]  ;;  %v14319_v13 = vld [vmem:[#allocation298_spill] sm:$0xff] }
 0x784   :  { %v3951_v47 = vmax.f32 %v3949_v57, %v3950_v33  ;;  %v12090_v54 = vmul.f32 %v14285_v26, %v14287_v44  ;;  %v12098_v59 = vmul.f32 %v14289_v49, %v14290_v62  ;;  %v12102_v10 = vmul.f32 %v14289_v49, %v14291_v5  ;;  %v14303_v33 = vld [vmem:[#allocation293_spill] sm:$0xff]  ;;  %v14304_v26 = vld [vmem:[#allocation310_spill] sm:$0xff]  ;;  %v14315_v44 = vld [vmem:[#allocation292_spill] sm:$0xff] }
 0x785   :  { %v3910_v60 = vrot.slane %v3909_v50, 4  ;;  %v4096_v53 = vmul.f32 %v14293_v21, %v14292_v25  ;;  %v3931_v32 = vrot.slane %v3930_v41, 4  ;;  %v4097_v43 = vmul.f32 %v14293_v21, %v14294_v48  ;;  %v14305_v49 = vld [vmem:[#allocation225_spill] sm:$0xff]  ;;  %v14313_v48 = vld [vmem:[#allocation174_spill] sm:$0xff]  ;;  %v14318_v0 = vld [vmem:[#allocation320_spill] sm:$0xff] }
 0x786   :  { %v3952_v27 = vrot.slane %v3951_v47, 4  ;;  %v4098_v6 = vmul.f32 %v14293_v21, %v14295_v31  ;;  %v4099_v39 = vmul.f32 %v14297_v24, %v14296_v36  ;;  %v4100_v17 = vmul.f32 %v14297_v24, %v14298_v4  ;;  %v14306_v21 = vld [vmem:[#allocation313_spill] sm:$0xff]  ;;  %v14310_v36 = vld [vmem:[#allocation316_spill] sm:$0xff] }
 0x787   :  { %v3911_v63 = vmax.f32 %v3909_v50, %v3910_v60  ;;  %v4101_v16 = vmul.f32 %v14297_v24, %v14299_v12  ;;  %v3932_v7 = vmax.f32 %v3930_v41, %v3931_v32  ;;  %v4102_v61 = vmul.f32 %v14301_v52, %v14300_v38  ;;  %v14307_v32 = vld [vmem:[#allocation286_spill] sm:$0xff]  ;;  %v14314_v62 = vld [vmem:[#allocation317_spill] sm:$0xff]  ;;  %v14326_v58 = vld [vmem:[#allocation232_spill] sm:$0xff] }
 0x788   :  { %v3953_v30 = vmax.f32 %v3951_v47, %v3952_v27  ;;  %v12120_v2 = vmul.f32 %v14301_v52, %v14302_v42  ;;  %v12124_v50 = vmul.f32 %v14301_v52, %v14303_v33  ;;  %v4105_v60 = vmul.f32 %v14305_v49, %v14304_v26  ;;  %v14308_v38 = vld [vmem:[#allocation314_spill] sm:$0xff]  ;;  %v14309_v42 = vld [vmem:[#allocation227_spill] sm:$0xff] }
 0x789   :  { %v3912_v57 = vrot.slane %v3911_v63, 2  ;;  %v12130_v24 = vmul.f32 %v14305_v49, %v14306_v21  ;;  %v3933_v41 = vrot.slane %v3932_v7, 2  ;;  %v4107_v27 = vmul.f32 %v14305_v49, %v14307_v32  ;;  %v14311_v33 = vld [vmem:[#allocation294_spill] sm:$0xff]  ;;  %v14312_v26 = vld [vmem:[#allocation315_spill] sm:$0xff] }
 0x78a   :  { %v3954_v47 = vrot.slane %v3953_v30, 2  ;;  %v4108_v12 = vmul.f32 %v14309_v42, %v14308_v38  ;;  %v4109_v52 = vmul.f32 %v14309_v42, %v14310_v36  ;;  %v4110_v31 = vmul.f32 %v14309_v42, %v14311_v33  ;;  %v14316_v38 = vld [vmem:[#allocation318_spill] sm:$0xff] }
 0x78b   :  { %v3913_v4 = vmax.f32 %v3911_v63, %v3912_v57  ;;  %v4111_v25 = vmul.f32 %v14313_v48, %v14312_v26  ;;  %v3934_v21 = vmax.f32 %v3932_v7, %v3933_v41  ;;  %v4112_v20 = vmul.f32 %v14313_v48, %v14314_v62  ;;  %v14317_v63 = vld [vmem:[#allocation202_spill] sm:$0xff]  ;;  %v14322_v41 = vld [vmem:[#allocation204_spill] sm:$0xff]  ;;  %v14323_v62 = vld [vmem:[#allocation321_spill] sm:$0xff] }
 0x78c   :  { %v3955_v5 = vmax.f32 %v3953_v30, %v3954_v47  ;;  %v4113_v49 = vmul.f32 %v14313_v48, %v14315_v44  ;;  %v4114_v57 = vmul.f32 %v14317_v63, %v14316_v38  ;;  %v4115_v36 = vmul.f32 %v14317_v63, %v14318_v0  ;;  %v14321_v30 = vld [vmem:[#allocation319_spill] sm:$0xff]  ;;  %v14325_v38 = vld [vmem:[#allocation322_spill] sm:$0xff]  ;;  %v14327_v0 = vld [vmem:[#allocation324_spill] sm:$0xff] }
 0x78d   :  { %v3914_v32 = vrot.slane %v3913_v4, 1  ;;  %v12152_v42 = vmul.f32 %v14317_v63, %v14319_v13  ;;  %v3935_v26 = vrot.slane %v3934_v21, 1  ;;  %v4117_v47 = vmul.f32 %v14322_v41, %v14321_v30  ;;  %v14324_v44 = vld [vmem:[#allocation299_spill] sm:$0xff]  ;;  %v14328_v30 = vld [vmem:[#allocation229_spill] sm:$0xff] }
 0x78e   :  { %v3956_v7 = vrot.slane %v3955_v5, 1  ;;  %v4118_v33 = vmul.f32 %v14322_v41, %v14323_v62  ;;  %v4119_v51 = vmul.f32 %v14322_v41, %v14324_v44  ;;  %v4120_v9 = vmul.f32 %v14326_v58, %v14325_v38  ;;  %v14331_v44 = vld [vmem:[#allocation79_spill] sm:$0xff] }
 0x78f   :  { %14320 = vst [vmem:[#allocation95_spill] sm:$0xff] %v12152_v42  ;;  %v3915_v48 = vmax.f32 %v3913_v4, %v3914_v32  ;;  %v4121_v19 = vmul.f32 %v14326_v58, %v14327_v0  ;;  %v3936_v63 = vmax.f32 %v3934_v21, %v3935_v26  ;;  %v4122_v45 = vmul.f32 %v14326_v58, %v13850_v28  ;;  %v14329_v42 = vld [vmem:[#allocation325_spill] sm:$0xff]  ;;  %v14330_v32 = vld [vmem:[#allocation303_spill] sm:$0xff] }
 0x790   :  { %v3957_v13 = vmax.f32 %v3955_v5, %v3956_v7  ;;  %v4123_v14 = vmul.f32 %v14328_v30, %v13851_v34  ;;  %v4124_v4 = vmul.f32 %v14328_v30, %v14329_v42  ;;  %v4125_v41 = vmul.f32 %v14328_v30, %v14330_v32  ;;  %v14332_v62 = vld [vmem:[#allocation231_spill] sm:$0xff] }
 0x791   :  { %v4126_v38 = vmul.f32 %v14332_v62, %v14331_v44  ;;  %v4132_v0 = vmax.f32 %v12058_v23, %v12082_v55  ;;  %v3961_v26 = vcombine.low %v3915_v48, %v3936_v63  ;;  %v14333_v5 = vld [vmem:[#allocation327_spill] sm:$0xff]  ;;  %v4133_v58 = vmax.f32 %v12070_v56, %v12094_v40 }
 0x792   :  { %v4127_v21 = vmul.f32 %v14332_v62, %v14333_v5  ;;  %v4153_v7 = vmax.f32 %v12062_v46, %v12086_v3  ;;  %v4154_v30 = vmax.f32 %v12074_v8, %v12098_v59  ;;  %v4174_v44 = vmax.f32 %v12066_v15, %v12090_v54 }
 0x793   :  { %v4134_v42 = vmax.f32 %v4132_v0, %v4096_v53  ;;  %v4175_v23 = vmax.f32 %v12078_v1, %v12102_v10  ;;  %v3968_v55 = vrot.slane %v3961_v26, %v13856_v18  ;;  %v3975_v48 = vrot.slane %v3957_v13, %v13856_v18  ;;  %v14334_v53 = vld [vmem:[#allocation262_spill] sm:$0xff] }
 0x794   :  { %v4135_v63 = vmax.f32 %v4133_v58, %v4099_v39  ;;  %v4155_v5 = vmax.f32 %v4153_v7, %v4097_v43  ;;  %v4156_v40 = vmax.f32 %v4154_v30, %v4100_v17  ;;  %v4176_v32 = vmax.f32 %v4174_v44, %v4098_v6 }
 0x795   :  { %v4136_v56 = vmax.f32 %v4134_v42, %v4102_v61  ;;  %v4177_v46 = vmax.f32 %v4175_v23, %v4101_v16  ;;  %v3976_v0 = vcombine.low %v3968_v55, %v3975_v48  ;;  %v4128_v8 = vmul.f32 %v14332_v62, %v10627_v11 }
 0x796   :  { %v4137_v3 = vmax.f32 %v4135_v63, %v4105_v60  ;;  %v4157_v15 = vmax.f32 %v4155_v5, %v12120_v2  ;;  %v4158_v1 = vmax.f32 %v4156_v40, %v12130_v24  ;;  %v4178_v59 = vmax.f32 %v4176_v32, %v12124_v50  ;;  %v14338_v32 = vld [vmem:[#allocation275_spill] sm:$0xff]  ;;  %v14342_v63 = vld [vmem:[#allocation268_spill] sm:$0xff] }
 0x797   :  { %v4138_v54 = vmax.f32 %v4136_v56, %v4108_v12  ;;  %v4179_v10 = vmax.f32 %v4177_v46, %v4107_v27  ;;  %v3983_v13 = vrot.slane %v3976_v0, %v13856_v18  ;;  %v4129_v43 = vmul.f32 %v14334_v53, %v13917_v22  ;;  %v14335_v27 = vld [vmem:[#allocation95_spill] sm:$0xff]  ;;  %v14346_v46 = vld [vmem:[#allocation285_spill] sm:$0xff] }
 0x798   :  { %v4139_v44 = vmax.f32 %v4137_v3, %v4111_v25  ;;  %v4159_v6 = vmax.f32 %v4157_v15, %v4109_v52  ;;  %v4160_v17 = vmax.f32 %v4158_v1, %v4112_v20  ;;  %v4180_v16 = vmax.f32 %v4178_v59, %v4110_v31  ;;  %v14336_v31 = vld [vmem:[#allocation274_spill] sm:$0xff]  ;;  %v14347_v15 = vld [vmem:[#allocation276_spill] sm:$0xff]  ;;  %v14348_v1 = vld [vmem:[#allocation279_spill] sm:$0xff] }
 0x799   :  { %v4140_v39 = vmax.f32 %v4138_v54, %v4114_v57  ;;  %v4181_v62 = vmax.f32 %v4179_v10, %v4113_v49  ;;  %3986 = vst.msk [vmem:[#allocation2 + $0x18] ss:$8 sm:$0x7] %vm10961_vm0, %v3983_v13  ;;  %v4130_v12 = vmul.f32 %v14334_v53, %v13920_v35  ;;  %v4131_v61 = vmul.f32 %v14334_v53, %v13975_v29  ;;  %v14337_v49 = vld [vmem:[#allocation233_spill] sm:$0xff]  ;;  %v14349_v59 = vld [vmem:[#allocation235_spill] sm:$0xff] }
 0x79a   :  { %v4141_v2 = vmax.f32 %v4139_v44, %v4117_v47  ;;  %v4161_v50 = vmax.f32 %v4159_v6, %v4115_v36  ;;  %v4162_v24 = vmax.f32 %v4160_v17, %v4118_v33  ;;  %v4182_v25 = vmax.f32 %v4180_v16, %v14335_v27  ;;  %v14339_v33 = vld [vmem:[#allocation272_spill] sm:$0xff]  ;;  %v14350_v53 = vld [vmem:[#allocation281_spill] sm:$0xff]  ;;  %v14351_v44 = vld [vmem:[#allocation271_spill] sm:$0xff] }
 0x79b   :  { %v4142_v60 = vmax.f32 %v4140_v39, %v4120_v9  ;;  %v4183_v52 = vmax.f32 %v4181_v62, %v4119_v51  ;;  %v12207_v42 = vmul.f32 %v14337_v49, %v14336_v31  ;;  %v12211_v26 = vmul.f32 %v14337_v49, %v14338_v32  ;;  %v14352_v39 = vld [vmem:[#allocation296_spill] sm:$0xff]  ;;  %v14353_v17 = vld [vmem:[#allocation237_spill] sm:$0xff]  ;;  %v14356_v27 = vld [vmem:[#allocation307_spill] sm:$0xff] }
 0x79c   :  { %v4143_v57 = vmax.f32 %v4141_v2, %v4123_v14  ;;  %v4163_v20 = vmax.f32 %v4161_v50, %v4121_v19  ;;  %v4164_v58 = vmax.f32 %v4162_v24, %v4124_v4  ;;  %v4184_v7 = vmax.f32 %v4182_v25, %v4122_v45  ;;  %v14340_v14 = vld [vmem:[#allocation267_spill] sm:$0xff]  ;;  %v14343_v45 = vld [vmem:[#allocation270_spill] sm:$0xff]  ;;  %v14357_v25 = vld [vmem:[#allocation116_spill] sm:$0xff] }
 0x79d   :  { %v4144_v5 = vmax.f32 %v4142_v60, %v4126_v38  ;;  %v4185_v47 = vmax.f32 %v4183_v52, %v4125_v41  ;;  %v12215_v30 = vmul.f32 %v14337_v49, %v14339_v33  ;;  %v14341_v19 = vld [vmem:[#allocation75_spill] sm:$0xff]  ;;  %v14344_v41 = vld [vmem:[#allocation284_spill] sm:$0xff]  ;;  %v12243_v10 = vmul.f32 %v14349_v59, %v14348_v1  ;;  %v14359_v49 = vld [vmem:[#allocation282_spill] sm:$0xff] }
 0x79e   :  { %v4145_v36 = vmax.f32 %v4143_v57, %v4129_v43  ;;  %v4165_v9 = vmax.f32 %v4163_v20, %v4127_v21  ;;  %v12219_v51 = vmul.f32 %v14341_v19, %v14340_v14  ;;  %v4166_v23 = vmax.f32 %v4164_v58, %v4130_v12  ;;  %v14345_v21 = vld [vmem:[#allocation76_spill] sm:$0xff]  ;;  %v14355_v50 = vld [vmem:[#allocation287_spill] sm:$0xff] }
 0x79f   :  { %v4186_v55 = vmax.f32 %v4184_v7, %v4128_v8  ;;  %v4187_v48 = vmax.f32 %v4185_v47, %v4131_v61  ;;  %v12223_v56 = vmul.f32 %v14341_v19, %v14342_v63  ;;  %v12227_v4 = vmul.f32 %v14341_v19, %v14343_v45  ;;  %v14354_v61 = vld [vmem:[#allocation283_spill] sm:$0xff]  ;;  %v14358_v57 = vld [vmem:[#allocation308_spill] sm:$0xff]  ;;  %v14360_v47 = vld [vmem:[#allocation309_spill] sm:$0xff] }
 0x7a0   :  { %v4146_v38 = vmax.f32 %v4144_v5, %v4145_v36  ;;  %v12231_v40 = vmul.f32 %v14345_v21, %v14344_v41  ;;  %v12235_v0 = vmul.f32 %v14345_v21, %v14346_v46  ;;  %v4167_v3 = vmax.f32 %v4165_v9, %v4166_v23  ;;  %v14361_v36 = vld [vmem:[#allocation147_spill] sm:$0xff]  ;;  %v14362_v19 = vld [vmem:[#allocation312_spill] sm:$0xff]  ;;  %v14379_v41 = vld [vmem:[#allocation298_spill] sm:$0xff] }
 0x7a1   :  { %v4188_v8 = vmax.f32 %v4186_v55, %v4187_v48  ;;  %v12239_v54 = vmul.f32 %v14345_v21, %v14347_v15  ;;  %v12247_v43 = vmul.f32 %v14349_v59, %v14350_v53  ;;  %v12251_v6 = vmul.f32 %v14349_v59, %v14351_v44  ;;  %v14363_v48 = vld [vmem:[#allocation293_spill] sm:$0xff]  ;;  %v14364_v21 = vld [vmem:[#allocation310_spill] sm:$0xff]  ;;  %v14375_v15 = vld [vmem:[#allocation292_spill] sm:$0xff] }
 0x7a2   :  { %v4147_v13 = vrot.slane %v4146_v38, 4  ;;  %v4333_v16 = vmul.f32 %v14353_v17, %v14352_v39  ;;  %v4168_v62 = vrot.slane %v4167_v3, 4  ;;  %v4334_v2 = vmul.f32 %v14353_v17, %v14354_v61  ;;  %v14365_v59 = vld [vmem:[#allocation150_spill] sm:$0xff]  ;;  %v14373_v61 = vld [vmem:[#allocation239_spill] sm:$0xff]  ;;  %v14374_v53 = vld [vmem:[#allocation317_spill] sm:$0xff] }
 0x7a3   :  { %v4189_v12 = vrot.slane %v4188_v8, 4  ;;  %v4335_v60 = vmul.f32 %v14353_v17, %v14355_v50  ;;  %v4336_v52 = vmul.f32 %v14357_v25, %v14356_v27  ;;  %v4337_v20 = vmul.f32 %v14357_v25, %v14358_v57  ;;  %v14366_v17 = vld [vmem:[#allocation313_spill] sm:$0xff]  ;;  %v14370_v27 = vld [vmem:[#allocation316_spill] sm:$0xff]  ;;  %v14386_v63 = vld [vmem:[#allocation234_spill] sm:$0xff] }
 0x7a4   :  { %v4148_v24 = vmax.f32 %v4146_v38, %v4147_v13  ;;  %v4338_v5 = vmul.f32 %v14357_v25, %v14359_v49  ;;  %v4169_v58 = vmax.f32 %v4167_v3, %v4168_v62  ;;  %v4339_v9 = vmul.f32 %v14361_v36, %v14360_v47  ;;  %v14367_v62 = vld [vmem:[#allocation286_spill] sm:$0xff]  ;;  %v14378_v46 = vld [vmem:[#allocation320_spill] sm:$0xff] }
 0x7a5   :  { %v4190_v7 = vmax.f32 %v4188_v8, %v4189_v12  ;;  %v12269_v23 = vmul.f32 %v14361_v36, %v14362_v19  ;;  %v12273_v38 = vmul.f32 %v14361_v36, %v14363_v48  ;;  %v4342_v13 = vmul.f32 %v14365_v59, %v14364_v21  ;;  %v14368_v47 = vld [vmem:[#allocation314_spill] sm:$0xff]  ;;  %v14369_v19 = vld [vmem:[#allocation176_spill] sm:$0xff]  ;;  %v14372_v21 = vld [vmem:[#allocation315_spill] sm:$0xff] }
 0x7a6   :  { %v4149_v55 = vrot.slane %v4148_v24, 2  ;;  %v12279_v25 = vmul.f32 %v14365_v59, %v14366_v17  ;;  %v4170_v3 = vrot.slane %v4169_v58, 2  ;;  %v4344_v12 = vmul.f32 %v14365_v59, %v14367_v62  ;;  %v14371_v48 = vld [vmem:[#allocation294_spill] sm:$0xff] }
 0x7a7   :  { %v4191_v8 = vrot.slane %v4190_v7, 2  ;;  %v4345_v49 = vmul.f32 %v14369_v19, %v14368_v47  ;;  %v4346_v36 = vmul.f32 %v14369_v19, %v14370_v27  ;;  %v4347_v50 = vmul.f32 %v14369_v19, %v14371_v48  ;;  %v14376_v47 = vld [vmem:[#allocation318_spill] sm:$0xff] }
 0x7a8   :  { %v4150_v57 = vmax.f32 %v4148_v24, %v4149_v55  ;;  %v4348_v39 = vmul.f32 %v14373_v61, %v14372_v21  ;;  %v4171_v17 = vmax.f32 %v4169_v58, %v4170_v3  ;;  %v4349_v1 = vmul.f32 %v14373_v61, %v14374_v53  ;;  %v14377_v24 = vld [vmem:[#allocation241_spill] sm:$0xff]  ;;  %v14382_v3 = vld [vmem:[#allocation206_spill] sm:$0xff] }
 0x7a9   :  { %v4192_v44 = vmax.f32 %v4190_v7, %v4191_v8  ;;  %v4350_v59 = vmul.f32 %v14373_v61, %v14375_v15  ;;  %v4351_v55 = vmul.f32 %v14377_v24, %v14376_v47  ;;  %v4352_v27 = vmul.f32 %v14377_v24, %v14378_v46  ;;  %v14381_v7 = vld [vmem:[#allocation319_spill] sm:$0xff]  ;;  %v14383_v53 = vld [vmem:[#allocation321_spill] sm:$0xff]  ;;  %v14385_v47 = vld [vmem:[#allocation322_spill] sm:$0xff] }
 0x7aa   :  { %v4151_v62 = vrot.slane %v4150_v57, 1  ;;  %v12301_v19 = vmul.f32 %v14377_v24, %v14379_v41  ;;  %v4172_v21 = vrot.slane %v4171_v17, 1  ;;  %v4354_v8 = vmul.f32 %v14382_v3, %v14381_v7  ;;  %v14384_v15 = vld [vmem:[#allocation299_spill] sm:$0xff]  ;;  %v14387_v46 = vld [vmem:[#allocation324_spill] sm:$0xff] }
 0x7ab   :  { %v4193_v58 = vrot.slane %v4192_v44, 1  ;;  %v4355_v48 = vmul.f32 %v14382_v3, %v14383_v53  ;;  %v4356_v45 = vmul.f32 %v14382_v3, %v14384_v15  ;;  %v4357_v14 = vmul.f32 %v14386_v63, %v14385_v47  ;;  %v14388_v7 = vld [vmem:[#allocation236_spill] sm:$0xff]  ;;  %v14391_v15 = vld [vmem:[#allocation79_spill] sm:$0xff] }
 0x7ac   :  { %14380 = vst [vmem:[#allocation26_spill] sm:$0xff] %v12301_v19  ;;  %v4152_v61 = vmax.f32 %v4150_v57, %v4151_v62  ;;  %v4358_v33 = vmul.f32 %v14386_v63, %v14387_v46  ;;  %v4173_v24 = vmax.f32 %v4171_v17, %v4172_v21  ;;  %v4359_v32 = vmul.f32 %v14386_v63, %v13850_v28  ;;  %v14389_v19 = vld [vmem:[#allocation325_spill] sm:$0xff]  ;;  %v14390_v62 = vld [vmem:[#allocation303_spill] sm:$0xff]  ;;  %v14392_v53 = vld [vmem:[#allocation264_spill] sm:$0xff] }
 0x7ad   :  { %v4194_v41 = vmax.f32 %v4192_v44, %v4193_v58  ;;  %v4360_v31 = vmul.f32 %v14388_v7, %v13851_v34  ;;  %v4361_v57 = vmul.f32 %v14388_v7, %v14389_v19  ;;  %v4362_v3 = vmul.f32 %v14388_v7, %v14390_v62  ;;  %v14393_v44 = vld [vmem:[#allocation327_spill] sm:$0xff] }
 0x7ae   :  { %v4363_v47 = vmul.f32 %v14392_v53, %v14391_v15  ;;  %v4369_v46 = vmax.f32 %v12207_v42, %v12231_v40  ;;  %v4198_v21 = vcombine.low %v4152_v61, %v4173_v24  ;;  %v4364_v17 = vmul.f32 %v14392_v53, %v14393_v44 }
 0x7af   :  { %v4370_v63 = vmax.f32 %v12219_v51, %v12243_v10  ;;  %v4390_v58 = vmax.f32 %v12211_v26, %v12235_v0  ;;  %v4391_v7 = vmax.f32 %v12223_v56, %v12247_v43  ;;  %v4411_v15 = vmax.f32 %v12215_v30, %v12239_v54 }
 0x7b0   :  { %v4371_v19 = vmax.f32 %v4369_v46, %v4333_v16  ;;  %v4412_v42 = vmax.f32 %v12227_v4, %v12251_v6  ;;  %v4205_v40 = vrot.slane %v4198_v21, %v13856_v18  ;;  %v4212_v61 = vrot.slane %v4194_v41, %v13856_v18  ;;  %v14394_v16 = vld [vmem:[#allocation243_spill] sm:$0xff] }
 0x7b1   :  { %v4372_v24 = vmax.f32 %v4370_v63, %v4336_v52  ;;  %v4392_v44 = vmax.f32 %v4390_v58, %v4334_v2  ;;  %v4393_v10 = vmax.f32 %v4391_v7, %v4337_v20  ;;  %v4413_v62 = vmax.f32 %v4411_v15, %v4335_v60 }
 0x7b2   :  { %v4373_v51 = vmax.f32 %v4371_v19, %v4339_v9  ;;  %v4414_v26 = vmax.f32 %v4412_v42, %v4338_v5  ;;  %v4213_v46 = vcombine.low %v4205_v40, %v4212_v61  ;;  %v4365_v56 = vmul.f32 %v14392_v53, %v10627_v11 }
 0x7b3   :  { %v4374_v0 = vmax.f32 %v4372_v24, %v4342_v13  ;;  %v4394_v30 = vmax.f32 %v4392_v44, %v12269_v23  ;;  %v4395_v4 = vmax.f32 %v4393_v10, %v12279_v25  ;;  %v4415_v43 = vmax.f32 %v4413_v62, %v12273_v38  ;;  %v14398_v62 = vld [vmem:[#allocation275_spill] sm:$0xff]  ;;  %v14402_v24 = vld [vmem:[#allocation268_spill] sm:$0xff] }
 0x7b4   :  { %v4375_v54 = vmax.f32 %v4373_v51, %v4345_v49  ;;  %v4416_v6 = vmax.f32 %v4414_v26, %v4344_v12  ;;  %v4220_v41 = vrot.slane %v4213_v46, %v13856_v18  ;;  %v4366_v2 = vmul.f32 %v14394_v16, %v13917_v22  ;;  %v14395_v12 = vld [vmem:[#allocation26_spill] sm:$0xff]  ;;  %v14406_v26 = vld [vmem:[#allocation285_spill] sm:$0xff] }
 0x7b5   :  { %v4376_v15 = vmax.f32 %v4374_v0, %v4348_v39  ;;  %v4396_v60 = vmax.f32 %v4394_v30, %v4346_v36  ;;  %v4397_v20 = vmax.f32 %v4395_v4, %v4349_v1  ;;  %v4417_v5 = vmax.f32 %v4415_v43, %v4347_v50  ;;  %v14396_v50 = vld [vmem:[#allocation274_spill] sm:$0xff]  ;;  %v14407_v30 = vld [vmem:[#allocation276_spill] sm:$0xff]  ;;  %v14408_v4 = vld [vmem:[#allocation279_spill] sm:$0xff] }
 0x7b6   :  { %v4377_v52 = vmax.f32 %v4375_v54, %v4351_v55  ;;  %v4418_v53 = vmax.f32 %v4416_v6, %v4350_v59  ;;  %4223 = vst.msk [vmem:[#allocation2 + $0x19] ss:$8 sm:$0x7] %vm10961_vm0, %v4220_v41  ;;  %v4367_v49 = vmul.f32 %v14394_v16, %v13920_v35  ;;  %v4368_v9 = vmul.f32 %v14394_v16, %v13975_v29  ;;  %v14397_v59 = vld [vmem:[#allocation77_spill] sm:$0xff]  ;;  %v14409_v43 = vld [vmem:[#allocation80_spill] sm:$0xff] }
 0x7b7   :  { %v4378_v23 = vmax.f32 %v4376_v15, %v4354_v8  ;;  %v4398_v38 = vmax.f32 %v4396_v60, %v4352_v27  ;;  %v4399_v25 = vmax.f32 %v4397_v20, %v4355_v48  ;;  %v4419_v39 = vmax.f32 %v4417_v5, %v14395_v12  ;;  %v14399_v48 = vld [vmem:[#allocation272_spill] sm:$0xff]  ;;  %v14410_v16 = vld [vmem:[#allocation281_spill] sm:$0xff]  ;;  %v14411_v15 = vld [vmem:[#allocation271_spill] sm:$0xff] }
 0x7b8   :  { %v4379_v13 = vmax.f32 %v4377_v52, %v4357_v14  ;;  %v4420_v36 = vmax.f32 %v4418_v53, %v4356_v45  ;;  %v12356_v19 = vmul.f32 %v14397_v59, %v14396_v50  ;;  %v12360_v21 = vmul.f32 %v14397_v59, %v14398_v62  ;;  %v14412_v52 = vld [vmem:[#allocation296_spill] sm:$0xff]  ;;  %v14413_v20 = vld [vmem:[#allocation118_spill] sm:$0xff]  ;;  %v14416_v12 = vld [vmem:[#allocation307_spill] sm:$0xff] }
 0x7b9   :  { %v4380_v55 = vmax.f32 %v4378_v23, %v4360_v31  ;;  %v4400_v1 = vmax.f32 %v4398_v38, %v4358_v33  ;;  %v4401_v63 = vmax.f32 %v4399_v25, %v4361_v57  ;;  %v4421_v58 = vmax.f32 %v4419_v39, %v4359_v32  ;;  %v14400_v31 = vld [vmem:[#allocation267_spill] sm:$0xff]  ;;  %v14403_v32 = vld [vmem:[#allocation270_spill] sm:$0xff]  ;;  %v14417_v39 = vld [vmem:[#allocation181_spill] sm:$0xff] }
 0x7ba   :  { %v4381_v44 = vmax.f32 %v4379_v13, %v4363_v47  ;;  %v4422_v8 = vmax.f32 %v4420_v36, %v4362_v3  ;;  %v12364_v7 = vmul.f32 %v14397_v59, %v14399_v48  ;;  %v14401_v33 = vld [vmem:[#allocation179_spill] sm:$0xff]  ;;  %v14404_v3 = vld [vmem:[#allocation284_spill] sm:$0xff]  ;;  %v12392_v6 = vmul.f32 %v14409_v43, %v14408_v4  ;;  %v14419_v59 = vld [vmem:[#allocation282_spill] sm:$0xff] }
 0x7bb   :  { %v4382_v27 = vmax.f32 %v4380_v55, %v4366_v2  ;;  %v4402_v14 = vmax.f32 %v4400_v1, %v4364_v17  ;;  %v12368_v45 = vmul.f32 %v14401_v33, %v14400_v31  ;;  %v4403_v42 = vmax.f32 %v4401_v63, %v4367_v49  ;;  %v14405_v17 = vld [vmem:[#allocation78_spill] sm:$0xff]  ;;  %v14415_v38 = vld [vmem:[#allocation287_spill] sm:$0xff]  ;;  %v14418_v55 = vld [vmem:[#allocation308_spill] sm:$0xff] }
 0x7bc   :  { %v4423_v40 = vmax.f32 %v4421_v58, %v4365_v56  ;;  %v4424_v61 = vmax.f32 %v4422_v8, %v4368_v9  ;;  %v12372_v51 = vmul.f32 %v14401_v33, %v14402_v24  ;;  %v12376_v57 = vmul.f32 %v14401_v33, %v14403_v32  ;;  %v14414_v9 = vld [vmem:[#allocation283_spill] sm:$0xff]  ;;  %v14420_v8 = vld [vmem:[#allocation309_spill] sm:$0xff]  ;;  %v14422_v33 = vld [vmem:[#allocation312_spill] sm:$0xff] }
 0x7bd   :  { %v4383_v47 = vmax.f32 %v4381_v44, %v4382_v27  ;;  %v12380_v10 = vmul.f32 %v14405_v17, %v14404_v3  ;;  %v12384_v46 = vmul.f32 %v14405_v17, %v14406_v26  ;;  %v4404_v0 = vmax.f32 %v4402_v14, %v4403_v42  ;;  %v14421_v27 = vld [vmem:[#allocation183_spill] sm:$0xff]  ;;  %v14438_v26 = vld [vmem:[#allocation320_spill] sm:$0xff]  ;;  %v14439_v3 = vld [vmem:[#allocation298_spill] sm:$0xff] }
 0x7be   :  { %v4425_v56 = vmax.f32 %v4423_v40, %v4424_v61  ;;  %v12388_v54 = vmul.f32 %v14405_v17, %v14407_v30  ;;  %v12396_v2 = vmul.f32 %v14409_v43, %v14410_v16  ;;  %v12400_v60 = vmul.f32 %v14409_v43, %v14411_v15  ;;  %v14423_v61 = vld [vmem:[#allocation293_spill] sm:$0xff]  ;;  %v14424_v17 = vld [vmem:[#allocation310_spill] sm:$0xff]  ;;  %v14425_v43 = vld [vmem:[#allocation151_spill] sm:$0xff] }
 0x7bf   :  { %v4384_v41 = vrot.slane %v4383_v47, 4  ;;  %v4570_v5 = vmul.f32 %v14413_v20, %v14412_v52  ;;  %v4405_v53 = vrot.slane %v4404_v0, 4  ;;  %v4571_v23 = vmul.f32 %v14413_v20, %v14414_v9  ;;  %v14433_v9 = vld [vmem:[#allocation180_spill] sm:$0xff]  ;;  %v14434_v16 = vld [vmem:[#allocation317_spill] sm:$0xff]  ;;  %v14446_v24 = vld [vmem:[#allocation187_spill] sm:$0xff] }
 0x7c0   :  { %v4426_v49 = vrot.slane %v4425_v56, 4  ;;  %v4572_v13 = vmul.f32 %v14413_v20, %v14415_v38  ;;  %v4573_v36 = vmul.f32 %v14417_v39, %v14416_v12  ;;  %v4574_v1 = vmul.f32 %v14417_v39, %v14418_v55  ;;  %v14426_v20 = vld [vmem:[#allocation313_spill] sm:$0xff]  ;;  %v14430_v12 = vld [vmem:[#allocation316_spill] sm:$0xff] }
 0x7c1   :  { %v4385_v25 = vmax.f32 %v4383_v47, %v4384_v41  ;;  %v4575_v44 = vmul.f32 %v14417_v39, %v14419_v59  ;;  %v4406_v63 = vmax.f32 %v4404_v0, %v4405_v53  ;;  %v4576_v14 = vmul.f32 %v14421_v27, %v14420_v8  ;;  %v14427_v53 = vld [vmem:[#allocation286_spill] sm:$0xff]  ;;  %v14435_v30 = vld [vmem:[#allocation292_spill] sm:$0xff] }
 0x7c2   :  { %v4427_v58 = vmax.f32 %v4425_v56, %v4426_v49  ;;  %v12418_v42 = vmul.f32 %v14421_v27, %v14422_v33  ;;  %v12422_v47 = vmul.f32 %v14421_v27, %v14423_v61  ;;  %v4579_v41 = vmul.f32 %v14425_v43, %v14424_v17  ;;  %v14428_v8 = vld [vmem:[#allocation314_spill] sm:$0xff]  ;;  %v14432_v17 = vld [vmem:[#allocation315_spill] sm:$0xff] }
 0x7c3   :  { %v4386_v40 = vrot.slane %v4385_v25, 2  ;;  %v12428_v39 = vmul.f32 %v14425_v43, %v14426_v20  ;;  %v4407_v0 = vrot.slane %v4406_v63, 2  ;;  %v4581_v49 = vmul.f32 %v14425_v43, %v14427_v53  ;;  %v14429_v33 = vld [vmem:[#allocation178_spill] sm:$0xff] }
 0x7c4   :  { %v4428_v56 = vrot.slane %v4427_v58, 2  ;;  %v4582_v59 = vmul.f32 %v14429_v33, %v14428_v8  ;;  %v4583_v27 = vmul.f32 %v14429_v33, %v14430_v12  ;;  %v14431_v61 = vld [vmem:[#allocation294_spill] sm:$0xff]  ;;  %v4585_v52 = vmul.f32 %v14433_v9, %v14432_v17 }
 0x7c5   :  { %v4387_v55 = vmax.f32 %v4385_v25, %v4386_v40  ;;  %v4584_v38 = vmul.f32 %v14429_v33, %v14431_v61  ;;  %v4408_v20 = vmax.f32 %v4406_v63, %v4407_v0  ;;  %v4586_v4 = vmul.f32 %v14433_v9, %v14434_v16  ;;  %v14436_v8 = vld [vmem:[#allocation318_spill] sm:$0xff]  ;;  %v14437_v25 = vld [vmem:[#allocation208_spill] sm:$0xff]  ;;  %v14442_v0 = vld [vmem:[#allocation185_spill] sm:$0xff] }
 0x7c6   :  { %v4429_v15 = vmax.f32 %v4427_v58, %v4428_v56  ;;  %v4587_v43 = vmul.f32 %v14433_v9, %v14435_v30  ;;  %v4588_v40 = vmul.f32 %v14437_v25, %v14436_v8  ;;  %v4589_v12 = vmul.f32 %v14437_v25, %v14438_v26  ;;  %v14441_v58 = vld [vmem:[#allocation319_spill] sm:$0xff]  ;;  %v14443_v16 = vld [vmem:[#allocation321_spill] sm:$0xff]  ;;  %v14445_v8 = vld [vmem:[#allocation322_spill] sm:$0xff] }
 0x7c7   :  { %v4388_v53 = vrot.slane %v4387_v55, 1  ;;  %v12450_v33 = vmul.f32 %v14437_v25, %v14439_v3  ;;  %v4409_v17 = vrot.slane %v4408_v20, 1  ;;  %v4591_v56 = vmul.f32 %v14442_v0, %v14441_v58  ;;  %v14444_v30 = vld [vmem:[#allocation299_spill] sm:$0xff]  ;;  %v14447_v26 = vld [vmem:[#allocation324_spill] sm:$0xff]  ;;  %v14448_v58 = vld [vmem:[#allocation238_spill] sm:$0xff] }
 0x7c8   :  { %v4430_v63 = vrot.slane %v4429_v15, 1  ;;  %v4592_v61 = vmul.f32 %v14442_v0, %v14443_v16  ;;  %v4593_v32 = vmul.f32 %v14442_v0, %v14444_v30  ;;  %v4594_v31 = vmul.f32 %v14446_v24, %v14445_v8  ;;  %v14451_v30 = vld [vmem:[#allocation79_spill] sm:$0xff]  ;;  %v14452_v16 = vld [vmem:[#allocation266_spill] sm:$0xff] }
 0x7c9   :  { %14440 = vst [vmem:[#allocation97_spill] sm:$0xff] %v12450_v33  ;;  %v4389_v9 = vmax.f32 %v4387_v55, %v4388_v53  ;;  %v4595_v48 = vmul.f32 %v14446_v24, %v14447_v26  ;;  %v4410_v25 = vmax.f32 %v4408_v20, %v4409_v17  ;;  %v4596_v62 = vmul.f32 %v14446_v24, %v13850_v28  ;;  %v14449_v33 = vld [vmem:[#allocation325_spill] sm:$0xff]  ;;  %v14450_v53 = vld [vmem:[#allocation303_spill] sm:$0xff] }
 0x7ca   :  { %v4431_v3 = vmax.f32 %v4429_v15, %v4430_v63  ;;  %v4597_v50 = vmul.f32 %v14448_v58, %v13851_v34  ;;  %v4598_v55 = vmul.f32 %v14448_v58, %v14449_v33  ;;  %v4599_v0 = vmul.f32 %v14448_v58, %v14450_v53  ;;  %v14453_v15 = vld [vmem:[#allocation327_spill] sm:$0xff] }
 0x7cb   :  { %v4600_v8 = vmul.f32 %v14452_v16, %v14451_v30  ;;  %v4606_v26 = vmax.f32 %v12356_v19, %v12380_v10  ;;  %v4435_v17 = vcombine.low %v4389_v9, %v4410_v25  ;;  %v4601_v20 = vmul.f32 %v14452_v16, %v14453_v15 }
 0x7cc   :  { %v4607_v24 = vmax.f32 %v12368_v45, %v12392_v6  ;;  %v4627_v63 = vmax.f32 %v12360_v21, %v12384_v46  ;;  %v4628_v58 = vmax.f32 %v12372_v51, %v12396_v2  ;;  %v4648_v30 = vmax.f32 %v12364_v7, %v12388_v54 }
 0x7cd   :  { %v4608_v33 = vmax.f32 %v4606_v26, %v4570_v5  ;;  %v4649_v19 = vmax.f32 %v12376_v57, %v12400_v60  ;;  %v4442_v10 = vrot.slane %v4435_v17, %v13856_v18  ;;  %v4449_v9 = vrot.slane %v4431_v3, %v13856_v18  ;;  %v14454_v5 = vld [vmem:[#allocation269_spill] sm:$0xff] }
 0x7ce   :  { %v4609_v25 = vmax.f32 %v4607_v24, %v4573_v36  ;;  %v4629_v15 = vmax.f32 %v4627_v63, %v4571_v23  ;;  %v4630_v6 = vmax.f32 %v4628_v58, %v4574_v1  ;;  %v4650_v53 = vmax.f32 %v4648_v30, %v4572_v13 }
 0x7cf   :  { %v4610_v45 = vmax.f32 %v4608_v33, %v4576_v14  ;;  %v4651_v21 = vmax.f32 %v4649_v19, %v4575_v44  ;;  %v4450_v26 = vcombine.low %v4442_v10, %v4449_v9  ;;  %v4602_v51 = vmul.f32 %v14452_v16, %v10627_v11  ;;  %v14457_v33 = vld [vmem:[#allocation274_spill] sm:$0xff]  ;;  %v14461_v9 = vld [vmem:[#allocation267_spill] sm:$0xff] }
 0x7d0   :  { %v4611_v46 = vmax.f32 %v4609_v25, %v4579_v41  ;;  %v4631_v7 = vmax.f32 %v4629_v15, %v12418_v42  ;;  %v4632_v57 = vmax.f32 %v4630_v6, %v12428_v39  ;;  %v4652_v2 = vmax.f32 %v4650_v53, %v12422_v47  ;;  %v14458_v53 = vld [vmem:[#allocation245_spill] sm:$0xff]  ;;  %v14465_v6 = vld [vmem:[#allocation284_spill] sm:$0xff] }
 0x7d1   :  { %v4612_v54 = vmax.f32 %v4610_v45, %v4582_v59  ;;  %v4653_v60 = vmax.f32 %v4651_v21, %v4581_v49  ;;  %v4457_v3 = vrot.slane %v4450_v26, %v13856_v18  ;;  %v4603_v23 = vmul.f32 %v14454_v5, %v13917_v22  ;;  %v14455_v49 = vld [vmem:[#allocation97_spill] sm:$0xff]  ;;  %v14466_v21 = vld [vmem:[#allocation83_spill] sm:$0xff] }
 0x7d2   :  { %v4613_v30 = vmax.f32 %v4611_v46, %v4585_v52  ;;  %v4633_v13 = vmax.f32 %v4631_v7, %v4583_v27  ;;  %v4634_v1 = vmax.f32 %v4632_v57, %v4586_v4  ;;  %v4654_v44 = vmax.f32 %v4652_v2, %v4584_v38  ;;  %v14462_v25 = vld [vmem:[#allocation81_spill] sm:$0xff]  ;;  %v14468_v57 = vld [vmem:[#allocation276_spill] sm:$0xff] }
 0x7d3   :  { %v4614_v36 = vmax.f32 %v4612_v54, %v4588_v40  ;;  %v4655_v16 = vmax.f32 %v4653_v60, %v4587_v43  ;;  %4460 = vst.msk [vmem:[#allocation2 + $0x1a] ss:$8 sm:$0x7] %vm10961_vm0, %v4457_v3  ;;  %v4604_v59 = vmul.f32 %v14454_v5, %v13920_v35  ;;  %v4605_v14 = vmul.f32 %v14454_v5, %v13975_v29  ;;  %v14469_v3 = vld [vmem:[#allocation279_spill] sm:$0xff] }
 0x7d4   :  { %v4615_v42 = vmax.f32 %v4613_v30, %v4591_v56  ;;  %v4635_v47 = vmax.f32 %v4633_v13, %v4589_v12  ;;  %v4636_v39 = vmax.f32 %v4634_v1, %v4592_v61  ;;  %v4656_v52 = vmax.f32 %v4654_v44, %v14455_v49  ;;  %v14459_v12 = vld [vmem:[#allocation275_spill] sm:$0xff]  ;;  %v14460_v61 = vld [vmem:[#allocation272_spill] sm:$0xff]  ;;  %v14471_v30 = vld [vmem:[#allocation281_spill] sm:$0xff] }
 0x7d5   :  { %v4616_v41 = vmax.f32 %v4614_v36, %v4594_v31  ;;  %v4657_v27 = vmax.f32 %v4655_v16, %v4593_v32  ;;  %v12506_v17 = vmul.f32 %v14458_v53, %v14457_v33  ;;  %v12510_v31 = vmul.f32 %v14458_v53, %v14459_v12  ;;  %v14470_v5 = vld [vmem:[#allocation247_spill] sm:$0xff]  ;;  %v14507_v12 = vld [vmem:[#allocation324_spill] sm:$0xff] }
 0x7d6   :  { %v4617_v38 = vmax.f32 %v4615_v42, %v4597_v50  ;;  %v4637_v43 = vmax.f32 %v4635_v47, %v4595_v48  ;;  %v4638_v24 = vmax.f32 %v4636_v39, %v4598_v55  ;;  %v4658_v63 = vmax.f32 %v4656_v52, %v4596_v62  ;;  %v14463_v62 = vld [vmem:[#allocation268_spill] sm:$0xff]  ;;  %v14472_v36 = vld [vmem:[#allocation271_spill] sm:$0xff] }
 0x7d7   :  { %v4618_v15 = vmax.f32 %v4616_v41, %v4600_v8  ;;  %v4659_v58 = vmax.f32 %v4657_v27, %v4599_v0  ;;  %v12514_v32 = vmul.f32 %v14458_v53, %v14460_v61  ;;  %v12518_v45 = vmul.f32 %v14462_v25, %v14461_v9  ;;  %v14464_v0 = vld [vmem:[#allocation270_spill] sm:$0xff]  ;;  %v14475_v47 = vld [vmem:[#allocation283_spill] sm:$0xff]  ;;  %v14479_v53 = vld [vmem:[#allocation308_spill] sm:$0xff] }
 0x7d8   :  { %v4619_v19 = vmax.f32 %v4617_v38, %v4603_v23  ;;  %v4639_v56 = vmax.f32 %v4637_v43, %v4601_v20  ;;  %v4640_v50 = vmax.f32 %v4638_v24, %v4604_v59  ;;  %v4660_v48 = vmax.f32 %v4658_v63, %v4602_v51  ;;  %v14467_v51 = vld [vmem:[#allocation285_spill] sm:$0xff]  ;;  %v14473_v59 = vld [vmem:[#allocation296_spill] sm:$0xff]  ;;  %v14476_v49 = vld [vmem:[#allocation287_spill] sm:$0xff] }
 0x7d9   :  { %v4661_v10 = vmax.f32 %v4659_v58, %v4605_v14  ;;  %v12522_v55 = vmul.f32 %v14462_v25, %v14463_v62  ;;  %v12526_v20 = vmul.f32 %v14462_v25, %v14464_v0  ;;  %v4801_v26 = vmul.f32 %v14466_v21, %v14465_v6  ;;  %v14474_v14 = vld [vmem:[#allocation120_spill] sm:$0xff]  ;;  %v14477_v27 = vld [vmem:[#allocation307_spill] sm:$0xff]  ;;  %v14478_v38 = vld [vmem:[#allocation122_spill] sm:$0xff] }
 0x7da   :  { %v4620_v8 = vmax.f32 %v4618_v15, %v4619_v19  ;;  %v4641_v46 = vmax.f32 %v4639_v56, %v4640_v50  ;;  %v12532_v54 = vmul.f32 %v14466_v21, %v14467_v51  ;;  %v12536_v2 = vmul.f32 %v14466_v21, %v14468_v57  ;;  %v14480_v58 = vld [vmem:[#allocation282_spill] sm:$0xff]  ;;  %v14481_v56 = vld [vmem:[#allocation309_spill] sm:$0xff]  ;;  %v14483_v25 = vld [vmem:[#allocation312_spill] sm:$0xff] }
 0x7db   :  { %v4662_v7 = vmax.f32 %v4660_v48, %v4661_v10  ;;  %v4804_v23 = vmul.f32 %v14470_v5, %v14469_v3  ;;  %v12542_v13 = vmul.f32 %v14470_v5, %v14471_v30  ;;  %v12546_v1 = vmul.f32 %v14470_v5, %v14472_v36  ;;  %v14482_v50 = vld [vmem:[#allocation153_spill] sm:$0xff]  ;;  %v14485_v5 = vld [vmem:[#allocation310_spill] sm:$0xff]  ;;  %v14499_v51 = vld [vmem:[#allocation320_spill] sm:$0xff] }
 0x7dc   :  { %v4621_v60 = vrot.slane %v4620_v8, 4  ;;  %v4642_v44 = vrot.slane %v4641_v46, 4  ;;  %v4807_v42 = vmul.f32 %v14474_v14, %v14473_v59  ;;  %v4808_v41 = vmul.f32 %v14474_v14, %v14475_v47  ;;  %v14484_v21 = vld [vmem:[#allocation293_spill] sm:$0xff]  ;;  %v14493_v59 = vld [vmem:[#allocation315_spill] sm:$0xff]  ;;  %v14494_v36 = vld [vmem:[#allocation182_spill] sm:$0xff] }
 0x7dd   :  { %v4663_v16 = vrot.slane %v4662_v7, 4  ;;  %v4809_v52 = vmul.f32 %v14474_v14, %v14476_v49  ;;  %v4810_v43 = vmul.f32 %v14478_v38, %v14477_v27  ;;  %v4811_v15 = vmul.f32 %v14478_v38, %v14479_v53  ;;  %v14486_v14 = vld [vmem:[#allocation249_spill] sm:$0xff]  ;;  %v14490_v53 = vld [vmem:[#allocation251_spill] sm:$0xff]  ;;  %v14491_v27 = vld [vmem:[#allocation316_spill] sm:$0xff] }
 0x7de   :  { %v4622_v39 = vmax.f32 %v4620_v8, %v4621_v60  ;;  %v4643_v24 = vmax.f32 %v4641_v46, %v4642_v44  ;;  %v4812_v19 = vmul.f32 %v14478_v38, %v14480_v58  ;;  %v4813_v48 = vmul.f32 %v14482_v50, %v14481_v56  ;;  %v14487_v44 = vld [vmem:[#allocation313_spill] sm:$0xff]  ;;  %v14488_v38 = vld [vmem:[#allocation286_spill] sm:$0xff]  ;;  %v14504_v62 = vld [vmem:[#allocation299_spill] sm:$0xff] }
 0x7df   :  { %v4664_v63 = vmax.f32 %v4662_v7, %v4663_v16  ;;  %v12564_v8 = vmul.f32 %v14482_v50, %v14483_v25  ;;  %v12568_v60 = vmul.f32 %v14482_v50, %v14484_v21  ;;  %v4816_v4 = vmul.f32 %v14486_v14, %v14485_v5  ;;  %v14489_v58 = vld [vmem:[#allocation314_spill] sm:$0xff]  ;;  %v14495_v3 = vld [vmem:[#allocation317_spill] sm:$0xff] }
 0x7e0   :  { %v4623_v10 = vrot.slane %v4622_v39, 2  ;;  %v4644_v46 = vrot.slane %v4643_v24, 2  ;;  %v4817_v16 = vmul.f32 %v14486_v14, %v14487_v44  ;;  %v4818_v40 = vmul.f32 %v14486_v14, %v14488_v38  ;;  %v14492_v50 = vld [vmem:[#allocation294_spill] sm:$0xff]  ;;  %v14496_v14 = vld [vmem:[#allocation292_spill] sm:$0xff] }
 0x7e1   :  { %v4665_v7 = vrot.slane %v4664_v63, 2  ;;  %v4819_v25 = vmul.f32 %v14490_v53, %v14489_v58  ;;  %v4820_v49 = vmul.f32 %v14490_v53, %v14491_v27  ;;  %v4821_v21 = vmul.f32 %v14490_v53, %v14492_v50  ;;  %v14498_v58 = vld [vmem:[#allocation210_spill] sm:$0xff] }
 0x7e2   :  { %v4624_v56 = vmax.f32 %v4622_v39, %v4623_v10  ;;  %v4645_v47 = vmax.f32 %v4643_v24, %v4644_v46  ;;  %v4822_v30 = vmul.f32 %v14494_v36, %v14493_v59  ;;  %v4823_v44 = vmul.f32 %v14494_v36, %v14495_v3  ;;  %v14497_v10 = vld [vmem:[#allocation318_spill] sm:$0xff]  ;;  %v14501_v46 = vld [vmem:[#allocation319_spill] sm:$0xff]  ;;  %v14503_v3 = vld [vmem:[#allocation321_spill] sm:$0xff] }
 0x7e3   :  { %v4666_v5 = vmax.f32 %v4664_v63, %v4665_v7  ;;  %v4824_v39 = vmul.f32 %v14494_v36, %v14496_v14  ;;  %v4825_v38 = vmul.f32 %v14498_v58, %v14497_v10  ;;  %v4826_v27 = vmul.f32 %v14498_v58, %v14499_v51  ;;  %v14500_v24 = vld [vmem:[#allocation298_spill] sm:$0xff]  ;;  %v14502_v7 = vld [vmem:[#allocation212_spill] sm:$0xff] }
 0x7e4   :  { %v4625_v57 = vrot.slane %v4624_v56, 1  ;;  %v4646_v6 = vrot.slane %v4645_v47, 1  ;;  %v4827_v63 = vmul.f32 %v14498_v58, %v14500_v24  ;;  %v4828_v59 = vmul.f32 %v14502_v7, %v14501_v46  ;;  %v14505_v14 = vld [vmem:[#allocation322_spill] sm:$0xff]  ;;  %v14506_v10 = vld [vmem:[#allocation240_spill] sm:$0xff]  ;;  %v14508_v46 = vld [vmem:[#allocation253_spill] sm:$0xff] }
 0x7e5   :  { %v4667_v53 = vrot.slane %v4666_v5, 1  ;;  %v4829_v0 = vmul.f32 %v14502_v7, %v14503_v3  ;;  %v4830_v36 = vmul.f32 %v14502_v7, %v14504_v62  ;;  %v4831_v9 = vmul.f32 %v14506_v10, %v14505_v14  ;;  %v14510_v24 = vld [vmem:[#allocation303_spill] sm:$0xff] }
 0x7e6   :  { %v4626_v50 = vmax.f32 %v4624_v56, %v4625_v57  ;;  %v4647_v61 = vmax.f32 %v4645_v47, %v4646_v6  ;;  %v4832_v33 = vmul.f32 %v14506_v10, %v14507_v12  ;;  %v4833_v58 = vmul.f32 %v14506_v10, %v13850_v28  ;;  %v14509_v56 = vld [vmem:[#allocation325_spill] sm:$0xff]  ;;  %v14511_v6 = vld [vmem:[#allocation79_spill] sm:$0xff] }
 0x7e7   :  { %v4668_v51 = vmax.f32 %v4666_v5, %v4667_v53  ;;  %v4834_v57 = vmul.f32 %v14508_v46, %v13851_v34  ;;  %v4835_v3 = vmul.f32 %v14508_v46, %v14509_v56  ;;  %v4836_v7 = vmul.f32 %v14508_v46, %v14510_v24  ;;  %v14512_v47 = vld [vmem:[#allocation255_spill] sm:$0xff] }
 0x7e8   :  { %v4843_v62 = vmax.f32 %v12506_v17, %v4801_v26  ;;  %v4672_v14 = vcombine.low %v4626_v50, %v4647_v61  ;;  %v4837_v5 = vmul.f32 %v14512_v47, %v14511_v6  ;;  %v4844_v53 = vmax.f32 %v12518_v45, %v4804_v23 }
 0x7e9   :  { %v4864_v10 = vmax.f32 %v12510_v31, %v12532_v54  ;;  %v4865_v34 = vmax.f32 %v12522_v55, %v12542_v13  ;;  %v4885_v56 = vmax.f32 %v12514_v32, %v12536_v2  ;;  %v4886_v46 = vmax.f32 %v12526_v20, %v12546_v1  ;;  %v14513_v54 = vld [vmem:[#allocation327_spill] sm:$0xff] }
 0x7ea   :  { %v4845_v28 = vmax.f32 %v4843_v62, %v4807_v42  ;;  %v4679_v17 = vrot.slane %v4672_v14, %v13856_v18  ;;  %v4686_v61 = vrot.slane %v4668_v51, %v13856_v18  ;;  %v4846_v26 = vmax.f32 %v4844_v53, %v4810_v43 }
 0x7eb   :  { %v4866_v50 = vmax.f32 %v4864_v10, %v4808_v41  ;;  %v4867_v23 = vmax.f32 %v4865_v34, %v4811_v15  ;;  %v4887_v6 = vmax.f32 %v4885_v56, %v4809_v52  ;;  %v4888_v31 = vmax.f32 %v4886_v46, %v4812_v19  ;;  %v14514_v41 = vld [vmem:[#allocation280_spill] sm:$0xff] }
 0x7ec   :  { %v4847_v45 = vmax.f32 %v4845_v28, %v4813_v48  ;;  %v4687_v62 = vcombine.low %v4679_v17, %v4686_v61  ;;  %v4838_v55 = vmul.f32 %v14512_v47, %v14513_v54  ;;  %v4848_v13 = vmax.f32 %v4846_v26, %v4816_v4  ;;  %v14520_v61 = vld [vmem:[#allocation257_spill] sm:$0xff] }
 0x7ed   :  { %v4868_v32 = vmax.f32 %v4866_v50, %v12564_v8  ;;  %v4869_v42 = vmax.f32 %v4867_v23, %v4817_v16  ;;  %v4889_v20 = vmax.f32 %v4887_v6, %v12568_v60  ;;  %v4890_v1 = vmax.f32 %v4888_v31, %v4818_v40  ;;  %v14524_v23 = vld [vmem:[#allocation90_spill] sm:$0xff] }
 0x7ee   :  { %v4849_v2 = vmax.f32 %v4847_v45, %v4819_v25  ;;  %v4694_v51 = vrot.slane %v4687_v62, %v13856_v18  ;;  %v4840_v28 = vmul.f32 %v14514_v41, %v13917_v22  ;;  %v4850_v34 = vmax.f32 %v4848_v13, %v4822_v30  ;;  %v14523_v45 = vld [vmem:[#allocation284_spill] sm:$0xff]  ;;  %v14525_v13 = vld [vmem:[#allocation285_spill] sm:$0xff] }
 0x7ef   :  { %v4870_v52 = vmax.f32 %v4868_v32, %v4820_v49  ;;  %v4871_v15 = vmax.f32 %v4869_v42, %v4823_v44  ;;  %v4891_v19 = vmax.f32 %v4889_v20, %v4821_v21  ;;  %v4892_v48 = vmax.f32 %v4890_v1, %v4824_v39  ;;  %v14516_v39 = vld [vmem:[#allocation86_spill] sm:$0xff]  ;;  %v14527_v1 = vld [vmem:[#allocation279_spill] sm:$0xff] }
 0x7f0   :  { %v4851_v43 = vmax.f32 %v4849_v2, %v4825_v38  ;;  %4697 = vst.msk [vmem:[#allocation2 + $0x1b] ss:$8 sm:$0x7] %vm10961_vm0, %v4694_v51  ;;  %v4841_v4 = vmul.f32 %v14514_v41, %v13920_v35  ;;  %v4842_v40 = vmul.f32 %v14514_v41, %v13975_v29  ;;  %v4852_v25 = vmax.f32 %v4850_v34, %v4828_v59  ;;  %v14515_v38 = vld [vmem:[#allocation274_spill] sm:$0xff]  ;;  %v14526_v2 = vld [vmem:[#allocation276_spill] sm:$0xff] }
 0x7f1   :  { %v4872_v8 = vmax.f32 %v4870_v52, %v4826_v27  ;;  %v4873_v16 = vmax.f32 %v4871_v15, %v4829_v0  ;;  %v4893_v14 = vmax.f32 %v4891_v19, %v4827_v63  ;;  %v4894_v30 = vmax.f32 %v4892_v48, %v4830_v36  ;;  %v14517_v27 = vld [vmem:[#allocation275_spill] sm:$0xff]  ;;  %v14518_v0 = vld [vmem:[#allocation272_spill] sm:$0xff]  ;;  %v14565_v29 = vld [vmem:[#allocation302_spill] sm:$0xff] }
 0x7f2   :  { %v4853_v60 = vmax.f32 %v4851_v43, %v4831_v9  ;;  %v4839_v49 = vmul.f32 %v14512_v47, %v10627_v11  ;;  %v4854_v21 = vmax.f32 %v4852_v25, %v4834_v57  ;;  %v12643_v56 = vmul.f32 %v14516_v39, %v14515_v38  ;;  %v14519_v47 = vld [vmem:[#allocation267_spill] sm:$0xff]  ;;  %v14528_v51 = vld [vmem:[#allocation92_spill] sm:$0xff] }
 0x7f3   :  { %v4874_v44 = vmax.f32 %v4872_v8, %v4832_v33  ;;  %v4875_v53 = vmax.f32 %v4873_v16, %v4835_v3  ;;  %v4895_v10 = vmax.f32 %v4893_v14, %v4833_v58  ;;  %v4896_v46 = vmax.f32 %v4894_v30, %v4836_v7  ;;  %v14521_v58 = vld [vmem:[#allocation268_spill] sm:$0xff]  ;;  %v14530_v52 = vld [vmem:[#allocation271_spill] sm:$0xff] }
 0x7f4   :  { %v4855_v6 = vmax.f32 %v4853_v60, %v4837_v5  ;;  %v4856_v17 = vmax.f32 %v4854_v21, %v4840_v28  ;;  %v12647_v9 = vmul.f32 %v14516_v39, %v14517_v27  ;;  %v12651_v63 = vmul.f32 %v14516_v39, %v14518_v0  ;;  %v14522_v5 = vld [vmem:[#allocation270_spill] sm:$0xff]  ;;  %v14529_v28 = vld [vmem:[#allocation281_spill] sm:$0xff]  ;;  %v14531_v48 = vld [vmem:[#allocation296_spill] sm:$0xff] }
 0x7f5   :  { %v4876_v59 = vmax.f32 %v4874_v44, %v4838_v55  ;;  %v4877_v36 = vmax.f32 %v4875_v53, %v4841_v4  ;;  %v4897_v33 = vmax.f32 %v4895_v10, %v4839_v49  ;;  %v4898_v57 = vmax.f32 %v4896_v46, %v4842_v40  ;;  %v14532_v4 = vld [vmem:[#allocation259_spill] sm:$0xff]  ;;  %v14536_v49 = vld [vmem:[#allocation124_spill] sm:$0xff]  ;;  %v14538_v10 = vld [vmem:[#allocation282_spill] sm:$0xff] }
 0x7f6   :  { %v12655_v26 = vmul.f32 %v14520_v61, %v14519_v47  ;;  %v4857_v3 = vmax.f32 %v4855_v6, %v4856_v17  ;;  %v12659_v7 = vmul.f32 %v14520_v61, %v14521_v58  ;;  %v12663_v50 = vmul.f32 %v14520_v61, %v14522_v5  ;;  %v14533_v25 = vld [vmem:[#allocation283_spill] sm:$0xff]  ;;  %v14537_v44 = vld [vmem:[#allocation308_spill] sm:$0xff]  ;;  %v14539_v17 = vld [vmem:[#allocation309_spill] sm:$0xff] }
 0x7f7   :  { %v5038_v31 = vmul.f32 %v14524_v23, %v14523_v45  ;;  %v4878_v62 = vmax.f32 %v4876_v59, %v4877_v36  ;;  %v4899_v55 = vmax.f32 %v4897_v33, %v4898_v57  ;;  %v12669_v32 = vmul.f32 %v14524_v23, %v14525_v13  ;;  %v14534_v16 = vld [vmem:[#allocation287_spill] sm:$0xff]  ;;  %v14541_v33 = vld [vmem:[#allocation312_spill] sm:$0xff]  ;;  %v14542_v61 = vld [vmem:[#allocation293_spill] sm:$0xff] }
 0x7f8   :  { %v12673_v42 = vmul.f32 %v14524_v23, %v14526_v2  ;;  %v4858_v20 = vrot.slane %v4857_v3, 4  ;;  %v5041_v41 = vmul.f32 %v14528_v51, %v14527_v1  ;;  %v12679_v34 = vmul.f32 %v14528_v51, %v14529_v28  ;;  %v14535_v30 = vld [vmem:[#allocation307_spill] sm:$0xff]  ;;  %v14543_v5 = vld [vmem:[#allocation310_spill] sm:$0xff]  ;;  %v14544_v23 = vld [vmem:[#allocation157_spill] sm:$0xff] }
 0x7f9   :  { %v12683_v43 = vmul.f32 %v14528_v51, %v14530_v52  ;;  %v4879_v15 = vrot.slane %v4878_v62, 4  ;;  %v4900_v19 = vrot.slane %v4899_v55, 4  ;;  %v5044_v40 = vmul.f32 %v14532_v4, %v14531_v48  ;;  %v14540_v59 = vld [vmem:[#allocation155_spill] sm:$0xff]  ;;  %v14546_v52 = vld [vmem:[#allocation286_spill] sm:$0xff]  ;;  %v14553_v48 = vld [vmem:[#allocation317_spill] sm:$0xff] }
 0x7fa   :  { %v5045_v8 = vmul.f32 %v14532_v4, %v14533_v25  ;;  %v4859_v60 = vmax.f32 %v4857_v3, %v4858_v20  ;;  %v5046_v14 = vmul.f32 %v14532_v4, %v14534_v16  ;;  %v5047_v21 = vmul.f32 %v14536_v49, %v14535_v30  ;;  %v14545_v20 = vld [vmem:[#allocation313_spill] sm:$0xff]  ;;  %v14547_v4 = vld [vmem:[#allocation314_spill] sm:$0xff]  ;;  %v14548_v16 = vld [vmem:[#allocation184_spill] sm:$0xff] }
 0x7fb   :  { %v5048_v39 = vmul.f32 %v14536_v49, %v14537_v44  ;;  %v4880_v6 = vmax.f32 %v4878_v62, %v4879_v15  ;;  %v4901_v53 = vmax.f32 %v4899_v55, %v4900_v19  ;;  %v5049_v46 = vmul.f32 %v14536_v49, %v14538_v10  ;;  %v14549_v10 = vld [vmem:[#allocation316_spill] sm:$0xff]  ;;  %v14551_v44 = vld [vmem:[#allocation315_spill] sm:$0xff]  ;;  %v14552_v30 = vld [vmem:[#allocation261_spill] sm:$0xff] }
 0x7fc   :  { %v5050_v0 = vmul.f32 %v14540_v59, %v14539_v17  ;;  %v4860_v36 = vrot.slane %v4859_v60, 2  ;;  %v12701_v57 = vmul.f32 %v14540_v59, %v14541_v33  ;;  %v12705_v3 = vmul.f32 %v14540_v59, %v14542_v61  ;;  %v14550_v59 = vld [vmem:[#allocation294_spill] sm:$0xff]  ;;  %v14557_v1 = vld [vmem:[#allocation320_spill] sm:$0xff]  ;;  %v14562_v58 = vld [vmem:[#allocation299_spill] sm:$0xff] }
 0x7fd   :  { %v5053_v2 = vmul.f32 %v14544_v23, %v14543_v5  ;;  %v4881_v62 = vrot.slane %v4880_v6, 2  ;;  %v4902_v55 = vrot.slane %v4901_v53, 2  ;;  %v5054_v51 = vmul.f32 %v14544_v23, %v14545_v20 }
 0x7fe   :  { %v5055_v15 = vmul.f32 %v14544_v23, %v14546_v52  ;;  %v4861_v19 = vmax.f32 %v4859_v60, %v4860_v36  ;;  %v5056_v49 = vmul.f32 %v14548_v16, %v14547_v4  ;;  %v5057_v33 = vmul.f32 %v14548_v16, %v14549_v10  ;;  %v14554_v23 = vld [vmem:[#allocation292_spill] sm:$0xff]  ;;  %v14555_v36 = vld [vmem:[#allocation318_spill] sm:$0xff]  ;;  %v14556_v52 = vld [vmem:[#allocation263_spill] sm:$0xff] }
 0x7ff   :  { %v5058_v61 = vmul.f32 %v14548_v16, %v14550_v59  ;;  %v4882_v17 = vmax.f32 %v4880_v6, %v4881_v62  ;;  %v4903_v5 = vmax.f32 %v4901_v53, %v4902_v55  ;;  %v5059_v25 = vmul.f32 %v14552_v30, %v14551_v44  ;;  %v14558_v6 = vld [vmem:[#allocation298_spill] sm:$0xff]  ;;  %v14559_v62 = vld [vmem:[#allocation319_spill] sm:$0xff] }
 0x800   :  { %v5060_v20 = vmul.f32 %v14552_v30, %v14553_v48  ;;  %v4862_v28 = vrot.slane %v4861_v19, 1  ;;  %v5061_v60 = vmul.f32 %v14552_v30, %v14554_v23  ;;  %v5062_v4 = vmul.f32 %v14556_v52, %v14555_v36  ;;  %v14560_v55 = vld [vmem:[#allocation214_spill] sm:$0xff]  ;;  %v14561_v48 = vld [vmem:[#allocation321_spill] sm:$0xff] }
 0x801   :  { %v5063_v10 = vmul.f32 %v14556_v52, %v14557_v1  ;;  %v4883_v13 = vrot.slane %v4882_v17, 1  ;;  %v4904_v16 = vrot.slane %v4903_v5, 1  ;;  %v5064_v53 = vmul.f32 %v14556_v52, %v14558_v6  ;;  %v14563_v23 = vld [vmem:[#allocation322_spill] sm:$0xff]  ;;  %v14566_v6 = vld [vmem:[#allocation323_spill] sm:$0xff] }
 0x802   :  { %v5065_v59 = vmul.f32 %v14560_v55, %v14559_v62  ;;  %v4863_v44 = vmax.f32 %v4861_v19, %v4862_v28  ;;  %v5066_v45 = vmul.f32 %v14560_v55, %v14561_v48  ;;  %v5067_v30 = vmul.f32 %v14560_v55, %v14562_v58  ;;  %v14564_v36 = vld [vmem:[#allocation242_spill] sm:$0xff]  ;;  %v14567_v62 = vld [vmem:[#allocation244_spill] sm:$0xff]  ;;  %v14568_v19 = vld [vmem:[#allocation325_spill] sm:$0xff] }
 0x803   :  { %v5068_v47 = vmul.f32 %v14564_v36, %v14563_v23  ;;  %v4884_v27 = vmax.f32 %v4882_v17, %v4883_v13  ;;  %v4905_v1 = vmax.f32 %v4903_v5, %v4904_v16  ;;  %v5069_v38 = vmul.f32 %v14564_v36, %v14507_v12  ;;  %v14569_v13 = vld [vmem:[#allocation79_spill] sm:$0xff]  ;;  %v14570_v17 = vld [vmem:[#allocation288_spill] sm:$0xff] }
 0x804   :  { %v5070_v52 = vmul.f32 %v14564_v36, %v14565_v29  ;;  %v5071_v28 = vmul.f32 %v14567_v62, %v14566_v6  ;;  %v5072_v48 = vmul.f32 %v14567_v62, %v14568_v19  ;;  %v5073_v58 = vmul.f32 %v14567_v62, %v14510_v24 }
 0x805   :  { %v5080_v55 = vmax.f32 %v12643_v56, %v5038_v31  ;;  %v4909_v23 = vcombine.low %v4863_v44, %v4884_v27  ;;  %v5074_v5 = vmul.f32 %v14570_v17, %v14569_v13  ;;  %v5081_v16 = vmax.f32 %v12655_v26, %v5041_v41 }
 0x806   :  { %v5101_v29 = vmax.f32 %v12647_v9, %v12669_v32  ;;  %v5102_v6 = vmax.f32 %v12659_v7, %v12679_v34  ;;  %v5122_v19 = vmax.f32 %v12651_v63, %v12673_v42  ;;  %v5123_v24 = vmax.f32 %v12663_v50, %v12683_v43 }
 0x807   :  { %v5082_v36 = vmax.f32 %v5080_v55, %v5044_v40  ;;  %v4916_v56 = vrot.slane %v4909_v23, %v13856_v18  ;;  %v4923_v27 = vrot.slane %v4905_v1, %v13856_v18  ;;  %v5083_v31 = vmax.f32 %v5081_v16, %v5047_v21 }
 0x808   :  { %v5103_v44 = vmax.f32 %v5101_v29, %v5045_v8  ;;  %v5104_v41 = vmax.f32 %v5102_v6, %v5048_v39  ;;  %v5124_v62 = vmax.f32 %v5122_v19, %v5046_v14  ;;  %v5125_v9 = vmax.f32 %v5123_v24, %v5049_v46  ;;  %v14574_v19 = vld [vmem:[#allocation189_spill] sm:$0xff] }
 0x809   :  { %v5084_v26 = vmax.f32 %v5082_v36, %v5050_v0  ;;  %v4924_v32 = vcombine.low %v4916_v56, %v4923_v27  ;;  %v5075_v7 = vmul.f32 %v14570_v17, %v14513_v54  ;;  %v5085_v34 = vmax.f32 %v5083_v31, %v5053_v2 }
 0x80a   :  { %v5105_v63 = vmax.f32 %v5103_v44, %v12701_v57  ;;  %v5106_v40 = vmax.f32 %v5104_v41, %v5054_v51  ;;  %v5126_v50 = vmax.f32 %v5124_v62, %v12705_v3  ;;  %v5127_v43 = vmax.f32 %v5125_v9, %v5055_v15  ;;  %v14571_v57 = vld [vmem:[#allocation265_spill] sm:$0xff]  ;;  %v14582_v41 = vld [vmem:[#allocation279_spill] sm:$0xff] }
 0x80b   :  { %v5086_v42 = vmax.f32 %v5084_v26, %v5056_v49  ;;  %v4931_v1 = vrot.slane %v4924_v32, %v13856_v18  ;;  %v5076_v8 = vmul.f32 %v14570_v17, %v10627_v11  ;;  %v5087_v21 = vmax.f32 %v5085_v34, %v5059_v25  ;;  %v14579_v26 = vld [vmem:[#allocation284_spill] sm:$0xff]  ;;  %v14583_v62 = vld [vmem:[#allocation191_spill] sm:$0xff]  ;;  %v14584_v34 = vld [vmem:[#allocation281_spill] sm:$0xff] }
 0x80c   :  { %v5107_v14 = vmax.f32 %v5105_v63, %v5057_v33  ;;  %v5108_v46 = vmax.f32 %v5106_v40, %v5060_v20  ;;  %v5128_v0 = vmax.f32 %v5126_v50, %v5058_v61  ;;  %v5129_v23 = vmax.f32 %v5127_v43, %v5061_v60  ;;  %v14572_v33 = vld [vmem:[#allocation304_spill] sm:$0xff]  ;;  %v14573_v60 = vld [vmem:[#allocation274_spill] sm:$0xff] }
 0x80d   :  { %v5088_v39 = vmax.f32 %v5086_v42, %v5062_v4  ;;  %4934 = vst.msk [vmem:[#allocation2 + $0x1c] ss:$8 sm:$0x7] %vm10961_vm0, %v4931_v1  ;;  %v5077_v2 = vmul.f32 %v14571_v57, %v13917_v22  ;;  %v5078_v3 = vmul.f32 %v14571_v57, %v13920_v35  ;;  %v5089_v51 = vmax.f32 %v5087_v21, %v5065_v59  ;;  %v14575_v59 = vld [vmem:[#allocation275_spill] sm:$0xff]  ;;  %v14585_v42 = vld [vmem:[#allocation296_spill] sm:$0xff]  ;;  %v14586_v40 = vld [vmem:[#allocation126_spill] sm:$0xff] }
 0x80e   :  { %v5109_v15 = vmax.f32 %v5107_v14, %v5063_v10  ;;  %v5110_v6 = vmax.f32 %v5108_v46, %v5066_v45  ;;  %v5130_v11 = vmax.f32 %v5128_v0, %v5064_v53  ;;  %v5131_v25 = vmax.f32 %v5129_v23, %v5067_v30  ;;  %v14576_v45 = vld [vmem:[#allocation267_spill] sm:$0xff]  ;;  %v14577_v10 = vld [vmem:[#allocation94_spill] sm:$0xff]  ;;  %v14589_v14 = vld [vmem:[#allocation193_spill] sm:$0xff] }
 0x80f   :  { %v5090_v49 = vmax.f32 %v5088_v39, %v5068_v47  ;;  %v5079_v20 = vmul.f32 %v14571_v57, %v14572_v33  ;;  %v5091_v4 = vmax.f32 %v5089_v51, %v5071_v28  ;;  %v5269_v55 = vmul.f32 %v14574_v19, %v14573_v60  ;;  %v14578_v28 = vld [vmem:[#allocation268_spill] sm:$0xff]  ;;  %v14587_v1 = vld [vmem:[#allocation283_spill] sm:$0xff] }
 0x810   :  { %v5111_v61 = vmax.f32 %v5109_v15, %v5069_v38  ;;  %v5112_v16 = vmax.f32 %v5110_v6, %v5072_v48  ;;  %v5132_v29 = vmax.f32 %v5130_v11, %v5070_v52  ;;  %v5133_v36 = vmax.f32 %v5131_v25, %v5073_v58  ;;  %v14581_v52 = vld [vmem:[#allocation285_spill] sm:$0xff]  ;;  %v14588_v21 = vld [vmem:[#allocation307_spill] sm:$0xff]  ;;  %v14590_v46 = vld [vmem:[#allocation308_spill] sm:$0xff] }
 0x811   :  { %v5092_v17 = vmax.f32 %v5090_v49, %v5074_v5  ;;  %v5093_v24 = vmax.f32 %v5091_v4, %v5077_v2  ;;  %v5270_v47 = vmul.f32 %v14574_v19, %v14575_v59  ;;  %v5272_v53 = vmul.f32 %v14577_v10, %v14576_v45  ;;  %v14580_v5 = vld [vmem:[#allocation96_spill] sm:$0xff]  ;;  %v14591_v2 = vld [vmem:[#allocation309_spill] sm:$0xff]  ;;  %v14594_v11 = vld [vmem:[#allocation310_spill] sm:$0xff] }
 0x812   :  { %v5113_v56 = vmax.f32 %v5111_v61, %v5075_v7  ;;  %v5114_v30 = vmax.f32 %v5112_v16, %v5078_v3  ;;  %v5134_v27 = vmax.f32 %v5132_v29, %v5076_v8  ;;  %v5135_v31 = vmax.f32 %v5133_v36, %v5079_v20  ;;  %v14592_v3 = vld [vmem:[#allocation195_spill] sm:$0xff]  ;;  %v14593_v15 = vld [vmem:[#allocation312_spill] sm:$0xff]  ;;  %v14596_v20 = vld [vmem:[#allocation313_spill] sm:$0xff] }
 0x813   :  { %v5273_v38 = vmul.f32 %v14577_v10, %v14578_v28  ;;  %v5094_v44 = vmax.f32 %v5092_v17, %v5093_v24  ;;  %v5275_v48 = vmul.f32 %v14580_v5, %v14579_v26  ;;  %v5276_v58 = vmul.f32 %v14580_v5, %v14581_v52  ;;  %v14595_v25 = vld [vmem:[#allocation159_spill] sm:$0xff]  ;;  %v14597_v61 = vld [vmem:[#allocation314_spill] sm:$0xff]  ;;  %v14599_v36 = vld [vmem:[#allocation316_spill] sm:$0xff] }
 0x814   :  { %v5278_v9 = vmul.f32 %v14583_v62, %v14582_v41  ;;  %v5115_v32 = vmax.f32 %v5113_v56, %v5114_v30  ;;  %v5136_v7 = vmax.f32 %v5134_v27, %v5135_v31  ;;  %v5279_v63 = vmul.f32 %v14583_v62, %v14584_v34  ;;  %v14598_v19 = vld [vmem:[#allocation186_spill] sm:$0xff]  ;;  %v14600_v56 = vld [vmem:[#allocation315_spill] sm:$0xff]  ;;  %v14601_v45 = vld [vmem:[#allocation188_spill] sm:$0xff] }
 0x815   :  { %v5281_v50 = vmul.f32 %v14586_v40, %v14585_v42  ;;  %v5095_v43 = vrot.slane %v5094_v44, 4  ;;  %v5282_v8 = vmul.f32 %v14586_v40, %v14587_v1  ;;  %v5284_v39 = vmul.f32 %v14589_v14, %v14588_v21  ;;  %v14602_v27 = vld [vmem:[#allocation317_spill] sm:$0xff]  ;;  %v14603_v28 = vld [vmem:[#allocation318_spill] sm:$0xff]  ;;  %v14605_v41 = vld [vmem:[#allocation320_spill] sm:$0xff] }
 0x816   :  { %v5285_v0 = vmul.f32 %v14589_v14, %v14590_v46  ;;  %v5116_v23 = vrot.slane %v5115_v32, 4  ;;  %v5137_v57 = vrot.slane %v5136_v7, 4  ;;  %v5287_v51 = vmul.f32 %v14592_v3, %v14591_v2  ;;  %v14608_v14 = vld [vmem:[#allocation321_spill] sm:$0xff] }
 0x817   :  { %v5288_v49 = vmul.f32 %v14592_v3, %v14593_v15  ;;  %v5096_v6 = vmax.f32 %v5094_v44, %v5095_v43  ;;  %v5290_v33 = vmul.f32 %v14595_v25, %v14594_v11  ;;  %v5291_v4 = vmul.f32 %v14595_v25, %v14596_v20  ;;  %v14604_v44 = vld [vmem:[#allocation216_spill] sm:$0xff]  ;;  %v14609_v3 = vld [vmem:[#allocation322_spill] sm:$0xff]  ;;  %v14610_v25 = vld [vmem:[#allocation199_spill] sm:$0xff] }
 0x818   :  { %v5293_v17 = vmul.f32 %v14598_v19, %v14597_v61  ;;  %v5117_v16 = vmax.f32 %v5115_v32, %v5116_v23  ;;  %v5138_v29 = vmax.f32 %v5136_v7, %v5137_v57  ;;  %v5294_v24 = vmul.f32 %v14598_v19, %v14599_v36  ;;  %v14606_v32 = vld [vmem:[#allocation319_spill] sm:$0xff]  ;;  %v14607_v7 = vld [vmem:[#allocation197_spill] sm:$0xff]  ;;  %v14612_v20 = vld [vmem:[#allocation246_spill] sm:$0xff] }
 0x819   :  { %v5296_v10 = vmul.f32 %v14601_v45, %v14600_v56  ;;  %v5097_v30 = vrot.slane %v5096_v6, 2  ;;  %v5297_v31 = vmul.f32 %v14601_v45, %v14602_v27  ;;  %v5299_v5 = vmul.f32 %v14604_v44, %v14603_v28  ;;  %v14611_v61 = vld [vmem:[#allocation323_spill] sm:$0xff] }
 0x81a   :  { %v5300_v62 = vmul.f32 %v14604_v44, %v14605_v41  ;;  %v5118_v34 = vrot.slane %v5117_v16, 2  ;;  %v5139_v40 = vrot.slane %v5138_v29, 2  ;;  %v5302_v43 = vmul.f32 %v14607_v7, %v14606_v32 }
 0x81b   :  { %v5303_v23 = vmul.f32 %v14607_v7, %v14608_v14  ;;  %v5098_v57 = vmax.f32 %v5096_v6, %v5097_v30  ;;  %v5305_v19 = vmul.f32 %v14610_v25, %v14609_v3  ;;  %v5306_v45 = vmul.f32 %v14610_v25, %v14507_v12  ;;  %v14613_v3 = vld [vmem:[#allocation325_spill] sm:$0xff] }
 0x81c   :  { %v5317_v27 = vmax.f32 %v5269_v55, %v5275_v48  ;;  %v5119_v28 = vmax.f32 %v5117_v16, %v5118_v34  ;;  %v5140_v56 = vmax.f32 %v5138_v29, %v5139_v40  ;;  %v5318_v36 = vmax.f32 %v5272_v53, %v5278_v9 }
 0x81d   :  { %v5338_v44 = vmax.f32 %v5270_v47, %v5276_v58  ;;  %v5099_v41 = vrot.slane %v5098_v57, 1  ;;  %v5308_v11 = vmul.f32 %v14612_v20, %v14611_v61  ;;  %v5339_v37 = vmax.f32 %v5273_v38, %v5279_v63  ;;  %v14614_v58 = vld [vmem:[#allocation295_spill] sm:$0xff] }
 0x81e   :  { %v5319_v32 = vmax.f32 %v5317_v27, %v5281_v50  ;;  %v5120_v15 = vrot.slane %v5119_v28, 1  ;;  %v5141_v7 = vrot.slane %v5140_v56, 1  ;;  %v5320_v6 = vmax.f32 %v5318_v36, %v5284_v39 }
 0x81f   :  { %v5340_v30 = vmax.f32 %v5338_v44, %v5282_v8  ;;  %v5100_v14 = vmax.f32 %v5098_v57, %v5099_v41  ;;  %v5309_v2 = vmul.f32 %v14612_v20, %v14613_v3  ;;  %v5341_v55 = vmax.f32 %v5339_v37, %v5285_v0  ;;  %v14615_v8 = vld [vmem:[#allocation300_spill] sm:$0xff]  ;;  %v14621_v44 = vld [vmem:[#allocation161_spill] sm:$0xff] }
 0x820   :  { %v5321_v25 = vmax.f32 %v5319_v32, %v5287_v51  ;;  %v5121_v48 = vmax.f32 %v5119_v28, %v5120_v15  ;;  %v5142_v16 = vmax.f32 %v5140_v56, %v5141_v7  ;;  %v5322_v53 = vmax.f32 %v5320_v6, %v5290_v33  ;;  %v14616_v15 = vld [vmem:[#allocation98_spill] sm:$0xff]  ;;  %v14622_v7 = vld [vmem:[#allocation312_spill] sm:$0xff] }
 0x821   :  { %v5342_v47 = vmax.f32 %v5340_v30, %v5288_v49  ;;  %v5311_v9 = vmul.f32 %v14614_v58, %v14569_v13  ;;  %v5312_v38 = vmul.f32 %v14614_v58, %v14513_v54  ;;  %v5343_v50 = vmax.f32 %v5341_v55, %v5291_v4  ;;  %v14624_v30 = vld [vmem:[#allocation310_spill] sm:$0xff]  ;;  %v14629_v58 = vld [vmem:[#allocation316_spill] sm:$0xff] }
 0x822   :  { %v5323_v63 = vmax.f32 %v5321_v25, %v5293_v17  ;;  %v5146_v39 = vcombine.low %v5100_v14, %v5121_v48  ;;  %v5314_v29 = vmul.f32 %v14615_v8, %v13917_v22  ;;  %v5324_v36 = vmax.f32 %v5322_v53, %v5296_v10  ;;  %v14618_v14 = vld [vmem:[#allocation128_spill] sm:$0xff]  ;;  %v14625_v25 = vld [vmem:[#allocation291_spill] sm:$0xff]  ;;  %v14626_v48 = vld [vmem:[#allocation313_spill] sm:$0xff] }
 0x823   :  { %v5344_v20 = vmax.f32 %v5342_v47, %v5294_v24  ;;  %v5315_v37 = vmul.f32 %v14615_v8, %v13920_v35  ;;  %v5345_v51 = vmax.f32 %v5343_v50, %v5297_v31  ;;  %v5506_v49 = vmul.f32 %v14616_v15, %v14573_v60  ;;  %v14617_v24 = vld [vmem:[#allocation100_spill] sm:$0xff]  ;;  %v14628_v53 = vld [vmem:[#allocation297_spill] sm:$0xff] }
 0x824   :  { %v5325_v0 = vmax.f32 %v5323_v63, %v5299_v5  ;;  %v5153_v33 = vrot.slane %v5146_v39, %v13856_v18  ;;  %v5160_v56 = vrot.slane %v5142_v16, %v13856_v18  ;;  %v5326_v17 = vmax.f32 %v5324_v36, %v5302_v43  ;;  %v14627_v16 = vld [vmem:[#allocation314_spill] sm:$0xff]  ;;  %v14632_v39 = vld [vmem:[#allocation317_spill] sm:$0xff] }
 0x825   :  { %v5346_v4 = vmax.f32 %v5344_v20, %v5300_v62  ;;  %v5347_v28 = vmax.f32 %v5345_v51, %v5303_v23  ;;  %v5507_v10 = vmul.f32 %v14616_v15, %v14575_v59  ;;  %v5512_v41 = vmul.f32 %v14617_v24, %v14579_v26  ;;  %v14619_v26 = vld [vmem:[#allocation131_spill] sm:$0xff]  ;;  %v14631_v63 = vld [vmem:[#allocation190_spill] sm:$0xff] }
 0x826   :  { %v5327_v27 = vmax.f32 %v5325_v0, %v5305_v19  ;;  %v5161_v34 = vcombine.low %v5153_v33, %v5160_v56  ;;  %v5328_v5 = vmax.f32 %v5326_v17, %v5308_v11  ;;  %v5513_v60 = vmul.f32 %v14617_v24, %v14581_v52  ;;  %v14620_v52 = vld [vmem:[#allocation309_spill] sm:$0xff]  ;;  %v14633_v36 = vld [vmem:[#allocation318_spill] sm:$0xff]  ;;  %v14635_v0 = vld [vmem:[#allocation320_spill] sm:$0xff] }
 0x827   :  { %v5348_v31 = vmax.f32 %v5346_v4, %v5306_v45  ;;  %v5349_v32 = vmax.f32 %v5347_v28, %v5309_v2  ;;  %v5518_v43 = vmul.f32 %v14618_v14, %v14585_v42  ;;  %v5519_v62 = vmul.f32 %v14618_v14, %v14587_v1  ;;  %v14634_v20 = vld [vmem:[#allocation218_spill] sm:$0xff]  ;;  %v14636_v15 = vld [vmem:[#allocation319_spill] sm:$0xff]  ;;  %v14637_v33 = vld [vmem:[#allocation220_spill] sm:$0xff] }
 0x828   :  { %v5329_v40 = vmax.f32 %v5327_v27, %v5311_v9  ;;  %v5168_v23 = vrot.slane %v5161_v34, %v13856_v18  ;;  %v5330_v59 = vmax.f32 %v5328_v5, %v5314_v29  ;;  %v5521_v19 = vmul.f32 %v14619_v26, %v14588_v21  ;;  %v12885_v17 = vld [vmem:[#allocation11 + $0x400] sm:$0xff]  ;;  %v14638_v28 = vld [vmem:[#allocation321_spill] sm:$0xff]  ;;  %v14640_v5 = vld [vmem:[#allocation248_spill] sm:$0xff] }
 0x829   :  { %v5350_v57 = vmax.f32 %v5348_v31, %v5312_v38  ;;  %v5351_v11 = vmax.f32 %v5349_v32, %v5315_v37  ;;  %v5522_v45 = vmul.f32 %v14619_v26, %v14590_v46  ;;  %v5524_v2 = vmul.f32 %v14621_v44, %v14620_v52  ;;  %v14630_v38 = vld [vmem:[#allocation315_spill] sm:$0xff]  ;;  %v12887_v4 = vld [vmem:[#allocation11 + $0x420] sm:$0xff] }
 0x82a   :  { %v5525_v42 = vmul.f32 %v14621_v44, %v14622_v7  ;;  %5171 = vst.msk [vmem:[#allocation2 + $0x1d] ss:$8 sm:$0x7] %vm10961_vm0, %v5168_v23  ;;  %v5331_v1 = vmax.f32 %v5329_v40, %v5330_v59  ;;  %v5527_v55 = vmul.f32 %v14625_v25, %v14624_v30  ;;  %v5528_v21 = vmul.f32 %v14625_v25, %v14626_v48  ;;  %v14639_v34 = vld [vmem:[#allocation322_spill] sm:$0xff]  ;;  %v14641_v23 = vld [vmem:[#allocation277_spill] sm:$0xff]  ;;  %v12898_v52 = vld [vmem:[#allocation11 + $0x408] sm:$0xff] }
 0x82b   :  { %v5530_v47 = vmul.f32 %v14628_v53, %v14627_v16  ;;  %v5352_v46 = vmax.f32 %v5350_v57, %v5351_v11  ;;  %v5531_v9 = vmul.f32 %v14628_v53, %v14629_v58  ;;  %v5533_v50 = vmul.f32 %v14631_v63, %v14630_v38  ;;  %v14642_v59 = vld [vmem:[#allocation289_spill] sm:$0xff]  ;;  %v12900_v44 = vld [vmem:[#allocation11 + $0x428] sm:$0xff]  ;;  %v14645_v48 = vld [vmem:[#allocation278_spill] sm:$0xff] }
 0x82c   :  { %v5534_v8 = vmul.f32 %v14631_v63, %v14632_v39  ;;  %v5332_v29 = vrot.slane %v5331_v1, 4  ;;  %v5536_v37 = vmul.f32 %v14634_v20, %v14633_v36  ;;  %v5537_v51 = vmul.f32 %v14634_v20, %v14635_v0  ;;  %v14644_v30 = vld [vmem:[#allocation301_spill] sm:$0xff]  ;;  %v14646_v16 = vld [vmem:[#allocation290_spill] sm:$0xff] }
 0x82d   :  { %v5539_v56 = vmul.f32 %v14637_v33, %v14636_v15  ;;  %v5353_v27 = vrot.slane %v5352_v46, 4  ;;  %v5540_v24 = vmul.f32 %v14637_v33, %v14638_v28  ;;  %v5542_v31 = vmul.f32 %v14640_v5, %v14639_v34  ;;  %v14648_v36 = vld [vmem:[#allocation306_spill] sm:$0xff] }
 0x82e   :  { %v5543_v40 = vmul.f32 %v14640_v5, %v14507_v12  ;;  %v5333_v32 = vmax.f32 %v5331_v1, %v5332_v29  ;;  %v5554_v14 = vmax.f32 %v5506_v49, %v5512_v41  ;;  %v14643_v57 = vmax.f32 %v14641_v23, %v14642_v59  ;;  %v14650_v5 = vld [vmem:[#allocation326_spill] sm:$0xff] }
 0x82f   :  { %v5575_v11 = vmax.f32 %v5507_v10, %v5513_v60  ;;  %v5354_v7 = vmax.f32 %v5352_v46, %v5353_v27  ;;  %v5545_v25 = vmul.f32 %v14644_v30, %v14611_v61  ;;  %v14647_v53 = vmax.f32 %v14645_v48, %v14646_v16 }
 0x830   :  { %v5557_v26 = vmax.f32 %v14643_v57, %v5521_v19  ;;  %v8141_v12 = vcombine.high %v12885_v17, %v12887_v4  ;;  %v5334_v49 = vrot.slane %v5333_v32, 2  ;;  %v5556_v41 = vmax.f32 %v5554_v14, %v5518_v43  ;;  %v14649_v43 = vld [vmem:[#allocation305_spill] sm:$0xff] }
 0x831   :  { %v5578_v58 = vmax.f32 %v14647_v53, %v5522_v45  ;;  %v5577_v19 = vmax.f32 %v5575_v11, %v5519_v62  ;;  %v5355_v10 = vrot.slane %v5354_v7, 2  ;;  %v5546_v60 = vmul.f32 %v14644_v30, %v14613_v3 }
 0x832   :  { %v5559_v1 = vmax.f32 %v5557_v26, %v5527_v55  ;;  %6893 = vmatprep.subr.bf16.mxu0 %v8141_v12  ;;  %v8143_v61 = vcombine.high %v12898_v52, %v12900_v44  ;;  %v5335_v46 = vmax.f32 %v5333_v32, %v5334_v49  ;;  %v5558_v63 = vmax.f32 %v5556_v41, %v5524_v2 }
 0x833   :  { %v5580_v38 = vmax.f32 %v5578_v58, %v5528_v21  ;;  %v5579_v45 = vmax.f32 %v5577_v19, %v5525_v42  ;;  %v5356_v29 = vmax.f32 %v5354_v7, %v5355_v10  ;;  %v5548_v20 = vmul.f32 %v14648_v36, %v14569_v13 }
 0x834   :  { %v5561_v39 = vmax.f32 %v5559_v1, %v5533_v50  ;;  %v5551_v62 = vmul.f32 %v14649_v43, %v13917_v22  ;;  %6979 = vmatprep.subr.bf16.mxu1 %v8143_v61  ;;  %v5336_v0 = vrot.slane %v5335_v46, 1  ;;  %v5560_v3 = vmax.f32 %v5558_v63, %v5530_v47 }
 0x835   :  { %v5582_v55 = vmax.f32 %v5580_v38, %v5534_v8  ;;  %v5581_v15 = vmax.f32 %v5579_v45, %v5531_v9  ;;  %v5357_v33 = vrot.slane %v5356_v29, 1  ;;  %v5549_v27 = vmul.f32 %v14648_v36, %v14513_v54 }
 0x836   :  { %v5563_v21 = vmax.f32 %v5561_v39, %v5539_v56  ;;  %v5552_v2 = vmul.f32 %v14649_v43, %v13920_v35  ;;  %v5337_v50 = vmax.f32 %v5335_v46, %v5336_v0  ;;  %v5562_v28 = vmax.f32 %v5560_v3, %v5536_v37  ;;  %v14652_v56 = vld [vmem:[#allocation311_spill] sm:$0xff]  ;;  %v5647_v43 = vld [vmem:[#allocation2] sm:$0xff] }
 0x837   :  { %v5584_v42 = vmax.f32 %v5582_v55, %v5540_v24  ;;  %v5583_v34 = vmax.f32 %v5581_v15, %v5537_v51  ;;  %v14651_v22 = vrot.slane %v14650_v5, 1  ;;  %v5358_v32 = vmax.f32 %v5356_v29, %v5357_v33  ;;  %v5796_v55 = vld [vmem:[#allocation11 + $0x460] sm:$0xff]  ;;  %v5793_v0 = vld [vmem:[#allocation11 + $0x448] sm:$0xff] }
 0x838   :  { %v5565_v13 = vmax.f32 %v5563_v21, %v5545_v25  ;;  %v14653_v9 = vrot.slane %v14652_v56, 4  ;;  %v5564_v23 = vmax.f32 %v5562_v28, %v5542_v31  ;;  %v5797_v3 = vld [vmem:[#allocation11 + $0x468] sm:$0xff]  ;;  %v5804_v28 = vld [vmem:[#allocation11 + $0x4a0] sm:$0xff] }
 0x839   :  { %v5379_v8 = vmax.f32 %v14650_v5, %v14651_v22  ;;  %v5586_v47 = vmax.f32 %v5584_v42, %v5546_v60  ;;  %v5585_v59 = vmax.f32 %v5583_v34, %v5543_v40  ;;  %v5383_v57 = vcombine.low %v5337_v50, %v5358_v32  ;;  %v5800_v50 = vld [vmem:[#allocation11 + $0x480] sm:$0xff]  ;;  %v5805_v34 = vld [vmem:[#allocation11 + $0x4a8] sm:$0xff] }
 0x83a   :  { %v5612_v14 = vmax.f32 %v14652_v56, %v14653_v9  ;;  %v5567_v54 = vmax.f32 %v5565_v13, %v5551_v62  ;;  %v5566_v24 = vmax.f32 %v5564_v23, %v5548_v20  ;;  %v5648_v20 = vld [vmem:[#allocation2 + $0x8] sm:$0xff]  ;;  %v5792_v62 = vld [vmem:[#allocation11 + $0x440] sm:$0xff]  ;;  %v8151_v42 = vcombine.high %v5793_v0, %v5797_v3  ;;  %v5801_v13 = vld [vmem:[#allocation11 + $0x488] sm:$0xff] }
 0x83b   :  { %v5588_v35 = vmax.f32 %v5586_v47, %v5552_v2  ;;  %v5587_v26 = vmax.f32 %v5585_v59, %v5549_v27  ;;  %v5397_v37 = vrot.slane %v5379_v8, %v13856_v18  ;;  %v5390_v51 = vrot.slane %v5383_v57, %v13856_v18  ;;  %v5808_v5 = vld [vmem:[#allocation11 + $0x4c0] sm:$0xff]  ;;  %v5809_v8 = vld [vmem:[#allocation11 + $0x4c8] sm:$0xff] }
 0x83c   :  { %v5613_v11 = vrot.slane %v5612_v14, 2  ;;  %v5568_v7 = vmax.f32 %v5566_v24, %v5567_v54  ;;  %v8140_v27 = vcombine.low %v12885_v17, %v12887_v4  ;;  %v8142_v2 = vcombine.low %v12898_v52, %v12900_v44  ;;  %v5812_v22 = vld [vmem:[#allocation11 + $0x4e0] sm:$0xff]  ;;  %v5813_v32 = vld [vmem:[#allocation11 + $0x4e8] sm:$0xff] }
 0x83d   :  { %v5589_v30 = vmax.f32 %v5587_v26, %v5588_v35  ;;  %v5398_v25 = vcombine.low %v5390_v51, %v5397_v37  ;;  %v8149_v6 = vcombine.high %v5792_v62, %v5796_v55  ;;  %v8148_v17 = vcombine.low %v5792_v62, %v5796_v55  ;;  %v5816_v54 = vld [vmem:[#allocation11 + $0x500] sm:$0xff]  ;;  %v5817_v57 = vld [vmem:[#allocation11 + $0x508] sm:$0xff]  ;;  %v5663_v62 = vld [vmem:[#allocation11 + $0x38] sm:$0xff] }
 0x83e   :  { %v5569_v48 = vrot.slane %v5568_v7, 4  ;;  %v5614_v58 = vmax.f32 %v5612_v14, %v5613_v11  ;;  %v8150_v4 = vcombine.low %v5793_v0, %v5797_v3  ;;  %v8157_v52 = vcombine.high %v5800_v50, %v5804_v28  ;;  %v5820_v59 = vld [vmem:[#allocation11 + $0x520] sm:$0xff]  ;;  %v5821_v35 = vld [vmem:[#allocation11 + $0x528] sm:$0xff] }
 0x83f   :  { %v5590_v16 = vrot.slane %v5589_v30, 4  ;;  %v5405_v53 = vrot.slane %v5398_v25, %v13856_v18  ;;  %v8159_v44 = vcombine.high %v5801_v13, %v5805_v34  ;;  %v14654_v47 = vmov 0   ;;  %v5824_v11 = vld [vmem:[#allocation11 + $0x540] sm:$0xff]  ;;  %v5829_v25 = vld [vmem:[#allocation11 + $0x568] sm:$0xff] }
 0x840   :  { %v5570_v31 = vmax.f32 %v5568_v7, %v5569_v48  ;;  %v5615_v41 = vrot.slane %v5614_v58, 1  ;;  %v8156_v56 = vcombine.low %v5800_v50, %v5804_v28  ;;  %v8158_v9 = vcombine.low %v5801_v13, %v5805_v34  ;;  %v5828_v7 = vld [vmem:[#allocation11 + $0x560] sm:$0xff]  ;;  %v5671_v50 = vld [vmem:[#allocation11 + $0x78] sm:$0xff] }
 0x841   :  { %v5591_v12 = vmax.f32 %v5589_v30, %v5590_v16  ;;  %5408 = vst.msk [vmem:[#allocation2 + $0x1e] ss:$8 sm:$0x7] %vm10961_vm0, %v5405_v53  ;;  %v8165_v14 = vcombine.high %v5808_v5, %v5812_v22  ;;  %v8167_v23 = vcombine.high %v5809_v8, %v5813_v32  ;;  %v8164_v24 = vcombine.low %v5808_v5, %v5812_v22  ;;  %v5825_v30 = vld [vmem:[#allocation11 + $0x548] sm:$0xff]  ;;  %v5675_v5 = vld [vmem:[#allocation11 + $0x98] sm:$0xff] }
 0x842   :  { %v5571_v40 = vrot.slane %v5570_v31, 2  ;;  %v5616_v38 = vmax.f32 %v5614_v58, %v5615_v41  ;;  %v8166_v26 = vcombine.low %v5809_v8, %v5813_v32  ;;  %v8173_v37 = vcombine.high %v5816_v54, %v5820_v59  ;;  %v5679_v22 = vld [vmem:[#allocation11 + $0xb8] sm:$0xff] }
 0x843   :  { %v5592_v49 = vrot.slane %v5591_v12, 2  ;;  %v8175_v51 = vcombine.high %v5817_v57, %v5821_v35  ;;  %v8172_v48 = vcombine.low %v5816_v54, %v5820_v59  ;;  %v8174_v16 = vcombine.low %v5817_v57, %v5821_v35  ;;  %v5683_v54 = vld [vmem:[#allocation11 + $0xd8] sm:$0xff] }
 0x844   :  { %v5572_v1 = vmax.f32 %v5570_v31, %v5571_v40  ;;  %v5634_v39 = vrot.slane %v5616_v38, %v13856_v18  ;;  %v8181_v53 = vcombine.high %v5824_v11, %v5828_v7  ;;  %v8183_v58 = vcombine.high %v5825_v30, %v5829_v25  ;;  %v5832_v31 = vld [vmem:[#allocation11 + $0x580] sm:$0xff]  ;;  %v5833_v40 = vld [vmem:[#allocation11 + $0x588] sm:$0xff]  ;;  %v5687_v59 = vld [vmem:[#allocation11 + $0xf8] sm:$0xff] }
 0x845   :  { %v5593_v19 = vmax.f32 %v5591_v12, %v5592_v49  ;;  %v5836_v12 = vld [vmem:[#allocation11 + $0x5a0] sm:$0xff]  ;;  %v5837_v49 = vld [vmem:[#allocation11 + $0x5a8] sm:$0xff]  ;;  %v8180_v41 = vcombine.low %v5824_v11, %v5828_v7  ;;  %v8034_v35 = vcombine.low %v5675_v5, %v5679_v22  ;;  %v5695_v11 = vld [vmem:[#allocation11 + $0x138] sm:$0xff] }
 0x846   :  { %v5573_v10 = vrot.slane %v5572_v1, 1  ;;  %v5844_v38 = vld [vmem:[#allocation11 + $0x5e0] sm:$0xff] }
 0x847   :  { %v5594_v60 = vrot.slane %v5593_v19, 1 }
 0x848   :  { %v5574_v61 = vmax.f32 %v5572_v1, %v5573_v10  ;;  %v8182_v1 = vcombine.low %v5825_v30, %v5829_v25  ;;  %v8191_v10 = vcombine.high %v5833_v40, %v5837_v49  ;;  %v8042_v30 = vcombine.low %v5683_v54, %v5687_v59 }
 0x849   :  { %v5595_v46 = vmax.f32 %v5593_v19, %v5594_v60  ;;  %v8189_v19 = vcombine.high %v5832_v31, %v5836_v12  ;;  %v5840_v60 = vld [vmem:[#allocation11 + $0x5c0] sm:$0xff] }
 0x84a   :  { %v8196_v55 = vcombine.low %v5840_v60, %v5844_v38 }
 0x84b   :  { %v5620_v63 = vcombine.low %v5574_v61, %v5595_v46  ;;  %v5841_v61 = vld [vmem:[#allocation11 + $0x5c8] sm:$0xff] }
 0x84c   :  { %v5845_v46 = vld [vmem:[#allocation11 + $0x5e8] sm:$0xff] }
 0x84d   :  { %v5627_v45 = vrot.slane %v5620_v63, %v13856_v18  ;;  %v8188_v63 = vcombine.low %v5832_v31, %v5836_v12  ;;  %v8198_v0 = vcombine.low %v5841_v61, %v5845_v46  ;;  %v5703_v31 = vld [vmem:[#allocation11 + $0x178] sm:$0xff] }
 0x84f   :  { %v5635_v29 = vcombine.low %v5627_v45, %v5634_v39  ;;  %v8190_v39 = vcombine.low %v5833_v40, %v5837_v49  ;;  %v8197_v45 = vcombine.high %v5840_v60, %v5844_v38  ;;  %v5711_v60 = vld [vmem:[#allocation11 + $0x1b8] sm:$0xff] }
 0x851   :  { %v5642_v36 = vrot.slane %v5635_v29, %v13856_v18  ;;  %v8199_v29 = vcombine.high %v5841_v61, %v5845_v46 }
 0x853   :  { %5645 = vst.msk [vmem:[#allocation2 + $0x1f] ss:$8 sm:$0x7] %vm10961_vm0, %v5642_v36  ;;  %v5658_v36 = vld [vmem:[#allocation11 + $0x10] sm:$0xff] }
 0x85a   :  { %v5651_v21 = vld [vmem:[#allocation2 + $0x20] sm:$0xff]  ;;  %v5650_v15 = vld [vmem:[#allocation2 + $0x18] sm:$0xff] }
 0x85b   :  { %v12937_v33 = vpack.c.bf16 %v5651_v21, %v5648_v20  ;;  %v12943_v18 = vpack.c.bf16 %v5650_v15, %v5647_v43  ;;  %v5662_v20 = vld [vmem:[#allocation11 + $0x30] sm:$0xff]  ;;  %v5659_v43 = vld [vmem:[#allocation11 + $0x18] sm:$0xff]  ;;  %v5649_v15 = vld [vmem:[#allocation2 + $0x10] sm:$0xff] }
 0x85c   :  { %v8017_v3 = vcombine.high %v5658_v36, %v5662_v20  ;;  %v8019_v21 = vcombine.high %v5659_v43, %v5663_v62  ;;  %v8016_v28 = vcombine.low %v5658_v36, %v5662_v20  ;;  %v8018_v34 = vcombine.low %v5659_v43, %v5663_v62  ;;  %v5719_v36 = vld [vmem:[#allocation11 + $0x1f8] sm:$0xff] }
 0x85d   :  { %6882 = vmatprep.mubr.bf16.mxu0 %v12937_v33  ;;  %6968 = vmatprep.mubr.bf16.mxu1 %v12937_v33 }
 0x85e   :  { %6883 = vmatmul.mubr.bf16.vlgmr.msra.gmra.mrb[112].mxu0 %v12943_v18  ;;  %6969 = vmatmul.mubr.bf16.vlgmr.msra.gmra.mrb[96].mxu1 %v12943_v18 }
 0x85f   :  { %6894 = vmatpush1.bf16.msra.mxu0 %v8140_v27  ;;  %6980 = vmatpush1.bf16.msra.mxu1 %v8142_v2  ;;  %v5652_v27 = vld [vmem:[#allocation2 + $0x28] sm:$0xff]  ;;  %v5666_v2 = vld [vmem:[#allocation11 + $0x50] sm:$0xff] }
 0x860   :  { %6895 = vmatprep.subr.bf16.mxu0 %v8149_v6  ;;  %6981 = vmatprep.subr.bf16.mxu1 %v8151_v42  ;;  %v5670_v6 = vld [vmem:[#allocation11 + $0x70] sm:$0xff]  ;;  %v5667_v42 = vld [vmem:[#allocation11 + $0x58] sm:$0xff]  ;;  %v12951_v13 = vpack.c.bf16 %v5652_v27, %v5649_v15 }
 0x861   :  { %6925 = vmatprep.mubr.bf16.mxu0 %v14654_v47  ;;  %7011 = vmatprep.mubr.bf16.mxu1 %v14654_v47  ;;  %v8024_v8 = vcombine.low %v5666_v2, %v5670_v6  ;;  %v8026_v32 = vcombine.low %v5667_v42, %v5671_v50  ;;  %v5727_v15 = vld [vmem:[#allocation11 + $0x238] sm:$0xff] }
 0x863   :  { %6896 = vmatpush1.bf16.msra.mxu0 %v8148_v17  ;;  %6982 = vmatpush1.bf16.msra.mxu1 %v8150_v4  ;;  %v8025_v17 = vcombine.high %v5666_v2, %v5670_v6  ;;  %v8027_v4 = vcombine.high %v5667_v42, %v5671_v50  ;;  %v5730_v50 = vld [vmem:[#allocation11 + $0x250] sm:$0xff] }
 0x864   :  { %6897 = vmatprep.subr.bf16.mxu0 %v8157_v52  ;;  %6983 = vmatprep.subr.bf16.mxu1 %v8159_v44  ;;  %v5674_v52 = vld [vmem:[#allocation11 + $0x90] sm:$0xff] }
 0x865   :  { %v5678_v44 = vld [vmem:[#allocation11 + $0xb0] sm:$0xff] }
 0x866   :  { %v8032_v57 = vcombine.low %v5674_v52, %v5678_v44 }
 0x867   :  { %6898 = vmatpush1.bf16.msra.mxu0 %v8156_v56  ;;  %6984 = vmatpush1.bf16.msra.mxu1 %v8158_v9  ;;  %v8033_v56 = vcombine.high %v5674_v52, %v5678_v44  ;;  %v8035_v9 = vcombine.high %v5675_v5, %v5679_v22  ;;  %v5738_v22 = vld [vmem:[#allocation11 + $0x290] sm:$0xff] }
 0x868   :  { %6899 = vmatprep.subr.bf16.mxu0 %v8165_v14  ;;  %6985 = vmatprep.subr.bf16.mxu1 %v8167_v23  ;;  %v5682_v14 = vld [vmem:[#allocation11 + $0xd0] sm:$0xff] }
 0x869   :  { %v5686_v23 = vld [vmem:[#allocation11 + $0xf0] sm:$0xff] }
 0x86a   :  { %v8040_v7 = vcombine.low %v5682_v14, %v5686_v23 }
 0x86b   :  { %6900 = vmatpush1.bf16.msra.mxu0 %v8164_v24  ;;  %6986 = vmatpush1.bf16.msra.mxu1 %v8166_v26  ;;  %v8041_v24 = vcombine.high %v5682_v14, %v5686_v23  ;;  %v8043_v26 = vcombine.high %v5683_v54, %v5687_v59  ;;  %v5746_v59 = vld [vmem:[#allocation11 + $0x2d0] sm:$0xff] }
 0x86c   :  { %6901 = vmatprep.subr.bf16.mxu0 %v8173_v37  ;;  %6987 = vmatprep.subr.bf16.mxu1 %v8175_v51  ;;  %v5690_v37 = vld [vmem:[#allocation11 + $0x110] sm:$0xff] }
 0x86d   :  { %v5694_v51 = vld [vmem:[#allocation11 + $0x130] sm:$0xff] }
 0x86e   :  { %v8049_v25 = vcombine.high %v5690_v37, %v5694_v51  ;;  %v8048_v12 = vcombine.low %v5690_v37, %v5694_v51 }
 0x86f   :  { %6902 = vmatpush1.bf16.msra.mxu0 %v8172_v48  ;;  %6988 = vmatpush1.bf16.msra.mxu1 %v8174_v16  ;;  %v5698_v16 = vld [vmem:[#allocation11 + $0x150] sm:$0xff] }
 0x870   :  { %6903 = vmatprep.subr.bf16.mxu0 %v8181_v53  ;;  %6989 = vmatprep.subr.bf16.mxu1 %v8183_v58  ;;  %v5702_v53 = vld [vmem:[#allocation11 + $0x170] sm:$0xff]  ;;  %v5699_v58 = vld [vmem:[#allocation11 + $0x158] sm:$0xff] }
 0x871   :  { %v8057_v49 = vcombine.high %v5698_v16, %v5702_v53  ;;  %v8056_v38 = vcombine.low %v5698_v16, %v5702_v53  ;;  %v8058_v61 = vcombine.low %v5699_v58, %v5703_v31 }
 0x873   :  { %6904 = vmatpush1.bf16.msra.mxu0 %v8180_v41  ;;  %6990 = vmatpush1.bf16.msra.mxu1 %v8182_v1  ;;  %v8059_v41 = vcombine.high %v5699_v58, %v5703_v31  ;;  %v5706_v1 = vld [vmem:[#allocation11 + $0x190] sm:$0xff] }
 0x874   :  { %6905 = vmatprep.subr.bf16.mxu0 %v8189_v19  ;;  %6991 = vmatprep.subr.bf16.mxu1 %v8191_v10  ;;  %v5710_v19 = vld [vmem:[#allocation11 + $0x1b0] sm:$0xff]  ;;  %v5707_v10 = vld [vmem:[#allocation11 + $0x198] sm:$0xff] }
 0x875   :  { %v8065_v46 = vcombine.high %v5706_v1, %v5710_v19  ;;  %v8064_v20 = vcombine.low %v5706_v1, %v5710_v19  ;;  %v8066_v43 = vcombine.low %v5707_v10, %v5711_v60  ;;  %v5762_v31 = vld [vmem:[#allocation11 + $0x350] sm:$0xff] }
 0x877   :  { %6906 = vmatpush1.bf16.msra.mxu0 %v8188_v63  ;;  %6992 = vmatpush1.bf16.msra.mxu1 %v8190_v39  ;;  %v8067_v63 = vcombine.high %v5707_v10, %v5711_v60  ;;  %v5714_v39 = vld [vmem:[#allocation11 + $0x1d0] sm:$0xff] }
 0x878   :  { %6907 = vmatprep.subr.bf16.mxu0 %v8197_v45  ;;  %6993 = vmatprep.subr.bf16.mxu1 %v8199_v29  ;;  %v5718_v45 = vld [vmem:[#allocation11 + $0x1f0] sm:$0xff]  ;;  %v5715_v29 = vld [vmem:[#allocation11 + $0x1d8] sm:$0xff] }
 0x879   :  { %v8073_v62 = vcombine.high %v5714_v39, %v5718_v45  ;;  %v8072_v27 = vcombine.low %v5714_v39, %v5718_v45  ;;  %v8074_v2 = vcombine.low %v5715_v29, %v5719_v36  ;;  %v5770_v60 = vld [vmem:[#allocation11 + $0x390] sm:$0xff] }
 0x87b   :  { %6908 = vmatpush1.bf16.msra.mxu0 %v8196_v55  ;;  %6994 = vmatpush1.bf16.msra.mxu1 %v8198_v0  ;;  %v8075_v55 = vcombine.high %v5715_v29, %v5719_v36  ;;  %v5722_v0 = vld [vmem:[#allocation11 + $0x210] sm:$0xff] }
 0x87c   :  { %7022 = vmatprep.subr.bf16.mxu0 %v8017_v3  ;;  %7108 = vmatprep.subr.bf16.mxu1 %v8019_v21  ;;  %v5726_v3 = vld [vmem:[#allocation11 + $0x230] sm:$0xff]  ;;  %v5723_v21 = vld [vmem:[#allocation11 + $0x218] sm:$0xff] }
 0x87d   :  { %v8081_v6 = vcombine.high %v5722_v0, %v5726_v3  ;;  %v8083_v42 = vcombine.high %v5723_v21, %v5727_v15  ;;  %v8082_v52 = vcombine.low %v5723_v21, %v5727_v15  ;;  %v5778_v36 = vld [vmem:[#allocation11 + $0x3d0] sm:$0xff] }
 0x87e   :  { %6926 = vmatmul.mubr.bf16.vlgmr.msra.gmra.mrb[112].mxu0 %v12951_v13  ;;  %7012 = vmatmul.mubr.bf16.vlgmr.msra.gmra.mrb[96].mxu1 %v12951_v13  ;;  %v5786_v15 = vld [vmem:[#allocation11 + $0x410] sm:$0xff] }
 0x87f   :  { %7023 = vmatpush1.bf16.msra.mxu0 %v8016_v28  ;;  %7054 = vmatprep.mubr.bf16.mxu0 %v12937_v33  ;;  %v5734_v28 = vld [vmem:[#allocation11 + $0x270] sm:$0xff] }
 0x880   :  { %7109 = vmatpush1.bf16.msra.mxu1 %v8018_v34  ;;  %7140 = vmatprep.mubr.bf16.mxu1 %v12937_v33  ;;  %v5691_v33 = vld [vmem:[#allocation11 + $0x118] sm:$0xff]  ;;  %v8089_v44 = vcombine.high %v5730_v50, %v5734_v28 }
 0x881   :  { %7024 = vmatprep.subr.bf16.mxu0 %v8025_v17  ;;  %7110 = vmatprep.subr.bf16.mxu1 %v8027_v4  ;;  %v8051_v48 = vcombine.high %v5691_v33, %v5695_v11  ;;  %v8050_v40 = vcombine.low %v5691_v33, %v5695_v11  ;;  %v5731_v34 = vld [vmem:[#allocation11 + $0x258] sm:$0xff]  ;;  %v8080_v4 = vcombine.low %v5722_v0, %v5726_v3  ;;  %v5754_v11 = vld [vmem:[#allocation11 + $0x310] sm:$0xff] }
 0x882   :  { %v5735_v17 = vld [vmem:[#allocation11 + $0x278] sm:$0xff] }
 0x883   :  { %7025 = vmatpush1.bf16.msra.mxu0 %v8024_v8  ;;  %v8091_v5 = vcombine.high %v5731_v34, %v5735_v17  ;;  %v5742_v8 = vld [vmem:[#allocation11 + $0x2b0] sm:$0xff]  ;;  %v8090_v14 = vcombine.low %v5731_v34, %v5735_v17 }
 0x884   :  { %7111 = vmatpush1.bf16.msra.mxu1 %v8026_v32  ;;  %7026 = vmatprep.subr.bf16.mxu0 %v8033_v56  ;;  %v5739_v32 = vld [vmem:[#allocation11 + $0x298] sm:$0xff]  ;;  %v8097_v23 = vcombine.high %v5738_v22, %v5742_v8  ;;  %v5794_v17 = vld [vmem:[#allocation11 + $0x450] sm:$0xff] }
 0x885   :  { %7112 = vmatprep.subr.bf16.mxu1 %v8035_v9  ;;  %v5743_v56 = vld [vmem:[#allocation11 + $0x2b8] sm:$0xff]  ;;  %v8088_v9 = vcombine.low %v5730_v50, %v5734_v28 }
 0x886   :  { %v8099_v54 = vcombine.high %v5739_v32, %v5743_v56  ;;  %v8098_v37 = vcombine.low %v5739_v32, %v5743_v56  ;;  %v5802_v56 = vld [vmem:[#allocation11 + $0x490] sm:$0xff] }
 0x887   :  { %7027 = vmatpush1.bf16.msra.mxu0 %v8032_v57  ;;  %v5750_v57 = vld [vmem:[#allocation11 + $0x2f0] sm:$0xff] }
 0x888   :  { %7113 = vmatpush1.bf16.msra.mxu1 %v8034_v35  ;;  %7028 = vmatprep.subr.bf16.mxu0 %v8041_v24  ;;  %v5747_v35 = vld [vmem:[#allocation11 + $0x2d8] sm:$0xff]  ;;  %v8105_v51 = vcombine.high %v5746_v59, %v5750_v57 }
 0x889   :  { %7114 = vmatprep.subr.bf16.mxu1 %v8043_v26  ;;  %v5751_v24 = vld [vmem:[#allocation11 + $0x2f8] sm:$0xff]  ;;  %v8096_v26 = vcombine.low %v5738_v22, %v5742_v8 }
 0x88a   :  { %v8107_v33 = vcombine.high %v5747_v35, %v5751_v24  ;;  %v8106_v16 = vcombine.low %v5747_v35, %v5751_v24  ;;  %v5810_v24 = vld [vmem:[#allocation11 + $0x4d0] sm:$0xff] }
 0x88b   :  { %7029 = vmatpush1.bf16.msra.mxu0 %v8040_v7  ;;  %v5758_v7 = vld [vmem:[#allocation11 + $0x330] sm:$0xff] }
 0x88c   :  { %7115 = vmatpush1.bf16.msra.mxu1 %v8042_v30  ;;  %7030 = vmatprep.subr.bf16.mxu0 %v8049_v25  ;;  %v5755_v30 = vld [vmem:[#allocation11 + $0x318] sm:$0xff]  ;;  %v8113_v53 = vcombine.high %v5754_v11, %v5758_v7 }
 0x88d   :  { %7116 = vmatprep.subr.bf16.mxu1 %v8051_v48  ;;  %v5759_v25 = vld [vmem:[#allocation11 + $0x338] sm:$0xff]  ;;  %v8104_v48 = vcombine.low %v5746_v59, %v5750_v57 }
 0x88e   :  { %v8115_v58 = vcombine.high %v5755_v30, %v5759_v25  ;;  %v8114_v1 = vcombine.low %v5755_v30, %v5759_v25  ;;  %v5818_v30 = vld [vmem:[#allocation11 + $0x510] sm:$0xff] }
 0x88f   :  { %7031 = vmatpush1.bf16.msra.mxu0 %v8048_v12  ;;  %v5766_v12 = vld [vmem:[#allocation11 + $0x370] sm:$0xff] }
 0x890   :  { %7117 = vmatpush1.bf16.msra.mxu1 %v8050_v40  ;;  %7032 = vmatprep.subr.bf16.mxu0 %v8057_v49  ;;  %v5763_v40 = vld [vmem:[#allocation11 + $0x358] sm:$0xff]  ;;  %v8121_v19 = vcombine.high %v5762_v31, %v5766_v12  ;;  %v5822_v25 = vld [vmem:[#allocation11 + $0x530] sm:$0xff] }
 0x891   :  { %7118 = vmatprep.subr.bf16.mxu1 %v8059_v41  ;;  %v5767_v49 = vld [vmem:[#allocation11 + $0x378] sm:$0xff]  ;;  %v8112_v41 = vcombine.low %v5754_v11, %v5758_v7 }
 0x892   :  { %v8123_v10 = vcombine.high %v5763_v40, %v5767_v49  ;;  %v8122_v39 = vcombine.low %v5763_v40, %v5767_v49  ;;  %v5830_v40 = vld [vmem:[#allocation11 + $0x570] sm:$0xff]  ;;  %v5827_v49 = vld [vmem:[#allocation11 + $0x558] sm:$0xff] }
 0x893   :  { %7033 = vmatpush1.bf16.msra.mxu0 %v8056_v38  ;;  %v5774_v38 = vld [vmem:[#allocation11 + $0x3b0] sm:$0xff] }
 0x894   :  { %7119 = vmatpush1.bf16.msra.mxu1 %v8058_v61  ;;  %7034 = vmatprep.subr.bf16.mxu0 %v8065_v46  ;;  %v5771_v61 = vld [vmem:[#allocation11 + $0x398] sm:$0xff]  ;;  %v8129_v45 = vcombine.high %v5770_v60, %v5774_v38 }
 0x895   :  { %7120 = vmatprep.subr.bf16.mxu1 %v8067_v63  ;;  %v5775_v46 = vld [vmem:[#allocation11 + $0x3b8] sm:$0xff]  ;;  %v8120_v63 = vcombine.low %v5762_v31, %v5766_v12  ;;  %v8177_v31 = vcombine.high %v5818_v30, %v5822_v25  ;;  %v5826_v12 = vld [vmem:[#allocation11 + $0x550] sm:$0xff] }
 0x896   :  { %v8131_v29 = vcombine.high %v5771_v61, %v5775_v46  ;;  %v8130_v0 = vcombine.low %v5771_v61, %v5775_v46  ;;  %v5838_v61 = vld [vmem:[#allocation11 + $0x5b0] sm:$0xff]  ;;  %v5835_v46 = vld [vmem:[#allocation11 + $0x598] sm:$0xff] }
 0x897   :  { %7035 = vmatpush1.bf16.msra.mxu0 %v8064_v20  ;;  %v5782_v20 = vld [vmem:[#allocation11 + $0x3f0] sm:$0xff] }
 0x898   :  { %7121 = vmatpush1.bf16.msra.mxu1 %v8066_v43  ;;  %7036 = vmatprep.subr.bf16.mxu0 %v8073_v62  ;;  %v5779_v43 = vld [vmem:[#allocation11 + $0x3d8] sm:$0xff]  ;;  %v8137_v3 = vcombine.high %v5778_v36, %v5782_v20 }
 0x899   :  { %7122 = vmatprep.subr.bf16.mxu1 %v8075_v55  ;;  %v5783_v62 = vld [vmem:[#allocation11 + $0x3f8] sm:$0xff]  ;;  %v8128_v55 = vcombine.low %v5770_v60, %v5774_v38  ;;  %v5834_v38 = vld [vmem:[#allocation11 + $0x590] sm:$0xff] }
 0x89a   :  { %v8139_v21 = vcombine.high %v5779_v43, %v5783_v62  ;;  %v8138_v50 = vcombine.low %v5779_v43, %v5783_v62  ;;  %v5846_v43 = vld [vmem:[#allocation11 + $0x5f0] sm:$0xff]  ;;  %v5843_v62 = vld [vmem:[#allocation11 + $0x5d8] sm:$0xff] }
 0x89b   :  { %7037 = vmatpush1.bf16.msra.mxu0 %v8072_v27  ;;  %v5790_v27 = vld [vmem:[#allocation11 + $0x430] sm:$0xff] }
 0x89c   :  { %7123 = vmatpush1.bf16.msra.mxu1 %v8074_v2  ;;  %7038 = vmatprep.subr.bf16.mxu0 %v8081_v6  ;;  %v5787_v2 = vld [vmem:[#allocation11 + $0x418] sm:$0xff]  ;;  %v8145_v28 = vcombine.high %v5786_v15, %v5790_v27 }
 0x89d   :  { %7124 = vmatprep.subr.bf16.mxu1 %v8083_v42  ;;  %v5791_v6 = vld [vmem:[#allocation11 + $0x438] sm:$0xff]  ;;  %v8136_v42 = vcombine.low %v5778_v36, %v5782_v20  ;;  %v5842_v20 = vld [vmem:[#allocation11 + $0x5d0] sm:$0xff] }
 0x89e   :  { %v8147_v34 = vcombine.high %v5787_v2, %v5791_v6  ;;  %v8146_v22 = vcombine.low %v5787_v2, %v5791_v6  ;;  %v8838_v6 = vld [vmem:[#allocation12 + $0x40] sm:$0xff]  }
 0x89f   :  { %7039 = vmatpush1.bf16.msra.mxu0 %v8080_v4  ;;  %v5798_v4 = vld [vmem:[#allocation11 + $0x470] sm:$0xff] }
 0x8a0   :  { %7125 = vmatpush1.bf16.msra.mxu1 %v8082_v52  ;;  %7040 = vmatprep.subr.bf16.mxu0 %v8089_v44  ;;  %v5795_v52 = vld [vmem:[#allocation11 + $0x458] sm:$0xff]  ;;  %v8153_v8 = vcombine.high %v5794_v17, %v5798_v4 }
 0x8a1   :  { %7126 = vmatprep.subr.bf16.mxu1 %v8091_v5  ;;  %v5799_v44 = vld [vmem:[#allocation11 + $0x478] sm:$0xff]  ;;  %v8144_v5 = vcombine.low %v5786_v15, %v5790_v27  ;;  %v8200_v27 = vcombine.low %v5842_v20, %v5846_v43 }
 0x8a2   :  { %v8155_v32 = vcombine.high %v5795_v52, %v5799_v44  ;;  %v8154_v59 = vcombine.low %v5795_v52, %v5799_v44  ;;  %v8845_v52 = vld [vmem:[#allocation12 + $0x88] sm:$0xff]   ;;  %v8846_v44 = vld [vmem:[#allocation12 + $0x50] sm:$0xff]  }
 0x8a3   :  { %7041 = vmatpush1.bf16.msra.mxu0 %v8088_v9  ;;  %v5806_v9 = vld [vmem:[#allocation11 + $0x4b0] sm:$0xff] }
 0x8a4   :  { %7127 = vmatpush1.bf16.msra.mxu1 %v8090_v14  ;;  %7042 = vmatprep.subr.bf16.mxu0 %v8097_v23  ;;  %v5803_v14 = vld [vmem:[#allocation11 + $0x498] sm:$0xff]  ;;  %v8161_v57 = vcombine.high %v5802_v56, %v5806_v9 }
 0x8a5   :  { %7128 = vmatprep.subr.bf16.mxu1 %v8099_v54  ;;  %v5807_v23 = vld [vmem:[#allocation11 + $0x4b8] sm:$0xff]  ;;  %v8152_v54 = vcombine.low %v5794_v17, %v5798_v4  ;;  %v8843_v17 = vld [vmem:[#allocation12 + $0xc8] sm:$0xff]  }
 0x8a6   :  { %v8163_v35 = vcombine.high %v5803_v14, %v5807_v23  ;;  %v8844_v4 = vld [vmem:[#allocation12 + $0x8] sm:$0xff]  }
 0x8a7   :  { %7043 = vmatpush1.bf16.msra.mxu0 %v8096_v26  ;;  %v5814_v26 = vld [vmem:[#allocation11 + $0x4f0] sm:$0xff] }
 0x8a8   :  { %7129 = vmatpush1.bf16.msra.mxu1 %v8098_v37  ;;  %7044 = vmatprep.subr.bf16.mxu0 %v8105_v51  ;;  %v5811_v37 = vld [vmem:[#allocation11 + $0x4d8] sm:$0xff]  ;;  %v8169_v11 = vcombine.high %v5810_v24, %v5814_v26 }
 0x8a9   :  { %7130 = vmatprep.subr.bf16.mxu1 %v8107_v33  ;;  %v5815_v51 = vld [vmem:[#allocation11 + $0x4f8] sm:$0xff]  ;;  %v8160_v33 = vcombine.low %v5802_v56, %v5806_v9 }
 0x8aa   :  { %v8171_v7 = vcombine.high %v5811_v37, %v5815_v51  ;;  %v8851_v56 = vld [vmem:[#allocation12 + $0xd8] sm:$0xff]  }
 0x8ab   :  { %7045 = vmatpush1.bf16.msra.mxu0 %v8104_v48  ;;  %v5819_v48 = vld [vmem:[#allocation11 + $0x518] sm:$0xff] }
 0x8ac   :  { %7131 = vmatpush1.bf16.msra.mxu1 %v8106_v16  ;;  %7046 = vmatprep.subr.bf16.mxu0 %v8113_v53  ;;  %v5823_v16 = vld [vmem:[#allocation11 + $0x538] sm:$0xff]  ;;  %v8168_v53 = vcombine.low %v5810_v24, %v5814_v26  ;;  %v8860_v24 = vld [vmem:[#allocation12 + $0x28] sm:$0xff]  }
 0x8ad   :  { %7132 = vmatprep.subr.bf16.mxu1 %v8115_v58  ;;  %v8170_v58 = vcombine.low %v5811_v37, %v5815_v51  ;;  %v8852_v9 = vld [vmem:[#allocation12 + $0x18] sm:$0xff]   ;;  %v8861_v26 = vld [vmem:[#allocation12 + $0xa8] sm:$0xff]   ;;  %v8862_v37 = vld [vmem:[#allocation12 + $0x70] sm:$0xff]  }
 0x8ae   :  { %v8863_v51 = vld [vmem:[#allocation12 + $0xf0] sm:$0xff]  }
 0x8af   :  { %7047 = vmatpush1.bf16.msra.mxu0 %v8112_v41  ;;  %v5831_v41 = vld [vmem:[#allocation11 + $0x578] sm:$0xff] }
 0x8b0   :  { %7133 = vmatpush1.bf16.msra.mxu1 %v8114_v1  ;;  %7048 = vmatprep.subr.bf16.mxu0 %v8121_v19  ;;  %v8176_v1 = vcombine.low %v5818_v30, %v5822_v25  ;;  %v8178_v19 = vcombine.low %v5819_v48, %v5823_v16  ;;  %v8187_v60 = vcombine.high %v5827_v49, %v5831_v41  ;;  %v8868_v30 = vld [vmem:[#allocation12 + $0x38] sm:$0xff]  }
 0x8b1   :  { %7134 = vmatprep.subr.bf16.mxu1 %v8123_v10  ;;  %v8185_v10 = vcombine.high %v5826_v12, %v5830_v40  ;;  %v8869_v25 = vld [vmem:[#allocation12 + $0xb8] sm:$0xff]  }
 0x8b3   :  { %7049 = vmatpush1.bf16.msra.mxu0 %v8120_v63  ;;  %v5839_v63 = vld [vmem:[#allocation11 + $0x5b8] sm:$0xff] }
 0x8b4   :  { %7135 = vmatpush1.bf16.msra.mxu1 %v8122_v39  ;;  %7050 = vmatprep.subr.bf16.mxu0 %v8129_v45  ;;  %v8184_v39 = vcombine.low %v5826_v12, %v5830_v40  ;;  %v8186_v45 = vcombine.low %v5827_v49, %v5831_v41  ;;  %v8195_v36 = vcombine.high %v5835_v46, %v5839_v63  ;;  %v14658_v41 = vld [vmem:[#allocation89_spill] sm:$0xff] }
 0x8b5   :  { %7136 = vmatprep.subr.bf16.mxu1 %v8131_v29  ;;  %v8193_v29 = vcombine.high %v5834_v38, %v5838_v61 }
 0x8b7   :  { %7051 = vmatpush1.bf16.msra.mxu0 %v8128_v55  ;;  %v5847_v55 = vld [vmem:[#allocation11 + $0x5f8] sm:$0xff] }
 0x8b8   :  { %7137 = vmatpush1.bf16.msra.mxu1 %v8130_v0  ;;  %7052 = vmatprep.subr.bf16.mxu0 %v8137_v3  ;;  %v8192_v0 = vcombine.low %v5834_v38, %v5838_v61  ;;  %v8194_v3 = vcombine.low %v5835_v46, %v5839_v63  ;;  %v8203_v15 = vcombine.high %v5843_v62, %v5847_v55 }
 0x8b9   :  { %7138 = vmatprep.subr.bf16.mxu1 %v8139_v21  ;;  %v8201_v21 = vcombine.high %v5842_v20, %v5846_v43  ;;  %v8202_v2 = vcombine.low %v5843_v62, %v5847_v55 }
 0x8bb   :  { %7053 = vmatpush1.bf16.msra.mxu0 %v8136_v42  ;;  %v8839_v42 = vld [vmem:[#allocation12 + $0xc0] sm:$0xff]  }
 0x8bc   :  { %7139 = vmatpush1.bf16.msra.mxu1 %v8138_v50  ;;  %7065 = vmatprep.subr.bf16.mxu0 %v8145_v28  ;;  %v8840_v50 = vld [vmem:[#allocation12] sm:$0xff]  }
 0x8bd   :  { %7151 = vmatprep.subr.bf16.mxu1 %v8147_v34  ;;  %v8841_v28 = vld [vmem:[#allocation12 + $0x80] sm:$0xff]   ;;  %v8842_v34 = vld [vmem:[#allocation12 + $0x48] sm:$0xff]  }
 0x8be   :  { %7055 = vmatmul.mubr.bf16.vlgmr.msra.gmra.mrb[116].mxu0 %v12943_v18 }
 0x8bf   :  { %7141 = vmatmul.mubr.bf16.vlgmr.msra.gmra.mrb[100].mxu1 %v12943_v18  ;;  %7066 = vmatpush1.bf16.msra.mxu0 %v8144_v5  ;;  %v8162_v18 = vcombine.low %v5803_v14, %v5807_v23  ;;  %v8847_v5 = vld [vmem:[#allocation12 + $0xd0] sm:$0xff]   ;;  %v8854_v14 = vld [vmem:[#allocation12 + $0x60] sm:$0xff]  }
 0x8c0   :  { %7152 = vmatpush1.bf16.msra.mxu1 %v8146_v22  ;;  %7067 = vmatprep.subr.bf16.mxu0 %v8153_v8  ;;  %v8848_v22 = vld [vmem:[#allocation12 + $0x10] sm:$0xff]   ;;  %v8855_v23 = vld [vmem:[#allocation12 + $0xe0] sm:$0xff]  }
 0x8c1   :  { %7153 = vmatprep.subr.bf16.mxu1 %v8155_v32  ;;  %7097 = vmatprep.mubr.bf16.mxu0 %v14654_v47  ;;  %v8849_v8 = vld [vmem:[#allocation12 + $0x90] sm:$0xff]   ;;  %v8850_v32 = vld [vmem:[#allocation12 + $0x58] sm:$0xff]  }
 0x8c2   :  { %7183 = vmatprep.mubr.bf16.mxu1 %v14654_v47  ;;  %v8179_v47 = vcombine.high %v5819_v48, %v5823_v16  ;;  %v8870_v48 = vld [vmem:[#allocation12 + $0x140] sm:$0xff]  }
 0x8c3   :  { %7068 = vmatpush1.bf16.msra.mxu0 %v8152_v54  ;;  %v8856_v54 = vld [vmem:[#allocation12 + $0x20] sm:$0xff]  }
 0x8c4   :  { %7154 = vmatpush1.bf16.msra.mxu1 %v8154_v59  ;;  %7069 = vmatprep.subr.bf16.mxu0 %v8161_v57  ;;  %v8857_v59 = vld [vmem:[#allocation12 + $0xa0] sm:$0xff]   ;;  %v8858_v57 = vld [vmem:[#allocation12 + $0x68] sm:$0xff]  }
 0x8c5   :  { %7155 = vmatprep.subr.bf16.mxu1 %v8163_v35  ;;  %v8859_v35 = vld [vmem:[#allocation12 + $0xe8] sm:$0xff]   ;;  %v8871_v16 = vld [vmem:[#allocation12 + $0x1c0] sm:$0xff]  }
 0x8c7   :  { %7070 = vmatpush1.bf16.msra.mxu0 %v8160_v33  ;;  %v8864_v33 = vld [vmem:[#allocation12 + $0x30] sm:$0xff]  }
 0x8c8   :  { %7156 = vmatpush1.bf16.msra.mxu1 %v8162_v18  ;;  %7071 = vmatprep.subr.bf16.mxu0 %v8169_v11  ;;  %v8865_v18 = vld [vmem:[#allocation12 + $0xb0] sm:$0xff]   ;;  %v8866_v11 = vld [vmem:[#allocation12 + $0x78] sm:$0xff]  }
 0x8c9   :  { %7157 = vmatprep.subr.bf16.mxu1 %v8171_v7  ;;  %v8867_v7 = vld [vmem:[#allocation12 + $0xf8] sm:$0xff]  }
 0x8cb   :  { %7072 = vmatpush1.bf16.msra.mxu0 %v8168_v53  ;;  %v12966_v53 = vld [vmem:[%s13010_s10] sm:$0xff] }
 0x8cc   :  { %7158 = vmatpush1.bf16.msra.mxu1 %v8170_v58  ;;  %7073 = vmatprep.subr.bf16.mxu0 %v8177_v31  ;;  %v14655_v58 = vld [vmem:[#allocation85_spill] sm:$0xff] }
 0x8cd   :  { %7159 = vmatprep.subr.bf16.mxu1 %v8179_v47  ;;  %v5864_v31 = vsub.s32 3, %v14655_v58  ;;  %v14656_v47 = vld [vmem:[#allocation88_spill] sm:$0xff]  ;;  %v14657_v40 = vsub.s32 2, %v14655_v58 }
 0x8ce   :  { %v5853_v12 = vrot.slane %v12966_v53, %v14656_v47  ;;  %v8899_v47 = vld [vmem:[#allocation12 + $0x1f8] sm:$0xff]  }
 0x8cf   :  { %7074 = vmatpush1.bf16.msra.mxu0 %v8176_v1  ;;  %v5861_v49 = vrot.slane %v12966_v53, %v14657_v40  ;;  %v5857_v1 = vrot.slane %v12966_v53, %v14658_v41  ;;  %v8901_v40 = vld [vmem:[#allocation12 + $0x1b8] sm:$0xff]   ;;  %v5876_v41 = vsub.s32 6, %v14655_v58 }
 0x8d0   :  { %7160 = vmatpush1.bf16.msra.mxu1 %v8178_v19  ;;  %7075 = vmatprep.subr.bf16.mxu0 %v8185_v10  ;;  %v5865_v19 = vrot.slane %v12966_v53, %v5864_v31  ;;  %v8898_v31 = vld [vmem:[#allocation12 + $0x178] sm:$0xff]  }
 0x8d1   :  { %7161 = vmatprep.subr.bf16.mxu1 %v8187_v60 }
 0x8d3   :  { %7076 = vmatpush1.bf16.msra.mxu0 %v8184_v39 }
 0x8d4   :  { %7162 = vmatpush1.bf16.msra.mxu1 %v8186_v45  ;;  %7077 = vmatprep.subr.bf16.mxu0 %v8193_v29 }
 0x8d5   :  { %7163 = vmatprep.subr.bf16.mxu1 %v8195_v36 }
 0x8d7   :  { %7078 = vmatpush1.bf16.msra.mxu0 %v8192_v0 }
 0x8d8   :  { %7164 = vmatpush1.bf16.msra.mxu1 %v8194_v3  ;;  %7079 = vmatprep.subr.bf16.mxu0 %v8201_v21 }
 0x8d9   :  { %7165 = vmatprep.subr.bf16.mxu1 %v8203_v15 }
 0x8db   :  { %7080 = vmatpush1.bf16.msra.mxu0 %v8200_v27 }
 0x8dc   :  { %7166 = vmatpush1.bf16.msra.mxu1 %v8202_v2  ;;  %8381 = vmatprep.subr.bf16.mxu0 %v8838_v6 }
 0x8dd   :  { %8403 = vmatprep.subr.bf16.mxu1 %v8839_v42 }
 0x8de   :  { %7098 = vmatmul.mubr.bf16.vlgmr.msra.gmra.mrb[116].mxu0 %v12951_v13 }
 0x8df   :  { %7184 = vmatmul.mubr.bf16.vlgmr.msra.gmra.mrb[100].mxu1 %v12951_v13  ;;  %8382 = vmatpush3.bf16.msra.mxu0 %v8840_v50  ;;  %v8853_v13 = vld [vmem:[#allocation12 + $0x98] sm:$0xff]  }
 0x8e0   :  { %8404 = vmatpush3.bf16.msra.mxu1 %v8841_v28  ;;  %8383 = vmatprep.subr.bf16.mxu0 %v8842_v34 }
 0x8e1   :  { %8405 = vmatprep.subr.bf16.mxu1 %v8843_v17 }
 0x8e3   :  { %8384 = vmatpush3.bf16.msra.mxu0 %v8844_v4 }
 0x8e4   :  { %8406 = vmatpush3.bf16.msra.mxu1 %v8845_v52  ;;  %8385 = vmatprep.subr.bf16.mxu0 %v8846_v44  ;;  %v8872_v44 = vld [vmem:[#allocation12 + $0x100] sm:$0xff]  }
 0x8e5   :  { %8407 = vmatprep.subr.bf16.mxu1 %v8847_v5  ;;  %v8873_v5 = vld [vmem:[#allocation12 + $0x180] sm:$0xff]  }
 0x8e7   :  { %8386 = vmatpush3.bf16.msra.mxu0 %v8848_v22  ;;  %v8874_v22 = vld [vmem:[#allocation12 + $0x148] sm:$0xff]  }
 0x8e8   :  { %8408 = vmatpush3.bf16.msra.mxu1 %v8849_v8  ;;  %8387 = vmatprep.subr.bf16.mxu0 %v8850_v32  ;;  %v8875_v8 = vld [vmem:[#allocation12 + $0x1c8] sm:$0xff]  }
 0x8e9   :  { %8409 = vmatprep.subr.bf16.mxu1 %v8851_v56  ;;  %v8876_v32 = vld [vmem:[#allocation12 + $0x108] sm:$0xff]  }
 0x8ea   :  { %v8877_v56 = vld [vmem:[#allocation12 + $0x188] sm:$0xff]  }
 0x8eb   :  { %8388 = vmatpush3.bf16.msra.mxu0 %v8852_v9  ;;  %v8878_v9 = vld [vmem:[#allocation12 + $0x150] sm:$0xff]  }
 0x8ec   :  { %8410 = vmatpush3.bf16.msra.mxu1 %v8853_v13  ;;  %8389 = vmatprep.subr.bf16.mxu0 %v8854_v14  ;;  %v8879_v13 = vld [vmem:[#allocation12 + $0x1d0] sm:$0xff]  }
 0x8ed   :  { %8411 = vmatprep.subr.bf16.mxu1 %v8855_v23  ;;  %v8880_v14 = vld [vmem:[#allocation12 + $0x110] sm:$0xff]  }
 0x8ee   :  { %v8881_v23 = vld [vmem:[#allocation12 + $0x190] sm:$0xff]  }
 0x8ef   :  { %8390 = vmatpush3.bf16.msra.mxu0 %v8856_v54  ;;  %v8882_v54 = vld [vmem:[#allocation12 + $0x158] sm:$0xff]  }
 0x8f0   :  { %8412 = vmatpush3.bf16.msra.mxu1 %v8857_v59  ;;  %8391 = vmatprep.subr.bf16.mxu0 %v8858_v57  ;;  %v8883_v59 = vld [vmem:[#allocation12 + $0x1d8] sm:$0xff]  }
 0x8f1   :  { %8413 = vmatprep.subr.bf16.mxu1 %v8859_v35  ;;  %v8884_v57 = vld [vmem:[#allocation12 + $0x118] sm:$0xff]  }
 0x8f2   :  { %v8885_v35 = vld [vmem:[#allocation12 + $0x198] sm:$0xff]  }
 0x8f3   :  { %8392 = vmatpush3.bf16.msra.mxu0 %v8860_v24  ;;  %v8886_v24 = vld [vmem:[#allocation12 + $0x160] sm:$0xff]  }
 0x8f4   :  { %8414 = vmatpush3.bf16.msra.mxu1 %v8861_v26  ;;  %8393 = vmatprep.subr.bf16.mxu0 %v8862_v37  ;;  %v8887_v26 = vld [vmem:[#allocation12 + $0x1e0] sm:$0xff]  }
 0x8f5   :  { %8415 = vmatprep.subr.bf16.mxu1 %v8863_v51  ;;  %v8888_v37 = vld [vmem:[#allocation12 + $0x120] sm:$0xff]  }
 0x8f6   :  { %v8889_v51 = vld [vmem:[#allocation12 + $0x1a0] sm:$0xff]  }
 0x8f7   :  { %8394 = vmatpush3.bf16.msra.mxu0 %v8864_v33  ;;  %v8890_v33 = vld [vmem:[#allocation12 + $0x168] sm:$0xff]  }
 0x8f8   :  { %8416 = vmatpush3.bf16.msra.mxu1 %v8865_v18  ;;  %8395 = vmatprep.subr.bf16.mxu0 %v8866_v11  ;;  %v8891_v18 = vld [vmem:[#allocation12 + $0x1e8] sm:$0xff]  }
 0x8f9   :  { %8417 = vmatprep.subr.bf16.mxu1 %v8867_v7  ;;  %v8892_v11 = vld [vmem:[#allocation12 + $0x128] sm:$0xff]  }
 0x8fa   :  { %v8893_v7 = vld [vmem:[#allocation12 + $0x1a8] sm:$0xff]  }
 0x8fb   :  { %8396 = vmatpush3.bf16.msra.mxu0 %v8868_v30  ;;  %v8894_v30 = vld [vmem:[#allocation12 + $0x170] sm:$0xff]  }
 0x8fc   :  { %8418 = vmatpush3.bf16.msra.mxu1 %v8869_v25  ;;  %8425 = vmatprep.subr.bf16.mxu0 %v8870_v48  ;;  %v8895_v25 = vld [vmem:[#allocation12 + $0x1f0] sm:$0xff]  }
 0x8fd   :  { %8447 = vmatprep.subr.bf16.mxu1 %v8871_v16  ;;  %v8896_v48 = vld [vmem:[#allocation12 + $0x130] sm:$0xff]  }
 0x8fe   :  { %v8897_v16 = vld [vmem:[#allocation12 + $0x1b0] sm:$0xff]  }
 0x951   :  { %v6927_v10 = vpop.f32.mrb[112].mxu0  ;;  %v7013_v60 = vpop.f32.mrb[96].mxu1 }
 0x952   :  { %v8565_v38 = vadd.f32 %v6927_v10, %v5853_v12  ;;  %v8569_v61 = vadd.f32 %v7013_v60, %v5861_v49  ;;  %v6929_v46 = vpop.f32.mrb[113].mxu0  ;;  %v7015_v63 = vpop.f32.mrb[97].mxu1  ;;  %v5877_v60 = vrot.slane %v12966_v53, %v5876_v41 }
 0x953   :  { %v8566_v39 = vadd.f32 %v6929_v46, %v5857_v1  ;;  %v8570_v45 = vadd.f32 %v7015_v63, %v5865_v19  ;;  %v6931_v29 = vpop.f32.mrb[114].mxu0  ;;  %v7017_v36 = vpop.f32.mrb[98].mxu1 }
 0x954   :  { %v8567_v20 = vadd.f32 %v6931_v29, %v5853_v12  ;;  %v8571_v43 = vadd.f32 %v7017_v36, %v5861_v49  ;;  %v6933_v62 = vpop.f32.mrb[115].mxu0  ;;  %v7019_v55 = vpop.f32.mrb[99].mxu1  ;;  %v7194_v21 = vmax.f32 %v8565_v38, 0.0  ;;  %v7196_v15 = vmax.f32 %v8569_v61, 0.0  ;;  %v8900_v12 = vld [vmem:[#allocation12 + $0x138] sm:$0xff]  }
 0x955   :  { %v8568_v0 = vadd.f32 %v6933_v62, %v5857_v1  ;;  %v8572_v3 = vadd.f32 %v7019_v55, %v5865_v19  ;;  %v7195_v6 = vmax.f32 %v8566_v39, 0.0  ;;  %v7197_v42 = vmax.f32 %v8570_v45, 0.0 }
 0x956   :  { %v7202_v27 = vmax.f32 %v8567_v20, 0.0  ;;  %v7204_v2 = vmax.f32 %v8571_v43, 0.0  ;;  %v5868_v49 = vsub.s32 4, %v14655_v58  ;;  %v5872_v1 = vsub.s32 5, %v14655_v58 }
 0x957   :  { %v7203_v50 = vmax.f32 %v8568_v0, 0.0  ;;  %v7205_v28 = vmax.f32 %v8572_v3, 0.0  ;;  %v5880_v19 = vsub.s32 7, %v14655_v58 }
 0x958   :  { %v7210_v34 = vpack.c.bf16 %v7202_v27, %v7194_v21  ;;  %v7212_v17 = vpack.c.bf16 %v7204_v2, %v7196_v15  ;;  %v5869_v10 = vrot.slane %v12966_v53, %v5868_v49  ;;  %v5873_v38 = vrot.slane %v12966_v53, %v5872_v1 }
 0x959   :  { %v7211_v4 = vpack.c.bf16 %v7203_v50, %v7195_v6  ;;  %v7213_v52 = vpack.c.bf16 %v7205_v28, %v7197_v42  ;;  %v5881_v61 = vrot.slane %v12966_v53, %v5880_v19 }
 0x95b   :  { %7769 = vmatprep.mubr.bf16.mxu0 %v7211_v4  ;;  %7810 = vmatprep.mubr.bf16.mxu1 %v7213_v52 }
 0x95c   :  { %7770 = vmatmul.mubr.bf16.vlgmr.msra.gmra.mrb[120].mxu0 %v7210_v34  ;;  %7811 = vmatmul.mubr.bf16.vlgmr.msra.gmra.mrb[104].mxu1 %v7212_v17 }
 0x95d   :  { %8426 = vmatpush3.bf16.msra.mxu0 %v8872_v44  ;;  %8448 = vmatpush3.bf16.msra.mxu1 %v8873_v5 }
 0x95e   :  { %8427 = vmatprep.subr.bf16.mxu0 %v8874_v22  ;;  %8449 = vmatprep.subr.bf16.mxu1 %v8875_v8 }
 0x961   :  { %8428 = vmatpush3.bf16.msra.mxu0 %v8876_v32  ;;  %8450 = vmatpush3.bf16.msra.mxu1 %v8877_v56  ;;  %v8204_v32 = vld [vmem:[%s13012_s12] ss:$0 sm:$0xff]  ;;  %s9103_s12 = smov [#allocation14]  }
 0x962   :  { %8429 = vmatprep.subr.bf16.mxu0 %v8878_v9  ;;  %8451 = vmatprep.subr.bf16.mxu1 %v8879_v13  ;;  %s7908_s11 = sshll.u32 %s9103_s12, 4  ;;  %s7909_s11 = int_to_ptr.vmem [resolvable:$true] %s7908_s11 }
 0x963   :  { %s9042_s20 = scalar_lea.vmem %s7909_s11, 256  ;;  %p9047_p7 = scmp.lt.s32.totalorder %s7909_s11, %s7909_s11 }
 0x964   :  { %p9043_p6 = scmp.ne.s32.totalorder %s7909_s11, %s9042_s20  ;;  %p9048_p8 = scmp.lt.s32.totalorder %s9042_s20, %s9042_s20 }
 0x965   :  { %8430 = vmatpush3.bf16.msra.mxu0 %v8880_v14  ;;  %8452 = vmatpush3.bf16.msra.mxu1 %v8881_v23 }
 0x966   :  { %8431 = vmatprep.subr.bf16.mxu0 %v8882_v54  ;;  %8453 = vmatprep.subr.bf16.mxu1 %v8883_v59  ;;  %p9049_p9 = por %p9048_p8, %p9047_p7 }
 0x968   :  { %p9050_p10 = pnand %p9049_p9, %p9043_p6 }
 0x969   :  { %8432 = vmatpush3.bf16.msra.mxu0 %v8884_v57  ;;  %8454 = vmatpush3.bf16.msra.mxu1 %v8885_v35 }
 0x96a   :  { %8433 = vmatprep.subr.bf16.mxu0 %v8886_v24  ;;  %8455 = vmatprep.subr.bf16.mxu1 %v8887_v26 }
 0x96d   :  { %8434 = vmatpush3.bf16.msra.mxu0 %v8888_v37  ;;  %8456 = vmatpush3.bf16.msra.mxu1 %v8889_v51 }
 0x96e   :  { %8435 = vmatprep.subr.bf16.mxu0 %v8890_v33  ;;  %8457 = vmatprep.subr.bf16.mxu1 %v8891_v18 }
 0x971   :  { %8436 = vmatpush3.bf16.msra.mxu0 %v8892_v11  ;;  %8458 = vmatpush3.bf16.msra.mxu1 %v8893_v7 }
 0x972   :  { %8437 = vmatprep.subr.bf16.mxu0 %v8894_v30  ;;  %8459 = vmatprep.subr.bf16.mxu1 %v8895_v25 }
 0x975   :  { %8438 = vmatpush3.bf16.msra.mxu0 %v8896_v48  ;;  %8460 = vmatpush3.bf16.msra.mxu1 %v8897_v16 }
 0x976   :  { %8439 = vmatprep.subr.bf16.mxu0 %v8898_v31  ;;  %8461 = vmatprep.subr.bf16.mxu1 %v8899_v47 }
 0x979   :  { %8440 = vmatpush3.bf16.msra.mxu0 %v8900_v12  ;;  %8462 = vmatpush3.bf16.msra.mxu1 %v8901_v40 }
 0x9b1   :  { %v7099_v46 = vpop.f32.mrb[116].mxu0 }
 0x9b2   :  { %v8573_v63 = vadd.f32 %v7099_v46, %v5869_v10  ;;  %v7185_v39 = vpop.f32.mrb[100].mxu1  ;;  %v7101_v45 = vpop.f32.mrb[117].mxu0 }
 0x9b3   :  { %v8577_v29 = vadd.f32 %v7185_v39, %v5877_v60  ;;  %v8574_v36 = vadd.f32 %v7101_v45, %v5873_v38  ;;  %v7187_v20 = vpop.f32.mrb[101].mxu1  ;;  %v7103_v43 = vpop.f32.mrb[118].mxu0 }
 0x9b4   :  { %v8578_v62 = vadd.f32 %v7187_v20, %v5881_v61  ;;  %v8575_v55 = vadd.f32 %v7103_v43, %v5869_v10  ;;  %v7189_v0 = vpop.f32.mrb[102].mxu1  ;;  %v7105_v58 = vpop.f32.mrb[119].mxu0  ;;  %v7198_v27 = vmax.f32 %v8573_v63, 0.0 }
 0x9b5   :  { %v8579_v3 = vadd.f32 %v7189_v0, %v5877_v60  ;;  %v8576_v21 = vadd.f32 %v7105_v58, %v5873_v38  ;;  %v7191_v15 = vpop.f32.mrb[103].mxu1  ;;  %v7200_v42 = vmax.f32 %v8577_v29, 0.0  ;;  %v7199_v53 = vmax.f32 %v8574_v36, 0.0 }
 0x9b6   :  { %v7206_v2 = vmax.f32 %v8575_v55, 0.0  ;;  %v8580_v6 = vadd.f32 %v7191_v15, %v5881_v61  ;;  %v7201_v34 = vmax.f32 %v8578_v62, 0.0 }
 0x9b7   :  { %v7208_v50 = vmax.f32 %v8579_v3, 0.0  ;;  %v7207_v28 = vmax.f32 %v8576_v21, 0.0 }
 0x9b8   :  { %v7214_v17 = vpack.c.bf16 %v7206_v2, %v7198_v27  ;;  %v7209_v4 = vmax.f32 %v8580_v6, 0.0 }
 0x9b9   :  { %v7216_v52 = vpack.c.bf16 %v7208_v50, %v7200_v42  ;;  %v7215_v44 = vpack.c.bf16 %v7207_v28, %v7199_v53 }
 0x9ba   :  { %v7217_v5 = vpack.c.bf16 %v7209_v4, %v7201_v34 }
 0x9bb   :  { %7851 = vmatprep.mubr.bf16.mxu0 %v7215_v44 }
 0x9bc   :  { %7892 = vmatprep.mubr.bf16.mxu1 %v7217_v5  ;;  %7852 = vmatmul.mubr.bf16.vlgmr.msra.gmra.mrb[124].mxu0 %v7214_v17 }
 0x9bd   :  { %7893 = vmatmul.mubr.bf16.vlgmr.msra.gmra.mrb[108].mxu1 %v7216_v52 }
 0xa2f   :  { %v8397_v22 = vpop.f32.mrb[120].mxu0  ;;  %v8419_v8 = vpop.f32.mrb[104].mxu1 }
 0xa30   :  { %v8398_v56 = vpop.f32.mrb[121].mxu0  ;;  %v8420_v9 = vpop.f32.mrb[105].mxu1 }
 0xa31   :  { %v8399_v13 = vadd.f32 %v8398_v56, %v8397_v22  ;;  %v8421_v14 = vadd.f32 %v8420_v9, %v8419_v8  ;;  %v8400_v23 = vpop.f32.mrb[122].mxu0  ;;  %v8422_v54 = vpop.f32.mrb[106].mxu1 }
 0xa32   :  { %v8401_v59 = vpop.f32.mrb[123].mxu0  ;;  %v8423_v57 = vpop.f32.mrb[107].mxu1 }
 0xa33   :  { %v7772_v35 = vadd.f32 %v8399_v13, %v8204_v32  ;;  %v8402_v24 = vadd.f32 %v8401_v59, %v8400_v23  ;;  %v8424_v26 = vadd.f32 %v8423_v57, %v8422_v54 }
 0xa35   :  { %v7813_v37 = vadd.f32 %v8421_v14, %v7772_v35  ;;  %v7775_v51 = vadd.f32 %v8402_v24, %v8204_v32 }
 0xa37   :  { %v7816_v33 = vadd.f32 %v8424_v26, %v7775_v51 }
 0xa8f   :  { %v8441_v18 = vpop.f32.mrb[124].mxu0 }
 0xa90   :  { %v8463_v11 = vpop.f32.mrb[108].mxu1  ;;  %v8442_v7 = vpop.f32.mrb[125].mxu0 }
 0xa91   :  { %v8443_v30 = vadd.f32 %v8442_v7, %v8441_v18  ;;  %v8464_v25 = vpop.f32.mrb[109].mxu1  ;;  %v8444_v48 = vpop.f32.mrb[126].mxu0 }
 0xa92   :  { %v8465_v16 = vadd.f32 %v8464_v25, %v8463_v11  ;;  %v8466_v31 = vpop.f32.mrb[110].mxu1  ;;  %v8445_v47 = vpop.f32.mrb[127].mxu0 }
 0xa93   :  { %v7854_v12 = vadd.f32 %v8443_v30, %v7813_v37  ;;  %v8446_v40 = vadd.f32 %v8445_v47, %v8444_v48  ;;  %v8467_v49 = vpop.f32.mrb[111].mxu1 }
 0xa94   :  { %v8468_v41 = vadd.f32 %v8467_v49, %v8466_v31 }
 0xa95   :  { %v7895_v1 = vadd.f32 %v8465_v16, %v7854_v12  ;;  %v7857_v19 = vadd.f32 %v8446_v40, %v7816_v33 }
 0xa97   :  { %7901 = vst [vmem:[#allocation14] sm:$0xff] %v7895_v1  ;;  %v7898_v10 = vadd.f32 %v8468_v41, %v7857_v19 }
 0xa99   :  { %7902 = vst [vmem:[#allocation14 + $0x8] sm:$0xff] %v7898_v10 }
 0xa9a   :  { %9053 = shalt.err (!%p9050_p10)
}
 0xa9b   :  { %s9054_s26 = scalar_lea.hbm %s13013_s13, 256 }
 0xa9c   :  { %p9055_p11 = scmp.ne.s32.totalorder %s13013_s13, %s9054_s26  ;;  %p9058_p12 = scmp.lt.u32.totalorder %s9054_s26, %s13013_s13 }
 0xa9e   :  { %p9060_p13 = pnand %p9058_p12, %p9055_p11 }
 0xaa0   :  { %9063 = shalt.err (!%p9060_p13)
}
 0xaa1   :  { %s9104_s19 = smov 128   ;;  %s9105_s23 = smov 8  }
 0xaa2   :  { %7914 = dma.vmem_to_hbm [thread:$0]  %s7909_s11, 256, %s13013_s13, [#allocation5], %s9104_s19, %s9104_s19, %s9105_s23  }
 0xaa3   :  { %9072 = dma.done.wait [#allocation5], 256  }
 0xaa4   :  { %9073 = vsyncadd [#allocation5], 4294967040 }
 0xaa5   :  { %7918 = vsyncpa [#allocation4], 1 }
 0xaa6   :  { %7919 = vsyncpa [#allocation7], 1 }
 0xaa7   :  { %7920 = vsyncpa [#allocation10], 1 }
 0xaa8   :  { %7921 = vsyncpa [#allocation13], 1 }
 0xaa9   :  { %7922 = vsyncpa [#allocation5], 1 }

</bundles_post_ra>
